<compile_context>
chip_gen: v7x
topology: tpu7x:2x2x1
jax: 0.10.0
libtpu: 0.0.40
codegen_flags: <defaults>
</compile_context>

<pallas_src>
import jax
import jax.numpy as jnp
from jax.experimental import pallas as pl
from jax.experimental.pallas import tpu as pltpu

LANE = 128
H1 = 1000           # fc1 hidden size (PyTorch)
H1_PAD = 1024       # padded to a multiple of 128 lanes
NUM_CLASSES = 10
OUT_PAD = 128       # padded logits width


def _round_up(x, m):
    return ((x + m - 1) // m) * m


# ----------------------------- Pallas kernels -----------------------------

def _conv_relu_pool_kernel(p00_ref, p01_ref, p10_ref, p11_ref, w_ref, b_ref, o_ref):
    """Fused conv (im2col matmul) + bias + ReLU + 2x2 max-pool for one M tile.

    p??_ref : (tile_m, K) bf16   im2col patches, one per 2x2-pool-window slot;
                                 each row is one POOLED output position.
    w_ref   : (K, 128) bf16      conv weight, Cout zero-padded to 128 lanes.
    b_ref   : (1, 128) f32       bias, zero-padded.
    o_ref   : (tile_m, 128) bf16 pooled activations (lane-dense, unmasked stores).
    """
    w = w_ref[...]
    b = b_ref[...]

    def branch(p_ref):
        y = jnp.dot(p_ref[...], w, preferred_element_type=jnp.float32) + b
        return jnp.maximum(y, 0.0)

    y = jnp.maximum(jnp.maximum(branch(p00_ref), branch(p01_ref)),
                    jnp.maximum(branch(p10_ref), branch(p11_ref)))
    o_ref[...] = y.astype(o_ref.dtype)


def _fc_fused_kernel(x_ref, w1_ref, b1_ref, w2_ref, b2_ref, o_ref, acc_ref):
    k = pl.program_id(0)

    @pl.when(k == 0)
    def _():
        acc_ref[...] = jnp.zeros_like(acc_ref)

    acc_ref[...] += jnp.dot(x_ref[...], w1_ref[...],
                            preferred_element_type=jnp.float32)

    @pl.when(k == pl.num_programs(0) - 1)
    def _():
        # NOTE: the reference model applies NO ReLU between fc1 and fc2.
        h = (acc_ref[...] + b1_ref[...]).astype(w2_ref.dtype)
        o_ref[...] = (jnp.dot(h, w2_ref[...], preferred_element_type=jnp.float32)
                      + b2_ref[...]).astype(o_ref.dtype)


# ----------------------------- kernel wrappers -----------------------------

def conv2d_relu_pool_nhwc(x_nhwc, w_mat, b_row, *, tile_m=1024):
    """5x5 conv (stride 1, pad 2) + bias + ReLU + MaxPool2d(2,2), one Pallas call.

    x_nhwc : (N, H, W, Cin) float     (cast to bf16 internally)
    w_mat  : (25*Cin, 128) bf16       Cout zero-padded to 128
    b_row  : (1, 128) f32             zero-padded bias
    returns: (N, H//2, W//2, 128) bf16
    """
    N, H, W, Cin = x_nhwc.shape
    KH = KW = 5
    pad = KH // 2
    Hp, Wp = H // 2, W // 2
    K = KH * KW * Cin
    Cout_pad = w_mat.shape[1]

    xp = jnp.pad(x_nhwc.astype(jnp.bfloat16),
                 ((0, 0), (pad, pad), (pad, pad), (0, 0)))

    # im2col per 2x2-pool-window slot (glue).  Each P_ab has one row per pooled
    # output position so the kernel epilogue takes the 4-way max directly --
    # no separate pool kernel, no strided-slice HBM round trip of the conv out.
    # TODO(synk): replace im2col materialization with in-kernel shifted-window
    # accumulation to avoid the 25x patch blow-up at large batch sizes.
    def patches(a, b):
        cols = [xp[:, a + kh: a + kh + 2 * Hp: 2, b + kw: b + kw + 2 * Wp: 2, :]
                for kh in range(KH) for kw in range(KW)]
        p = jnp.stack(cols, axis=3)            # (N, Hp, Wp, 25, Cin)
        return p.reshape(N * Hp * Wp, K)

    p00 = patches(0, 0)
    p01 = patches(0, 1)
    p10 = patches(1, 0)
    p11 = patches(1, 1)

    M = N * Hp * Wp
    tile_m = min(tile_m, _round_up(M, 8))
    Mpad = _round_up(M, tile_m)
    if Mpad != M:                              # arbitrary batch: pad M, slice after
        rows = ((0, Mpad - M), (0, 0))
        p00 = jnp.pad(p00, rows)
        p01 = jnp.pad(p01, rows)
        p10 = jnp.pad(p10, rows)
        p11 = jnp.pad(p11, rows)

    patch_spec = pl.BlockSpec((tile_m, K), lambda i: (i, 0))
    out = pl.pallas_call(
        _conv_relu_pool_kernel,
        out_shape=jax.ShapeDtypeStruct((Mpad, Cout_pad), jnp.bfloat16),
        grid=(Mpad // tile_m,),
        in_specs=[patch_spec, patch_spec, patch_spec, patch_spec,
                  pl.BlockSpec((K, Cout_pad), lambda i: (0, 0)),
                  pl.BlockSpec((1, Cout_pad), lambda i: (0, 0))],
        out_specs=pl.BlockSpec((tile_m, Cout_pad), lambda i: (i, 0)),
        # M axis is fully independent -> let Mosaic shard it across both
        # TensorCores on v7x.
        compiler_params=pltpu.CompilerParams(
            dimension_semantics=("parallel",)),
    )(p00, p01, p10, p11, w_mat, b_row)
    return out[:M].reshape(N, Hp, Wp, Cout_pad)


def fc1_fc2(x, w1, b1, w2, b2, *, tile_k=2048):
    """Fused fc1 + fc2; fc1 contraction (K1) tiled across the grid (VMEM f32 acc).

    x  : (N, K1) bf16
    w1 : (K1, H1_PAD) bf16   (hidden zero-padded 1000->1024)
    b1 : (1, H1_PAD) f32
    w2 : (H1_PAD, OUT_PAD) bf16
    b2 : (1, OUT_PAD) f32
    """
    N, K1 = x.shape
    H1p = w1.shape[1]
    Op = w2.shape[1]

    tile_k = min(tile_k, K1)
    Kpad = _round_up(K1, tile_k)
    if Kpad != K1:                             # tolerate non-dividing K1
        x = jnp.pad(x, ((0, 0), (0, Kpad - K1)))
        w1 = jnp.pad(w1, ((0, Kpad - K1), (0, 0)))

    return pl.pallas_call(
        _fc_fused_kernel,
        out_shape=jax.ShapeDtypeStruct((N, Op), jnp.float32),
        grid=(Kpad // tile_k,),
        in_specs=[
            pl.BlockSpec((N, tile_k), lambda k: (0, k)),
            pl.BlockSpec((tile_k, H1p), lambda k: (k, 0)),
            pl.BlockSpec((1, H1p), lambda k: (0, 0)),
            pl.BlockSpec((H1p, Op), lambda k: (0, 0)),
            pl.BlockSpec((1, Op), lambda k: (0, 0)),
        ],
        out_specs=pl.BlockSpec((N, Op), lambda k: (0, 0)),
        scratch_shapes=[pltpu.VMEM((N, H1p), jnp.float32)],
        # K axis is a reduction with a resident accumulator -> arbitrary.
        compiler_params=pltpu.CompilerParams(
            dimension_semantics=("arbitrary",)),
    )(x, w1, b1, w2, b2)


# ------------------------------ parameters ---------------------------------

def init_params(key):
    """Deterministic synthetic parameters in the PyTorch module's layout."""
    ks = jax.random.split(key, 8)
    return {
        "w_conv1": jax.random.normal(ks[0], (32, 3, 5, 5), jnp.float32) * 0.05,
        "b_conv1": jax.random.normal(ks[1], (32,), jnp.float32) * 0.05,
        "w_conv2": jax.random.normal(ks[2], (64, 32, 5, 5), jnp.float32) * 0.05,
        "b_conv2": jax.random.normal(ks[3], (64,), jnp.float32) * 0.05,
        "w_fc1":   jax.random.normal(ks[4], (H1, 8 * 8 * 64), jnp.float32) * 0.02,
        "b_fc1":   jax.random.normal(ks[5], (H1,), jnp.float32) * 0.02,
        "w_fc2":   jax.random.normal(ks[6], (NUM_CLASSES, H1), jnp.float32) * 0.02,
        "b_fc2":   jax.random.normal(ks[7], (NUM_CLASSES,), jnp.float32) * 0.02,
    }


def prepare_params(p):
    """One-time weight re-layout (runs OUTSIDE the jitted forward):
       * conv weights -> (25*Cin, Cout) matmul layout, Cout zero-padded to 128, bf16
       * fc1 weight   -> (in, out), rows permuted from PyTorch (c,h,w) flatten
         order to the kernel's (h,w,c) order, hidden zero-padded 1000->1024, bf16
       * fc2 weight   -> (in, out), in zero-padded to 1024, out to 128, bf16
       * biases kept f32, zero-padded, as (1, width) rows
       Zero padding is mathematically inert (padded cols/rows contribute 0 and
       the padded logits are sliced off)."""
    def conv_w(w_oihw):
        cout = w_oihw.shape[0]
        wm = jnp.transpose(w_oihw, (2, 3, 1, 0)).reshape(-1, cout)   # (K, Cout)
        wm = jnp.pad(wm, ((0, 0), (0, LANE - cout)))
        return wm.astype(jnp.bfloat16)

    def conv_b(b):
        return jnp.pad(b, (0, LANE - b.shape[0])).reshape(1, LANE).astype(jnp.float32)

    C2, HP2, WP2 = 64, 8, 8
    w1 = p["w_fc1"].T.reshape(C2, HP2, WP2, H1)              # (c, h, w, out)
    w1 = jnp.transpose(w1, (1, 2, 0, 3)).reshape(C2 * HP2 * WP2, H1)
    w1 = jnp.pad(w1, ((0, 0), (0, H1_PAD - H1))).astype(jnp.bfloat16)
    b1 = jnp.pad(p["b_fc1"], (0, H1_PAD - H1)).reshape(1, H1_PAD).astype(jnp.float32)

    w2 = jnp.pad(p["w_fc2"].T, ((0, H1_PAD - H1), (0, OUT_PAD - NUM_CLASSES)))
    w2 = w2.astype(jnp.bfloat16)
    b2 = jnp.pad(p["b_fc2"], (0, OUT_PAD - NUM_CLASSES)).reshape(1, OUT_PAD)
    b2 = b2.astype(jnp.float32)

    return {
        "w_conv1": conv_w(p["w_conv1"]), "b_conv1": conv_b(p["b_conv1"]),
        "w_conv2": conv_w(p["w_conv2"]), "b_conv2": conv_b(p["b_conv2"]),
        "w_fc1": w1, "b_fc1": b1, "w_fc2": w2, "b_fc2": b2,
    }


# ------------------------------- forward -----------------------------------

@jax.jit
def convnet_forward(dev_params, x_nchw):
    p = dev_params
    # NCHW -> NHWC (channels onto the TPU lane dimension), bf16 activations.
    x = jnp.transpose(x_nchw, (0, 2, 3, 1)).astype(jnp.bfloat16)

    # layer1: Conv2d(3, 32, 5, pad=2) + ReLU + MaxPool2d(2,2)  -- one fused kernel
    y1 = conv2d_relu_pool_nhwc(x, p["w_conv1"], p["b_conv1"])    # (N,16,16,128)
    y1 = y1[..., :32]                                            # drop Cout padding

    # layer2: Conv2d(32, 64, 5, pad=2) + ReLU + MaxPool2d(2,2)  -- one fused kernel
    y2 = conv2d_relu_pool_nhwc(y1, p["w_conv2"], p["b_conv2"])   # (N,8,8,128)
    y2 = y2[..., :64]

    # Flatten in (h, w, c) order; the permutation to PyTorch's (c, h, w) flatten
    # order is pre-folded into the prepared fc1 weight -> no transpose here.
    feat = y2.reshape(y2.shape[0], -1)                           # (N, 4096) bf16

    # drop_out: nn.Dropout() is identity in the deterministic/eval forward.
    # TODO(synk): training-mode dropout (p=0.5 Bernoulli mask) not implemented.

    logits = fc1_fc2(feat, p["w_fc1"], p["b_fc1"], p["w_fc2"], p["b_fc2"])
    return logits[:, :NUM_CLASSES]


if __name__ == "__main__":
    key = jax.random.PRNGKey(0)
    pkey, xkey = jax.random.split(key)
    params = prepare_params(init_params(pkey))
    # Input implied by the module: fc1 expects 8*8*64 after two 2x pools -> 3x32x32.
    x = jax.random.normal(xkey, (2, 3, 32, 32), jnp.float32)
    out = convnet_forward(params, x)
    out = jax.block_until_ready(out)
    assert out.shape == (2, 10)
    assert bool(jnp.all(jnp.isfinite(out)))
    print("KERNEL_OK")
</pallas_src>

<mosaic_0001>
module attributes {stable_mosaic.version = 11 : i64} {
  func.func @_conv_relu_pool_kernel(%arg0: i32, %arg1: memref<512x75xbf16, #tpu.memory_space<vmem>>, %arg2: memref<512x75xbf16, #tpu.memory_space<vmem>>, %arg3: memref<512x75xbf16, #tpu.memory_space<vmem>>, %arg4: memref<512x75xbf16, #tpu.memory_space<vmem>>, %arg5: memref<75x128xbf16, #tpu.memory_space<vmem>>, %arg6: memref<1x128xf32, #tpu.memory_space<vmem>>, %arg7: memref<512x128xbf16, #tpu.memory_space<vmem>>) attributes {dimension_semantics = [#tpu.dimension_semantics<parallel>], iteration_bounds = array<i64: 1>, scalar_prefetch = 0 : i64, scratch_operands = 0 : i64, tpu.core_type = #tpu.core_type<tc>, window_params = [{transform_indices = @transform_0, window_bounds = array<i64: 512, 75>}, {transform_indices = @transform_1, window_bounds = array<i64: 512, 75>}, {transform_indices = @transform_2, window_bounds = array<i64: 512, 75>}, {transform_indices = @transform_3, window_bounds = array<i64: 512, 75>}, {pipeline_mode = #tpu.pipeline_mode<synchronous>, transform_indices = @transform_4, window_bounds = array<i64: 75, 128>}, {pipeline_mode = #tpu.pipeline_mode<synchronous>, transform_indices = @transform_5, window_bounds = array<i64: 1, 128>}, {transform_indices = @transform_6, window_bounds = array<i64: 512, 128>}]} {
    %c0 = arith.constant 0 : index
    %c0_0 = arith.constant 0 : index
    %0 = vector.load %arg5[%c0, %c0_0] : memref<75x128xbf16, #tpu.memory_space<vmem>>, vector<75x128xbf16>
    %c0_1 = arith.constant 0 : index
    %c0_2 = arith.constant 0 : index
    %1 = vector.load %arg6[%c0_1, %c0_2] : memref<1x128xf32, #tpu.memory_space<vmem>>, vector<1x128xf32>
    %c0_3 = arith.constant 0 : index
    %c0_4 = arith.constant 0 : index
    %2 = vector.load %arg1[%c0_3, %c0_4] : memref<512x75xbf16, #tpu.memory_space<vmem>>, vector<512x75xbf16>
    %cst = arith.constant dense<0.000000e+00> : vector<512x128xf32>
    %3 = tpu.matmul %2, %0, %cst {dimension_numbers = #tpu.dot_dimension_numbers<[1], [0], [0], [1], [0, 0, 1, 1], [], []>} : vector<512x75xbf16>, vector<75x128xbf16>, vector<512x128xf32> -> vector<512x128xf32>
    %4 = vector.broadcast %1 : vector<1x128xf32> to vector<512x128xf32>
    %5 = arith.addf %3, %4 : vector<512x128xf32>
    %cst_5 = arith.constant 0.000000e+00 : f32
    %6 = vector.broadcast %cst_5 : f32 to vector<512x128xf32>
    %7 = arith.maximumf %5, %6 : vector<512x128xf32>
    %c0_6 = arith.constant 0 : index
    %c0_7 = arith.constant 0 : index
    %8 = vector.load %arg2[%c0_6, %c0_7] : memref<512x75xbf16, #tpu.memory_space<vmem>>, vector<512x75xbf16>
    %cst_8 = arith.constant dense<0.000000e+00> : vector<512x128xf32>
    %9 = tpu.matmul %8, %0, %cst_8 {dimension_numbers = #tpu.dot_dimension_numbers<[1], [0], [0], [1], [0, 0, 1, 1], [], []>} : vector<512x75xbf16>, vector<75x128xbf16>, vector<512x128xf32> -> vector<512x128xf32>
    %10 = vector.broadcast %1 : vector<1x128xf32> to vector<512x128xf32>
    %11 = arith.addf %9, %10 : vector<512x128xf32>
    %cst_9 = arith.constant 0.000000e+00 : f32
    %12 = vector.broadcast %cst_9 : f32 to vector<512x128xf32>
    %13 = arith.maximumf %11, %12 : vector<512x128xf32>
    %14 = arith.maximumf %7, %13 : vector<512x128xf32>
    %c0_10 = arith.constant 0 : index
    %c0_11 = arith.constant 0 : index
    %15 = vector.load %arg3[%c0_10, %c0_11] : memref<512x75xbf16, #tpu.memory_space<vmem>>, vector<512x75xbf16>
    %cst_12 = arith.constant dense<0.000000e+00> : vector<512x128xf32>
    %16 = tpu.matmul %15, %0, %cst_12 {dimension_numbers = #tpu.dot_dimension_numbers<[1], [0], [0], [1], [0, 0, 1, 1], [], []>} : vector<512x75xbf16>, vector<75x128xbf16>, vector<512x128xf32> -> vector<512x128xf32>
    %17 = vector.broadcast %1 : vector<1x128xf32> to vector<512x128xf32>
    %18 = arith.addf %16, %17 : vector<512x128xf32>
    %cst_13 = arith.constant 0.000000e+00 : f32
    %19 = vector.broadcast %cst_13 : f32 to vector<512x128xf32>
    %20 = arith.maximumf %18, %19 : vector<512x128xf32>
    %c0_14 = arith.constant 0 : index
    %c0_15 = arith.constant 0 : index
    %21 = vector.load %arg4[%c0_14, %c0_15] : memref<512x75xbf16, #tpu.memory_space<vmem>>, vector<512x75xbf16>
    %cst_16 = arith.constant dense<0.000000e+00> : vector<512x128xf32>
    %22 = tpu.matmul %21, %0, %cst_16 {dimension_numbers = #tpu.dot_dimension_numbers<[1], [0], [0], [1], [0, 0, 1, 1], [], []>} : vector<512x75xbf16>, vector<75x128xbf16>, vector<512x128xf32> -> vector<512x128xf32>
    %23 = vector.broadcast %1 : vector<1x128xf32> to vector<512x128xf32>
    %24 = arith.addf %22, %23 : vector<512x128xf32>
    %cst_17 = arith.constant 0.000000e+00 : f32
    %25 = vector.broadcast %cst_17 : f32 to vector<512x128xf32>
    %26 = arith.maximumf %24, %25 : vector<512x128xf32>
    %27 = arith.maximumf %20, %26 : vector<512x128xf32>
    %28 = arith.maximumf %14, %27 : vector<512x128xf32>
    %29 = arith.truncf %28 : vector<512x128xf32> to vector<512x128xbf16>
    %c0_18 = arith.constant 0 : index
    %c0_19 = arith.constant 0 : index
    %30 = vector.load %arg7[%c0_18, %c0_19] : memref<512x128xbf16, #tpu.memory_space<vmem>>, vector<512x128xbf16>
    tpu.vector_store %arg7[%c0_18, %c0_19], %29 {strides = array<i32>} : memref<512x128xbf16, #tpu.memory_space<vmem>>, vector<512x128xbf16>,
    return
  }
  func.func @transform_0(%arg0: i32) -> (i32, i32) {
    %c0_i32 = arith.constant 0 : i32
    %c0_i32_0 = arith.constant 0 : i32
    return %arg0, %c0_i32 : i32, i32
  }
  func.func @transform_1(%arg0: i32) -> (i32, i32) {
    %c0_i32 = arith.constant 0 : i32
    %c0_i32_0 = arith.constant 0 : i32
    return %arg0, %c0_i32 : i32, i32
  }
  func.func @transform_2(%arg0: i32) -> (i32, i32) {
    %c0_i32 = arith.constant 0 : i32
    %c0_i32_0 = arith.constant 0 : i32
    return %arg0, %c0_i32 : i32, i32
  }
  func.func @transform_3(%arg0: i32) -> (i32, i32) {
    %c0_i32 = arith.constant 0 : i32
    %c0_i32_0 = arith.constant 0 : i32
    return %arg0, %c0_i32 : i32, i32
  }
  func.func @transform_4(%arg0: i32) -> (i32, i32) {
    %c0_i32 = arith.constant 0 : i32
    %c0_i32_0 = arith.constant 0 : i32
    %c0_i32_1 = arith.constant 0 : i32
    return %c0_i32, %c0_i32_0 : i32, i32
  }
  func.func @transform_5(%arg0: i32) -> (i32, i32) {
    %c0_i32 = arith.constant 0 : i32
    %c0_i32_0 = arith.constant 0 : i32
    %c0_i32_1 = arith.constant 0 : i32
    return %c0_i32, %c0_i32_0 : i32, i32
  }
  func.func @transform_6(%arg0: i32) -> (i32, i32) {
    %c0_i32 = arith.constant 0 : i32
    %c0_i32_0 = arith.constant 0 : i32
    return %arg0, %c0_i32 : i32, i32
  }
}

module attributes {stable_mosaic.version = 11 : i64} {
  func.func @_conv_relu_pool_kernel(%arg0: i32, %arg1: memref<128x800xbf16, #tpu.memory_space<vmem>>, %arg2: memref<128x800xbf16, #tpu.memory_space<vmem>>, %arg3: memref<128x800xbf16, #tpu.memory_space<vmem>>, %arg4: memref<128x800xbf16, #tpu.memory_space<vmem>>, %arg5: memref<800x128xbf16, #tpu.memory_space<vmem>>, %arg6: memref<1x128xf32, #tpu.memory_space<vmem>>, %arg7: memref<128x128xbf16, #tpu.memory_space<vmem>>) attributes {dimension_semantics = [#tpu.dimension_semantics<parallel>], iteration_bounds = array<i64: 1>, scalar_prefetch = 0 : i64, scratch_operands = 0 : i64, tpu.core_type = #tpu.core_type<tc>, window_params = [{transform_indices = @transform_0, window_bounds = array<i64: 128, 800>}, {transform_indices = @transform_1, window_bounds = array<i64: 128, 800>}, {transform_indices = @transform_2, window_bounds = array<i64: 128, 800>}, {transform_indices = @transform_3, window_bounds = array<i64: 128, 800>}, {pipeline_mode = #tpu.pipeline_mode<synchronous>, transform_indices = @transform_4, window_bounds = array<i64: 800, 128>}, {pipeline_mode = #tpu.pipeline_mode<synchronous>, transform_indices = @transform_5, window_bounds = array<i64: 1, 128>}, {transform_indices = @transform_6, window_bounds = array<i64: 128, 128>}]} {
    %c0 = arith.constant 0 : index
    %c0_0 = arith.constant 0 : index
    %0 = vector.load %arg5[%c0, %c0_0] : memref<800x128xbf16, #tpu.memory_space<vmem>>, vector<800x128xbf16>
    %c0_1 = arith.constant 0 : index
    %c0_2 = arith.constant 0 : index
    %1 = vector.load %arg6[%c0_1, %c0_2] : memref<1x128xf32, #tpu.memory_space<vmem>>, vector<1x128xf32>
    %c0_3 = arith.constant 0 : index
    %c0_4 = arith.constant 0 : index
    %2 = vector.load %arg1[%c0_3, %c0_4] : memref<128x800xbf16, #tpu.memory_space<vmem>>, vector<128x800xbf16>
    %cst = arith.constant dense<0.000000e+00> : vector<128x128xf32>
    %3 = tpu.matmul %2, %0, %cst {dimension_numbers = #tpu.dot_dimension_numbers<[1], [0], [0], [1], [0, 0, 1, 1], [], []>} : vector<128x800xbf16>, vector<800x128xbf16>, vector<128x128xf32> -> vector<128x128xf32>
    %4 = vector.broadcast %1 : vector<1x128xf32> to vector<128x128xf32>
    %5 = arith.addf %3, %4 : vector<128x128xf32>
    %cst_5 = arith.constant 0.000000e+00 : f32
    %6 = vector.broadcast %cst_5 : f32 to vector<128x128xf32>
    %7 = arith.maximumf %5, %6 : vector<128x128xf32>
    %c0_6 = arith.constant 0 : index
    %c0_7 = arith.constant 0 : index
    %8 = vector.load %arg2[%c0_6, %c0_7] : memref<128x800xbf16, #tpu.memory_space<vmem>>, vector<128x800xbf16>
    %cst_8 = arith.constant dense<0.000000e+00> : vector<128x128xf32>
    %9 = tpu.matmul %8, %0, %cst_8 {dimension_numbers = #tpu.dot_dimension_numbers<[1], [0], [0], [1], [0, 0, 1, 1], [], []>} : vector<128x800xbf16>, vector<800x128xbf16>, vector<128x128xf32> -> vector<128x128xf32>
    %10 = vector.broadcast %1 : vector<1x128xf32> to vector<128x128xf32>
    %11 = arith.addf %9, %10 : vector<128x128xf32>
    %cst_9 = arith.constant 0.000000e+00 : f32
    %12 = vector.broadcast %cst_9 : f32 to vector<128x128xf32>
    %13 = arith.maximumf %11, %12 : vector<128x128xf32>
    %14 = arith.maximumf %7, %13 : vector<128x128xf32>
    %c0_10 = arith.constant 0 : index
    %c0_11 = arith.constant 0 : index
    %15 = vector.load %arg3[%c0_10, %c0_11] : memref<128x800xbf16, #tpu.memory_space<vmem>>, vector<128x800xbf16>
    %cst_12 = arith.constant dense<0.000000e+00> : vector<128x128xf32>
    %16 = tpu.matmul %15, %0, %cst_12 {dimension_numbers = #tpu.dot_dimension_numbers<[1], [0], [0], [1], [0, 0, 1, 1], [], []>} : vector<128x800xbf16>, vector<800x128xbf16>, vector<128x128xf32> -> vector<128x128xf32>
    %17 = vector.broadcast %1 : vector<1x128xf32> to vector<128x128xf32>
    %18 = arith.addf %16, %17 : vector<128x128xf32>
    %cst_13 = arith.constant 0.000000e+00 : f32
    %19 = vector.broadcast %cst_13 : f32 to vector<128x128xf32>
    %20 = arith.maximumf %18, %19 : vector<128x128xf32>
    %c0_14 = arith.constant 0 : index
    %c0_15 = arith.constant 0 : index
    %21 = vector.load %arg4[%c0_14, %c0_15] : memref<128x800xbf16, #tpu.memory_space<vmem>>, vector<128x800xbf16>
    %cst_16 = arith.constant dense<0.000000e+00> : vector<128x128xf32>
    %22 = tpu.matmul %21, %0, %cst_16 {dimension_numbers = #tpu.dot_dimension_numbers<[1], [0], [0], [1], [0, 0, 1, 1], [], []>} : vector<128x800xbf16>, vector<800x128xbf16>, vector<128x128xf32> -> vector<128x128xf32>
    %23 = vector.broadcast %1 : vector<1x128xf32> to vector<128x128xf32>
    %24 = arith.addf %22, %23 : vector<128x128xf32>
    %cst_17 = arith.constant 0.000000e+00 : f32
    %25 = vector.broadcast %cst_17 : f32 to vector<128x128xf32>
    %26 = arith.maximumf %24, %25 : vector<128x128xf32>
    %27 = arith.maximumf %20, %26 : vector<128x128xf32>
    %28 = arith.maximumf %14, %27 : vector<128x128xf32>
    %29 = arith.truncf %28 : vector<128x128xf32> to vector<128x128xbf16>
    %c0_18 = arith.constant 0 : index
    %c0_19 = arith.constant 0 : index
    %30 = vector.load %arg7[%c0_18, %c0_19] : memref<128x128xbf16, #tpu.memory_space<vmem>>, vector<128x128xbf16>
    tpu.vector_store %arg7[%c0_18, %c0_19], %29 {strides = array<i32>} : memref<128x128xbf16, #tpu.memory_space<vmem>>, vector<128x128xbf16>,
    return
  }
  func.func @transform_0(%arg0: i32) -> (i32, i32) {
    %c0_i32 = arith.constant 0 : i32
    %c0_i32_0 = arith.constant 0 : i32
    return %arg0, %c0_i32 : i32, i32
  }
  func.func @transform_1(%arg0: i32) -> (i32, i32) {
    %c0_i32 = arith.constant 0 : i32
    %c0_i32_0 = arith.constant 0 : i32
    return %arg0, %c0_i32 : i32, i32
  }
  func.func @transform_2(%arg0: i32) -> (i32, i32) {
    %c0_i32 = arith.constant 0 : i32
    %c0_i32_0 = arith.constant 0 : i32
    return %arg0, %c0_i32 : i32, i32
  }
  func.func @transform_3(%arg0: i32) -> (i32, i32) {
    %c0_i32 = arith.constant 0 : i32
    %c0_i32_0 = arith.constant 0 : i32
    return %arg0, %c0_i32 : i32, i32
  }
  func.func @transform_4(%arg0: i32) -> (i32, i32) {
    %c0_i32 = arith.constant 0 : i32
    %c0_i32_0 = arith.constant 0 : i32
    %c0_i32_1 = arith.constant 0 : i32
    return %c0_i32, %c0_i32_0 : i32, i32
  }
  func.func @transform_5(%arg0: i32) -> (i32, i32) {
    %c0_i32 = arith.constant 0 : i32
    %c0_i32_0 = arith.constant 0 : i32
    %c0_i32_1 = arith.constant 0 : i32
    return %c0_i32, %c0_i32_0 : i32, i32
  }
  func.func @transform_6(%arg0: i32) -> (i32, i32) {
    %c0_i32 = arith.constant 0 : i32
    %c0_i32_0 = arith.constant 0 : i32
    return %arg0, %c0_i32 : i32, i32
  }
}

module attributes {stable_mosaic.version = 11 : i64} {
  func.func @_fc_fused_kernel(%arg0: i32, %arg1: memref<2x2048xbf16, #tpu.memory_space<vmem>>, %arg2: memref<2048x1024xbf16, #tpu.memory_space<vmem>>, %arg3: memref<1x1024xf32, #tpu.memory_space<vmem>>, %arg4: memref<1024x128xbf16, #tpu.memory_space<vmem>>, %arg5: memref<1x128xf32, #tpu.memory_space<vmem>>, %arg6: memref<2x128xf32, #tpu.memory_space<vmem>>, %arg7: memref<2x1024xf32, #tpu.memory_space<vmem>>) attributes {dimension_semantics = [#tpu.dimension_semantics<arbitrary>], iteration_bounds = array<i64: 2>, scalar_prefetch = 0 : i64, scratch_operands = 1 : i64, tpu.core_type = #tpu.core_type<tc>, window_params = [{transform_indices = @transform_0, window_bounds = array<i64: 2, 2048>}, {transform_indices = @transform_1, window_bounds = array<i64: 2048, 1024>}, {pipeline_mode = #tpu.pipeline_mode<synchronous>, transform_indices = @transform_2, window_bounds = array<i64: 1, 1024>}, {pipeline_mode = #tpu.pipeline_mode<synchronous>, transform_indices = @transform_3, window_bounds = array<i64: 1024, 128>}, {pipeline_mode = #tpu.pipeline_mode<synchronous>, transform_indices = @transform_4, window_bounds = array<i64: 1, 128>}, {pipeline_mode = #tpu.pipeline_mode<synchronous>, transform_indices = @transform_5, window_bounds = array<i64: 2, 128>}]} {
    %c0_i32 = arith.constant 0 : i32
    %0 = arith.cmpi eq, %arg0, %c0_i32 : i32
    %1 = arith.extui %0 : i1 to i32
    %c0_i32_0 = arith.constant 0 : i32
    %2 = arith.cmpi ne, %1, %c0_i32_0 : i32
    scf.if %2 {
      %cst_9 = arith.constant 0.000000e+00 : f32
      %12 = vector.broadcast %cst_9 : f32 to vector<2x1024xf32>
      %c0_10 = arith.constant 0 : index
      %c0_11 = arith.constant 0 : index
      %13 = vector.load %arg7[%c0_10, %c0_11] : memref<2x1024xf32, #tpu.memory_space<vmem>>, vector<2x1024xf32>
      tpu.vector_store %arg7[%c0_10, %c0_11], %12 {strides = array<i32>} : memref<2x1024xf32, #tpu.memory_space<vmem>>, vector<2x1024xf32>,
    } else {
    }
    %c0 = arith.constant 0 : index
    %c0_1 = arith.constant 0 : index
    %3 = vector.load %arg7[%c0, %c0_1] : memref<2x1024xf32, #tpu.memory_space<vmem>>, vector<2x1024xf32>
    %c0_2 = arith.constant 0 : index
    %c0_3 = arith.constant 0 : index
    %4 = vector.load %arg1[%c0_2, %c0_3] : memref<2x2048xbf16, #tpu.memory_space<vmem>>, vector<2x2048xbf16>
    %c0_4 = arith.constant 0 : index
    %c0_5 = arith.constant 0 : index
    %5 = vector.load %arg2[%c0_4, %c0_5] : memref<2048x1024xbf16, #tpu.memory_space<vmem>>, vector<2048x1024xbf16>
    %cst = arith.constant dense<0.000000e+00> : vector<2x1024xf32>
    %6 = tpu.matmul %4, %5, %cst {dimension_numbers = #tpu.dot_dimension_numbers<[1], [0], [0], [1], [0, 0, 1, 1], [], []>} : vector<2x2048xbf16>, vector<2048x1024xbf16>, vector<2x1024xf32> -> vector<2x1024xf32>
    %7 = arith.addf %3, %6 : vector<2x1024xf32>
    %c0_6 = arith.constant 0 : index
    %c0_7 = arith.constant 0 : index
    %8 = vector.load %arg7[%c0_6, %c0_7] : memref<2x1024xf32, #tpu.memory_space<vmem>>, vector<2x1024xf32>
    tpu.vector_store %arg7[%c0_6, %c0_7], %7 {strides = array<i32>} : memref<2x1024xf32, #tpu.memory_space<vmem>>, vector<2x1024xf32>,
    %c1_i32 = arith.constant 1 : i32
    %9 = arith.cmpi eq, %arg0, %c1_i32 : i32
    %10 = arith.extui %9 : i1 to i32
    %c0_i32_8 = arith.constant 0 : i32
    %11 = arith.cmpi ne, %10, %c0_i32_8 : i32
    scf.if %11 {
      %c0_9 = arith.constant 0 : index
      %c0_10 = arith.constant 0 : index
      %12 = vector.load %arg7[%c0_9, %c0_10] : memref<2x1024xf32, #tpu.memory_space<vmem>>, vector<2x1024xf32>
      %c0_11 = arith.constant 0 : index
      %c0_12 = arith.constant 0 : index
      %13 = vector.load %arg3[%c0_11, %c0_12] : memref<1x1024xf32, #tpu.memory_space<vmem>>, vector<1x1024xf32>
      %14 = vector.broadcast %13 : vector<1x1024xf32> to vector<2x1024xf32>
      %15 = arith.addf %12, %14 : vector<2x1024xf32>
      %16 = arith.truncf %15 : vector<2x1024xf32> to vector<2x1024xbf16>
      %c0_13 = arith.constant 0 : index
      %c0_14 = arith.constant 0 : index
      %17 = vector.load %arg4[%c0_13, %c0_14] : memref<1024x128xbf16, #tpu.memory_space<vmem>>, vector<1024x128xbf16>
      %cst_15 = arith.constant dense<0.000000e+00> : vector<2x128xf32>
      %18 = tpu.matmul %16, %17, %cst_15 {dimension_numbers = #tpu.dot_dimension_numbers<[1], [0], [0], [1], [0, 0, 1, 1], [], []>} : vector<2x1024xbf16>, vector<1024x128xbf16>, vector<2x128xf32> -> vector<2x128xf32>
      %c0_16 = arith.constant 0 : index
      %c0_17 = arith.constant 0 : index
      %19 = vector.load %arg5[%c0_16, %c0_17] : memref<1x128xf32, #tpu.memory_space<vmem>>, vector<1x128xf32>
      %20 = vector.broadcast %19 : vector<1x128xf32> to vector<2x128xf32>
      %21 = arith.addf %18, %20 : vector<2x128xf32>
      %c0_18 = arith.constant 0 : index
      %c0_19 = arith.constant 0 : index
      %22 = vector.load %arg6[%c0_18, %c0_19] : memref<2x128xf32, #tpu.memory_space<vmem>>, vector<2x128xf32>
      tpu.vector_store %arg6[%c0_18, %c0_19], %21 {strides = array<i32>} : memref<2x128xf32, #tpu.memory_space<vmem>>, vector<2x128xf32>,
    } else {
    }
    return
  }
  func.func @transform_0(%arg0: i32) -> (i32, i32) {
    %c0_i32 = arith.constant 0 : i32
    %c0_i32_0 = arith.constant 0 : i32
    return %c0_i32, %arg0 : i32, i32
  }
  func.func @transform_1(%arg0: i32) -> (i32, i32) {
    %c0_i32 = arith.constant 0 : i32
    %c0_i32_0 = arith.constant 0 : i32
    return %arg0, %c0_i32 : i32, i32
  }
  func.func @transform_2(%arg0: i32) -> (i32, i32) {
    %c0_i32 = arith.constant 0 : i32
    %c0_i32_0 = arith.constant 0 : i32
    %c0_i32_1 = arith.constant 0 : i32
    return %c0_i32, %c0_i32_0 : i32, i32
  }
  func.func @transform_3(%arg0: i32) -> (i32, i32) {
    %c0_i32 = arith.constant 0 : i32
    %c0_i32_0 = arith.constant 0 : i32
    %c0_i32_1 = arith.constant 0 : i32
    return %c0_i32, %c0_i32_0 : i32, i32
  }
  func.func @transform_4(%arg0: i32) -> (i32, i32) {
    %c0_i32 = arith.constant 0 : i32
    %c0_i32_0 = arith.constant 0 : i32
    %c0_i32_1 = arith.constant 0 : i32
    return %c0_i32, %c0_i32_0 : i32, i32
  }
  func.func @transform_5(%arg0: i32) -> (i32, i32) {
    %c0_i32 = arith.constant 0 : i32
    %c0_i32_0 = arith.constant 0 : i32
    %c0_i32_1 = arith.constant 0 : i32
    return %c0_i32, %c0_i32_0 : i32, i32
  }
}

</mosaic_0001>

<bundles_post_ra>
// kernel: convnet_forward.3
= control target key start
LH: loop header
LB: loop body
LE: loop exit
PB: predicated region body
PF: predicated region fallthrough
CT: control target
= control target key end

     0   :  { %vm391_vm0 = vcmask 1044480   ;;  %vm392_vm1 = vcmask 1045504   ;;  %vm294_vm2 = vcmask 613376   ;;  %v4447_v4 = vmov 65535   ;;  %s5563_s4 = inlined_call_operand.vmem [shape: bf16[75,128], index: 4, kind: input, shape index: {}]   ;;  %s5564_s0 = inlined_call_operand.vmem [shape: bf16[512,75], index: 0, kind: input, shape index: {}]   ;;  %s5565_s1 = inlined_call_operand.vmem [shape: bf16[512,75], index: 1, kind: input, shape index: {}]   ;;  %s5566_s2 = inlined_call_operand.vmem [shape: bf16[512,75], index: 2, kind: input, shape index: {}]   ;;  %s5567_s3 = inlined_call_operand.vmem [shape: bf16[512,75], index: 3, kind: input, shape index: {}]   ;;  %s5568_s5 = inlined_call_operand.vmem [shape: f32[1,128], index: 5, kind: input, shape index: {}]   ;;  %s5569_s6 = inlined_call_operand.vmem [shape: bf16[512,128], index: 6, kind: output, shape index: {}]  }
   0x1   :  { %v4312_v0 = vld [vmem:[%s5563_s4] sm:$0xff]   ;;  %v4313_v1 = vld [vmem:[%s5563_s4 + $0x8] sm:$0xff]   ;;  %v4314_v2 = vld [vmem:[%s5563_s4 + $0x10] sm:$0xff]   ;;  %v393_v5 = vsel %vm391_vm0, 4294967295, %v4447_v4 }
   0x2   :  { %4015 = vmatprep.subr.bf16.mxu0 %v4312_v0  ;;  %4089 = vmatprep.subr.bf16.mxu1 %v4312_v0  ;;  %v4317_v3 = vld [vmem:[%s5564_s0] sm:$0xff]   ;;  %v4315_v7 = vld [vmem:[%s5563_s4 + $0x18] sm:$0xff]   ;;  %v394_v9 = vsel %vm392_vm1, %v393_v5, 0  ;;  %v4319_v11 = vld [vmem:[%s5564_s0 + $0x8] sm:$0xff]  }
   0x3   :  { %4016 = vmatpush3.bf16.msra.mxu0 %v4312_v0  ;;  %4090 = vmatpush3.bf16.msra.mxu1 %v4312_v0  ;;  %v4318_v6 = vld [vmem:[%s5565_s1] sm:$0xff]   ;;  %v4320_v12 = vld [vmem:[%s5565_s1 + $0x8] sm:$0xff]   ;;  %v4321_v13 = vld [vmem:[%s5564_s0 + $0x10] sm:$0xff]  }
   0x4   :  { %4017 = vmatprep.subr.bf16.mxu0 %v4313_v1  ;;  %4091 = vmatprep.subr.bf16.mxu1 %v4313_v1  ;;  %v4316_v8 = vld [vmem:[%s5563_s4 + $0x20] sm:$0x3f]   ;;  %v4322_v14 = vld [vmem:[%s5565_s1 + $0x10] sm:$0xff]   ;;  %v4323_v15 = vld [vmem:[%s5564_s0 + $0x18] sm:$0xff]  }
   0x5   :  { %4025 = vmatprep.mubr.msk.bf16.mxu0 %vm294_vm2, %v4317_v3  ;;  %4099 = vmatprep.mubr.msk.bf16.mxu1 %vm294_vm2, %v4318_v6  ;;  %v396_v10 = vand.u32 %v4316_v8, %v394_v9  ;;  %v4324_v16 = vld [vmem:[%s5565_s1 + $0x18] sm:$0xff]   ;;  %v4325_v17 = vld [vmem:[%s5564_s0 + $0x20] sm:$0xff]   ;;  %v4327_v19 = vld [vmem:[%s5564_s0 + $0x28] sm:$0xff]  }
   0x6   :  { %v4326_v18 = vld [vmem:[%s5565_s1 + $0x20] sm:$0xff]   ;;  %v4328_v20 = vld [vmem:[%s5565_s1 + $0x28] sm:$0xff]   ;;  %v4329_v21 = vld [vmem:[%s5564_s0 + $0x30] sm:$0xff]  }
   0x7   :  { %4018 = vmatpush3.bf16.msra.mxu0 %v4313_v1  ;;  %4092 = vmatpush3.bf16.msra.mxu1 %v4313_v1  ;;  %v4330_v22 = vld [vmem:[%s5565_s1 + $0x30] sm:$0xff]   ;;  %v4331_v23 = vld [vmem:[%s5564_s0 + $0x38] sm:$0xff]   ;;  %v4333_v25 = vld [vmem:[%s5564_s0 + $0x40] sm:$0xff]  }
   0x8   :  { %4019 = vmatprep.subr.bf16.mxu0 %v4314_v2  ;;  %4093 = vmatprep.subr.bf16.mxu1 %v4314_v2  ;;  %v4332_v24 = vld [vmem:[%s5565_s1 + $0x38] sm:$0xff]   ;;  %v4334_v26 = vld [vmem:[%s5565_s1 + $0x40] sm:$0xff]   ;;  %v4335_v27 = vld [vmem:[%s5564_s0 + $0x48] sm:$0xff]  }
   0x9   :  { %v4336_v28 = vld [vmem:[%s5565_s1 + $0x48] sm:$0xff]   ;;  %v4337_v29 = vld [vmem:[%s5564_s0 + $0x50] sm:$0xff]   ;;  %v4339_v31 = vld [vmem:[%s5564_s0 + $0x58] sm:$0xff]  }
   0xa   :  { %v4338_v30 = vld [vmem:[%s5565_s1 + $0x50] sm:$0xff]   ;;  %v4340_v32 = vld [vmem:[%s5565_s1 + $0x58] sm:$0xff]   ;;  %v4341_v33 = vld [vmem:[%s5564_s0 + $0x60] sm:$0xff]  }
   0xb   :  { %4020 = vmatpush3.bf16.msra.mxu0 %v4314_v2  ;;  %4094 = vmatpush3.bf16.msra.mxu1 %v4314_v2  ;;  %v4342_v34 = vld [vmem:[%s5565_s1 + $0x60] sm:$0xff]   ;;  %v4343_v35 = vld [vmem:[%s5564_s0 + $0x68] sm:$0xff]   ;;  %v4345_v37 = vld [vmem:[%s5564_s0 + $0x70] sm:$0xff]  }
   0xc   :  { %4021 = vmatprep.subr.bf16.mxu0 %v4315_v7  ;;  %4095 = vmatprep.subr.bf16.mxu1 %v4315_v7  ;;  %v4344_v36 = vld [vmem:[%s5565_s1 + $0x68] sm:$0xff]   ;;  %v4346_v38 = vld [vmem:[%s5565_s1 + $0x70] sm:$0xff]   ;;  %v4347_v39 = vld [vmem:[%s5564_s0 + $0x78] sm:$0xff]  }
   0xd   :  { %v4348_v40 = vld [vmem:[%s5565_s1 + $0x78] sm:$0xff]   ;;  %v4349_v41 = vld [vmem:[%s5564_s0 + $0x80] sm:$0xff]   ;;  %v4351_v43 = vld [vmem:[%s5564_s0 + $0x88] sm:$0xff]  }
   0xe   :  { %v4350_v42 = vld [vmem:[%s5565_s1 + $0x80] sm:$0xff]   ;;  %v4352_v44 = vld [vmem:[%s5565_s1 + $0x88] sm:$0xff]   ;;  %v4353_v45 = vld [vmem:[%s5564_s0 + $0x90] sm:$0xff]  }
   0xf   :  { %4022 = vmatpush3.bf16.msra.mxu0 %v4315_v7  ;;  %4096 = vmatpush3.bf16.msra.mxu1 %v4315_v7  ;;  %v4354_v46 = vld [vmem:[%s5565_s1 + $0x90] sm:$0xff]   ;;  %v4355_v47 = vld [vmem:[%s5564_s0 + $0x98] sm:$0xff]   ;;  %v4357_v49 = vld [vmem:[%s5564_s0 + $0xa0] sm:$0xff]  }
  0x10   :  { %4023 = vmatprep.subr.bf16.mxu0 %v396_v10  ;;  %4097 = vmatprep.subr.bf16.mxu1 %v396_v10  ;;  %v4356_v48 = vld [vmem:[%s5565_s1 + $0x98] sm:$0xff]   ;;  %v4358_v50 = vld [vmem:[%s5565_s1 + $0xa0] sm:$0xff]   ;;  %v4359_v51 = vld [vmem:[%s5564_s0 + $0xa8] sm:$0xff]  }
  0x11   :  { %v4360_v52 = vld [vmem:[%s5565_s1 + $0xa8] sm:$0xff]   ;;  %v4361_v53 = vld [vmem:[%s5564_s0 + $0xb0] sm:$0xff]   ;;  %v4363_v55 = vld [vmem:[%s5564_s0 + $0xb8] sm:$0xff]  }
  0x12   :  { %v4362_v54 = vld [vmem:[%s5565_s1 + $0xb0] sm:$0xff]   ;;  %v4364_v56 = vld [vmem:[%s5565_s1 + $0xb8] sm:$0xff]   ;;  %v4365_v57 = vld [vmem:[%s5564_s0 + $0xc0] sm:$0xff]  }
  0x13   :  { %4024 = vmatpush3.bf16.msra.mxu0 %v396_v10  ;;  %4098 = vmatpush3.bf16.msra.mxu1 %v396_v10  ;;  %v4366_v58 = vld [vmem:[%s5565_s1 + $0xc0] sm:$0xff]   ;;  %v4367_v59 = vld [vmem:[%s5564_s0 + $0xc8] sm:$0xff]   ;;  %v4369_v61 = vld [vmem:[%s5564_s0 + $0xd0] sm:$0xff]  }
  0x14   :  { %4163 = vmatprep.subr.bf16.mxu0 %v4312_v0  ;;  %4237 = vmatprep.subr.bf16.mxu1 %v4312_v0  ;;  %v4368_v60 = vld [vmem:[%s5565_s1 + $0xc8] sm:$0xff]   ;;  %v4370_v62 = vld [vmem:[%s5565_s1 + $0xd0] sm:$0xff]   ;;  %v4371_v63 = vld [vmem:[%s5564_s0 + $0xd8] sm:$0xff]  }
  0x15   :  { %v4375_v3 = vld [vmem:[%s5564_s0 + $0xe8] sm:$0xff]   ;;  %v4377_v5 = vld [vmem:[%s5564_s0 + $0xf0] sm:$0xff]   ;;  %v4380_v8 = vld [vmem:[%s5565_s1 + $0xf8] sm:$0xff]  }
  0x16   :  { %4026 = vmatmul.mubr.msk.bf16.vlgmr.msra.gmra.mrb[0].mxu0 %vm294_vm2, %v4319_v11  ;;  %4100 = vmatmul.mubr.msk.bf16.vlgmr.msra.gmra.mrb[0].mxu1 %vm294_vm2, %v4320_v12  ;;  %v4376_v4 = vld [vmem:[%s5565_s1 + $0xe8] sm:$0xff]   ;;  %v4378_v6 = vld [vmem:[%s5565_s1 + $0xf0] sm:$0xff]   ;;  %v4381_v9 = vld [vmem:[%s5566_s2] sm:$0xff]  }
  0x17   :  { %4164 = vmatpush3.bf16.msra.mxu0 %v4312_v0  ;;  %4238 = vmatpush3.bf16.msra.mxu1 %v4312_v0  ;;  %v4372_v0 = vld [vmem:[%s5565_s1 + $0xd8] sm:$0xff]   ;;  %v4383_v11 = vld [vmem:[%s5566_s2 + $0x8] sm:$0xff]  }
  0x18   :  { %4029 = vmatprep.mubr.msk.bf16.mxu0 %vm294_vm2, %v4321_v13  ;;  %4103 = vmatprep.mubr.msk.bf16.mxu1 %vm294_vm2, %v4322_v14  ;;  %v4384_v12 = vld [vmem:[%s5567_s3 + $0x8] sm:$0xff]   ;;  %v4385_v13 = vld [vmem:[%s5566_s2 + $0x10] sm:$0xff]  }
  0x19   :  { %4165 = vmatprep.subr.bf16.mxu0 %v4313_v1  ;;  %4239 = vmatprep.subr.bf16.mxu1 %v4313_v1  ;;  %v4386_v14 = vld [vmem:[%s5567_s3 + $0x10] sm:$0xff]  }
  0x1b   :  { %4166 = vmatpush3.bf16.msra.mxu0 %v4313_v1  ;;  %4240 = vmatpush3.bf16.msra.mxu1 %v4313_v1  ;;  %v4373_v1 = vld [vmem:[%s5564_s0 + $0xe0] sm:$0xff]  }
  0x1c   :  { %4167 = vmatprep.subr.bf16.mxu0 %v4314_v2  ;;  %4241 = vmatprep.subr.bf16.mxu1 %v4314_v2 }
  0x1e   :  { %4030 = vmatmul.mubr.msk.bf16.gmra.mrb[4].mxu0 %vm294_vm2, %v4323_v15  ;;  %4104 = vmatmul.mubr.msk.bf16.gmra.mrb[4].mxu1 %vm294_vm2, %v4324_v16  ;;  %v4387_v15 = vld [vmem:[%s5566_s2 + $0x18] sm:$0xff]  }
  0x1f   :  { %4033 = vmatprep.mubr.msk.bf16.mxu0 %vm294_vm2, %v4325_v17  ;;  %4107 = vmatprep.mubr.msk.bf16.mxu1 %vm294_vm2, %v4326_v18  ;;  %v4388_v16 = vld [vmem:[%s5567_s3 + $0x18] sm:$0xff]   ;;  %v4389_v17 = vld [vmem:[%s5566_s2 + $0x20] sm:$0xff]  }
  0x20   :  { %4168 = vmatpush3.bf16.msra.mxu0 %v4314_v2  ;;  %4242 = vmatpush3.bf16.msra.mxu1 %v4314_v2  ;;  %v4374_v2 = vld [vmem:[%s5565_s1 + $0xe0] sm:$0xff]  }
  0x21   :  { %4169 = vmatprep.subr.bf16.mxu0 %v4315_v7  ;;  %4243 = vmatprep.subr.bf16.mxu1 %v4315_v7  ;;  %v4390_v18 = vld [vmem:[%s5567_s3 + $0x20] sm:$0xff]  }
  0x24   :  { %4170 = vmatpush3.bf16.msra.mxu0 %v4315_v7  ;;  %4244 = vmatpush3.bf16.msra.mxu1 %v4315_v7  ;;  %v4379_v7 = vld [vmem:[%s5564_s0 + $0xf8] sm:$0xff]  }
  0x25   :  { %4171 = vmatprep.subr.bf16.mxu0 %v396_v10  ;;  %4245 = vmatprep.subr.bf16.mxu1 %v396_v10 }
  0x26   :  { %4034 = vmatmul.mubr.msk.bf16.gmra.mrb[8].mxu0 %vm294_vm2, %v4327_v19  ;;  %4108 = vmatmul.mubr.msk.bf16.gmra.mrb[8].mxu1 %vm294_vm2, %v4328_v20  ;;  %v4391_v19 = vld [vmem:[%s5566_s2 + $0x28] sm:$0xff]  }
  0x27   :  { %4037 = vmatprep.mubr.msk.bf16.mxu0 %vm294_vm2, %v4329_v21  ;;  %4111 = vmatprep.mubr.msk.bf16.mxu1 %vm294_vm2, %v4330_v22  ;;  %v4392_v20 = vld [vmem:[%s5567_s3 + $0x28] sm:$0xff]   ;;  %v4393_v21 = vld [vmem:[%s5566_s2 + $0x30] sm:$0xff]  }
  0x28   :  { %4172 = vmatpush3.bf16.msra.mxu0 %v396_v10  ;;  %4246 = vmatpush3.bf16.msra.mxu1 %v396_v10  ;;  %v4382_v10 = vld [vmem:[%s5567_s3] sm:$0xff]   ;;  %v4394_v22 = vld [vmem:[%s5567_s3 + $0x30] sm:$0xff]  }
  0x2e   :  { %4038 = vmatmul.mubr.msk.bf16.gmra.mrb[12].mxu0 %vm294_vm2, %v4331_v23  ;;  %4112 = vmatmul.mubr.msk.bf16.gmra.mrb[12].mxu1 %vm294_vm2, %v4332_v24  ;;  %v4395_v23 = vld [vmem:[%s5566_s2 + $0x38] sm:$0xff]  }
  0x2f   :  { %4041 = vmatprep.mubr.msk.bf16.mxu0 %vm294_vm2, %v4333_v25  ;;  %4115 = vmatprep.mubr.msk.bf16.mxu1 %vm294_vm2, %v4334_v26  ;;  %v4396_v24 = vld [vmem:[%s5567_s3 + $0x38] sm:$0xff]   ;;  %v4397_v25 = vld [vmem:[%s5566_s2 + $0x40] sm:$0xff]  }
  0x30   :  { %v4398_v26 = vld [vmem:[%s5567_s3 + $0x40] sm:$0xff]  }
  0x36   :  { %4042 = vmatmul.mubr.msk.bf16.gmra.mrb[16].mxu0 %vm294_vm2, %v4335_v27  ;;  %4116 = vmatmul.mubr.msk.bf16.gmra.mrb[16].mxu1 %vm294_vm2, %v4336_v28  ;;  %v4399_v27 = vld [vmem:[%s5566_s2 + $0x48] sm:$0xff]  }
  0x37   :  { %4045 = vmatprep.mubr.msk.bf16.mxu0 %vm294_vm2, %v4337_v29  ;;  %4119 = vmatprep.mubr.msk.bf16.mxu1 %vm294_vm2, %v4338_v30  ;;  %v4400_v28 = vld [vmem:[%s5567_s3 + $0x48] sm:$0xff]   ;;  %v4401_v29 = vld [vmem:[%s5566_s2 + $0x50] sm:$0xff]  }
  0x38   :  { %v4402_v30 = vld [vmem:[%s5567_s3 + $0x50] sm:$0xff]  }
  0x3e   :  { %4046 = vmatmul.mubr.msk.bf16.gmra.mrb[20].mxu0 %vm294_vm2, %v4339_v31  ;;  %4120 = vmatmul.mubr.msk.bf16.gmra.mrb[20].mxu1 %vm294_vm2, %v4340_v32  ;;  %v4403_v31 = vld [vmem:[%s5566_s2 + $0x58] sm:$0xff]  }
  0x3f   :  { %4049 = vmatprep.mubr.msk.bf16.mxu0 %vm294_vm2, %v4341_v33  ;;  %4123 = vmatprep.mubr.msk.bf16.mxu1 %vm294_vm2, %v4342_v34  ;;  %v4404_v32 = vld [vmem:[%s5567_s3 + $0x58] sm:$0xff]   ;;  %v4405_v33 = vld [vmem:[%s5566_s2 + $0x60] sm:$0xff]  }
  0x40   :  { %v4406_v34 = vld [vmem:[%s5567_s3 + $0x60] sm:$0xff]  }
  0x46   :  { %4050 = vmatmul.mubr.msk.bf16.gmra.mrb[24].mxu0 %vm294_vm2, %v4343_v35  ;;  %4124 = vmatmul.mubr.msk.bf16.gmra.mrb[24].mxu1 %vm294_vm2, %v4344_v36  ;;  %v4407_v35 = vld [vmem:[%s5566_s2 + $0x68] sm:$0xff]  }
  0x47   :  { %4053 = vmatprep.mubr.msk.bf16.mxu0 %vm294_vm2, %v4345_v37  ;;  %4127 = vmatprep.mubr.msk.bf16.mxu1 %vm294_vm2, %v4346_v38  ;;  %v4408_v36 = vld [vmem:[%s5567_s3 + $0x68] sm:$0xff]   ;;  %v4409_v37 = vld [vmem:[%s5566_s2 + $0x70] sm:$0xff]  }
  0x48   :  { %v4410_v38 = vld [vmem:[%s5567_s3 + $0x70] sm:$0xff]  }
  0x4e   :  { %4054 = vmatmul.mubr.msk.bf16.gmra.mrb[28].mxu0 %vm294_vm2, %v4347_v39  ;;  %4128 = vmatmul.mubr.msk.bf16.gmra.mrb[28].mxu1 %vm294_vm2, %v4348_v40  ;;  %v4411_v39 = vld [vmem:[%s5566_s2 + $0x78] sm:$0xff]  }
  0x4f   :  { %4057 = vmatprep.mubr.msk.bf16.mxu0 %vm294_vm2, %v4349_v41  ;;  %4131 = vmatprep.mubr.msk.bf16.mxu1 %vm294_vm2, %v4350_v42  ;;  %v4412_v40 = vld [vmem:[%s5567_s3 + $0x78] sm:$0xff]   ;;  %v4413_v41 = vld [vmem:[%s5566_s2 + $0x80] sm:$0xff]  }
  0x50   :  { %v4414_v42 = vld [vmem:[%s5567_s3 + $0x80] sm:$0xff]  }
  0x56   :  { %4058 = vmatmul.mubr.msk.bf16.gmra.mrb[32].mxu0 %vm294_vm2, %v4351_v43  ;;  %4132 = vmatmul.mubr.msk.bf16.gmra.mrb[32].mxu1 %vm294_vm2, %v4352_v44  ;;  %v4415_v43 = vld [vmem:[%s5566_s2 + $0x88] sm:$0xff]  }
  0x57   :  { %4061 = vmatprep.mubr.msk.bf16.mxu0 %vm294_vm2, %v4353_v45  ;;  %4135 = vmatprep.mubr.msk.bf16.mxu1 %vm294_vm2, %v4354_v46  ;;  %v4416_v44 = vld [vmem:[%s5567_s3 + $0x88] sm:$0xff]   ;;  %v4417_v45 = vld [vmem:[%s5566_s2 + $0x90] sm:$0xff]  }
  0x58   :  { %v4418_v46 = vld [vmem:[%s5567_s3 + $0x90] sm:$0xff]  }
  0x5e   :  { %4062 = vmatmul.mubr.msk.bf16.gmra.mrb[36].mxu0 %vm294_vm2, %v4355_v47  ;;  %4136 = vmatmul.mubr.msk.bf16.gmra.mrb[36].mxu1 %vm294_vm2, %v4356_v48  ;;  %v4419_v47 = vld [vmem:[%s5566_s2 + $0x98] sm:$0xff]  }
  0x5f   :  { %4065 = vmatprep.mubr.msk.bf16.mxu0 %vm294_vm2, %v4357_v49  ;;  %4139 = vmatprep.mubr.msk.bf16.mxu1 %vm294_vm2, %v4358_v50  ;;  %v4420_v48 = vld [vmem:[%s5567_s3 + $0x98] sm:$0xff]   ;;  %v4421_v49 = vld [vmem:[%s5566_s2 + $0xa0] sm:$0xff]  }
  0x60   :  { %v4422_v50 = vld [vmem:[%s5567_s3 + $0xa0] sm:$0xff]  }
  0x66   :  { %4066 = vmatmul.mubr.msk.bf16.gmra.mrb[40].mxu0 %vm294_vm2, %v4359_v51  ;;  %4140 = vmatmul.mubr.msk.bf16.gmra.mrb[40].mxu1 %vm294_vm2, %v4360_v52  ;;  %v4423_v51 = vld [vmem:[%s5566_s2 + $0xa8] sm:$0xff]  }
  0x67   :  { %4069 = vmatprep.mubr.msk.bf16.mxu0 %vm294_vm2, %v4361_v53  ;;  %4143 = vmatprep.mubr.msk.bf16.mxu1 %vm294_vm2, %v4362_v54  ;;  %v4424_v52 = vld [vmem:[%s5567_s3 + $0xa8] sm:$0xff]   ;;  %v4425_v53 = vld [vmem:[%s5566_s2 + $0xb0] sm:$0xff]  }
  0x68   :  { %v4426_v54 = vld [vmem:[%s5567_s3 + $0xb0] sm:$0xff]  }
  0x6e   :  { %4070 = vmatmul.mubr.msk.bf16.gmra.mrb[44].mxu0 %vm294_vm2, %v4363_v55  ;;  %4144 = vmatmul.mubr.msk.bf16.gmra.mrb[44].mxu1 %vm294_vm2, %v4364_v56  ;;  %v4939_v55 = vld [vmem:[%s5568_s5] ss:$0 sm:$0xff] }
  0x6f   :  { %4073 = vmatprep.mubr.msk.bf16.mxu0 %vm294_vm2, %v4365_v57  ;;  %4147 = vmatprep.mubr.msk.bf16.mxu1 %vm294_vm2, %v4366_v58 }
  0x76   :  { %4074 = vmatmul.mubr.msk.bf16.gmra.mrb[48].mxu0 %vm294_vm2, %v4367_v59  ;;  %4148 = vmatmul.mubr.msk.bf16.gmra.mrb[48].mxu1 %vm294_vm2, %v4368_v60 }
  0x77   :  { %4077 = vmatprep.mubr.msk.bf16.mxu0 %vm294_vm2, %v4369_v61  ;;  %4151 = vmatprep.mubr.msk.bf16.mxu1 %vm294_vm2, %v4370_v62  ;;  %v4427_v62 = vld [vmem:[%s5566_s2 + $0xb8] sm:$0xff]  }
  0x7e   :  { %4078 = vmatmul.mubr.msk.bf16.gmra.mrb[52].mxu0 %vm294_vm2, %v4371_v63  ;;  %4152 = vmatmul.mubr.msk.bf16.gmra.mrb[52].mxu1 %vm294_vm2, %v4372_v0  ;;  %v4428_v63 = vld [vmem:[%s5567_s3 + $0xb8] sm:$0xff]  }
  0x7f   :  { %4081 = vmatprep.mubr.msk.bf16.mxu0 %vm294_vm2, %v4373_v1  ;;  %4155 = vmatprep.mubr.msk.bf16.mxu1 %vm294_vm2, %v4374_v2 }
  0x86   :  { %4082 = vmatmul.mubr.msk.bf16.gmra.mrb[56].mxu0 %vm294_vm2, %v4375_v3  ;;  %4156 = vmatmul.mubr.msk.bf16.gmra.mrb[56].mxu1 %vm294_vm2, %v4376_v4  ;;  %v4429_v4 = vld [vmem:[%s5566_s2 + $0xc0] sm:$0xff]  }
  0x87   :  { %4085 = vmatprep.mubr.msk.bf16.mxu0 %vm294_vm2, %v4377_v5  ;;  %4159 = vmatprep.mubr.msk.bf16.mxu1 %vm294_vm2, %v4378_v6  ;;  %v4430_v5 = vld [vmem:[%s5567_s3 + $0xc0] sm:$0xff]  }
  0x8e   :  { %4086 = vmatmul.mubr.msk.bf16.gmra.mrb[60].mxu0 %vm294_vm2, %v4379_v7  ;;  %4160 = vmatmul.mubr.msk.bf16.gmra.mrb[60].mxu1 %vm294_vm2, %v4380_v8 }
  0x8f   :  { %4173 = vmatprep.mubr.msk.bf16.mxu0 %vm294_vm2, %v4381_v9  ;;  %4247 = vmatprep.mubr.msk.bf16.mxu1 %vm294_vm2, %v4382_v10 }
  0x96   :  { %4174 = vmatmul.mubr.msk.bf16.vlgmr.msra.gmra.mrb[64].mxu0 %vm294_vm2, %v4383_v11  ;;  %4248 = vmatmul.mubr.msk.bf16.vlgmr.msra.gmra.mrb[64].mxu1 %vm294_vm2, %v4384_v12 }
  0x97   :  { %4177 = vmatprep.mubr.msk.bf16.mxu0 %vm294_vm2, %v4385_v13  ;;  %4251 = vmatprep.mubr.msk.bf16.mxu1 %vm294_vm2, %v4386_v14 }
  0x9e   :  { %4178 = vmatmul.mubr.msk.bf16.gmra.mrb[68].mxu0 %vm294_vm2, %v4387_v15  ;;  %4252 = vmatmul.mubr.msk.bf16.gmra.mrb[68].mxu1 %vm294_vm2, %v4388_v16 }
  0x9f   :  { %4181 = vmatprep.mubr.msk.bf16.mxu0 %vm294_vm2, %v4389_v17  ;;  %4255 = vmatprep.mubr.msk.bf16.mxu1 %vm294_vm2, %v4390_v18 }
  0xa6   :  { %4182 = vmatmul.mubr.msk.bf16.gmra.mrb[72].mxu0 %vm294_vm2, %v4391_v19  ;;  %4256 = vmatmul.mubr.msk.bf16.gmra.mrb[72].mxu1 %vm294_vm2, %v4392_v20 }
  0xa7   :  { %4185 = vmatprep.mubr.msk.bf16.mxu0 %vm294_vm2, %v4393_v21  ;;  %4259 = vmatprep.mubr.msk.bf16.mxu1 %vm294_vm2, %v4394_v22 }
  0xae   :  { %4186 = vmatmul.mubr.msk.bf16.gmra.mrb[76].mxu0 %vm294_vm2, %v4395_v23  ;;  %4260 = vmatmul.mubr.msk.bf16.gmra.mrb[76].mxu1 %vm294_vm2, %v4396_v24 }
  0xaf   :  { %4189 = vmatprep.mubr.msk.bf16.mxu0 %vm294_vm2, %v4397_v25  ;;  %4263 = vmatprep.mubr.msk.bf16.mxu1 %vm294_vm2, %v4398_v26 }
  0xb6   :  { %4190 = vmatmul.mubr.msk.bf16.gmra.mrb[80].mxu0 %vm294_vm2, %v4399_v27  ;;  %4264 = vmatmul.mubr.msk.bf16.gmra.mrb[80].mxu1 %vm294_vm2, %v4400_v28 }
  0xb7   :  { %4193 = vmatprep.mubr.msk.bf16.mxu0 %vm294_vm2, %v4401_v29  ;;  %4267 = vmatprep.mubr.msk.bf16.mxu1 %vm294_vm2, %v4402_v30  ;;  %v4431_v30 = vld [vmem:[%s5566_s2 + $0xc8] sm:$0xff]  }
  0xbe   :  { %4194 = vmatmul.mubr.msk.bf16.gmra.mrb[84].mxu0 %vm294_vm2, %v4403_v31  ;;  %4268 = vmatmul.mubr.msk.bf16.gmra.mrb[84].mxu1 %vm294_vm2, %v4404_v32  ;;  %v4432_v31 = vld [vmem:[%s5567_s3 + $0xc8] sm:$0xff]  }
  0xbf   :  { %4197 = vmatprep.mubr.msk.bf16.mxu0 %vm294_vm2, %v4405_v33  ;;  %4271 = vmatprep.mubr.msk.bf16.mxu1 %vm294_vm2, %v4406_v34 }
  0xc6   :  { %4198 = vmatmul.mubr.msk.bf16.gmra.mrb[88].mxu0 %vm294_vm2, %v4407_v35  ;;  %4272 = vmatmul.mubr.msk.bf16.gmra.mrb[88].mxu1 %vm294_vm2, %v4408_v36  ;;  %v4433_v36 = vld [vmem:[%s5566_s2 + $0xd0] sm:$0xff]  }
  0xc7   :  { %4201 = vmatprep.mubr.msk.bf16.mxu0 %vm294_vm2, %v4409_v37  ;;  %4275 = vmatprep.mubr.msk.bf16.mxu1 %vm294_vm2, %v4410_v38  ;;  %v4434_v37 = vld [vmem:[%s5567_s3 + $0xd0] sm:$0xff]  }
  0xce   :  { %4202 = vmatmul.mubr.msk.bf16.gmra.mrb[92].mxu0 %vm294_vm2, %v4411_v39  ;;  %4276 = vmatmul.mubr.msk.bf16.gmra.mrb[92].mxu1 %vm294_vm2, %v4412_v40 }
  0xcf   :  { %4205 = vmatprep.mubr.msk.bf16.mxu0 %vm294_vm2, %v4413_v41  ;;  %4279 = vmatprep.mubr.msk.bf16.mxu1 %vm294_vm2, %v4414_v42 }
  0xd6   :  { %4206 = vmatmul.mubr.msk.bf16.gmra.mrb[96].mxu0 %vm294_vm2, %v4415_v43  ;;  %4280 = vmatmul.mubr.msk.bf16.gmra.mrb[96].mxu1 %vm294_vm2, %v4416_v44 }
  0xd7   :  { %4209 = vmatprep.mubr.msk.bf16.mxu0 %vm294_vm2, %v4417_v45  ;;  %4283 = vmatprep.mubr.msk.bf16.mxu1 %vm294_vm2, %v4418_v46 }
  0xde   :  { %4210 = vmatmul.mubr.msk.bf16.gmra.mrb[100].mxu0 %vm294_vm2, %v4419_v47  ;;  %4284 = vmatmul.mubr.msk.bf16.gmra.mrb[100].mxu1 %vm294_vm2, %v4420_v48 }
  0xdf   :  { %4213 = vmatprep.mubr.msk.bf16.mxu0 %vm294_vm2, %v4421_v49  ;;  %4287 = vmatprep.mubr.msk.bf16.mxu1 %vm294_vm2, %v4422_v50 }
  0xe6   :  { %4214 = vmatmul.mubr.msk.bf16.gmra.mrb[104].mxu0 %vm294_vm2, %v4423_v51  ;;  %4288 = vmatmul.mubr.msk.bf16.gmra.mrb[104].mxu1 %vm294_vm2, %v4424_v52 }
  0xe7   :  { %4217 = vmatprep.mubr.msk.bf16.mxu0 %vm294_vm2, %v4425_v53  ;;  %4291 = vmatprep.mubr.msk.bf16.mxu1 %vm294_vm2, %v4426_v54 }
  0xe9   :  { %v4027_v56 = vpop.f32.mrb[0].mxu0  ;;  %v4101_v57 = vpop.f32.mrb[0].mxu1 }
  0xea   :  { %v441_v58 = vadd.f32 %v4027_v56, %v4939_v55  ;;  %v1114_v59 = vadd.f32 %v4101_v57, %v4939_v55  ;;  %v432_v60 = vpop.f32.mrb[1].mxu0  ;;  %v1105_v61 = vpop.f32.mrb[1].mxu1 }
  0xeb   :  { %v433_v0 = vadd.f32 %v4939_v55, %v432_v60  ;;  %v1106_v1 = vadd.f32 %v4939_v55, %v1105_v61  ;;  %v4028_v2 = vpop.f32.mrb[2].mxu0  ;;  %v4102_v3 = vpop.f32.mrb[2].mxu1 }
  0xec   :  { %v689_v6 = vmax.f32 %v441_v58, 0.0  ;;  %v1362_v7 = vmax.f32 %v1114_v59, 0.0  ;;  %v444_v8 = vadd.f32 %v4028_v2, %v4939_v55  ;;  %v1117_v9 = vadd.f32 %v4102_v3, %v4939_v55  ;;  %v435_v10 = vpop.f32.mrb[3].mxu0  ;;  %v1108_v11 = vpop.f32.mrb[3].mxu1 }
  0xed   :  { %v687_v12 = vmax.f32 %v433_v0, 0.0  ;;  %v1360_v13 = vmax.f32 %v1106_v1, 0.0  ;;  %v436_v14 = vadd.f32 %v4939_v55, %v435_v10  ;;  %v1109_v15 = vadd.f32 %v4939_v55, %v1108_v11  ;;  %v4436_v0 = vld [vmem:[%s5567_s3 + $0xd8] sm:$0xff]  }
  0xee   :  { %v4963_v16 = vmax.f32 %v689_v6, %v1362_v7  ;;  %v690_v17 = vmax.f32 %v444_v8, 0.0  ;;  %v1363_v18 = vmax.f32 %v1117_v9, 0.0  ;;  %4218 = vmatmul.mubr.msk.bf16.gmra.mrb[108].mxu0 %vm294_vm2, %v4427_v62  ;;  %4292 = vmatmul.mubr.msk.bf16.gmra.mrb[108].mxu1 %vm294_vm2, %v4428_v63  ;;  %v4435_v63 = vld [vmem:[%s5566_s2 + $0xd8] sm:$0xff]   ;;  %v4438_v6 = vld [vmem:[%s5567_s3 + $0xe0] sm:$0xff]  }
  0xef   :  { %v4967_v19 = vmax.f32 %v687_v12, %v1360_v13  ;;  %v688_v20 = vmax.f32 %v436_v14, 0.0  ;;  %v1361_v21 = vmax.f32 %v1109_v15, 0.0  ;;  %4221 = vmatprep.mubr.msk.bf16.mxu0 %vm294_vm2, %v4429_v4  ;;  %4295 = vmatprep.mubr.msk.bf16.mxu1 %vm294_vm2, %v4430_v5  ;;  %v4437_v5 = vld [vmem:[%s5566_s2 + $0xe0] sm:$0xff]  }
  0xf0   :  { %v4971_v22 = vmax.f32 %v690_v17, %v1363_v18 }
  0xf1   :  { %v4973_v23 = vmax.f32 %v688_v20, %v1361_v21  ;;  %v4031_v24 = vpop.f32.mrb[4].mxu0  ;;  %v4105_v25 = vpop.f32.mrb[4].mxu1 }
  0xf2   :  { %v457_v26 = vadd.f32 %v4031_v24, %v4939_v55  ;;  %v1130_v27 = vadd.f32 %v4105_v25, %v4939_v55  ;;  %v448_v28 = vpop.f32.mrb[5].mxu0  ;;  %v1121_v29 = vpop.f32.mrb[5].mxu1 }
  0xf3   :  { %v449_v32 = vadd.f32 %v4939_v55, %v448_v28  ;;  %v1122_v33 = vadd.f32 %v4939_v55, %v1121_v29  ;;  %v4032_v34 = vpop.f32.mrb[6].mxu0  ;;  %v4106_v35 = vpop.f32.mrb[6].mxu1 }
  0xf4   :  { %v693_v38 = vmax.f32 %v457_v26, 0.0  ;;  %v1366_v39 = vmax.f32 %v1130_v27, 0.0  ;;  %v460_v40 = vadd.f32 %v4032_v34, %v4939_v55  ;;  %v1133_v41 = vadd.f32 %v4106_v35, %v4939_v55  ;;  %v451_v42 = vpop.f32.mrb[7].mxu0  ;;  %v1124_v43 = vpop.f32.mrb[7].mxu1  ;;  %v4439_v35 = vld [vmem:[%s5566_s2 + $0xe8] sm:$0xff]  }
  0xf5   :  { %v691_v44 = vmax.f32 %v449_v32, 0.0  ;;  %v1364_v45 = vmax.f32 %v1122_v33, 0.0  ;;  %v452_v46 = vadd.f32 %v4939_v55, %v451_v42  ;;  %v1125_v47 = vadd.f32 %v4939_v55, %v1124_v43  ;;  %v4442_v42 = vld [vmem:[%s5567_s3 + $0xf0] sm:$0xff]  }
  0xf6   :  { %v4995_v48 = vmax.f32 %v693_v38, %v1366_v39  ;;  %v694_v49 = vmax.f32 %v460_v40, 0.0  ;;  %v1367_v50 = vmax.f32 %v1133_v41, 0.0  ;;  %4222 = vmatmul.mubr.msk.bf16.gmra.mrb[112].mxu0 %vm294_vm2, %v4431_v30  ;;  %4296 = vmatmul.mubr.msk.bf16.gmra.mrb[112].mxu1 %vm294_vm2, %v4432_v31  ;;  %v4441_v41 = vld [vmem:[%s5566_s2 + $0xf0] sm:$0xff]  }
  0xf7   :  { %v4999_v51 = vmax.f32 %v691_v44, %v1364_v45  ;;  %v692_v52 = vmax.f32 %v452_v46, 0.0  ;;  %v1365_v53 = vmax.f32 %v1125_v47, 0.0  ;;  %4225 = vmatprep.mubr.msk.bf16.mxu0 %vm294_vm2, %v4433_v36  ;;  %4299 = vmatprep.mubr.msk.bf16.mxu1 %vm294_vm2, %v4434_v37  ;;  %v4440_v36 = vld [vmem:[%s5567_s3 + $0xe8] sm:$0xff]  }
  0xf8   :  { %v5003_v54 = vmax.f32 %v694_v49, %v1367_v50 }
  0xf9   :  { %v5005_v56 = vmax.f32 %v692_v52, %v1365_v53  ;;  %v4035_v57 = vpop.f32.mrb[8].mxu0  ;;  %v4109_v58 = vpop.f32.mrb[8].mxu1 }
  0xfa   :  { %v473_v59 = vadd.f32 %v4035_v57, %v4939_v55  ;;  %v1146_v60 = vadd.f32 %v4109_v58, %v4939_v55  ;;  %v464_v61 = vpop.f32.mrb[9].mxu0  ;;  %v1137_v62 = vpop.f32.mrb[9].mxu1 }
  0xfb   :  { %v465_v1 = vadd.f32 %v4939_v55, %v464_v61  ;;  %v1138_v2 = vadd.f32 %v4939_v55, %v1137_v62  ;;  %v4036_v3 = vpop.f32.mrb[10].mxu0  ;;  %v4110_v4 = vpop.f32.mrb[10].mxu1 }
  0xfc   :  { %v697_v7 = vmax.f32 %v473_v59, 0.0  ;;  %v1370_v8 = vmax.f32 %v1146_v60, 0.0  ;;  %v476_v9 = vadd.f32 %v4036_v3, %v4939_v55  ;;  %v1149_v10 = vadd.f32 %v4110_v4, %v4939_v55  ;;  %v467_v11 = vpop.f32.mrb[11].mxu0  ;;  %v1140_v12 = vpop.f32.mrb[11].mxu1 }
  0xfd   :  { %v695_v13 = vmax.f32 %v465_v1, 0.0  ;;  %v1368_v14 = vmax.f32 %v1138_v2, 0.0  ;;  %v468_v15 = vadd.f32 %v4939_v55, %v467_v11  ;;  %v1141_v17 = vadd.f32 %v4939_v55, %v1140_v12 }
  0xfe   :  { %v5027_v18 = vmax.f32 %v697_v7, %v1370_v8  ;;  %v698_v20 = vmax.f32 %v476_v9, 0.0  ;;  %v1371_v21 = vmax.f32 %v1149_v10, 0.0  ;;  %4226 = vmatmul.mubr.msk.bf16.gmra.mrb[116].mxu0 %vm294_vm2, %v4435_v63  ;;  %4300 = vmatmul.mubr.msk.bf16.gmra.mrb[116].mxu1 %vm294_vm2, %v4436_v0  ;;  %v4443_v8 = vld [vmem:[%s5566_s2 + $0xf8] sm:$0xff]  }
  0xff   :  { %v5031_v24 = vmax.f32 %v695_v13, %v1368_v14  ;;  %v696_v25 = vmax.f32 %v468_v15, 0.0  ;;  %v1369_v26 = vmax.f32 %v1141_v17, 0.0  ;;  %4229 = vmatprep.mubr.msk.bf16.mxu0 %vm294_vm2, %v4437_v5  ;;  %4303 = vmatprep.mubr.msk.bf16.mxu1 %vm294_vm2, %v4438_v6  ;;  %v4444_v9 = vld [vmem:[%s5567_s3 + $0xf8] sm:$0xff]  }
 0x100   :  { %v5035_v27 = vmax.f32 %v698_v20, %v1371_v21 }
 0x101   :  { %v5037_v28 = vmax.f32 %v696_v25, %v1369_v26  ;;  %v4039_v29 = vpop.f32.mrb[12].mxu0  ;;  %v4113_v30 = vpop.f32.mrb[12].mxu1 }
 0x102   :  { %v489_v31 = vadd.f32 %v4039_v29, %v4939_v55  ;;  %v1162_v32 = vadd.f32 %v4113_v30, %v4939_v55  ;;  %v480_v33 = vpop.f32.mrb[13].mxu0  ;;  %v1153_v34 = vpop.f32.mrb[13].mxu1 }
 0x103   :  { %v481_v37 = vadd.f32 %v4939_v55, %v480_v33  ;;  %v1154_v38 = vadd.f32 %v4939_v55, %v1153_v34  ;;  %v4040_v39 = vpop.f32.mrb[14].mxu0  ;;  %v4114_v40 = vpop.f32.mrb[14].mxu1 }
 0x104   :  { %v701_v43 = vmax.f32 %v489_v31, 0.0  ;;  %v1374_v44 = vmax.f32 %v1162_v32, 0.0  ;;  %v492_v45 = vadd.f32 %v4040_v39, %v4939_v55  ;;  %v1165_v46 = vadd.f32 %v4114_v40, %v4939_v55  ;;  %v483_v47 = vpop.f32.mrb[15].mxu0  ;;  %v1156_v49 = vpop.f32.mrb[15].mxu1 }
 0x105   :  { %v699_v50 = vmax.f32 %v481_v37, 0.0  ;;  %v1372_v52 = vmax.f32 %v1154_v38, 0.0  ;;  %v484_v53 = vadd.f32 %v4939_v55, %v483_v47  ;;  %v1157_v57 = vadd.f32 %v4939_v55, %v1156_v49 }
 0x106   :  { %v5059_v58 = vmax.f32 %v701_v43, %v1374_v44  ;;  %v702_v59 = vmax.f32 %v492_v45, 0.0  ;;  %v1375_v60 = vmax.f32 %v1165_v46, 0.0  ;;  %4230 = vmatmul.mubr.msk.bf16.gmra.mrb[120].mxu0 %vm294_vm2, %v4439_v35  ;;  %4304 = vmatmul.mubr.msk.bf16.gmra.mrb[120].mxu1 %vm294_vm2, %v4440_v36 }
 0x107   :  { %v5063_v61 = vmax.f32 %v699_v50, %v1372_v52  ;;  %v700_v62 = vmax.f32 %v484_v53, 0.0  ;;  %v1373_v63 = vmax.f32 %v1157_v57, 0.0  ;;  %4233 = vmatprep.mubr.msk.bf16.mxu0 %vm294_vm2, %v4441_v41  ;;  %4307 = vmatprep.mubr.msk.bf16.mxu1 %vm294_vm2, %v4442_v42 }
 0x108   :  { %v5067_v0 = vmax.f32 %v702_v59, %v1375_v60 }
 0x109   :  { %v5069_v1 = vmax.f32 %v700_v62, %v1373_v63  ;;  %v4043_v2 = vpop.f32.mrb[16].mxu0  ;;  %v4117_v3 = vpop.f32.mrb[16].mxu1 }
 0x10a   :  { %v505_v4 = vadd.f32 %v4043_v2, %v4939_v55  ;;  %v1178_v5 = vadd.f32 %v4117_v3, %v4939_v55  ;;  %v496_v6 = vpop.f32.mrb[17].mxu0  ;;  %v1169_v7 = vpop.f32.mrb[17].mxu1 }
 0x10b   :  { %v497_v10 = vadd.f32 %v4939_v55, %v496_v6  ;;  %v1170_v11 = vadd.f32 %v4939_v55, %v1169_v7  ;;  %v4044_v12 = vpop.f32.mrb[18].mxu0  ;;  %v4118_v13 = vpop.f32.mrb[18].mxu1 }
 0x10c   :  { %v705_v14 = vmax.f32 %v505_v4, 0.0  ;;  %v1378_v15 = vmax.f32 %v1178_v5, 0.0  ;;  %v508_v17 = vadd.f32 %v4044_v12, %v4939_v55  ;;  %v1181_v20 = vadd.f32 %v4118_v13, %v4939_v55  ;;  %v499_v21 = vpop.f32.mrb[19].mxu0  ;;  %v1172_v25 = vpop.f32.mrb[19].mxu1 }
 0x10d   :  { %v703_v26 = vmax.f32 %v497_v10, 0.0  ;;  %v1376_v29 = vmax.f32 %v1170_v11, 0.0  ;;  %v500_v30 = vadd.f32 %v4939_v55, %v499_v21  ;;  %v1173_v31 = vadd.f32 %v4939_v55, %v1172_v25 }
 0x10e   :  { %v5085_v32 = vmax.f32 %v705_v14, %v1378_v15  ;;  %v706_v33 = vmax.f32 %v508_v17, 0.0  ;;  %v1379_v34 = vmax.f32 %v1181_v20, 0.0  ;;  %4234 = vmatmul.mubr.msk.bf16.gmra.mrb[124].mxu0 %vm294_vm2, %v4443_v8  ;;  %4308 = vmatmul.mubr.msk.bf16.gmra.mrb[124].mxu1 %vm294_vm2, %v4444_v9 }
 0x10f   :  { %v5089_v35 = vmax.f32 %v703_v26, %v1376_v29  ;;  %v704_v36 = vmax.f32 %v500_v30, 0.0  ;;  %v1377_v37 = vmax.f32 %v1173_v31, 0.0 }
 0x110   :  { %v5091_v38 = vmax.f32 %v706_v33, %v1379_v34 }
 0x111   :  { %v5093_v39 = vmax.f32 %v704_v36, %v1377_v37  ;;  %v4047_v40 = vpop.f32.mrb[20].mxu0  ;;  %v4121_v41 = vpop.f32.mrb[20].mxu1 }
 0x112   :  { %v521_v42 = vadd.f32 %v4047_v40, %v4939_v55  ;;  %v1194_v43 = vadd.f32 %v4121_v41, %v4939_v55  ;;  %v512_v44 = vpop.f32.mrb[21].mxu0  ;;  %v1185_v45 = vpop.f32.mrb[21].mxu1 }
 0x113   :  { %v513_v46 = vadd.f32 %v4939_v55, %v512_v44  ;;  %v1186_v47 = vadd.f32 %v4939_v55, %v1185_v45  ;;  %v4048_v49 = vpop.f32.mrb[22].mxu0  ;;  %v4122_v50 = vpop.f32.mrb[22].mxu1 }
 0x114   :  { %v709_v52 = vmax.f32 %v521_v42, 0.0  ;;  %v1382_v53 = vmax.f32 %v1194_v43, 0.0  ;;  %v524_v57 = vadd.f32 %v4048_v49, %v4939_v55  ;;  %v1197_v59 = vadd.f32 %v4122_v50, %v4939_v55  ;;  %v515_v60 = vpop.f32.mrb[23].mxu0  ;;  %v1188_v62 = vpop.f32.mrb[23].mxu1 }
 0x115   :  { %v707_v63 = vmax.f32 %v513_v46, 0.0  ;;  %v1380_v2 = vmax.f32 %v1186_v47, 0.0  ;;  %v516_v3 = vadd.f32 %v4939_v55, %v515_v60  ;;  %v1189_v4 = vadd.f32 %v4939_v55, %v1188_v62 }
 0x116   :  { %v5103_v5 = vmax.f32 %v709_v52, %v1382_v53  ;;  %v710_v6 = vmax.f32 %v524_v57, 0.0  ;;  %v1383_v7 = vmax.f32 %v1197_v59, 0.0 }
 0x117   :  { %v5105_v8 = vmax.f32 %v707_v63, %v1380_v2  ;;  %v708_v9 = vmax.f32 %v516_v3, 0.0  ;;  %v1381_v10 = vmax.f32 %v1189_v4, 0.0 }
 0x118   :  { %v5107_v11 = vmax.f32 %v710_v6, %v1383_v7 }
 0x119   :  { %v5109_v12 = vmax.f32 %v708_v9, %v1381_v10  ;;  %v4051_v13 = vpop.f32.mrb[24].mxu0  ;;  %v4125_v14 = vpop.f32.mrb[24].mxu1 }
 0x11a   :  { %v537_v15 = vadd.f32 %v4051_v13, %v4939_v55  ;;  %v1210_v17 = vadd.f32 %v4125_v14, %v4939_v55  ;;  %v528_v20 = vpop.f32.mrb[25].mxu0  ;;  %v1201_v21 = vpop.f32.mrb[25].mxu1 }
 0x11b   :  { %v529_v25 = vadd.f32 %v4939_v55, %v528_v20  ;;  %v1202_v26 = vadd.f32 %v4939_v55, %v1201_v21  ;;  %v4052_v29 = vpop.f32.mrb[26].mxu0  ;;  %v4126_v30 = vpop.f32.mrb[26].mxu1 }
 0x11c   :  { %v713_v31 = vmax.f32 %v537_v15, 0.0  ;;  %v1386_v33 = vmax.f32 %v1210_v17, 0.0  ;;  %v540_v34 = vadd.f32 %v4052_v29, %v4939_v55  ;;  %v1213_v36 = vadd.f32 %v4126_v30, %v4939_v55  ;;  %v531_v37 = vpop.f32.mrb[27].mxu0  ;;  %v1204_v40 = vpop.f32.mrb[27].mxu1 }
 0x11d   :  { %v711_v41 = vmax.f32 %v529_v25, 0.0  ;;  %v1384_v42 = vmax.f32 %v1202_v26, 0.0  ;;  %v532_v43 = vadd.f32 %v4939_v55, %v531_v37  ;;  %v1205_v44 = vadd.f32 %v4939_v55, %v1204_v40 }
 0x11e   :  { %v5119_v45 = vmax.f32 %v713_v31, %v1386_v33  ;;  %v714_v46 = vmax.f32 %v540_v34, 0.0  ;;  %v1387_v47 = vmax.f32 %v1213_v36, 0.0 }
 0x11f   :  { %v5121_v49 = vmax.f32 %v711_v41, %v1384_v42  ;;  %v712_v50 = vmax.f32 %v532_v43, 0.0  ;;  %v1385_v52 = vmax.f32 %v1205_v44, 0.0 }
 0x120   :  { %v5123_v53 = vmax.f32 %v714_v46, %v1387_v47 }
 0x121   :  { %v5125_v57 = vmax.f32 %v712_v50, %v1385_v52  ;;  %v4055_v59 = vpop.f32.mrb[28].mxu0  ;;  %v4129_v60 = vpop.f32.mrb[28].mxu1 }
 0x122   :  { %v553_v62 = vadd.f32 %v4055_v59, %v4939_v55  ;;  %v1226_v63 = vadd.f32 %v4129_v60, %v4939_v55  ;;  %v544_v2 = vpop.f32.mrb[29].mxu0  ;;  %v1217_v3 = vpop.f32.mrb[29].mxu1 }
 0x123   :  { %v545_v4 = vadd.f32 %v4939_v55, %v544_v2  ;;  %v1218_v6 = vadd.f32 %v4939_v55, %v1217_v3  ;;  %v4056_v7 = vpop.f32.mrb[30].mxu0  ;;  %v4130_v9 = vpop.f32.mrb[30].mxu1 }
 0x124   :  { %v717_v10 = vmax.f32 %v553_v62, 0.0  ;;  %v1390_v13 = vmax.f32 %v1226_v63, 0.0  ;;  %v556_v14 = vadd.f32 %v4056_v7, %v4939_v55  ;;  %v1229_v15 = vadd.f32 %v4130_v9, %v4939_v55  ;;  %v547_v17 = vpop.f32.mrb[31].mxu0  ;;  %v1220_v20 = vpop.f32.mrb[31].mxu1 }
 0x125   :  { %v715_v21 = vmax.f32 %v545_v4, 0.0  ;;  %v1388_v25 = vmax.f32 %v1218_v6, 0.0  ;;  %v548_v26 = vadd.f32 %v4939_v55, %v547_v17  ;;  %v1221_v29 = vadd.f32 %v4939_v55, %v1220_v20 }
 0x126   :  { %v5135_v30 = vmax.f32 %v717_v10, %v1390_v13  ;;  %v718_v31 = vmax.f32 %v556_v14, 0.0  ;;  %v1391_v33 = vmax.f32 %v1229_v15, 0.0 }
 0x127   :  { %v5137_v34 = vmax.f32 %v715_v21, %v1388_v25  ;;  %v716_v36 = vmax.f32 %v548_v26, 0.0  ;;  %v1389_v37 = vmax.f32 %v1221_v29, 0.0 }
 0x128   :  { %v5139_v40 = vmax.f32 %v718_v31, %v1391_v33 }
 0x129   :  { %v5141_v41 = vmax.f32 %v716_v36, %v1389_v37  ;;  %v4059_v42 = vpop.f32.mrb[32].mxu0  ;;  %v4133_v43 = vpop.f32.mrb[32].mxu1 }
 0x12a   :  { %v569_v44 = vadd.f32 %v4059_v42, %v4939_v55  ;;  %v1242_v46 = vadd.f32 %v4133_v43, %v4939_v55  ;;  %v560_v47 = vpop.f32.mrb[33].mxu0  ;;  %v1233_v50 = vpop.f32.mrb[33].mxu1 }
 0x12b   :  { %v561_v52 = vadd.f32 %v4939_v55, %v560_v47  ;;  %v1234_v59 = vadd.f32 %v4939_v55, %v1233_v50  ;;  %v4060_v60 = vpop.f32.mrb[34].mxu0  ;;  %v4134_v62 = vpop.f32.mrb[34].mxu1 }
 0x12c   :  { %v721_v63 = vmax.f32 %v569_v44, 0.0  ;;  %v1394_v2 = vmax.f32 %v1242_v46, 0.0  ;;  %v572_v3 = vadd.f32 %v4060_v60, %v4939_v55  ;;  %v1245_v4 = vadd.f32 %v4134_v62, %v4939_v55  ;;  %v563_v6 = vpop.f32.mrb[35].mxu0  ;;  %v1236_v7 = vpop.f32.mrb[35].mxu1 }
 0x12d   :  { %v719_v9 = vmax.f32 %v561_v52, 0.0  ;;  %v1392_v10 = vmax.f32 %v1234_v59, 0.0  ;;  %v564_v13 = vadd.f32 %v4939_v55, %v563_v6  ;;  %v1237_v14 = vadd.f32 %v4939_v55, %v1236_v7 }
 0x12e   :  { %v5151_v15 = vmax.f32 %v721_v63, %v1394_v2  ;;  %v722_v17 = vmax.f32 %v572_v3, 0.0  ;;  %v1395_v20 = vmax.f32 %v1245_v4, 0.0 }
 0x12f   :  { %v5153_v21 = vmax.f32 %v719_v9, %v1392_v10  ;;  %v720_v25 = vmax.f32 %v564_v13, 0.0  ;;  %v1393_v26 = vmax.f32 %v1237_v14, 0.0 }
 0x130   :  { %v5155_v29 = vmax.f32 %v722_v17, %v1395_v20 }
 0x131   :  { %v5157_v31 = vmax.f32 %v720_v25, %v1393_v26  ;;  %v4063_v33 = vpop.f32.mrb[36].mxu0  ;;  %v4137_v36 = vpop.f32.mrb[36].mxu1 }
 0x132   :  { %v585_v37 = vadd.f32 %v4063_v33, %v4939_v55  ;;  %v1258_v42 = vadd.f32 %v4137_v36, %v4939_v55  ;;  %v576_v43 = vpop.f32.mrb[37].mxu0  ;;  %v1249_v44 = vpop.f32.mrb[37].mxu1 }
 0x133   :  { %v577_v46 = vadd.f32 %v4939_v55, %v576_v43  ;;  %v1250_v47 = vadd.f32 %v4939_v55, %v1249_v44  ;;  %v4064_v50 = vpop.f32.mrb[38].mxu0  ;;  %v4138_v52 = vpop.f32.mrb[38].mxu1 }
 0x134   :  { %v725_v59 = vmax.f32 %v585_v37, 0.0  ;;  %v1398_v60 = vmax.f32 %v1258_v42, 0.0  ;;  %v588_v62 = vadd.f32 %v4064_v50, %v4939_v55  ;;  %v1261_v63 = vadd.f32 %v4138_v52, %v4939_v55  ;;  %v579_v2 = vpop.f32.mrb[39].mxu0  ;;  %v1252_v3 = vpop.f32.mrb[39].mxu1 }
 0x135   :  { %v723_v4 = vmax.f32 %v577_v46, 0.0  ;;  %v1396_v6 = vmax.f32 %v1250_v47, 0.0  ;;  %v580_v7 = vadd.f32 %v4939_v55, %v579_v2  ;;  %v1253_v9 = vadd.f32 %v4939_v55, %v1252_v3 }
 0x136   :  { %v5167_v10 = vmax.f32 %v725_v59, %v1398_v60  ;;  %v726_v13 = vmax.f32 %v588_v62, 0.0  ;;  %v1399_v14 = vmax.f32 %v1261_v63, 0.0 }
 0x137   :  { %v5169_v17 = vmax.f32 %v723_v4, %v1396_v6  ;;  %v724_v20 = vmax.f32 %v580_v7, 0.0  ;;  %v1397_v25 = vmax.f32 %v1253_v9, 0.0 }
 0x138   :  { %v5171_v26 = vmax.f32 %v726_v13, %v1399_v14 }
 0x139   :  { %v5173_v33 = vmax.f32 %v724_v20, %v1397_v25  ;;  %v4067_v36 = vpop.f32.mrb[40].mxu0  ;;  %v4141_v37 = vpop.f32.mrb[40].mxu1 }
 0x13a   :  { %v601_v42 = vadd.f32 %v4067_v36, %v4939_v55  ;;  %v1274_v43 = vadd.f32 %v4141_v37, %v4939_v55  ;;  %v592_v44 = vpop.f32.mrb[41].mxu0  ;;  %v1265_v46 = vpop.f32.mrb[41].mxu1 }
 0x13b   :  { %5570 = vst [vmem:[#allocation2_spill] sm:$0xff] %v5173_v33  ;;  %v593_v47 = vadd.f32 %v4939_v55, %v592_v44  ;;  %v1266_v50 = vadd.f32 %v4939_v55, %v1265_v46  ;;  %v4068_v52 = vpop.f32.mrb[42].mxu0  ;;  %v4142_v59 = vpop.f32.mrb[42].mxu1 }
 0x13c   :  { %v729_v60 = vmax.f32 %v601_v42, 0.0  ;;  %v1402_v62 = vmax.f32 %v1274_v43, 0.0  ;;  %v604_v63 = vadd.f32 %v4068_v52, %v4939_v55  ;;  %v1277_v2 = vadd.f32 %v4142_v59, %v4939_v55  ;;  %v595_v3 = vpop.f32.mrb[43].mxu0  ;;  %v1268_v4 = vpop.f32.mrb[43].mxu1 }
 0x13d   :  { %v727_v6 = vmax.f32 %v593_v47, 0.0  ;;  %v1400_v7 = vmax.f32 %v1266_v50, 0.0  ;;  %v596_v9 = vadd.f32 %v4939_v55, %v595_v3  ;;  %v1269_v13 = vadd.f32 %v4939_v55, %v1268_v4 }
 0x13e   :  { %v5183_v14 = vmax.f32 %v729_v60, %v1402_v62  ;;  %v730_v20 = vmax.f32 %v604_v63, 0.0  ;;  %v1403_v25 = vmax.f32 %v1277_v2, 0.0 }
 0x13f   :  { %v5185_v36 = vmax.f32 %v727_v6, %v1400_v7  ;;  %v728_v37 = vmax.f32 %v596_v9, 0.0  ;;  %v1401_v42 = vmax.f32 %v1269_v13, 0.0 }
 0x140   :  { %5571 = vst [vmem:[#allocation3_spill] sm:$0xff] %v5183_v14  ;;  %v5187_v43 = vmax.f32 %v730_v20, %v1403_v25 }
 0x141   :  { %5572 = vst [vmem:[#allocation4_spill] sm:$0xff] %v5185_v36  ;;  %v5189_v44 = vmax.f32 %v728_v37, %v1401_v42  ;;  %v4071_v46 = vpop.f32.mrb[44].mxu0  ;;  %v4145_v52 = vpop.f32.mrb[44].mxu1 }
 0x142   :  { %5573 = vst [vmem:[#allocation5_spill] sm:$0xff] %v5187_v43  ;;  %v617_v47 = vadd.f32 %v4071_v46, %v4939_v55  ;;  %v1290_v50 = vadd.f32 %v4145_v52, %v4939_v55  ;;  %v608_v59 = vpop.f32.mrb[45].mxu0  ;;  %v1281_v3 = vpop.f32.mrb[45].mxu1 }
 0x143   :  { %5574 = vst [vmem:[#allocation6_spill] sm:$0xff] %v5189_v44  ;;  %v609_v60 = vadd.f32 %v4939_v55, %v608_v59  ;;  %v1282_v62 = vadd.f32 %v4939_v55, %v1281_v3  ;;  %v4072_v63 = vpop.f32.mrb[46].mxu0  ;;  %v4146_v2 = vpop.f32.mrb[46].mxu1 }
 0x144   :  { %v733_v4 = vmax.f32 %v617_v47, 0.0  ;;  %v1406_v6 = vmax.f32 %v1290_v50, 0.0  ;;  %v620_v7 = vadd.f32 %v4072_v63, %v4939_v55  ;;  %v1293_v9 = vadd.f32 %v4146_v2, %v4939_v55  ;;  %v611_v13 = vpop.f32.mrb[47].mxu0  ;;  %v1284_v20 = vpop.f32.mrb[47].mxu1 }
 0x145   :  { %v731_v25 = vmax.f32 %v609_v60, 0.0  ;;  %v1404_v37 = vmax.f32 %v1282_v62, 0.0  ;;  %v612_v42 = vadd.f32 %v4939_v55, %v611_v13  ;;  %v1285_v46 = vadd.f32 %v4939_v55, %v1284_v20 }
 0x146   :  { %v5199_v52 = vmax.f32 %v733_v4, %v1406_v6  ;;  %v734_v59 = vmax.f32 %v620_v7, 0.0  ;;  %v1407_v3 = vmax.f32 %v1293_v9, 0.0 }
 0x147   :  { %v5201_v44 = vmax.f32 %v731_v25, %v1404_v37  ;;  %v732_v47 = vmax.f32 %v612_v42, 0.0  ;;  %v1405_v50 = vmax.f32 %v1285_v46, 0.0 }
 0x148   :  { %5575 = vst [vmem:[#allocation7_spill] sm:$0xff] %v5199_v52  ;;  %v5203_v43 = vmax.f32 %v734_v59, %v1407_v3 }
 0x149   :  { %5576 = vst [vmem:[#allocation8_spill] sm:$0xff] %v5201_v44  ;;  %v5205_v63 = vmax.f32 %v732_v47, %v1405_v50  ;;  %v4075_v2 = vpop.f32.mrb[48].mxu0  ;;  %v4149_v36 = vpop.f32.mrb[48].mxu1 }
 0x14a   :  { %5577 = vst [vmem:[#allocation9_spill] sm:$0xff] %v5203_v43  ;;  %v633_v60 = vadd.f32 %v4075_v2, %v4939_v55  ;;  %v1306_v62 = vadd.f32 %v4149_v36, %v4939_v55  ;;  %v624_v13 = vpop.f32.mrb[49].mxu0  ;;  %v1297_v20 = vpop.f32.mrb[49].mxu1 }
 0x14b   :  { %5578 = vst [vmem:[#allocation10_spill] sm:$0xff] %v5205_v63  ;;  %v625_v4 = vadd.f32 %v4939_v55, %v624_v13  ;;  %v1298_v6 = vadd.f32 %v4939_v55, %v1297_v20  ;;  %v4076_v7 = vpop.f32.mrb[50].mxu0  ;;  %v4150_v9 = vpop.f32.mrb[50].mxu1 }
 0x14c   :  { %v737_v25 = vmax.f32 %v633_v60, 0.0  ;;  %v1410_v37 = vmax.f32 %v1306_v62, 0.0  ;;  %v636_v42 = vadd.f32 %v4076_v7, %v4939_v55  ;;  %v1309_v46 = vadd.f32 %v4150_v9, %v4939_v55  ;;  %v627_v59 = vpop.f32.mrb[51].mxu0  ;;  %v1300_v3 = vpop.f32.mrb[51].mxu1 }
 0x14d   :  { %v735_v47 = vmax.f32 %v625_v4, 0.0  ;;  %v1408_v50 = vmax.f32 %v1298_v6, 0.0  ;;  %v628_v36 = vadd.f32 %v4939_v55, %v627_v59  ;;  %v1301_v2 = vadd.f32 %v4939_v55, %v1300_v3 }
 0x14e   :  { %v5215_v63 = vmax.f32 %v737_v25, %v1410_v37  ;;  %v738_v13 = vmax.f32 %v636_v42, 0.0  ;;  %v1411_v20 = vmax.f32 %v1309_v46, 0.0 }
 0x14f   :  { %v5217_v43 = vmax.f32 %v735_v47, %v1408_v50  ;;  %v736_v60 = vmax.f32 %v628_v36, 0.0  ;;  %v1409_v62 = vmax.f32 %v1301_v2, 0.0 }
 0x150   :  { %5579 = vst [vmem:[#allocation11_spill] sm:$0xff] %v5215_v63  ;;  %v5219_v44 = vmax.f32 %v738_v13, %v1411_v20 }
 0x151   :  { %5580 = vst [vmem:[#allocation12_spill] sm:$0xff] %v5217_v43  ;;  %v5221_v7 = vmax.f32 %v736_v60, %v1409_v62  ;;  %v4079_v9 = vpop.f32.mrb[52].mxu0  ;;  %v4153_v52 = vpop.f32.mrb[52].mxu1 }
 0x152   :  { %5581 = vst [vmem:[#allocation13_spill] sm:$0xff] %v5219_v44  ;;  %v649_v4 = vadd.f32 %v4079_v9, %v4939_v55  ;;  %v1322_v6 = vadd.f32 %v4153_v52, %v4939_v55  ;;  %v640_v59 = vpop.f32.mrb[53].mxu0  ;;  %v1313_v3 = vpop.f32.mrb[53].mxu1 }
 0x153   :  { %5582 = vst [vmem:[#allocation14_spill] sm:$0xff] %v5221_v7  ;;  %v641_v25 = vadd.f32 %v4939_v55, %v640_v59  ;;  %v1314_v37 = vadd.f32 %v4939_v55, %v1313_v3  ;;  %v4080_v42 = vpop.f32.mrb[54].mxu0  ;;  %v4154_v46 = vpop.f32.mrb[54].mxu1 }
 0x154   :  { %v741_v47 = vmax.f32 %v649_v4, 0.0  ;;  %v1414_v50 = vmax.f32 %v1322_v6, 0.0  ;;  %v652_v36 = vadd.f32 %v4080_v42, %v4939_v55  ;;  %v1325_v2 = vadd.f32 %v4154_v46, %v4939_v55  ;;  %v643_v13 = vpop.f32.mrb[55].mxu0  ;;  %v1316_v20 = vpop.f32.mrb[55].mxu1 }
 0x155   :  { %v739_v60 = vmax.f32 %v641_v25, 0.0  ;;  %v1412_v62 = vmax.f32 %v1314_v37, 0.0  ;;  %v644_v52 = vadd.f32 %v4939_v55, %v643_v13  ;;  %v1317_v9 = vadd.f32 %v4939_v55, %v1316_v20 }
 0x156   :  { %v5231_v7 = vmax.f32 %v741_v47, %v1414_v50  ;;  %v742_v59 = vmax.f32 %v652_v36, 0.0  ;;  %v1415_v3 = vmax.f32 %v1325_v2, 0.0 }
 0x157   :  { %v5233_v44 = vmax.f32 %v739_v60, %v1412_v62  ;;  %v740_v4 = vmax.f32 %v644_v52, 0.0  ;;  %v1413_v6 = vmax.f32 %v1317_v9, 0.0 }
 0x158   :  { %5583 = vst [vmem:[#allocation15_spill] sm:$0xff] %v5231_v7  ;;  %v5235_v43 = vmax.f32 %v742_v59, %v1415_v3 }
 0x159   :  { %5584 = vst [vmem:[#allocation16_spill] sm:$0xff] %v5233_v44  ;;  %v5237_v42 = vmax.f32 %v740_v4, %v1413_v6  ;;  %v4083_v46 = vpop.f32.mrb[56].mxu0  ;;  %v4157_v63 = vpop.f32.mrb[56].mxu1 }
 0x15a   :  { %5585 = vst [vmem:[#allocation17_spill] sm:$0xff] %v5235_v43  ;;  %v665_v25 = vadd.f32 %v4083_v46, %v4939_v55  ;;  %v1338_v37 = vadd.f32 %v4157_v63, %v4939_v55  ;;  %v656_v13 = vpop.f32.mrb[57].mxu0  ;;  %v1329_v20 = vpop.f32.mrb[57].mxu1 }
 0x15b   :  { %5586 = vst [vmem:[#allocation18_spill] sm:$0xff] %v5237_v42  ;;  %v657_v47 = vadd.f32 %v4939_v55, %v656_v13  ;;  %v1330_v50 = vadd.f32 %v4939_v55, %v1329_v20  ;;  %v4084_v36 = vpop.f32.mrb[58].mxu0  ;;  %v4158_v2 = vpop.f32.mrb[58].mxu1 }
 0x15c   :  { %v745_v60 = vmax.f32 %v665_v25, 0.0  ;;  %v1418_v62 = vmax.f32 %v1338_v37, 0.0  ;;  %v668_v52 = vadd.f32 %v4084_v36, %v4939_v55  ;;  %v1341_v9 = vadd.f32 %v4158_v2, %v4939_v55  ;;  %v659_v59 = vpop.f32.mrb[59].mxu0  ;;  %v1332_v3 = vpop.f32.mrb[59].mxu1 }
 0x15d   :  { %v743_v4 = vmax.f32 %v657_v47, 0.0  ;;  %v1416_v6 = vmax.f32 %v1330_v50, 0.0  ;;  %v660_v63 = vadd.f32 %v4939_v55, %v659_v59  ;;  %v1333_v46 = vadd.f32 %v4939_v55, %v1332_v3 }
 0x15e   :  { %v5247_v42 = vmax.f32 %v745_v60, %v1418_v62  ;;  %v746_v13 = vmax.f32 %v668_v52, 0.0  ;;  %v1419_v20 = vmax.f32 %v1341_v9, 0.0 }
 0x15f   :  { %v5249_v43 = vmax.f32 %v743_v4, %v1416_v6  ;;  %v744_v25 = vmax.f32 %v660_v63, 0.0  ;;  %v1417_v37 = vmax.f32 %v1333_v46, 0.0 }
 0x160   :  { %5587 = vst [vmem:[#allocation19_spill] sm:$0xff] %v5247_v42  ;;  %v5251_v44 = vmax.f32 %v746_v13, %v1419_v20 }
 0x161   :  { %5588 = vst [vmem:[#allocation20_spill] sm:$0xff] %v5249_v43  ;;  %v5253_v36 = vmax.f32 %v744_v25, %v1417_v37  ;;  %v4087_v2 = vpop.f32.mrb[60].mxu0  ;;  %v4161_v7 = vpop.f32.mrb[60].mxu1 }
 0x162   :  { %5589 = vst [vmem:[#allocation21_spill] sm:$0xff] %v5251_v44  ;;  %v681_v47 = vadd.f32 %v4087_v2, %v4939_v55  ;;  %v1354_v50 = vadd.f32 %v4161_v7, %v4939_v55  ;;  %v672_v59 = vpop.f32.mrb[61].mxu0  ;;  %v1345_v3 = vpop.f32.mrb[61].mxu1 }
 0x163   :  { %5590 = vst [vmem:[#allocation22_spill] sm:$0xff] %v5253_v36  ;;  %v673_v60 = vadd.f32 %v4939_v55, %v672_v59  ;;  %v1346_v62 = vadd.f32 %v4939_v55, %v1345_v3  ;;  %v4088_v52 = vpop.f32.mrb[62].mxu0  ;;  %v4162_v9 = vpop.f32.mrb[62].mxu1 }
 0x164   :  { %v749_v4 = vmax.f32 %v681_v47, 0.0  ;;  %v1422_v6 = vmax.f32 %v1354_v50, 0.0  ;;  %v684_v63 = vadd.f32 %v4088_v52, %v4939_v55  ;;  %v1357_v46 = vadd.f32 %v4162_v9, %v4939_v55  ;;  %v675_v13 = vpop.f32.mrb[63].mxu0  ;;  %v1348_v20 = vpop.f32.mrb[63].mxu1 }
 0x165   :  { %v747_v25 = vmax.f32 %v673_v60, 0.0  ;;  %v1420_v37 = vmax.f32 %v1346_v62, 0.0  ;;  %v676_v7 = vadd.f32 %v4939_v55, %v675_v13  ;;  %v1349_v2 = vadd.f32 %v4939_v55, %v1348_v20 }
 0x166   :  { %v5263_v36 = vmax.f32 %v749_v4, %v1422_v6  ;;  %v750_v59 = vmax.f32 %v684_v63, 0.0  ;;  %v1423_v3 = vmax.f32 %v1357_v46, 0.0 }
 0x167   :  { %v5265_v44 = vmax.f32 %v747_v25, %v1420_v37  ;;  %v748_v47 = vmax.f32 %v676_v7, 0.0  ;;  %v1421_v50 = vmax.f32 %v1349_v2, 0.0 }
 0x168   :  { %5591 = vst [vmem:[#allocation23_spill] sm:$0xff] %v5263_v36  ;;  %v5267_v43 = vmax.f32 %v750_v59, %v1423_v3 }
 0x169   :  { %5592 = vst [vmem:[#allocation24_spill] sm:$0xff] %v5265_v44  ;;  %v5269_v52 = vmax.f32 %v748_v47, %v1421_v50  ;;  %v4175_v9 = vpop.f32.mrb[64].mxu0  ;;  %v4249_v42 = vpop.f32.mrb[64].mxu1 }
 0x16a   :  { %5593 = vst [vmem:[#allocation25_spill] sm:$0xff] %v5267_v43  ;;  %v1851_v60 = vadd.f32 %v4175_v9, %v4939_v55  ;;  %v2524_v62 = vadd.f32 %v4249_v42, %v4939_v55  ;;  %v1842_v13 = vpop.f32.mrb[65].mxu0  ;;  %v2515_v20 = vpop.f32.mrb[65].mxu1 }
 0x16b   :  { %5594 = vst [vmem:[#allocation26_spill] sm:$0xff] %v5269_v52  ;;  %v1843_v4 = vadd.f32 %v4939_v55, %v1842_v13  ;;  %v2516_v6 = vadd.f32 %v4939_v55, %v2515_v20  ;;  %v4176_v63 = vpop.f32.mrb[66].mxu0  ;;  %v4250_v46 = vpop.f32.mrb[66].mxu1 }
 0x16c   :  { %v2099_v25 = vmax.f32 %v1851_v60, 0.0  ;;  %v2772_v37 = vmax.f32 %v2524_v62, 0.0  ;;  %v1854_v7 = vadd.f32 %v4176_v63, %v4939_v55  ;;  %v2527_v2 = vadd.f32 %v4250_v46, %v4939_v55  ;;  %v1845_v59 = vpop.f32.mrb[67].mxu0  ;;  %v2518_v3 = vpop.f32.mrb[67].mxu1 }
 0x16d   :  { %v2097_v47 = vmax.f32 %v1843_v4, 0.0  ;;  %v2770_v50 = vmax.f32 %v2516_v6, 0.0  ;;  %v1846_v42 = vadd.f32 %v4939_v55, %v1845_v59  ;;  %v2519_v9 = vadd.f32 %v4939_v55, %v2518_v3  ;;  %v5285_v55 = vld [vmem:[%s5568_s5] ss:$0 sm:$0xff] }
 0x16e   :  { %v2836_v52 = vmax.f32 %v2099_v25, %v2772_v37  ;;  %v2100_v13 = vmax.f32 %v1854_v7, 0.0  ;;  %v2773_v43 = vmax.f32 %v2527_v2, 0.0 }
 0x16f   :  { %v2834_v20 = vmax.f32 %v2097_v47, %v2770_v50  ;;  %v2098_v44 = vmax.f32 %v1846_v42, 0.0  ;;  %v2771_v36 = vmax.f32 %v2519_v9, 0.0 }
 0x170   :  { %v2900_v60 = vmax.f32 %v4963_v16, %v2836_v52  ;;  %v2837_v62 = vmax.f32 %v2100_v13, %v2773_v43 }
 0x171   :  { %v2898_v63 = vmax.f32 %v4967_v19, %v2834_v20  ;;  %v2835_v46 = vmax.f32 %v2098_v44, %v2771_v36  ;;  %v4179_v14 = vpop.f32.mrb[68].mxu0  ;;  %v4253_v33 = vpop.f32.mrb[68].mxu1 }
 0x172   :  { %v2901_v4 = vmax.f32 %v4971_v22, %v2837_v62  ;;  %v1867_v6 = vadd.f32 %v5285_v55, %v4179_v14  ;;  %v2540_v25 = vadd.f32 %v5285_v55, %v4253_v33  ;;  %v1858_v37 = vpop.f32.mrb[69].mxu0  ;;  %v2531_v7 = vpop.f32.mrb[69].mxu1 }
 0x173   :  { %v2899_v16 = vmax.f32 %v4973_v23, %v2835_v46  ;;  %v1859_v19 = vadd.f32 %v5285_v55, %v1858_v37  ;;  %v2532_v43 = vadd.f32 %v5285_v55, %v2531_v7  ;;  %v4180_v44 = vpop.f32.mrb[70].mxu0  ;;  %v4254_v36 = vpop.f32.mrb[70].mxu1 }
 0x174   :  { %v3684_v22 = vpack.c.bf16 %v2901_v4, %v2900_v60  ;;  %v2103_v52 = vmax.f32 %v1867_v6, 0.0  ;;  %v2776_v2 = vmax.f32 %v2540_v25, 0.0  ;;  %v1870_v59 = vadd.f32 %v5285_v55, %v4180_v44  ;;  %v1861_v3 = vpop.f32.mrb[71].mxu0  ;;  %v2534_v47 = vpop.f32.mrb[71].mxu1 }
 0x175   :  { %v3679_v14 = vpack.c.bf16 %v2899_v16, %v2898_v63  ;;  %v2101_v50 = vmax.f32 %v1859_v19, 0.0  ;;  %v2774_v33 = vmax.f32 %v2532_v43, 0.0  ;;  %v2543_v42 = vadd.f32 %v5285_v55, %v4254_v36 }
 0x176   :  { %3836 = vst [vmem:[%s5569_s6 + $0x8] sm:$0xff] %v3684_v22   ;;  %v2840_v23 = vmax.f32 %v2103_v52, %v2776_v2  ;;  %v2104_v9 = vmax.f32 %v1870_v59, 0.0  ;;  %v1862_v13 = vadd.f32 %v5285_v55, %v1861_v3  ;;  %v2535_v20 = vadd.f32 %v5285_v55, %v2534_v47 }
 0x177   :  { %3680 = vst [vmem:[%s5569_s6] sm:$0xff] %v3679_v14   ;;  %v2838_v60 = vmax.f32 %v2101_v50, %v2774_v33  ;;  %v2777_v62 = vmax.f32 %v2543_v42, 0.0 }
 0x178   :  { %v2904_v63 = vmax.f32 %v4995_v48, %v2840_v23  ;;  %v2102_v46 = vmax.f32 %v1862_v13, 0.0  ;;  %v2775_v4 = vmax.f32 %v2535_v20, 0.0 }
 0x179   :  { %v2902_v6 = vmax.f32 %v4999_v51, %v2838_v60  ;;  %v2841_v25 = vmax.f32 %v2104_v9, %v2777_v62  ;;  %v4183_v37 = vpop.f32.mrb[72].mxu0  ;;  %v4257_v7 = vpop.f32.mrb[72].mxu1 }
 0x17a   :  { %v2839_v16 = vmax.f32 %v2102_v46, %v2775_v4  ;;  %v1883_v19 = vadd.f32 %v5285_v55, %v4183_v37  ;;  %v2556_v43 = vadd.f32 %v5285_v55, %v4257_v7  ;;  %v1874_v44 = vpop.f32.mrb[73].mxu0  ;;  %v2547_v36 = vpop.f32.mrb[73].mxu1 }
 0x17b   :  { %v2905_v22 = vmax.f32 %v5003_v54, %v2841_v25  ;;  %v1875_v52 = vadd.f32 %v5285_v55, %v1874_v44  ;;  %v2548_v48 = vadd.f32 %v5285_v55, %v2547_v36  ;;  %v4184_v2 = vpop.f32.mrb[74].mxu0  ;;  %v4258_v59 = vpop.f32.mrb[74].mxu1 }
 0x17c   :  { %v2903_v51 = vmax.f32 %v5005_v56, %v2839_v16  ;;  %v2107_v3 = vmax.f32 %v1883_v19, 0.0  ;;  %v2780_v47 = vmax.f32 %v2556_v43, 0.0  ;;  %v1886_v14 = vadd.f32 %v5285_v55, %v4184_v2  ;;  %v1877_v50 = vpop.f32.mrb[75].mxu0  ;;  %v2550_v33 = vpop.f32.mrb[75].mxu1 }
 0x17d   :  { %v3694_v42 = vpack.c.bf16 %v2905_v22, %v2904_v63  ;;  %v2105_v23 = vmax.f32 %v1875_v52, 0.0  ;;  %v2778_v9 = vmax.f32 %v2548_v48, 0.0  ;;  %v2559_v13 = vadd.f32 %v5285_v55, %v4258_v59 }
 0x17e   :  { %v3689_v54 = vpack.c.bf16 %v2903_v51, %v2902_v6  ;;  %v2844_v20 = vmax.f32 %v2107_v3, %v2780_v47  ;;  %v2108_v60 = vmax.f32 %v1886_v14, 0.0  ;;  %v1878_v62 = vadd.f32 %v5285_v55, %v1877_v50 }
 0x17f   :  { %3838 = vst [vmem:[%s5569_s6 + $0x18] sm:$0xff] %v3694_v42   ;;  %v2842_v56 = vmax.f32 %v2105_v23, %v2778_v9  ;;  %v2781_v46 = vmax.f32 %v2559_v13, 0.0  ;;  %v2551_v4 = vadd.f32 %v5285_v55, %v2550_v33 }
 0x180   :  { %3837 = vst [vmem:[%s5569_s6 + $0x10] sm:$0xff] %v3689_v54   ;;  %v2908_v63 = vmax.f32 %v5027_v18, %v2844_v20  ;;  %v2106_v25 = vmax.f32 %v1878_v62, 0.0 }
 0x181   :  { %v2906_v6 = vmax.f32 %v5031_v24, %v2842_v56  ;;  %v2845_v37 = vmax.f32 %v2108_v60, %v2781_v46  ;;  %v2779_v7 = vmax.f32 %v2551_v4, 0.0  ;;  %v4187_v16 = vpop.f32.mrb[76].mxu0  ;;  %v4261_v19 = vpop.f32.mrb[76].mxu1 }
 0x182   :  { %v1899_v43 = vadd.f32 %v5285_v55, %v4187_v16  ;;  %v2572_v44 = vadd.f32 %v5285_v55, %v4261_v19  ;;  %v1890_v36 = vpop.f32.mrb[77].mxu0  ;;  %v2563_v22 = vpop.f32.mrb[77].mxu1 }
 0x183   :  { %v2909_v52 = vmax.f32 %v5035_v27, %v2845_v37  ;;  %v2843_v48 = vmax.f32 %v2106_v25, %v2779_v7  ;;  %v1891_v2 = vadd.f32 %v5285_v55, %v1890_v36  ;;  %v2564_v18 = vadd.f32 %v5285_v55, %v2563_v22  ;;  %v4188_v59 = vpop.f32.mrb[78].mxu0  ;;  %v4262_v51 = vpop.f32.mrb[78].mxu1 }
 0x184   :  { %v2111_v24 = vmax.f32 %v1899_v43, 0.0  ;;  %v2784_v3 = vmax.f32 %v2572_v44, 0.0  ;;  %v1902_v47 = vadd.f32 %v5285_v55, %v4188_v59  ;;  %v2575_v14 = vadd.f32 %v5285_v55, %v4262_v51  ;;  %v1893_v50 = vpop.f32.mrb[79].mxu0  ;;  %v2566_v33 = vpop.f32.mrb[79].mxu1 }
 0x185   :  { %v3704_v42 = vpack.c.bf16 %v2909_v52, %v2908_v63  ;;  %v2907_v23 = vmax.f32 %v5037_v28, %v2843_v48  ;;  %v2109_v9 = vmax.f32 %v1891_v2, 0.0  ;;  %v2782_v27 = vmax.f32 %v2564_v18, 0.0 }
 0x186   :  { %v2848_v13 = vmax.f32 %v2111_v24, %v2784_v3  ;;  %v2112_v54 = vmax.f32 %v1902_v47, 0.0  ;;  %v2785_v20 = vmax.f32 %v2575_v14, 0.0  ;;  %v1894_v60 = vadd.f32 %v5285_v55, %v1893_v50 }
 0x187   :  { %3840 = vst [vmem:[%s5569_s6 + $0x28] sm:$0xff] %v3704_v42   ;;  %v3699_v62 = vpack.c.bf16 %v2907_v23, %v2906_v6  ;;  %v2846_v56 = vmax.f32 %v2109_v9, %v2782_v27  ;;  %v2567_v46 = vadd.f32 %v5285_v55, %v2566_v33 }
 0x188   :  { %v2912_v4 = vmax.f32 %v5059_v58, %v2848_v13  ;;  %v2849_v63 = vmax.f32 %v2112_v54, %v2785_v20  ;;  %v2110_v25 = vmax.f32 %v1894_v60, 0.0 }
 0x189   :  { %3839 = vst [vmem:[%s5569_s6 + $0x20] sm:$0xff] %v3699_v62   ;;  %v2910_v28 = vmax.f32 %v5063_v61, %v2846_v56  ;;  %v2783_v37 = vmax.f32 %v2567_v46, 0.0  ;;  %v4191_v7 = vpop.f32.mrb[80].mxu0  ;;  %v4265_v16 = vpop.f32.mrb[80].mxu1 }
 0x18a   :  { %v2913_v19 = vmax.f32 %v5067_v0, %v2849_v63  ;;  %v1915_v6 = vadd.f32 %v5285_v55, %v4191_v7  ;;  %v2588_v43 = vadd.f32 %v5285_v55, %v4265_v16  ;;  %v1906_v44 = vpop.f32.mrb[81].mxu0  ;;  %v2579_v36 = vpop.f32.mrb[81].mxu1 }
 0x18b   :  { %v2847_v58 = vmax.f32 %v2110_v25, %v2783_v37  ;;  %v1907_v22 = vadd.f32 %v5285_v55, %v1906_v44  ;;  %v2580_v52 = vadd.f32 %v5285_v55, %v2579_v36  ;;  %v4192_v48 = vpop.f32.mrb[82].mxu0  ;;  %v4266_v2 = vpop.f32.mrb[82].mxu1 }
 0x18c   :  { %v3714_v18 = vpack.c.bf16 %v2913_v19, %v2912_v4  ;;  %v2115_v61 = vmax.f32 %v1915_v6, 0.0  ;;  %v2788_v59 = vmax.f32 %v2588_v43, 0.0  ;;  %v1918_v51 = vadd.f32 %v5285_v55, %v4192_v48  ;;  %v1909_v24 = vpop.f32.mrb[83].mxu0  ;;  %v2582_v0 = vpop.f32.mrb[83].mxu1 }
 0x18d   :  { %v2911_v3 = vmax.f32 %v5069_v1, %v2847_v58  ;;  %v2113_v47 = vmax.f32 %v1907_v22, 0.0  ;;  %v2786_v14 = vmax.f32 %v2580_v52, 0.0  ;;  %v2591_v50 = vadd.f32 %v5285_v55, %v4266_v2 }
 0x18e   :  { %3842 = vst [vmem:[%s5569_s6 + $0x38] sm:$0xff] %v3714_v18   ;;  %v2852_v33 = vmax.f32 %v2115_v61, %v2788_v59  ;;  %v2116_v42 = vmax.f32 %v1918_v51, 0.0  ;;  %v1910_v23 = vadd.f32 %v5285_v55, %v1909_v24  ;;  %v2583_v9 = vadd.f32 %v5285_v55, %v2582_v0 }
 0x18f   :  { %v3709_v27 = vpack.c.bf16 %v2911_v3, %v2910_v28  ;;  %v2850_v13 = vmax.f32 %v2113_v47, %v2786_v14  ;;  %v2789_v54 = vmax.f32 %v2591_v50, 0.0 }
 0x190   :  { %v2916_v20 = vmax.f32 %v5085_v32, %v2852_v33  ;;  %v2114_v1 = vmax.f32 %v1910_v23, 0.0  ;;  %v2787_v60 = vmax.f32 %v2583_v9, 0.0 }
 0x191   :  { %3841 = vst [vmem:[%s5569_s6 + $0x30] sm:$0xff] %v3709_v27   ;;  %v2914_v62 = vmax.f32 %v5089_v35, %v2850_v13  ;;  %v2853_v56 = vmax.f32 %v2116_v42, %v2789_v54  ;;  %v4195_v46 = vpop.f32.mrb[84].mxu0  ;;  %v4269_v4 = vpop.f32.mrb[84].mxu1 }
 0x192   :  { %v2851_v63 = vmax.f32 %v2114_v1, %v2787_v60  ;;  %v1931_v25 = vadd.f32 %v5285_v55, %v4195_v46  ;;  %v2604_v28 = vadd.f32 %v5285_v55, %v4269_v4  ;;  %v1922_v37 = vpop.f32.mrb[85].mxu0  ;;  %v2595_v7 = vpop.f32.mrb[85].mxu1 }
 0x193   :  { %v2917_v32 = vmax.f32 %v5091_v38, %v2853_v56  ;;  %v1923_v16 = vadd.f32 %v5285_v55, %v1922_v37  ;;  %v2596_v19 = vadd.f32 %v5285_v55, %v2595_v7  ;;  %v4196_v6 = vpop.f32.mrb[86].mxu0  ;;  %v4270_v43 = vpop.f32.mrb[86].mxu1 }
 0x194   :  { %v2915_v35 = vmax.f32 %v5093_v39, %v2851_v63  ;;  %v2119_v44 = vmax.f32 %v1931_v25, 0.0  ;;  %v2792_v36 = vmax.f32 %v2604_v28, 0.0  ;;  %v1934_v58 = vadd.f32 %v5285_v55, %v4196_v6  ;;  %v1925_v22 = vpop.f32.mrb[87].mxu0  ;;  %v2598_v52 = vpop.f32.mrb[87].mxu1 }
 0x195   :  { %v3724_v48 = vpack.c.bf16 %v2917_v32, %v2916_v20  ;;  %v2117_v2 = vmax.f32 %v1923_v16, 0.0  ;;  %v2790_v18 = vmax.f32 %v2596_v19, 0.0  ;;  %v2607_v61 = vadd.f32 %v5285_v55, %v4270_v43 }
 0x196   :  { %v3719_v38 = vpack.c.bf16 %v2915_v35, %v2914_v62  ;;  %v2856_v59 = vmax.f32 %v2119_v44, %v2792_v36  ;;  %v2120_v51 = vmax.f32 %v1934_v58, 0.0  ;;  %v1926_v24 = vadd.f32 %v5285_v55, %v1925_v22 }
 0x197   :  { %3844 = vst [vmem:[%s5569_s6 + $0x48] sm:$0xff] %v3724_v48   ;;  %v2854_v39 = vmax.f32 %v2117_v2, %v2790_v18  ;;  %v2793_v0 = vmax.f32 %v2607_v61, 0.0  ;;  %v2599_v3 = vadd.f32 %v5285_v55, %v2598_v52 }
 0x198   :  { %3843 = vst [vmem:[%s5569_s6 + $0x40] sm:$0xff] %v3719_v38   ;;  %v2920_v47 = vmax.f32 %v5103_v5, %v2856_v59  ;;  %v2118_v14 = vmax.f32 %v1926_v24, 0.0 }
 0x199   :  { %v2918_v50 = vmax.f32 %v5105_v8, %v2854_v39  ;;  %v2857_v33 = vmax.f32 %v2120_v51, %v2793_v0  ;;  %v2791_v42 = vmax.f32 %v2599_v3, 0.0  ;;  %v4199_v23 = vpop.f32.mrb[88].mxu0  ;;  %v4273_v9 = vpop.f32.mrb[88].mxu1 }
 0x19a   :  { %v1947_v27 = vadd.f32 %v5285_v55, %v4199_v23  ;;  %v2620_v13 = vadd.f32 %v5285_v55, %v4273_v9  ;;  %v1938_v54 = vpop.f32.mrb[89].mxu0  ;;  %v2611_v20 = vpop.f32.mrb[89].mxu1 }
 0x19b   :  { %v2921_v1 = vmax.f32 %v5107_v11, %v2857_v33  ;;  %v2855_v60 = vmax.f32 %v2118_v14, %v2791_v42  ;;  %v1939_v62 = vadd.f32 %v5285_v55, %v1938_v54  ;;  %v2612_v5 = vadd.f32 %v5285_v55, %v2611_v20  ;;  %v4200_v56 = vpop.f32.mrb[90].mxu0  ;;  %v4274_v46 = vpop.f32.mrb[90].mxu1 }
 0x19c   :  { %v2123_v8 = vmax.f32 %v1947_v27, 0.0  ;;  %v2796_v4 = vmax.f32 %v2620_v13, 0.0  ;;  %v1950_v63 = vadd.f32 %v5285_v55, %v4200_v56  ;;  %v2623_v25 = vadd.f32 %v5285_v55, %v4274_v46  ;;  %v1941_v28 = vpop.f32.mrb[91].mxu0  ;;  %v2614_v37 = vpop.f32.mrb[91].mxu1 }
 0x19d   :  { %v3734_v7 = vpack.c.bf16 %v2921_v1, %v2920_v47  ;;  %v2919_v32 = vmax.f32 %v5109_v12, %v2855_v60  ;;  %v2121_v16 = vmax.f32 %v1939_v62, 0.0  ;;  %v2794_v11 = vmax.f32 %v2612_v5, 0.0 }
 0x19e   :  { %v2860_v19 = vmax.f32 %v2123_v8, %v2796_v4  ;;  %v2124_v6 = vmax.f32 %v1950_v63, 0.0  ;;  %v2797_v43 = vmax.f32 %v2623_v25, 0.0  ;;  %v1942_v35 = vadd.f32 %v5285_v55, %v1941_v28 }
 0x19f   :  { %3846 = vst [vmem:[%s5569_s6 + $0x58] sm:$0xff] %v3734_v7   ;;  %v3729_v44 = vpack.c.bf16 %v2919_v32, %v2918_v50  ;;  %v2858_v36 = vmax.f32 %v2121_v16, %v2794_v11  ;;  %v2615_v58 = vadd.f32 %v5285_v55, %v2614_v37 }
 0x1a0   :  { %v2924_v22 = vmax.f32 %v5119_v45, %v2860_v19  ;;  %v2861_v52 = vmax.f32 %v2124_v6, %v2797_v43  ;;  %v2122_v48 = vmax.f32 %v1942_v35, 0.0 }
 0x1a1   :  { %3845 = vst [vmem:[%s5569_s6 + $0x50] sm:$0xff] %v3729_v44   ;;  %v2922_v12 = vmax.f32 %v5121_v49, %v2858_v36  ;;  %v2795_v2 = vmax.f32 %v2615_v58, 0.0  ;;  %v4203_v18 = vpop.f32.mrb[92].mxu0  ;;  %v4277_v61 = vpop.f32.mrb[92].mxu1 }
 0x1a2   :  { %v2925_v38 = vmax.f32 %v5123_v53, %v2861_v52  ;;  %v1963_v59 = vadd.f32 %v5285_v55, %v4203_v18  ;;  %v2636_v51 = vadd.f32 %v5285_v55, %v4277_v61  ;;  %v1954_v24 = vpop.f32.mrb[93].mxu0  ;;  %v2627_v39 = vpop.f32.mrb[93].mxu1 }
 0x1a3   :  { %v2859_v45 = vmax.f32 %v2122_v48, %v2795_v2  ;;  %v1955_v0 = vadd.f32 %v5285_v55, %v1954_v24  ;;  %v2628_v3 = vadd.f32 %v5285_v55, %v2627_v39  ;;  %v4204_v47 = vpop.f32.mrb[94].mxu0  ;;  %v4278_v14 = vpop.f32.mrb[94].mxu1 }
 0x1a4   :  { %v3744_v50 = vpack.c.bf16 %v2925_v38, %v2924_v22  ;;  %v2127_v49 = vmax.f32 %v1963_v59, 0.0  ;;  %v2800_v33 = vmax.f32 %v2636_v51, 0.0  ;;  %v1966_v42 = vadd.f32 %v5285_v55, %v4204_v47  ;;  %v1957_v23 = vpop.f32.mrb[95].mxu0  ;;  %v2630_v53 = vpop.f32.mrb[95].mxu1 }
 0x1a5   :  { %v2923_v9 = vmax.f32 %v5125_v57, %v2859_v45  ;;  %v2125_v27 = vmax.f32 %v1955_v0, 0.0  ;;  %v2798_v13 = vmax.f32 %v2628_v3, 0.0  ;;  %v2639_v54 = vadd.f32 %v5285_v55, %v4278_v14 }
 0x1a6   :  { %3848 = vst [vmem:[%s5569_s6 + $0x68] sm:$0xff] %v3744_v50   ;;  %v2864_v20 = vmax.f32 %v2127_v49, %v2800_v33  ;;  %v2128_v1 = vmax.f32 %v1966_v42, 0.0  ;;  %v1958_v60 = vadd.f32 %v5285_v55, %v1957_v23  ;;  %v2631_v62 = vadd.f32 %v5285_v55, %v2630_v53 }
 0x1a7   :  { %v3739_v5 = vpack.c.bf16 %v2923_v9, %v2922_v12  ;;  %v2862_v56 = vmax.f32 %v2125_v27, %v2798_v13  ;;  %v2801_v46 = vmax.f32 %v2639_v54, 0.0 }
 0x1a8   :  { %v2928_v8 = vmax.f32 %v5135_v30, %v2864_v20  ;;  %v2126_v57 = vmax.f32 %v1958_v60, 0.0  ;;  %v2799_v4 = vmax.f32 %v2631_v62, 0.0 }
 0x1a9   :  { %3847 = vst [vmem:[%s5569_s6 + $0x60] sm:$0xff] %v3739_v5   ;;  %v2926_v63 = vmax.f32 %v5137_v34, %v2862_v56  ;;  %v2865_v25 = vmax.f32 %v2128_v1, %v2801_v46  ;;  %v4207_v28 = vpop.f32.mrb[96].mxu0  ;;  %v4281_v37 = vpop.f32.mrb[96].mxu1 }
 0x1aa   :  { %v2863_v7 = vmax.f32 %v2126_v57, %v2799_v4  ;;  %v1979_v32 = vadd.f32 %v5285_v55, %v4207_v28  ;;  %v2652_v16 = vadd.f32 %v5285_v55, %v4281_v37  ;;  %v1970_v11 = vpop.f32.mrb[97].mxu0  ;;  %v2643_v19 = vpop.f32.mrb[97].mxu1 }
 0x1ab   :  { %v2929_v30 = vmax.f32 %v5139_v40, %v2865_v25  ;;  %v1971_v6 = vadd.f32 %v5285_v55, %v1970_v11  ;;  %v2644_v43 = vadd.f32 %v5285_v55, %v2643_v19  ;;  %v4208_v35 = vpop.f32.mrb[98].mxu0  ;;  %v4282_v44 = vpop.f32.mrb[98].mxu1 }
 0x1ac   :  { %v2927_v34 = vmax.f32 %v5141_v41, %v2863_v7  ;;  %v2131_v36 = vmax.f32 %v1979_v32, 0.0  ;;  %v2804_v58 = vmax.f32 %v2652_v16, 0.0  ;;  %v1982_v22 = vadd.f32 %v5285_v55, %v4208_v35  ;;  %v1973_v52 = vpop.f32.mrb[99].mxu0  ;;  %v2646_v48 = vpop.f32.mrb[99].mxu1 }
 0x1ad   :  { %v3754_v12 = vpack.c.bf16 %v2929_v30, %v2928_v8  ;;  %v2129_v2 = vmax.f32 %v1971_v6, 0.0  ;;  %v2802_v18 = vmax.f32 %v2644_v43, 0.0  ;;  %v2655_v61 = vadd.f32 %v5285_v55, %v4282_v44 }
 0x1ae   :  { %v3749_v40 = vpack.c.bf16 %v2927_v34, %v2926_v63  ;;  %v2868_v38 = vmax.f32 %v2131_v36, %v2804_v58  ;;  %v2132_v59 = vmax.f32 %v1982_v22, 0.0  ;;  %v1974_v51 = vadd.f32 %v5285_v55, %v1973_v52 }
 0x1af   :  { %3850 = vst [vmem:[%s5569_s6 + $0x78] sm:$0xff] %v3754_v12   ;;  %v2866_v41 = vmax.f32 %v2129_v2, %v2802_v18  ;;  %v2805_v24 = vmax.f32 %v2655_v61, 0.0  ;;  %v2647_v39 = vadd.f32 %v5285_v55, %v2646_v48 }
 0x1b0   :  { %3849 = vst [vmem:[%s5569_s6 + $0x70] sm:$0xff] %v3749_v40   ;;  %v2932_v45 = vmax.f32 %v5151_v15, %v2868_v38  ;;  %v2130_v0 = vmax.f32 %v1974_v51, 0.0  ;;  %v5595_v38 = vld [vmem:[#allocation2_spill] sm:$0xff] }
 0x1b1   :  { %v2930_v3 = vmax.f32 %v5153_v21, %v2866_v41  ;;  %v2869_v47 = vmax.f32 %v2132_v59, %v2805_v24  ;;  %v2803_v14 = vmax.f32 %v2647_v39, 0.0  ;;  %v4211_v50 = vpop.f32.mrb[100].mxu0  ;;  %v4285_v49 = vpop.f32.mrb[100].mxu1 }
 0x1b2   :  { %v1995_v33 = vadd.f32 %v5285_v55, %v4211_v50  ;;  %v2668_v42 = vadd.f32 %v5285_v55, %v4285_v49  ;;  %v1986_v23 = vpop.f32.mrb[101].mxu0  ;;  %v2659_v53 = vpop.f32.mrb[101].mxu1  ;;  %v5596_v49 = vld [vmem:[#allocation3_spill] sm:$0xff] }
 0x1b3   :  { %v2933_v9 = vmax.f32 %v5155_v29, %v2869_v47  ;;  %v2867_v27 = vmax.f32 %v2130_v0, %v2803_v14  ;;  %v1987_v13 = vadd.f32 %v5285_v55, %v1986_v23  ;;  %v2660_v15 = vadd.f32 %v5285_v55, %v2659_v53  ;;  %v4212_v54 = vpop.f32.mrb[102].mxu0  ;;  %v4286_v20 = vpop.f32.mrb[102].mxu1  ;;  %v5597_v53 = vld [vmem:[#allocation4_spill] sm:$0xff] }
 0x1b4   :  { %v2135_v21 = vmax.f32 %v1995_v33, 0.0  ;;  %v2808_v1 = vmax.f32 %v2668_v42, 0.0  ;;  %v1998_v60 = vadd.f32 %v5285_v55, %v4212_v54  ;;  %v2671_v62 = vadd.f32 %v5285_v55, %v4286_v20  ;;  %v1989_v5 = vpop.f32.mrb[103].mxu0  ;;  %v2662_v56 = vpop.f32.mrb[103].mxu1 }
 0x1b5   :  { %v3764_v46 = vpack.c.bf16 %v2933_v9, %v2932_v45  ;;  %v2931_v8 = vmax.f32 %v5157_v31, %v2867_v27  ;;  %v2133_v57 = vmax.f32 %v1987_v13, 0.0  ;;  %v2806_v29 = vmax.f32 %v2660_v15, 0.0 }
 0x1b6   :  { %v2872_v4 = vmax.f32 %v2135_v21, %v2808_v1  ;;  %v2136_v63 = vmax.f32 %v1998_v60, 0.0  ;;  %v2809_v25 = vmax.f32 %v2671_v62, 0.0  ;;  %v1990_v28 = vadd.f32 %v5285_v55, %v1989_v5  ;;  %v5598_v62 = vld [vmem:[#allocation5_spill] sm:$0xff] }
 0x1b7   :  { %3852 = vst [vmem:[%s5569_s6 + $0x88] sm:$0xff] %v3764_v46   ;;  %v3759_v37 = vpack.c.bf16 %v2931_v8, %v2930_v3  ;;  %v2870_v7 = vmax.f32 %v2133_v57, %v2806_v29  ;;  %v2663_v32 = vadd.f32 %v5285_v55, %v2662_v56  ;;  %v5599_v29 = vld [vmem:[#allocation6_spill] sm:$0xff] }
 0x1b8   :  { %v2936_v16 = vmax.f32 %v5167_v10, %v2872_v4  ;;  %v2873_v11 = vmax.f32 %v2136_v63, %v2809_v25  ;;  %v2134_v19 = vmax.f32 %v1990_v28, 0.0 }
 0x1b9   :  { %3851 = vst [vmem:[%s5569_s6 + $0x80] sm:$0xff] %v3759_v37   ;;  %v2934_v31 = vmax.f32 %v5169_v17, %v2870_v7  ;;  %v2807_v30 = vmax.f32 %v2663_v32, 0.0  ;;  %v4215_v6 = vpop.f32.mrb[104].mxu0  ;;  %v4289_v43 = vpop.f32.mrb[104].mxu1 }
 0x1ba   :  { %v2937_v35 = vmax.f32 %v5171_v26, %v2873_v11  ;;  %v2011_v44 = vadd.f32 %v5285_v55, %v4215_v6  ;;  %v2684_v34 = vadd.f32 %v5285_v55, %v4289_v43  ;;  %v2002_v36 = vpop.f32.mrb[105].mxu0  ;;  %v2675_v58 = vpop.f32.mrb[105].mxu1 }
 0x1bb   :  { %v2871_v10 = vmax.f32 %v2134_v19, %v2807_v30  ;;  %v2003_v22 = vadd.f32 %v5285_v55, %v2002_v36  ;;  %v2676_v52 = vadd.f32 %v5285_v55, %v2675_v58  ;;  %v4216_v48 = vpop.f32.mrb[106].mxu0  ;;  %v4290_v12 = vpop.f32.mrb[106].mxu1  ;;  %v5600_v36 = vld [vmem:[#allocation7_spill] sm:$0xff] }
 0x1bc   :  { %v3774_v2 = vpack.c.bf16 %v2937_v35, %v2936_v16  ;;  %v2139_v17 = vmax.f32 %v2011_v44, 0.0  ;;  %v2812_v18 = vmax.f32 %v2684_v34, 0.0  ;;  %v2014_v61 = vadd.f32 %v5285_v55, %v4216_v48  ;;  %v2005_v40 = vpop.f32.mrb[107].mxu0  ;;  %v2678_v26 = vpop.f32.mrb[107].mxu1 }
 0x1bd   :  { %v2935_v59 = vmax.f32 %v5595_v38, %v2871_v10  ;;  %v2137_v51 = vmax.f32 %v2003_v22, 0.0  ;;  %v2810_v41 = vmax.f32 %v2676_v52, 0.0  ;;  %v2687_v24 = vadd.f32 %v5285_v55, %v4290_v12  ;;  %v5601_v22 = vld [vmem:[#allocation8_spill] sm:$0xff]  ;;  %v5602_v38 = vld [vmem:[#allocation9_spill] sm:$0xff] }
 0x1be   :  { %3854 = vst [vmem:[%s5569_s6 + $0x98] sm:$0xff] %v3774_v2   ;;  %v2876_v39 = vmax.f32 %v2139_v17, %v2812_v18  ;;  %v2140_v45 = vmax.f32 %v2014_v61, 0.0  ;;  %v2006_v0 = vadd.f32 %v5285_v55, %v2005_v40  ;;  %v2679_v3 = vadd.f32 %v5285_v55, %v2678_v26 }
 0x1bf   :  { %v3769_v47 = vpack.c.bf16 %v2935_v59, %v2934_v31  ;;  %v2874_v14 = vmax.f32 %v2137_v51, %v2810_v41  ;;  %v2813_v50 = vmax.f32 %v2687_v24, 0.0 }
 0x1c0   :  { %v2940_v33 = vmax.f32 %v5596_v49, %v2876_v39  ;;  %v2138_v42 = vmax.f32 %v2006_v0, 0.0  ;;  %v2811_v23 = vmax.f32 %v2679_v3, 0.0 }
 0x1c1   :  { %3853 = vst [vmem:[%s5569_s6 + $0x90] sm:$0xff] %v3769_v47   ;;  %v2938_v9 = vmax.f32 %v5597_v53, %v2874_v14  ;;  %v2877_v27 = vmax.f32 %v2140_v45, %v2813_v50  ;;  %v4219_v13 = vpop.f32.mrb[108].mxu0  ;;  %v4293_v15 = vpop.f32.mrb[108].mxu1 }
 0x1c2   :  { %v2875_v54 = vmax.f32 %v2138_v42, %v2811_v23  ;;  %v2027_v20 = vadd.f32 %v5285_v55, %v4219_v13  ;;  %v2700_v21 = vadd.f32 %v5285_v55, %v4293_v15  ;;  %v2018_v1 = vpop.f32.mrb[109].mxu0  ;;  %v2691_v60 = vpop.f32.mrb[109].mxu1  ;;  %v5603_v42 = vld [vmem:[#allocation10_spill] sm:$0xff] }
 0x1c3   :  { %v2941_v5 = vmax.f32 %v5598_v62, %v2877_v27  ;;  %v2019_v56 = vadd.f32 %v5285_v55, %v2018_v1  ;;  %v2692_v46 = vadd.f32 %v5285_v55, %v2691_v60  ;;  %v4220_v8 = vpop.f32.mrb[110].mxu0  ;;  %v4294_v57 = vpop.f32.mrb[110].mxu1  ;;  %v5604_v60 = vld [vmem:[#allocation11_spill] sm:$0xff] }
 0x1c4   :  { %v2939_v4 = vmax.f32 %v5599_v29, %v2875_v54  ;;  %v2143_v63 = vmax.f32 %v2027_v20, 0.0  ;;  %v2816_v25 = vmax.f32 %v2700_v21, 0.0  ;;  %v2030_v28 = vadd.f32 %v5285_v55, %v4220_v8  ;;  %v2021_v37 = vpop.f32.mrb[111].mxu0  ;;  %v2694_v7 = vpop.f32.mrb[111].mxu1 }
 0x1c5   :  { %v3784_v32 = vpack.c.bf16 %v2941_v5, %v2940_v33  ;;  %v2141_v16 = vmax.f32 %v2019_v56, 0.0  ;;  %v2814_v11 = vmax.f32 %v2692_v46, 0.0  ;;  %v2703_v19 = vadd.f32 %v5285_v55, %v4294_v57  ;;  %v5605_v46 = vld [vmem:[#allocation12_spill] sm:$0xff] }
 0x1c6   :  { %v3779_v31 = vpack.c.bf16 %v2939_v4, %v2938_v9  ;;  %v2880_v30 = vmax.f32 %v2143_v63, %v2816_v25  ;;  %v2144_v6 = vmax.f32 %v2030_v28, 0.0  ;;  %v2022_v43 = vadd.f32 %v5285_v55, %v2021_v37  ;;  %v5606_v63 = vld [vmem:[#allocation13_spill] sm:$0xff] }
 0x1c7   :  { %3856 = vst [vmem:[%s5569_s6 + $0xa8] sm:$0xff] %v3784_v32   ;;  %v2878_v35 = vmax.f32 %v2141_v16, %v2814_v11  ;;  %v2817_v44 = vmax.f32 %v2703_v19, 0.0  ;;  %v2695_v34 = vadd.f32 %v5285_v55, %v2694_v7 }
 0x1c8   :  { %3855 = vst [vmem:[%s5569_s6 + $0xa0] sm:$0xff] %v3779_v31   ;;  %v2944_v58 = vmax.f32 %v5600_v36, %v2880_v30  ;;  %v2142_v10 = vmax.f32 %v2022_v43, 0.0 }
 0x1c9   :  { %v2942_v52 = vmax.f32 %v5601_v22, %v2878_v35  ;;  %v2881_v48 = vmax.f32 %v2144_v6, %v2817_v44  ;;  %v2815_v12 = vmax.f32 %v2695_v34, 0.0  ;;  %v4223_v2 = vpop.f32.mrb[112].mxu0  ;;  %v4297_v17 = vpop.f32.mrb[112].mxu1 }
 0x1ca   :  { %v2043_v18 = vadd.f32 %v5285_v55, %v4223_v2  ;;  %v2716_v61 = vadd.f32 %v5285_v55, %v4297_v17  ;;  %v2034_v40 = vpop.f32.mrb[113].mxu0  ;;  %v2707_v26 = vpop.f32.mrb[113].mxu1 }
 0x1cb   :  { %v2945_v59 = vmax.f32 %v5602_v38, %v2881_v48  ;;  %v2879_v51 = vmax.f32 %v2142_v10, %v2815_v12  ;;  %v2035_v41 = vadd.f32 %v5285_v55, %v2034_v40  ;;  %v2708_v24 = vadd.f32 %v5285_v55, %v2707_v26  ;;  %v4224_v39 = vpop.f32.mrb[114].mxu0  ;;  %v4298_v45 = vpop.f32.mrb[114].mxu1  ;;  %v5608_v38 = vld [vmem:[#allocation15_spill] sm:$0xff] }
 0x1cc   :  { %v2147_v0 = vmax.f32 %v2043_v18, 0.0  ;;  %v2820_v3 = vmax.f32 %v2716_v61, 0.0  ;;  %v2046_v47 = vadd.f32 %v5285_v55, %v4224_v39  ;;  %v2719_v14 = vadd.f32 %v5285_v55, %v4298_v45  ;;  %v2037_v50 = vpop.f32.mrb[115].mxu0  ;;  %v2710_v49 = vpop.f32.mrb[115].mxu1 }
 0x1cd   :  { %v3794_v33 = vpack.c.bf16 %v2945_v59, %v2944_v58  ;;  %v2943_v23 = vmax.f32 %v5603_v42, %v2879_v51  ;;  %v2145_v53 = vmax.f32 %v2035_v41, 0.0  ;;  %v2818_v9 = vmax.f32 %v2708_v24, 0.0  ;;  %v5607_v58 = vld [vmem:[#allocation14_spill] sm:$0xff]  ;;  %v5609_v24 = vld [vmem:[#allocation16_spill] sm:$0xff]  ;;  %v5610_v42 = vld [vmem:[#allocation17_spill] sm:$0xff] }
 0x1ce   :  { %v2884_v27 = vmax.f32 %v2147_v0, %v2820_v3  ;;  %v2148_v13 = vmax.f32 %v2046_v47, 0.0  ;;  %v2821_v15 = vmax.f32 %v2719_v14, 0.0  ;;  %v2038_v54 = vadd.f32 %v5285_v55, %v2037_v50 }
 0x1cf   :  { %3858 = vst [vmem:[%s5569_s6 + $0xb8] sm:$0xff] %v3794_v33   ;;  %v3789_v20 = vpack.c.bf16 %v2943_v23, %v2942_v52  ;;  %v2882_v21 = vmax.f32 %v2145_v53, %v2818_v9  ;;  %v2711_v1 = vadd.f32 %v5285_v55, %v2710_v49 }
 0x1d0   :  { %v2948_v62 = vmax.f32 %v5604_v60, %v2884_v27  ;;  %v2885_v5 = vmax.f32 %v2148_v13, %v2821_v15  ;;  %v2146_v56 = vmax.f32 %v2038_v54, 0.0  ;;  %v5611_v15 = vld [vmem:[#allocation18_spill] sm:$0xff] }
 0x1d1   :  { %3857 = vst [vmem:[%s5569_s6 + $0xb0] sm:$0xff] %v3789_v20   ;;  %v2946_v8 = vmax.f32 %v5605_v46, %v2882_v21  ;;  %v2819_v57 = vmax.f32 %v2711_v1, 0.0  ;;  %v4227_v29 = vpop.f32.mrb[116].mxu0  ;;  %v4301_v4 = vpop.f32.mrb[116].mxu1 }
 0x1d2   :  { %v2949_v25 = vmax.f32 %v5606_v63, %v2885_v5  ;;  %v2059_v28 = vadd.f32 %v5285_v55, %v4227_v29  ;;  %v2732_v37 = vadd.f32 %v5285_v55, %v4301_v4  ;;  %v2050_v7 = vpop.f32.mrb[117].mxu0  ;;  %v2723_v32 = vpop.f32.mrb[117].mxu1 }
 0x1d3   :  { %v2883_v16 = vmax.f32 %v2146_v56, %v2819_v57  ;;  %v2051_v11 = vadd.f32 %v5285_v55, %v2050_v7  ;;  %v2724_v19 = vadd.f32 %v5285_v55, %v2723_v32  ;;  %v4228_v31 = vpop.f32.mrb[118].mxu0  ;;  %v4302_v30 = vpop.f32.mrb[118].mxu1  ;;  %v5612_v7 = vld [vmem:[#allocation19_spill] sm:$0xff] }
 0x1d4   :  { %v3804_v6 = vpack.c.bf16 %v2949_v25, %v2948_v62  ;;  %v2151_v43 = vmax.f32 %v2059_v28, 0.0  ;;  %v2824_v35 = vmax.f32 %v2732_v37, 0.0  ;;  %v2062_v44 = vadd.f32 %v5285_v55, %v4228_v31  ;;  %v2053_v34 = vpop.f32.mrb[119].mxu0  ;;  %v2726_v36 = vpop.f32.mrb[119].mxu1 }
 0x1d5   :  { %v2947_v10 = vmax.f32 %v5607_v58, %v2883_v16  ;;  %v2149_v22 = vmax.f32 %v2051_v11, 0.0  ;;  %v2822_v52 = vmax.f32 %v2724_v19, 0.0  ;;  %v2735_v48 = vadd.f32 %v5285_v55, %v4302_v30  ;;  %v5613_v11 = vld [vmem:[#allocation20_spill] sm:$0xff]  ;;  %v5614_v58 = vld [vmem:[#allocation21_spill] sm:$0xff] }
 0x1d6   :  { %3860 = vst [vmem:[%s5569_s6 + $0xc8] sm:$0xff] %v3804_v6   ;;  %v2888_v12 = vmax.f32 %v2151_v43, %v2824_v35  ;;  %v2152_v2 = vmax.f32 %v2062_v44, 0.0  ;;  %v2054_v17 = vadd.f32 %v5285_v55, %v2053_v34  ;;  %v2727_v18 = vadd.f32 %v5285_v55, %v2726_v36 }
 0x1d7   :  { %v3799_v61 = vpack.c.bf16 %v2947_v10, %v2946_v8  ;;  %v2886_v40 = vmax.f32 %v2149_v22, %v2822_v52  ;;  %v2825_v26 = vmax.f32 %v2735_v48, 0.0 }
 0x1d8   :  { %v2952_v59 = vmax.f32 %v5608_v38, %v2888_v12  ;;  %v2150_v51 = vmax.f32 %v2054_v17, 0.0  ;;  %v2823_v41 = vmax.f32 %v2727_v18, 0.0 }
 0x1d9   :  { %3859 = vst [vmem:[%s5569_s6 + $0xc0] sm:$0xff] %v3799_v61   ;;  %v2950_v39 = vmax.f32 %v5609_v24, %v2886_v40  ;;  %v2889_v45 = vmax.f32 %v2152_v2, %v2825_v26  ;;  %v4231_v0 = vpop.f32.mrb[120].mxu0  ;;  %v4305_v3 = vpop.f32.mrb[120].mxu1  ;;  %v4446_v61 = vld [vmem:[%s5568_s5] ss:$0 sm:$0xff] }
 0x1da   :  { %v2887_v47 = vmax.f32 %v2150_v51, %v2823_v41  ;;  %v2075_v14 = vadd.f32 %v5285_v55, %v4231_v0  ;;  %v2748_v50 = vadd.f32 %v5285_v55, %v4305_v3  ;;  %v2066_v49 = vpop.f32.mrb[121].mxu0  ;;  %v2739_v33 = vpop.f32.mrb[121].mxu1  ;;  %v5615_v41 = vld [vmem:[#allocation22_spill] sm:$0xff] }
 0x1db   :  { %v2953_v23 = vmax.f32 %v5610_v42, %v2889_v45  ;;  %v2067_v53 = vadd.f32 %v5285_v55, %v2066_v49  ;;  %v2740_v9 = vadd.f32 %v5285_v55, %v2739_v33  ;;  %v4232_v27 = vpop.f32.mrb[122].mxu0  ;;  %v4306_v13 = vpop.f32.mrb[122].mxu1  ;;  %v5616_v33 = vld [vmem:[#allocation23_spill] sm:$0xff] }
 0x1dc   :  { %v2951_v54 = vmax.f32 %v5611_v15, %v2887_v47  ;;  %v2155_v20 = vmax.f32 %v2075_v14, 0.0  ;;  %v2828_v21 = vmax.f32 %v2748_v50, 0.0  ;;  %v2078_v1 = vadd.f32 %v5285_v55, %v4232_v27  ;;  %v2069_v60 = vpop.f32.mrb[123].mxu0  ;;  %v2742_v62 = vpop.f32.mrb[123].mxu1  ;;  %v5618_v15 = vld [vmem:[#allocation25_spill] sm:$0xff] }
 0x1dd   :  { %v3814_v5 = vpack.c.bf16 %v2953_v23, %v2952_v59  ;;  %v2153_v56 = vmax.f32 %v2067_v53, 0.0  ;;  %v2826_v46 = vmax.f32 %v2740_v9, 0.0  ;;  %v2751_v8 = vadd.f32 %v5285_v55, %v4306_v13  ;;  %v5617_v9 = vld [vmem:[#allocation24_spill] sm:$0xff] }
 0x1de   :  { %v3809_v57 = vpack.c.bf16 %v2951_v54, %v2950_v39  ;;  %v2892_v29 = vmax.f32 %v2155_v20, %v2828_v21  ;;  %v2156_v4 = vmax.f32 %v2078_v1, 0.0  ;;  %v2070_v63 = vadd.f32 %v5285_v55, %v2069_v60  ;;  %v5619_v1 = vld [vmem:[#allocation26_spill] sm:$0xff] }
 0x1df   :  { %3862 = vst [vmem:[%s5569_s6 + $0xd8] sm:$0xff] %v3814_v5   ;;  %v2890_v25 = vmax.f32 %v2153_v56, %v2826_v46  ;;  %v2829_v28 = vmax.f32 %v2751_v8, 0.0  ;;  %v2743_v37 = vadd.f32 %v5285_v55, %v2742_v62 }
 0x1e0   :  { %3861 = vst [vmem:[%s5569_s6 + $0xd0] sm:$0xff] %v3809_v57   ;;  %v2956_v32 = vmax.f32 %v5612_v7, %v2892_v29  ;;  %v2154_v16 = vmax.f32 %v2070_v63, 0.0 }
 0x1e1   :  { %v2954_v19 = vmax.f32 %v5613_v11, %v2890_v25  ;;  %v2893_v31 = vmax.f32 %v2156_v4, %v2829_v28  ;;  %v2827_v30 = vmax.f32 %v2743_v37, 0.0  ;;  %v4235_v6 = vpop.f32.mrb[124].mxu0  ;;  %v4309_v43 = vpop.f32.mrb[124].mxu1 }
 0x1e2   :  { %v2091_v35 = vadd.f32 %v5285_v55, %v4235_v6  ;;  %v2764_v44 = vadd.f32 %v5285_v55, %v4309_v43  ;;  %v2082_v34 = vpop.f32.mrb[125].mxu0  ;;  %v2755_v36 = vpop.f32.mrb[125].mxu1 }
 0x1e3   :  { %v2957_v10 = vmax.f32 %v5614_v58, %v2893_v31  ;;  %v2891_v22 = vmax.f32 %v2154_v16, %v2827_v30  ;;  %v2083_v52 = vadd.f32 %v5285_v55, %v2082_v34  ;;  %v2756_v48 = vadd.f32 %v5285_v55, %v2755_v36  ;;  %v4236_v12 = vpop.f32.mrb[126].mxu0  ;;  %v4310_v2 = vpop.f32.mrb[126].mxu1 }
 0x1e4   :  { %v2159_v17 = vmax.f32 %v2091_v35, 0.0  ;;  %v2832_v18 = vmax.f32 %v2764_v44, 0.0  ;;  %v2094_v40 = vadd.f32 %v4446_v61, %v4236_v12  ;;  %v2767_v26 = vadd.f32 %v4446_v61, %v4310_v2  ;;  %v2085_v38 = vpop.f32.mrb[127].mxu0  ;;  %v2758_v59 = vpop.f32.mrb[127].mxu1 }
 0x1e5   :  { %v3824_v51 = vpack.c.bf16 %v2957_v10, %v2956_v32  ;;  %v2955_v24 = vmax.f32 %v5615_v41, %v2891_v22  ;;  %v2157_v39 = vmax.f32 %v2083_v52, 0.0  ;;  %v2830_v45 = vmax.f32 %v2756_v48, 0.0 }
 0x1e6   :  { %v2896_v0 = vmax.f32 %v2159_v17, %v2832_v18  ;;  %v2160_v3 = vmax.f32 %v2094_v40, 0.0  ;;  %v2833_v55 = vmax.f32 %v2767_v26, 0.0  ;;  %v2086_v47 = vadd.f32 %v4446_v61, %v2085_v38 }
 0x1e7   :  { %3864 = vst [vmem:[%s5569_s6 + $0xe8] sm:$0xff] %v3824_v51   ;;  %v3819_v14 = vpack.c.bf16 %v2955_v24, %v2954_v19  ;;  %v2894_v50 = vmax.f32 %v2157_v39, %v2830_v45  ;;  %v2759_v49 = vadd.f32 %v4446_v61, %v2758_v59 }
 0x1e8   :  { %v2960_v42 = vmax.f32 %v5616_v33, %v2896_v0  ;;  %v2897_v23 = vmax.f32 %v2160_v3, %v2833_v55  ;;  %v2158_v53 = vmax.f32 %v2086_v47, 0.0 }
 0x1e9   :  { %3863 = vst [vmem:[%s5569_s6 + $0xe0] sm:$0xff] %v3819_v14   ;;  %v2958_v27 = vmax.f32 %v5617_v9, %v2894_v50  ;;  %v2831_v13 = vmax.f32 %v2759_v49, 0.0 }
 0x1ea   :  { %v2961_v54 = vmax.f32 %v5618_v15, %v2897_v23 }
 0x1eb   :  { %v2895_v20 = vmax.f32 %v2158_v53, %v2831_v13 }
 0x1ec   :  { %v3834_v21 = vpack.c.bf16 %v2961_v54, %v2960_v42 }
 0x1ed   :  { %v2959_v60 = vmax.f32 %v5619_v1, %v2895_v20 }
 0x1ee   :  { %3866 = vst [vmem:[%s5569_s6 + $0xf8] sm:$0xff] %v3834_v21  }
 0x1ef   :  { %v3829_v62 = vpack.c.bf16 %v2959_v60, %v2958_v27 }
 0x1f1   :  { %3865 = vst [vmem:[%s5569_s6 + $0xf0] sm:$0xff] %v3829_v62  }

// kernel: convnet_forward.4
= control target key start
LH: loop header
LB: loop body
LE: loop exit
PB: predicated region body
PF: predicated region fallthrough
CT: control target
= control target key end

     0   :  { %vm775_vm0 = vcmask 261120   ;;  %s7366_s4 = inlined_call_operand.vmem [shape: bf16[800,128], index: 4, kind: input, shape index: {}]   ;;  %s7367_s0 = inlined_call_operand.vmem [shape: bf16[128,800], index: 0, kind: input, shape index: {}]   ;;  %s7368_s1 = inlined_call_operand.vmem [shape: bf16[128,800], index: 1, kind: input, shape index: {}]   ;;  %s7369_s2 = inlined_call_operand.vmem [shape: bf16[128,800], index: 2, kind: input, shape index: {}]   ;;  %s7370_s3 = inlined_call_operand.vmem [shape: bf16[128,800], index: 3, kind: input, shape index: {}]   ;;  %s7371_s5 = inlined_call_operand.vmem [shape: f32[1,128], index: 5, kind: input, shape index: {}]   ;;  %s7372_s6 = inlined_call_operand.vmem [shape: bf16[128,128], index: 6, kind: output, shape index: {}]  }
   0x1   :  { %v5387_v0 = vld [vmem:[%s7366_s4 + $0x40] sm:$0xff]   ;;  %v5410_v4 = vld [vmem:[%s7366_s4 + $0x48] sm:$0xff]   ;;  %v5434_v8 = vld [vmem:[%s7366_s4 + $0x50] sm:$0xff]  }
   0x2   :  { %v5392_v1 = vld [vmem:[%s7366_s4 + $0xc0] sm:$0xff]   ;;  %4038 = vmatprep.subr.bf16.mxu0 %v5387_v0  ;;  %v5416_v5 = vld [vmem:[%s7366_s4 + $0xc8] sm:$0xff]   ;;  %v5440_v9 = vld [vmem:[%s7366_s4 + $0xd0] sm:$0xff]  }
   0x3   :  { %v5398_v2 = vld [vmem:[%s7366_s4] sm:$0xff]   ;;  %4102 = vmatprep.subr.bf16.mxu1 %v5392_v1  ;;  %v5422_v6 = vld [vmem:[%s7366_s4 + $0x8] sm:$0xff]   ;;  %v5446_v10 = vld [vmem:[%s7366_s4 + $0x10] sm:$0xff]  }
   0x4   :  { %v5404_v3 = vld [vmem:[%s7366_s4 + $0x80] sm:$0xff]   ;;  %4039 = vmatpush3.bf16.msra.mxu0 %v5398_v2  ;;  %v5428_v7 = vld [vmem:[%s7366_s4 + $0x88] sm:$0xff]   ;;  %v5452_v11 = vld [vmem:[%s7366_s4 + $0x90] sm:$0xff]  }
   0x5   :  { %4103 = vmatpush3.bf16.msra.mxu1 %v5404_v3  ;;  %4040 = vmatprep.subr.bf16.mxu0 %v5410_v4  ;;  %v5458_v12 = vld [vmem:[%s7366_s4 + $0x58] sm:$0xff]   ;;  %v5482_v16 = vld [vmem:[%s7366_s4 + $0x60] sm:$0xff]   ;;  %v5506_v20 = vld [vmem:[%s7366_s4 + $0x68] sm:$0xff]  }
   0x6   :  { %4104 = vmatprep.subr.bf16.mxu1 %v5416_v5  ;;  %v5464_v13 = vld [vmem:[%s7366_s4 + $0xd8] sm:$0xff]   ;;  %v5488_v17 = vld [vmem:[%s7366_s4 + $0xe0] sm:$0xff]   ;;  %v5512_v21 = vld [vmem:[%s7366_s4 + $0xe8] sm:$0xff]  }
   0x7   :  { %v5470_v14 = vld [vmem:[%s7366_s4 + $0x18] sm:$0xff]   ;;  %v5494_v18 = vld [vmem:[%s7366_s4 + $0x20] sm:$0xff]   ;;  %v5518_v22 = vld [vmem:[%s7366_s4 + $0x28] sm:$0xff]  }
   0x8   :  { %4041 = vmatpush3.bf16.msra.mxu0 %v5422_v6  ;;  %v5476_v15 = vld [vmem:[%s7366_s4 + $0x98] sm:$0xff]   ;;  %v5500_v19 = vld [vmem:[%s7366_s4 + $0xa0] sm:$0xff]   ;;  %v5524_v23 = vld [vmem:[%s7366_s4 + $0xa8] sm:$0xff]  }
   0x9   :  { %4105 = vmatpush3.bf16.msra.mxu1 %v5428_v7  ;;  %4042 = vmatprep.subr.bf16.mxu0 %v5434_v8  ;;  %v5530_v24 = vld [vmem:[%s7366_s4 + $0x70] sm:$0xff]   ;;  %v5554_v28 = vld [vmem:[%s7366_s4 + $0x78] sm:$0xff]   ;;  %v4960_v33 = vld [vmem:[%s7367_s0 + $0x4] ss:$28 sps:$4 sm:$0xff]  }
   0xa   :  { %4106 = vmatprep.subr.bf16.mxu1 %v5440_v9  ;;  %v5536_v25 = vld [vmem:[%s7366_s4 + $0xf0] sm:$0xff]   ;;  %v5560_v29 = vld [vmem:[%s7366_s4 + $0xf8] sm:$0xff]   ;;  %v4961_v34 = vld [vmem:[%s7367_s0 + $0x8] ss:$28 sps:$4 sm:$0xff]   ;;  %832 = vmatprep.mubr.bf16.mxu0 %v4960_v33 }
   0xb   :  { %v5542_v26 = vld [vmem:[%s7366_s4 + $0x30] sm:$0xff]   ;;  %v5566_v30 = vld [vmem:[%s7366_s4 + $0x38] sm:$0xff]   ;;  %v4963_v35 = vld [vmem:[%s7367_s0 + $0xc] ss:$28 sps:$4 sm:$0xff]  }
   0xc   :  { %4043 = vmatpush3.bf16.msra.mxu0 %v5446_v10  ;;  %v5548_v27 = vld [vmem:[%s7366_s4 + $0xb0] sm:$0xff]   ;;  %v5572_v31 = vld [vmem:[%s7366_s4 + $0xb8] sm:$0xff]   ;;  %v5591_v36 = vld [vmem:[%s7366_s4 + $0x180] sm:$0xff]   ;;  %929 = vmatprep.mubr.bf16.mxu1 %v4963_v35 }
   0xd   :  { %4107 = vmatpush3.bf16.msra.mxu1 %v5452_v11  ;;  %4044 = vmatprep.subr.bf16.mxu0 %v5458_v12  ;;  %v4958_v32 = vld [vmem:[%s7367_s0] ss:$28 sps:$4 sm:$0xff]   ;;  %v4971_v41 = vld [vmem:[%s7367_s0 + $0x38] ss:$28 sps:$4 sm:$0xff]   ;;  %v5622_v43 = vld [vmem:[%s7366_s4 + $0x148] sm:$0xff]  }
   0xe   :  { %4108 = vmatprep.subr.bf16.mxu1 %v5464_v13  ;;  %v5596_v37 = vld [vmem:[%s7366_s4 + $0x140] sm:$0xff]   ;;  %v4967_v39 = vld [vmem:[%s7367_s0 + $0x3c] ss:$28 sps:$4 sm:$0xff]   ;;  %v5627_v44 = vld [vmem:[%s7366_s4 + $0x108] sm:$0xff]  }
   0xf   :  { %v5602_v38 = vld [vmem:[%s7366_s4 + $0x100] sm:$0xff]   ;;  %v4975_v45 = vld [vmem:[%s7367_s0 + $0x74] ss:$28 sps:$4 sm:$0xff]   ;;  %v4977_v46 = vld [vmem:[%s7367_s0 + $0x7c] ss:$28 sps:$4 sm:$0xff]  }
  0x10   :  { %4045 = vmatpush3.bf16.msra.mxu0 %v5470_v14  ;;  %v4969_v40 = vld [vmem:[%s7367_s0 + $0x44] ss:$28 sps:$4 sm:$0xff]   ;;  %v5640_v47 = vld [vmem:[%s7366_s4 + $0x150] sm:$0xff]   ;;  %v4983_v51 = vld [vmem:[%s7367_s0 + $0xac] ss:$28 sps:$4 sm:$0xff]  }
  0x11   :  { %4109 = vmatpush3.bf16.msra.mxu1 %v5476_v15  ;;  %4046 = vmatprep.subr.bf16.mxu0 %v5482_v16  ;;  %v4972_v42 = vld [vmem:[%s7367_s0 + $0x40] ss:$28 sps:$4 sm:$0xff]   ;;  %v5645_v48 = vld [vmem:[%s7366_s4 + $0x110] sm:$0xff]   ;;  %v4987_v55 = vld [vmem:[%s7367_s0 + $0xa8] ss:$28 sps:$4 sm:$0xff]  }
  0x12   :  { %4110 = vmatprep.subr.bf16.mxu1 %v5488_v17  ;;  %v4979_v49 = vld [vmem:[%s7367_s0 + $0x70] ss:$28 sps:$4 sm:$0xff]   ;;  %v4980_v50 = vld [vmem:[%s7367_s0 + $0x78] ss:$28 sps:$4 sm:$0xff]   ;;  %v4991_v57 = vld [vmem:[%s7367_s0 + $0xe4] ss:$28 sps:$4 sm:$0xff]  }
  0x13   :  { %v4985_v52 = vld [vmem:[%s7367_s0 + $0xb4] ss:$28 sps:$4 sm:$0xff]   ;;  %v5664_v53 = vld [vmem:[%s7366_s4 + $0x158] sm:$0xff]   ;;  %v5685_v58 = vld [vmem:[%s7366_s4 + $0x188] sm:$0xff]  }
  0x14   :  { %4047 = vmatpush3.bf16.msra.mxu0 %v5494_v18  ;;  %v5669_v54 = vld [vmem:[%s7366_s4 + $0x118] sm:$0xff]   ;;  %v4988_v56 = vld [vmem:[%s7367_s0 + $0xb0] ss:$28 sps:$4 sm:$0xff]   ;;  %v5690_v59 = vld [vmem:[%s7366_s4 + $0x160] sm:$0xff]  }
  0x15   :  { %4111 = vmatpush3.bf16.msra.mxu1 %v5500_v19  ;;  %4048 = vmatprep.subr.bf16.mxu0 %v5506_v20  ;;  %v5696_v60 = vld [vmem:[%s7366_s4 + $0x120] sm:$0xff]   ;;  %v4993_v61 = vld [vmem:[%s7367_s0 + $0xec] ss:$28 sps:$4 sm:$0xff]   ;;  %v5000_v33 = vld [vmem:[%s7367_s0 + $0x11c] ss:$28 sps:$4 sm:$0xff]  }
  0x16   :  { %4112 = vmatprep.subr.bf16.mxu1 %v5512_v21  ;;  %v5708_v62 = vld [vmem:[%s7366_s4 + $0x168] sm:$0xff]   ;;  %v5732_v35 = vld [vmem:[%s7366_s4 + $0x170] sm:$0xff]  }
  0x17   :  { %v5713_v63 = vld [vmem:[%s7366_s4 + $0x128] sm:$0xff]  }
  0x18   :  { %4049 = vmatpush3.bf16.msra.mxu0 %v5518_v22 }
  0x19   :  { %4113 = vmatpush3.bf16.msra.mxu1 %v5524_v23  ;;  %4050 = vmatprep.subr.bf16.mxu0 %v5530_v24 }
  0x1a   :  { %4114 = vmatprep.subr.bf16.mxu1 %v5536_v25 }
  0x1c   :  { %4051 = vmatpush3.bf16.msra.mxu0 %v5542_v26 }
  0x1d   :  { %4115 = vmatpush3.bf16.msra.mxu1 %v5548_v27  ;;  %4052 = vmatprep.subr.bf16.mxu0 %v5554_v28 }
  0x1e   :  { %4116 = vmatprep.subr.bf16.mxu1 %v5560_v29 }
  0x20   :  { %4053 = vmatpush3.bf16.msra.mxu0 %v5566_v30 }
  0x21   :  { %4117 = vmatpush3.bf16.msra.mxu1 %v5572_v31  ;;  %4166 = vmatprep.subr.bf16.mxu0 %v5596_v37 }
  0x22   :  { %4846 = vmatprep.subr.bf16.mxu1 %v5591_v36 }
  0x23   :  { %833 = vmatmul.mubr.bf16.vlgmr.msra.gmra.mrb[0].mxu0 %v4958_v32  ;;  %v4995_v32 = vld [vmem:[%s7367_s0 + $0xe0] ss:$28 sps:$4 sm:$0xff]  }
  0x24   :  { %930 = vmatmul.mubr.bf16.vlgmr.msra.gmra.mrb[0].mxu1 %v4961_v34  ;;  %4167 = vmatpush3.bf16.msra.mxu0 %v5602_v38  ;;  %v5002_v34 = vld [vmem:[%s7367_s0 + $0x124] ss:$28 sps:$4 sm:$0xff]  }
  0x25   :  { %4847 = vmatpush3.bf16.msra.mxu1 %v5591_v36  ;;  %840 = vmatprep.mubr.bf16.mxu0 %v4967_v39  ;;  %v5737_v39 = vld [vmem:[%s7366_s4 + $0x130] sm:$0xff]  }
  0x26   :  { %937 = vmatprep.mubr.bf16.mxu1 %v4969_v40  ;;  %4168 = vmatprep.subr.bf16.mxu0 %v5622_v43  ;;  %v5744_v40 = vld [vmem:[%s7366_s4 + $0x178] sm:$0xff]  }
  0x27   :  { %4848 = vmatprep.subr.bf16.mxu1 %v5685_v58 }
  0x28   :  { %4169 = vmatpush3.bf16.msra.mxu0 %v5627_v44 }
  0x29   :  { %4170 = vmatprep.subr.bf16.mxu0 %v5640_v47  ;;  %4849 = vmatpush3.bf16.msra.mxu1 %v5685_v58 }
  0x2a   :  { %4240 = vmatprep.subr.bf16.mxu1 %v5387_v0  ;;  %v4996_v0 = vld [vmem:[%s7367_s0 + $0xe8] ss:$28 sps:$4 sm:$0xff]  }
  0x2b   :  { %841 = vmatmul.mubr.bf16.gmra.mrb[4].mxu0 %v4971_v41  ;;  %v5749_v41 = vld [vmem:[%s7366_s4 + $0x138] sm:$0xff]  }
  0x2c   :  { %938 = vmatmul.mubr.bf16.gmra.mrb[4].mxu1 %v4972_v42  ;;  %848 = vmatprep.mubr.bf16.mxu0 %v4975_v45  ;;  %v5004_v42 = vld [vmem:[%s7367_s0 + $0x118] ss:$28 sps:$4 sm:$0xff]   ;;  %v5005_v45 = vld [vmem:[%s7367_s0 + $0x120] ss:$28 sps:$4 sm:$0xff]  }
  0x2d   :  { %945 = vmatprep.mubr.bf16.mxu1 %v4977_v46  ;;  %4171 = vmatpush3.bf16.msra.mxu0 %v5645_v48  ;;  %v5008_v46 = vld [vmem:[%s7367_s0 + $0x154] ss:$28 sps:$4 sm:$0xff]  }
  0x2e   :  { %4172 = vmatprep.subr.bf16.mxu0 %v5664_v53 }
  0x31   :  { %4173 = vmatpush3.bf16.msra.mxu0 %v5669_v54 }
  0x32   :  { %4174 = vmatprep.subr.bf16.mxu0 %v5690_v59 }
  0x33   :  { %849 = vmatmul.mubr.bf16.gmra.mrb[8].mxu0 %v4979_v49  ;;  %v5010_v49 = vld [vmem:[%s7367_s0 + $0x15c] ss:$28 sps:$4 sm:$0xff]  }
  0x34   :  { %946 = vmatmul.mubr.bf16.gmra.mrb[8].mxu1 %v4980_v50  ;;  %856 = vmatprep.mubr.bf16.mxu0 %v4983_v51  ;;  %v5012_v50 = vld [vmem:[%s7367_s0 + $0x150] ss:$28 sps:$4 sm:$0xff]   ;;  %v5013_v51 = vld [vmem:[%s7367_s0 + $0x158] ss:$28 sps:$4 sm:$0xff]  }
  0x35   :  { %953 = vmatprep.mubr.bf16.mxu1 %v4985_v52  ;;  %4175 = vmatpush3.bf16.msra.mxu0 %v5696_v60  ;;  %v5016_v52 = vld [vmem:[%s7367_s0 + $0x18c] ss:$28 sps:$4 sm:$0xff]  }
  0x36   :  { %4176 = vmatprep.subr.bf16.mxu0 %v5708_v62 }
  0x39   :  { %4177 = vmatpush3.bf16.msra.mxu0 %v5713_v63 }
  0x3a   :  { %4178 = vmatprep.subr.bf16.mxu0 %v5732_v35 }
  0x3b   :  { %857 = vmatmul.mubr.bf16.gmra.mrb[12].mxu0 %v4987_v55  ;;  %v5020_v55 = vld [vmem:[%s7367_s0 + $0x188] ss:$28 sps:$4 sm:$0xff]  }
  0x3c   :  { %954 = vmatmul.mubr.bf16.gmra.mrb[12].mxu1 %v4988_v56  ;;  %864 = vmatprep.mubr.bf16.mxu0 %v4991_v57  ;;  %v5021_v56 = vld [vmem:[%s7367_s0 + $0x190] ss:$28 sps:$4 sm:$0xff]  }
  0x3d   :  { %961 = vmatprep.mubr.bf16.mxu1 %v4993_v61  ;;  %4179 = vmatpush3.bf16.msra.mxu0 %v5737_v39  ;;  %v5026_v57 = vld [vmem:[%s7367_s0 + $0x14] ss:$28 sps:$4 sm:$0xff]  }
  0x3e   :  { %4180 = vmatprep.subr.bf16.mxu0 %v5744_v40  ;;  %v5027_v61 = vld [vmem:[%s7367_s0 + $0x18] ss:$28 sps:$4 sm:$0xff]  }
  0x41   :  { %4181 = vmatpush3.bf16.msra.mxu0 %v5749_v41 }
  0x42   :  { %4304 = vmatprep.subr.bf16.mxu0 %v5392_v1  ;;  %v5018_v1 = vld [vmem:[%s7367_s0 + $0x194] ss:$28 sps:$4 sm:$0xff]  }
  0x43   :  { %865 = vmatmul.mubr.bf16.gmra.mrb[16].mxu0 %v4995_v32  ;;  %v5024_v32 = vld [vmem:[%s7367_s0 + $0x10] ss:$28 sps:$4 sm:$0xff]  }
  0x44   :  { %962 = vmatmul.mubr.bf16.gmra.mrb[16].mxu1 %v4996_v0  ;;  %872 = vmatprep.mubr.bf16.mxu0 %v5000_v33  ;;  %v5028_v0 = vld [vmem:[%s7367_s0 + $0x50] ss:$28 sps:$4 sm:$0xff]  }
  0x45   :  { %969 = vmatprep.mubr.bf16.mxu1 %v5002_v34  ;;  %v5029_v33 = vld [vmem:[%s7367_s0 + $0x4c] ss:$28 sps:$4 sm:$0xff]  }
  0x46   :  { %v5031_v34 = vld [vmem:[%s7367_s0 + $0x88] ss:$28 sps:$4 sm:$0xff]  }
  0x4b   :  { %873 = vmatmul.mubr.bf16.gmra.mrb[20].mxu0 %v5004_v42  ;;  %v5032_v42 = vld [vmem:[%s7367_s0 + $0x48] ss:$28 sps:$4 sm:$0xff]  }
  0x4c   :  { %970 = vmatmul.mubr.bf16.gmra.mrb[20].mxu1 %v5005_v45  ;;  %880 = vmatprep.mubr.bf16.mxu0 %v5008_v46  ;;  %v5033_v45 = vld [vmem:[%s7367_s0 + $0xc0] ss:$28 sps:$4 sm:$0xff]  }
  0x4d   :  { %977 = vmatprep.mubr.bf16.mxu1 %v5010_v49  ;;  %v6019_v46 = vld [vmem:[%s7366_s4 + $0x80] sm:$0xff]   ;;  %v6025_v49 = vld [vmem:[%s7366_s4 + $0xc8] sm:$0xff]  }
  0x53   :  { %881 = vmatmul.mubr.bf16.gmra.mrb[24].mxu0 %v5012_v50  ;;  %v5102_v50 = vld [vmem:[%s7368_s1 + $0x120] ss:$28 sps:$4 sm:$0xff]  }
  0x54   :  { %978 = vmatmul.mubr.bf16.gmra.mrb[24].mxu1 %v5013_v51  ;;  %888 = vmatprep.mubr.bf16.mxu0 %v5016_v52  ;;  %v5103_v51 = vld [vmem:[%s7368_s1 + $0x48] ss:$28 sps:$4 sm:$0xff]   ;;  %v5104_v52 = vld [vmem:[%s7368_s1 + $0x15c] ss:$28 sps:$4 sm:$0xff]  }
  0x55   :  { %985 = vmatprep.mubr.bf16.mxu1 %v5018_v1  ;;  %v6040_v1 = vld [vmem:[%s7366_s4 + $0x88] sm:$0xff]  }
  0x5b   :  { %889 = vmatmul.mubr.bf16.gmra.mrb[28].mxu0 %v5020_v55  ;;  %v5106_v55 = vld [vmem:[%s7368_s1 + $0x84] ss:$28 sps:$4 sm:$0xff]  }
  0x5c   :  { %986 = vmatmul.mubr.bf16.gmra.mrb[28].mxu1 %v5021_v56  ;;  %1026 = vmatprep.mubr.bf16.mxu0 %v5026_v57  ;;  %v6049_v56 = vld [vmem:[%s7366_s4 + $0xd0] sm:$0xff]  }
  0x5d   :  { %4850 = vmatprep.mubr.msk.bf16.mxu1 %vm775_vm0, %v5027_v61  ;;  %v6055_v57 = vld [vmem:[%s7366_s4 + $0x90] sm:$0xff]   ;;  %v6061_v61 = vld [vmem:[%s7366_s4 + $0xd8] sm:$0xff]  }
  0x63   :  { %1027 = vmatmul.mubr.bf16.vlgmr.msra.gmra.mrb[32].mxu0 %v5024_v32  ;;  %v5108_v32 = vld [vmem:[%s7368_s1 + $0x158] ss:$28 sps:$4 sm:$0xff]  }
  0x64   :  { %4851 = vmatmul.mubr.msk.bf16.vlgmr.msra.gmra.mrb[32].mxu1 %vm775_vm0, %v5028_v0  ;;  %4305 = vmatpush3.bf16.msra.mxu0 %v5404_v3  ;;  %v5036_v3 = vld [vmem:[%s7367_s0 + $0xf8] ss:$28 sps:$4 sm:$0xff]   ;;  %v5109_v0 = vld [vmem:[%s7368_s1 + $0x80] ss:$28 sps:$4 sm:$0xff]  }
  0x65   :  { %4241 = vmatpush3.bf16.msra.mxu1 %v5398_v2  ;;  %1034 = vmatprep.mubr.bf16.mxu0 %v5029_v33  ;;  %v5034_v2 = vld [vmem:[%s7367_s0 + $0x84] ss:$28 sps:$4 sm:$0xff]   ;;  %v5110_v33 = vld [vmem:[%s7368_s1 + $0x194] ss:$28 sps:$4 sm:$0xff]  }
  0x66   :  { %4242 = vmatprep.subr.bf16.mxu1 %v5410_v4  ;;  %4854 = vmatprep.mubr.msk.bf16.mxu1 %vm775_vm0, %v5031_v34  ;;  %v5037_v4 = vld [vmem:[%s7367_s0 + $0x80] ss:$28 sps:$4 sm:$0xff]  }
  0x67   :  { %4306 = vmatprep.subr.bf16.mxu0 %v5416_v5  ;;  %v5038_v5 = vld [vmem:[%s7367_s0 + $0x130] ss:$28 sps:$4 sm:$0xff]   ;;  %v5112_v34 = vld [vmem:[%s7368_s1 + $0xbc] ss:$28 sps:$4 sm:$0xff]  }
  0x68   :  { %4307 = vmatpush3.bf16.msra.mxu0 %v5428_v7  ;;  %v5041_v7 = vld [vmem:[%s7367_s0 + $0x168] ss:$28 sps:$4 sm:$0xff]  }
  0x69   :  { %4243 = vmatpush3.bf16.msra.mxu1 %v5422_v6  ;;  %4308 = vmatprep.subr.bf16.mxu0 %v5440_v9  ;;  %v5039_v6 = vld [vmem:[%s7367_s0 + $0xbc] ss:$28 sps:$4 sm:$0xff]  }
  0x6a   :  { %4244 = vmatprep.subr.bf16.mxu1 %v5434_v8  ;;  %v5042_v8 = vld [vmem:[%s7367_s0 + $0xb8] ss:$28 sps:$4 sm:$0xff]   ;;  %v5043_v9 = vld [vmem:[%s7367_s0 + $0x1a0] ss:$28 sps:$4 sm:$0xff]  }
  0x6b   :  { %1035 = vmatmul.mubr.bf16.gmra.mrb[36].mxu0 %v5032_v42  ;;  %v6079_v42 = vld [vmem:[%s7366_s4 + $0x98] sm:$0xff]  }
  0x6c   :  { %4855 = vmatmul.mubr.msk.bf16.gmra.mrb[36].mxu1 %vm775_vm0, %v5033_v45  ;;  %1042 = vmatprep.mubr.bf16.mxu0 %v5034_v2  ;;  %v6085_v45 = vld [vmem:[%s7366_s4 + $0xe0] sm:$0xff]  }
  0x6d   :  { %4245 = vmatpush3.bf16.msra.mxu1 %v5446_v10  ;;  %4858 = vmatprep.mubr.msk.bf16.mxu1 %vm775_vm0, %v5036_v3  ;;  %v5044_v10 = vld [vmem:[%s7367_s0 + $0xf4] ss:$28 sps:$4 sm:$0xff]   ;;  %v6091_v2 = vld [vmem:[%s7366_s4 + $0xa0] sm:$0xff]   ;;  %v6097_v3 = vld [vmem:[%s7366_s4 + $0xe8] sm:$0xff]  }
  0x6e   :  { %4246 = vmatprep.subr.bf16.mxu1 %v5458_v12  ;;  %4309 = vmatpush3.bf16.msra.mxu0 %v5452_v11  ;;  %v5048_v11 = vld [vmem:[%s7368_s1 + $0x4] ss:$28 sps:$4 sm:$0xff]  }
  0x6f   :  { %4310 = vmatprep.subr.bf16.mxu0 %v5464_v13  ;;  %v5046_v12 = vld [vmem:[%s7368_s1] ss:$28 sps:$4 sm:$0xff]   ;;  %v5049_v13 = vld [vmem:[%s7367_s0 + $0xf0] ss:$28 sps:$4 sm:$0xff]  }
  0x71   :  { %4247 = vmatpush3.bf16.msra.mxu1 %v5470_v14  ;;  %v5050_v14 = vld [vmem:[%s7367_s0 + $0x12c] ss:$28 sps:$4 sm:$0xff]  }
  0x72   :  { %4248 = vmatprep.subr.bf16.mxu1 %v5482_v16  ;;  %4311 = vmatpush3.bf16.msra.mxu0 %v5476_v15  ;;  %v5052_v15 = vld [vmem:[%s7368_s1 + $0x3c] ss:$28 sps:$4 sm:$0xff]   ;;  %v5054_v16 = vld [vmem:[%s7367_s0 + $0x128] ss:$28 sps:$4 sm:$0xff]  }
  0x73   :  { %1043 = vmatmul.mubr.bf16.gmra.mrb[40].mxu0 %v5037_v4  ;;  %4312 = vmatprep.subr.bf16.mxu0 %v5488_v17  ;;  %v5055_v17 = vld [vmem:[%s7368_s1 + $0x38] ss:$28 sps:$4 sm:$0xff]   ;;  %v5114_v4 = vld [vmem:[%s7368_s1 + $0x190] ss:$28 sps:$4 sm:$0xff]  }
  0x74   :  { %4859 = vmatmul.mubr.msk.bf16.gmra.mrb[40].mxu1 %vm775_vm0, %v5038_v5  ;;  %1050 = vmatprep.mubr.bf16.mxu0 %v5039_v6  ;;  %v5115_v5 = vld [vmem:[%s7368_s1 + $0xb8] ss:$28 sps:$4 sm:$0xff]  }
  0x75   :  { %4249 = vmatpush3.bf16.msra.mxu1 %v5494_v18  ;;  %4862 = vmatprep.mubr.msk.bf16.mxu1 %vm775_vm0, %v5041_v7  ;;  %v5056_v18 = vld [vmem:[%s7367_s0 + $0x164] ss:$28 sps:$4 sm:$0xff]   ;;  %v5118_v6 = vld [vmem:[%s7368_s1 + $0x18] ss:$28 sps:$4 sm:$0xff]  }
  0x76   :  { %4250 = vmatprep.subr.bf16.mxu1 %v5506_v20  ;;  %4313 = vmatpush3.bf16.msra.mxu0 %v5500_v19  ;;  %v5058_v19 = vld [vmem:[%s7368_s1 + $0x74] ss:$28 sps:$4 sm:$0xff]   ;;  %v5060_v20 = vld [vmem:[%s7367_s0 + $0x160] ss:$28 sps:$4 sm:$0xff]  }
  0x77   :  { %4314 = vmatprep.subr.bf16.mxu0 %v5512_v21  ;;  %v5061_v21 = vld [vmem:[%s7368_s1 + $0x70] ss:$28 sps:$4 sm:$0xff]  }
  0x78   :  { %v5116_v7 = vld [vmem:[%s7368_s1 + $0xf4] ss:$28 sps:$4 sm:$0xff]  }
  0x79   :  { %4251 = vmatpush3.bf16.msra.mxu1 %v5518_v22  ;;  %v5062_v22 = vld [vmem:[%s7367_s0 + $0x19c] ss:$28 sps:$4 sm:$0xff]  }
  0x7a   :  { %4252 = vmatprep.subr.bf16.mxu1 %v5530_v24  ;;  %4315 = vmatpush3.bf16.msra.mxu0 %v5524_v23  ;;  %v5064_v23 = vld [vmem:[%s7368_s1 + $0xac] ss:$28 sps:$4 sm:$0xff]   ;;  %v5066_v24 = vld [vmem:[%s7367_s0 + $0x198] ss:$28 sps:$4 sm:$0xff]  }
  0x7b   :  { %1051 = vmatmul.mubr.bf16.gmra.mrb[44].mxu0 %v5042_v8  ;;  %4316 = vmatprep.subr.bf16.mxu0 %v5536_v25  ;;  %v5067_v25 = vld [vmem:[%s7368_s1 + $0xa8] ss:$28 sps:$4 sm:$0xff]  }
  0x7c   :  { %4863 = vmatmul.mubr.msk.bf16.gmra.mrb[44].mxu1 %vm775_vm0, %v5043_v9  ;;  %1058 = vmatprep.mubr.bf16.mxu0 %v5044_v10  ;;  %v6115_v8 = vld [vmem:[%s7366_s4 + $0xa8] sm:$0xff]   ;;  %v6121_v9 = vld [vmem:[%s7366_s4 + $0xf0] sm:$0xff]  }
  0x7d   :  { %4253 = vmatpush3.bf16.msra.mxu1 %v5542_v26  ;;  %1604 = vmatprep.mubr.bf16.mxu1 %v5048_v11  ;;  %v5072_v26 = vld [vmem:[%s7368_s1 + $0xc] ss:$28 sps:$4 sm:$0xff]   ;;  %v6128_v10 = vld [vmem:[%s7366_s4 + $0xb0] sm:$0xff]   ;;  %v6134_v11 = vld [vmem:[%s7366_s4 + $0xf8] sm:$0xff]  }
  0x7e   :  { %4254 = vmatprep.subr.bf16.mxu1 %v5554_v28  ;;  %4317 = vmatpush3.bf16.msra.mxu0 %v5548_v27  ;;  %v5068_v27 = vld [vmem:[%s7368_s1 + $0xe4] ss:$28 sps:$4 sm:$0xff]  }
  0x7f   :  { %4318 = vmatprep.subr.bf16.mxu0 %v5560_v29  ;;  %v5070_v28 = vld [vmem:[%s7368_s1 + $0x8] ss:$28 sps:$4 sm:$0xff]   ;;  %v5073_v29 = vld [vmem:[%s7368_s1 + $0xe0] ss:$28 sps:$4 sm:$0xff]  }
  0x81   :  { %4255 = vmatpush3.bf16.msra.mxu1 %v5566_v30  ;;  %v5074_v30 = vld [vmem:[%s7368_s1 + $0x11c] ss:$28 sps:$4 sm:$0xff]  }
  0x82   :  { %4368 = vmatprep.subr.bf16.mxu1 %v5596_v37  ;;  %4319 = vmatpush3.bf16.msra.mxu0 %v5572_v31  ;;  %v5076_v31 = vld [vmem:[%s7368_s1 + $0x44] ss:$28 sps:$4 sm:$0xff]  }
  0x83   :  { %1059 = vmatmul.mubr.bf16.gmra.mrb[48].mxu0 %v5049_v13  ;;  %4866 = vmatprep.subr.bf16.mxu0 %v5591_v36  ;;  %v5956_v37 = vld [vmem:[%s7366_s4 + $0xc0] sm:$0xff]   ;;  %v5119_v13 = vld [vmem:[%s7368_s1 + $0xf0] ss:$28 sps:$4 sm:$0xff]  }
  0x84   :  { %1605 = vmatmul.mubr.bf16.vlgmr.msra.gmra.mrb[48].mxu1 %v5046_v12  ;;  %1066 = vmatprep.mubr.bf16.mxu0 %v5050_v14  ;;  %v5120_v12 = vld [vmem:[%s7368_s1 + $0x50] ss:$28 sps:$4 sm:$0xff]  }
  0x85   :  { %4369 = vmatpush3.bf16.msra.mxu1 %v5602_v38  ;;  %1612 = vmatprep.mubr.bf16.mxu1 %v5052_v15  ;;  %v5079_v38 = vld [vmem:[%s7368_s1 + $0x40] ss:$28 sps:$4 sm:$0xff]   ;;  %v5121_v14 = vld [vmem:[%s7368_s1 + $0x12c] ss:$28 sps:$4 sm:$0xff]  }
  0x86   :  { %4370 = vmatprep.subr.bf16.mxu1 %v5622_v43  ;;  %v5078_v43 = vld [vmem:[%s7368_s1 + $0x118] ss:$28 sps:$4 sm:$0xff]  }
  0x87   :  { %v6149_v15 = vld [vmem:[%s7366_s4 + $0xb8] sm:$0xff]  }
  0x89   :  { %4371 = vmatpush3.bf16.msra.mxu1 %v5627_v44  ;;  %v5082_v44 = vld [vmem:[%s7368_s1 + $0x7c] ss:$28 sps:$4 sm:$0xff]  }
  0x8a   :  { %4372 = vmatprep.subr.bf16.mxu1 %v5640_v47  ;;  %v5977_v47 = vld [vmem:[%s7366_s4 + $0x40] sm:$0xff]  }
  0x8b   :  { %1067 = vmatmul.mubr.bf16.gmra.mrb[52].mxu0 %v5054_v16  ;;  %v5123_v16 = vld [vmem:[%s7368_s1 + $0x88] ss:$28 sps:$4 sm:$0xff]  }
  0x8c   :  { %1613 = vmatmul.mubr.bf16.gmra.mrb[52].mxu1 %v5055_v17  ;;  %1074 = vmatprep.mubr.bf16.mxu0 %v5056_v18  ;;  %v6158_v17 = vld [vmem:[%s7366_s4 + $0x180] sm:$0xff]  }
  0x8d   :  { %1620 = vmatprep.mubr.bf16.mxu1 %v5058_v19  ;;  %4373 = vmatpush3.bf16.msra.mxu1 %v5645_v48  ;;  %v5085_v48 = vld [vmem:[%s7368_s1 + $0x78] ss:$28 sps:$4 sm:$0xff]   ;;  %v6165_v18 = vld [vmem:[%s7366_s4] sm:$0xff]   ;;  %v6171_v19 = vld [vmem:[%s7366_s4 + $0x48] sm:$0xff]  }
  0x8e   :  { %4374 = vmatprep.subr.bf16.mxu1 %v5664_v53  ;;  %v5084_v53 = vld [vmem:[%s7368_s1 + $0x150] ss:$28 sps:$4 sm:$0xff]  }
  0x91   :  { %4375 = vmatpush3.bf16.msra.mxu1 %v5669_v54  ;;  %v5088_v54 = vld [vmem:[%s7368_s1 + $0xb4] ss:$28 sps:$4 sm:$0xff]  }
  0x92   :  { %4376 = vmatprep.subr.bf16.mxu1 %v5690_v59  ;;  %v5091_v59 = vld [vmem:[%s7368_s1 + $0xb0] ss:$28 sps:$4 sm:$0xff]  }
  0x93   :  { %1075 = vmatmul.mubr.bf16.gmra.mrb[56].mxu0 %v5060_v20  ;;  %v5125_v20 = vld [vmem:[%s7368_s1 + $0xc0] ss:$28 sps:$4 sm:$0xff]  }
  0x94   :  { %1621 = vmatmul.mubr.bf16.gmra.mrb[56].mxu1 %v5061_v21  ;;  %1082 = vmatprep.mubr.bf16.mxu0 %v5062_v22  ;;  %v5124_v21 = vld [vmem:[%s7368_s1 + $0x128] ss:$28 sps:$4 sm:$0xff]  }
  0x95   :  { %1628 = vmatprep.mubr.bf16.mxu1 %v5064_v23  ;;  %4377 = vmatpush3.bf16.msra.mxu1 %v5696_v60  ;;  %v5090_v60 = vld [vmem:[%s7368_s1 + $0x188] ss:$28 sps:$4 sm:$0xff]   ;;  %v6190_v23 = vld [vmem:[%s7366_s4 + $0x50] sm:$0xff]  }
  0x96   :  { %4378 = vmatprep.subr.bf16.mxu1 %v5708_v62  ;;  %v5092_v62 = vld [vmem:[%s7368_s1 + $0xec] ss:$28 sps:$4 sm:$0xff]  }
  0x97   :  { %v6184_v22 = vld [vmem:[%s7366_s4 + $0x8] sm:$0xff]  }
  0x99   :  { %4379 = vmatpush3.bf16.msra.mxu1 %v5713_v63  ;;  %v5096_v63 = vld [vmem:[%s7368_s1 + $0x14] ss:$28 sps:$4 sm:$0xff]  }
  0x9a   :  { %4380 = vmatprep.subr.bf16.mxu1 %v5732_v35  ;;  %v5097_v35 = vld [vmem:[%s7368_s1 + $0xe8] ss:$28 sps:$4 sm:$0xff]  }
  0x9b   :  { %1083 = vmatmul.mubr.bf16.gmra.mrb[60].mxu0 %v5066_v24  ;;  %v5126_v24 = vld [vmem:[%s7368_s1 + $0x164] ss:$28 sps:$4 sm:$0xff]  }
  0x9c   :  { %1629 = vmatmul.mubr.bf16.gmra.mrb[60].mxu1 %v5067_v25  ;;  %1701 = vmatprep.mubr.bf16.mxu0 %v5072_v26  ;;  %v5128_v25 = vld [vmem:[%s7368_s1 + $0xf8] ss:$28 sps:$4 sm:$0xff]  }
  0x9d   :  { %1636 = vmatprep.mubr.bf16.mxu1 %v5068_v27  ;;  %4381 = vmatpush3.bf16.msra.mxu1 %v5737_v39  ;;  %v5094_v39 = vld [vmem:[%s7368_s1 + $0x10] ss:$28 sps:$4 sm:$0xff]   ;;  %v6209_v27 = vld [vmem:[%s7366_s4 + $0x58] sm:$0xff]  }
  0x9e   :  { %4382 = vmatprep.subr.bf16.mxu1 %v5744_v40  ;;  %v5098_v40 = vld [vmem:[%s7368_s1 + $0x124] ss:$28 sps:$4 sm:$0xff]   ;;  %v6203_v26 = vld [vmem:[%s7366_s4 + $0x10] sm:$0xff]  }
  0xa1   :  { %4383 = vmatpush3.bf16.msra.mxu1 %v5749_v41  ;;  %v5100_v41 = vld [vmem:[%s7368_s1 + $0x4c] ss:$28 sps:$4 sm:$0xff]  }
  0xa2   :  { %4506 = vmatprep.subr.bf16.mxu1 %v5956_v37 }
  0xa3   :  { %1702 = vmatmul.mubr.bf16.vlgmr.msra.gmra.mrb[64].mxu0 %v5070_v28  ;;  %v5130_v28 = vld [vmem:[%s7368_s1 + $0x130] ss:$28 sps:$4 sm:$0xff]  }
  0xa4   :  { %1637 = vmatmul.mubr.bf16.gmra.mrb[64].mxu1 %v5073_v29  ;;  %4867 = vmatpush3.bf16.msra.mxu0 %v5591_v36  ;;  %v5080_v36 = vld [vmem:[%s7368_s1 + $0x154] ss:$28 sps:$4 sm:$0xff]   ;;  %v5129_v29 = vld [vmem:[%s7368_s1 + $0x160] ss:$28 sps:$4 sm:$0xff]  }
  0xa5   :  { %1644 = vmatprep.mubr.bf16.mxu1 %v5074_v30  ;;  %1709 = vmatprep.mubr.bf16.mxu0 %v5076_v31  ;;  %v6222_v30 = vld [vmem:[%s7366_s4 + $0x18] sm:$0xff]   ;;  %v6228_v31 = vld [vmem:[%s7366_s4 + $0x60] sm:$0xff]  }
  0xa6   :  { %4868 = vmatprep.subr.bf16.mxu0 %v5685_v58 }
  0xa8   :  { %4869 = vmatpush3.bf16.msra.mxu0 %v5685_v58  ;;  %v5086_v58 = vld [vmem:[%s7368_s1 + $0x18c] ss:$28 sps:$4 sm:$0xff]  }
  0xa9   :  { %4442 = vmatprep.subr.bf16.mxu0 %v5977_v47 }
  0xab   :  { %1710 = vmatmul.mubr.bf16.gmra.mrb[68].mxu0 %v5079_v38  ;;  %v5131_v38 = vld [vmem:[%s7368_s1 + $0x19c] ss:$28 sps:$4 sm:$0xff]  }
  0xac   :  { %1645 = vmatmul.mubr.bf16.gmra.mrb[68].mxu1 %v5078_v43  ;;  %1717 = vmatprep.mubr.bf16.mxu0 %v5082_v44  ;;  %v5133_v43 = vld [vmem:[%s7368_s1 + $0x168] ss:$28 sps:$4 sm:$0xff]  }
  0xad   :  { %1652 = vmatprep.mubr.bf16.mxu1 %v5080_v36  ;;  %v6241_v44 = vld [vmem:[%s7366_s4 + $0x20] sm:$0xff]  }
  0xae   :  { %v6247_v36 = vld [vmem:[%s7371_s5] ss:$0 sm:$0xff] }
  0xaf   :  { %7392 = vst [vmem:[#allocation2_spill] sm:$0xff] %v6247_v36 }
  0xb3   :  { %1718 = vmatmul.mubr.bf16.gmra.mrb[72].mxu0 %v5085_v48  ;;  %v6252_v48 = vld [vmem:[%s7366_s4 + $0x68] sm:$0xff]  }
  0xb4   :  { %1653 = vmatmul.mubr.bf16.gmra.mrb[72].mxu1 %v5084_v53  ;;  %1725 = vmatprep.mubr.bf16.mxu0 %v5088_v54  ;;  %v5135_v53 = vld [vmem:[%s7368_s1 + $0x1a0] ss:$28 sps:$4 sm:$0xff]  }
  0xb5   :  { %1660 = vmatprep.mubr.bf16.mxu1 %v5086_v58  ;;  %v5134_v58 = vld [vmem:[%s7368_s1 + $0x198] ss:$28 sps:$4 sm:$0xff]  }
  0xbb   :  { %1726 = vmatmul.mubr.bf16.gmra.mrb[76].mxu0 %v5091_v59 }
  0xbc   :  { %1661 = vmatmul.mubr.bf16.gmra.mrb[76].mxu1 %v5090_v60  ;;  %1733 = vmatprep.mubr.bf16.mxu0 %v5092_v62 }
  0xbd   :  { %1798 = vmatprep.mubr.bf16.mxu1 %v5096_v63 }
  0xc3   :  { %1734 = vmatmul.mubr.bf16.gmra.mrb[80].mxu0 %v5097_v35 }
  0xc4   :  { %1799 = vmatmul.mubr.bf16.vlgmr.msra.gmra.mrb[80].mxu1 %v5094_v39  ;;  %1741 = vmatprep.mubr.bf16.mxu0 %v5098_v40  ;;  %v6265_v39 = vld [vmem:[%s7366_s4 + $0x28] sm:$0xff]  }
  0xc5   :  { %4507 = vmatpush3.bf16.msra.mxu1 %v6019_v46  ;;  %1806 = vmatprep.mubr.bf16.mxu1 %v5100_v41 }
  0xc6   :  { %4508 = vmatprep.subr.bf16.mxu1 %v6025_v49 }
  0xc9   :  { %4509 = vmatpush3.bf16.msra.mxu1 %v6040_v1 }
  0xca   :  { %4510 = vmatprep.subr.bf16.mxu1 %v6049_v56 }
  0xcb   :  { %1742 = vmatmul.mubr.bf16.gmra.mrb[84].mxu0 %v5102_v50 }
  0xcc   :  { %1807 = vmatmul.mubr.bf16.gmra.mrb[84].mxu1 %v5103_v51  ;;  %1749 = vmatprep.mubr.bf16.mxu0 %v5104_v52  ;;  %v6271_v51 = vld [vmem:[%s7366_s4 + $0x70] sm:$0xff]   ;;  %v5138_v52 = vld [vmem:[%s7369_s2 + $0x4] ss:$28 sps:$4 sm:$0xff]  }
  0xcd   :  { %1814 = vmatprep.mubr.bf16.mxu1 %v5106_v55  ;;  %4511 = vmatpush3.bf16.msra.mxu1 %v6055_v57 }
  0xce   :  { %4512 = vmatprep.subr.bf16.mxu1 %v6061_v61 }
  0xd1   :  { %4513 = vmatpush3.bf16.msra.mxu1 %v6079_v42 }
  0xd2   :  { %4514 = vmatprep.subr.bf16.mxu1 %v6085_v45 }
  0xd3   :  { %1750 = vmatmul.mubr.bf16.gmra.mrb[88].mxu0 %v5108_v32 }
  0xd4   :  { %1815 = vmatmul.mubr.bf16.gmra.mrb[88].mxu1 %v5109_v0  ;;  %1757 = vmatprep.mubr.bf16.mxu0 %v5110_v33  ;;  %v5141_v33 = vld [vmem:[%s7369_s2 + $0xc] ss:$28 sps:$4 sm:$0xff]  }
  0xd5   :  { %1822 = vmatprep.mubr.bf16.mxu1 %v5112_v34  ;;  %4515 = vmatpush3.bf16.msra.mxu1 %v6091_v2 }
  0xd6   :  { %4516 = vmatprep.subr.bf16.mxu1 %v6097_v3 }
  0xd9   :  { %4517 = vmatpush3.bf16.msra.mxu1 %v6115_v8 }
  0xda   :  { %4518 = vmatprep.subr.bf16.mxu1 %v6121_v9 }
  0xdb   :  { %1758 = vmatmul.mubr.bf16.gmra.mrb[92].mxu0 %v5114_v4 }
  0xdc   :  { %1823 = vmatmul.mubr.bf16.gmra.mrb[92].mxu1 %v5115_v5  ;;  %4870 = vmatprep.mubr.msk.bf16.mxu0 %vm775_vm0, %v5118_v6  ;;  %v6288_v6 = vld [vmem:[%s7366_s4 + $0x30] sm:$0xff]  }
  0xdd   :  { %1830 = vmatprep.mubr.bf16.mxu1 %v5116_v7  ;;  %4519 = vmatpush3.bf16.msra.mxu1 %v6128_v10  ;;  %v6294_v7 = vld [vmem:[%s7366_s4 + $0x78] sm:$0xff]  }
  0xde   :  { %4520 = vmatprep.subr.bf16.mxu1 %v6134_v11 }
  0xe1   :  { %4521 = vmatpush3.bf16.msra.mxu1 %v6149_v15 }
  0xe2   :  { %4886 = vmatprep.subr.bf16.mxu1 %v6158_v17 }
  0xe3   :  { %4871 = vmatmul.mubr.msk.bf16.vlgmr.msra.gmra.mrb[96].mxu0 %vm775_vm0, %v5120_v12 }
  0xe4   :  { %1831 = vmatmul.mubr.bf16.gmra.mrb[96].mxu1 %v5119_v13  ;;  %4443 = vmatpush3.bf16.msra.mxu0 %v6165_v18 }
  0xe5   :  { %4444 = vmatprep.subr.bf16.mxu0 %v6171_v19  ;;  %1838 = vmatprep.mubr.bf16.mxu1 %v5121_v14 }
  0xe6   :  { %4874 = vmatprep.mubr.msk.bf16.mxu0 %vm775_vm0, %v5123_v16 }
  0xe8   :  { %4445 = vmatpush3.bf16.msra.mxu0 %v6184_v22 }
  0xe9   :  { %4446 = vmatprep.subr.bf16.mxu0 %v6190_v23 }
  0xeb   :  { %4875 = vmatmul.mubr.msk.bf16.gmra.mrb[100].mxu0 %vm775_vm0, %v5125_v20  ;;  %v5136_v20 = vld [vmem:[%s7369_s2] ss:$28 sps:$4 sm:$0xff]  }
  0xec   :  { %1839 = vmatmul.mubr.bf16.gmra.mrb[100].mxu1 %v5124_v21  ;;  %4447 = vmatpush3.bf16.msra.mxu0 %v6203_v26 }
  0xed   :  { %4448 = vmatprep.subr.bf16.mxu0 %v6209_v27  ;;  %1846 = vmatprep.mubr.bf16.mxu1 %v5126_v24 }
  0xee   :  { %4878 = vmatprep.mubr.msk.bf16.mxu0 %vm775_vm0, %v5128_v25 }
  0xf0   :  { %4449 = vmatpush3.bf16.msra.mxu0 %v6222_v30 }
  0xf1   :  { %4450 = vmatprep.subr.bf16.mxu0 %v6228_v31 }
  0xf3   :  { %4879 = vmatmul.mubr.msk.bf16.gmra.mrb[104].mxu0 %vm775_vm0, %v5130_v28  ;;  %v6305_v28 = vld [vmem:[%s7366_s4 + $0x38] sm:$0xff]  }
  0xf4   :  { %1847 = vmatmul.mubr.bf16.gmra.mrb[104].mxu1 %v5129_v29  ;;  %4451 = vmatpush3.bf16.msra.mxu0 %v6241_v44  ;;  %v5139_v29 = vld [vmem:[%s7369_s2 + $0x8] ss:$28 sps:$4 sm:$0xff]  }
  0xf5   :  { %4452 = vmatprep.subr.bf16.mxu0 %v6252_v48  ;;  %1854 = vmatprep.mubr.bf16.mxu1 %v5131_v38 }
  0xf6   :  { %v4054_v54 = vpop.f32.mrb[0].mxu0  ;;  %4882 = vmatprep.mubr.msk.bf16.mxu0 %vm775_vm0, %v5133_v43 }
  0xf7   :  { %v4118_v59 = vpop.f32.mrb[0].mxu1  ;;  %v4055_v60 = vpop.f32.mrb[1].mxu0 }
  0xf8   :  { %v4056_v62 = vadd.f32 %v4055_v60, %v4054_v54  ;;  %v4119_v63 = vpop.f32.mrb[1].mxu1  ;;  %v4057_v35 = vpop.f32.mrb[2].mxu0  ;;  %4453 = vmatpush3.bf16.msra.mxu0 %v6265_v39  ;;  %v6314_v54 = vld [vmem:[%s7366_s4 + $0x140] sm:$0xff]  }
  0xf9   :  { %v4120_v40 = vadd.f32 %v4119_v63, %v4118_v59  ;;  %v4121_v41 = vpop.f32.mrb[2].mxu1  ;;  %v4058_v50 = vpop.f32.mrb[3].mxu0  ;;  %4454 = vmatprep.subr.bf16.mxu0 %v6271_v51  ;;  %v5144_v63 = vld [vmem:[%s7369_s2 + $0x44] ss:$28 sps:$4 sm:$0xff]  }
  0xfa   :  { %v835_v55 = vadd.f32 %v4056_v62, %v6247_v36  ;;  %v4059_v32 = vadd.f32 %v4058_v50, %v4057_v35  ;;  %v4122_v0 = vpop.f32.mrb[3].mxu1  ;;  %v6330_v50 = vld [vmem:[%s7366_s4 + $0x100] sm:$0xff]  }
  0xfb   :  { %v4123_v34 = vadd.f32 %v4122_v0, %v4121_v41  ;;  %4883 = vmatmul.mubr.msk.bf16.gmra.mrb[108].mxu0 %vm775_vm0, %v5135_v53  ;;  %7393 = vst [vmem:[#allocation3_spill] sm:$0xff] %v6330_v50 }
  0xfc   :  { %v6282_v4 = vadd.f32 %v4120_v40, %v835_v55  ;;  %v838_v5 = vadd.f32 %v4059_v32, %v6247_v36  ;;  %1855 = vmatmul.mubr.bf16.gmra.mrb[108].mxu1 %v5134_v58  ;;  %4455 = vmatpush3.bf16.msra.mxu0 %v6288_v6  ;;  %v5142_v58 = vld [vmem:[%s7369_s2 + $0x3c] ss:$28 sps:$4 sm:$0xff]   ;;  %v6339_v32 = vld [vmem:[%s7366_s4 + $0x148] sm:$0xff]  }
  0xfd   :  { %4456 = vmatprep.subr.bf16.mxu0 %v6294_v7  ;;  %2392 = vmatprep.mubr.bf16.mxu0 %v5138_v52  ;;  %7394 = vst [vmem:[#allocation4_spill] sm:$0xff] %v6339_v32 }
  0xfe   :  { %v6297_v12 = vadd.f32 %v4123_v34, %v838_v5  ;;  %v4060_v13 = vpop.f32.mrb[4].mxu0  ;;  %2489 = vmatprep.mubr.bf16.mxu1 %v5141_v33  ;;  %v5146_v34 = vld [vmem:[%s7369_s2 + $0x38] ss:$28 sps:$4 sm:$0xff]   ;;  %v6348_v5 = vld [vmem:[%s7366_s4 + $0x188] sm:$0xff]  }
  0xff   :  { %v4124_v14 = vpop.f32.mrb[4].mxu1  ;;  %v4061_v16 = vpop.f32.mrb[5].mxu0  ;;  %7395 = vst [vmem:[#allocation5_spill] sm:$0xff] %v6348_v5 }
 0x100   :  { %v4062_v21 = vadd.f32 %v4061_v16, %v4060_v13  ;;  %v4125_v24 = vpop.f32.mrb[5].mxu1  ;;  %v4063_v25 = vpop.f32.mrb[6].mxu0  ;;  %4457 = vmatpush3.bf16.msra.mxu0 %v6305_v28 }
 0x101   :  { %v4126_v38 = vadd.f32 %v4125_v24, %v4124_v14  ;;  %v4127_v43 = vpop.f32.mrb[6].mxu1  ;;  %v4064_v53 = vpop.f32.mrb[7].mxu0  ;;  %4570 = vmatprep.subr.bf16.mxu0 %v6314_v54  ;;  %v5148_v24 = vld [vmem:[%s7369_s2 + $0x74] ss:$28 sps:$4 sm:$0xff]  }
 0x102   :  { %v843_v59 = vadd.f32 %v4062_v21, %v6247_v36  ;;  %v4065_v60 = vadd.f32 %v4064_v53, %v4063_v25  ;;  %v4128_v62 = vpop.f32.mrb[7].mxu1  ;;  %v6357_v21 = vld [vmem:[%s7366_s4 + $0x108] sm:$0xff]   ;;  %v6369_v53 = vld [vmem:[%s7366_s4 + $0x150] sm:$0xff]  }
 0x103   :  { %v4129_v35 = vadd.f32 %v4128_v62, %v4127_v43  ;;  %2393 = vmatmul.mubr.bf16.vlgmr.msra.gmra.mrb[112].mxu0 %v5136_v20  ;;  %v5147_v20 = vld [vmem:[%s7369_s2 + $0x40] ss:$28 sps:$4 sm:$0xff]   ;;  %7396 = vst [vmem:[#allocation6_spill] sm:$0xff] %v6357_v21  ;;  %7397 = vst [vmem:[#allocation7_spill] sm:$0xff] %v6369_v53 }
 0x104   :  { %v6324_v40 = vadd.f32 %v4126_v38, %v843_v59  ;;  %v846_v41 = vadd.f32 %v4065_v60, %v6247_v36  ;;  %2490 = vmatmul.mubr.bf16.vlgmr.msra.gmra.mrb[112].mxu1 %v5139_v29  ;;  %4571 = vmatpush3.bf16.msra.mxu0 %v6330_v50  ;;  %v5150_v43 = vld [vmem:[%s7369_s2 + $0x7c] ss:$28 sps:$4 sm:$0xff]  }
 0x105   :  { %4887 = vmatpush3.bf16.msra.mxu1 %v6158_v17  ;;  %2400 = vmatprep.mubr.bf16.mxu0 %v5142_v58 }
 0x106   :  { %v6334_v52 = vadd.f32 %v4129_v35, %v846_v41  ;;  %v4066_v55 = vpop.f32.mrb[8].mxu0  ;;  %2497 = vmatprep.mubr.bf16.mxu1 %v5144_v63  ;;  %4572 = vmatprep.subr.bf16.mxu0 %v6339_v32  ;;  %v6381_v41 = vld [vmem:[%s7366_s4 + $0x110] sm:$0xff]  }
 0x107   :  { %v4130_v0 = vpop.f32.mrb[8].mxu1  ;;  %v4067_v33 = vpop.f32.mrb[9].mxu0  ;;  %4888 = vmatprep.subr.bf16.mxu1 %v6348_v5  ;;  %7398 = vst [vmem:[#allocation8_spill] sm:$0xff] %v6381_v41 }
 0x108   :  { %v4068_v13 = vadd.f32 %v4067_v33, %v4066_v55  ;;  %v4131_v14 = vpop.f32.mrb[9].mxu1  ;;  %v4069_v16 = vpop.f32.mrb[10].mxu0  ;;  %4573 = vmatpush3.bf16.msra.mxu0 %v6357_v21 }
 0x109   :  { %v4132_v25 = vadd.f32 %v4131_v14, %v4130_v0  ;;  %v4133_v29 = vpop.f32.mrb[10].mxu1  ;;  %v4070_v38 = vpop.f32.mrb[11].mxu0  ;;  %4574 = vmatprep.subr.bf16.mxu0 %v6369_v53  ;;  %4889 = vmatpush3.bf16.msra.mxu1 %v6348_v5 }
 0x10a   :  { %v851_v58 = vadd.f32 %v4068_v13, %v6247_v36  ;;  %v4071_v59 = vadd.f32 %v4070_v38, %v4069_v16  ;;  %v4134_v60 = vpop.f32.mrb[11].mxu1  ;;  %4644 = vmatprep.subr.bf16.mxu1 %v5977_v47  ;;  %v6389_v47 = vld [vmem:[%s7366_s4 + $0x158] sm:$0xff]   ;;  %v5152_v13 = vld [vmem:[%s7369_s2 + $0x70] ss:$28 sps:$4 sm:$0xff]  }
 0x10b   :  { %v4135_v62 = vadd.f32 %v4134_v60, %v4133_v29  ;;  %2401 = vmatmul.mubr.bf16.gmra.mrb[116].mxu0 %v5146_v34  ;;  %7399 = vst [vmem:[#allocation9_spill] sm:$0xff] %v6389_v47 }
 0x10c   :  { %v6375_v63 = vadd.f32 %v4132_v25, %v851_v58  ;;  %v854_v35 = vadd.f32 %v4071_v59, %v6247_v36  ;;  %2498 = vmatmul.mubr.bf16.gmra.mrb[116].mxu1 %v5147_v20  ;;  %2408 = vmatprep.mubr.bf16.mxu0 %v5148_v24  ;;  %v5153_v24 = vld [vmem:[%s7369_s2 + $0x78] ss:$28 sps:$4 sm:$0xff]   ;;  %v5154_v25 = vld [vmem:[%s7369_s2 + $0xac] ss:$28 sps:$4 sm:$0xff]  }
 0x10d   :  { %2505 = vmatprep.mubr.bf16.mxu1 %v5150_v43  ;;  %4575 = vmatpush3.bf16.msra.mxu0 %v6381_v41  ;;  %v5156_v58 = vld [vmem:[%s7369_s2 + $0xb4] ss:$28 sps:$4 sm:$0xff]   ;;  %v6407_v59 = vld [vmem:[%s7366_s4 + $0x118] sm:$0xff]  }
 0x10e   :  { %v6384_v55 = vadd.f32 %v4135_v62, %v854_v35  ;;  %v4072_v0 = vpop.f32.mrb[12].mxu0  ;;  %4576 = vmatprep.subr.bf16.mxu0 %v6389_v47  ;;  %7400 = vst [vmem:[#allocation10_spill] sm:$0xff] %v6407_v59 }
 0x10f   :  { %v4136_v33 = vpop.f32.mrb[12].mxu1  ;;  %v4073_v34 = vpop.f32.mrb[13].mxu0 }
 0x110   :  { %v4074_v14 = vadd.f32 %v4073_v34, %v4072_v0  ;;  %v4137_v16 = vpop.f32.mrb[13].mxu1  ;;  %v4075_v20 = vpop.f32.mrb[14].mxu0  ;;  %v6414_v0 = vld [vmem:[%s7366_s4 + $0x160] sm:$0xff]  }
 0x111   :  { %v4138_v29 = vadd.f32 %v4137_v16, %v4136_v33  ;;  %v4139_v38 = vpop.f32.mrb[14].mxu1  ;;  %v4076_v43 = vpop.f32.mrb[15].mxu0  ;;  %4577 = vmatpush3.bf16.msra.mxu0 %v6407_v59  ;;  %7401 = vst [vmem:[#allocation11_spill] sm:$0xff] %v6414_v0 }
 0x112   :  { %v859_v60 = vadd.f32 %v4074_v14, %v6247_v36  ;;  %v4077_v62 = vadd.f32 %v4076_v43, %v4075_v20  ;;  %v4140_v35 = vpop.f32.mrb[15].mxu1  ;;  %4578 = vmatprep.subr.bf16.mxu0 %v6414_v0  ;;  %v6423_v14 = vld [vmem:[%s7366_s4 + $0x120] sm:$0xff]  }
 0x113   :  { %v4141_v33 = vadd.f32 %v4140_v35, %v4139_v38  ;;  %2409 = vmatmul.mubr.bf16.gmra.mrb[120].mxu0 %v5152_v13  ;;  %7402 = vst [vmem:[#allocation12_spill] sm:$0xff] %v6423_v14  ;;  %v6431_v13 = vld [vmem:[%s7366_s4 + $0x168] sm:$0xff]   ;;  %v5160_v35 = vld [vmem:[%s7369_s2 + $0xe4] ss:$28 sps:$4 sm:$0xff]  }
 0x114   :  { %v6417_v34 = vadd.f32 %v4138_v29, %v859_v60  ;;  %v862_v16 = vadd.f32 %v4077_v62, %v6247_v36  ;;  %2506 = vmatmul.mubr.bf16.gmra.mrb[120].mxu1 %v5153_v24  ;;  %2416 = vmatprep.mubr.bf16.mxu0 %v5154_v25  ;;  %7403 = vst [vmem:[#allocation13_spill] sm:$0xff] %v6431_v13  ;;  %v5158_v29 = vld [vmem:[%s7369_s2 + $0xa8] ss:$28 sps:$4 sm:$0xff]   ;;  %v5159_v62 = vld [vmem:[%s7369_s2 + $0xb0] ss:$28 sps:$4 sm:$0xff]  }
 0x115   :  { %2513 = vmatprep.mubr.bf16.mxu1 %v5156_v58  ;;  %4579 = vmatpush3.bf16.msra.mxu0 %v6423_v14 }
 0x116   :  { %v6426_v20 = vadd.f32 %v4141_v33, %v862_v16  ;;  %v4078_v43 = vpop.f32.mrb[16].mxu0  ;;  %4580 = vmatprep.subr.bf16.mxu0 %v6431_v13  ;;  %v5162_v13 = vld [vmem:[%s7369_s2 + $0xec] ss:$28 sps:$4 sm:$0xff]  }
 0x117   :  { %v4142_v24 = vpop.f32.mrb[16].mxu1  ;;  %v4079_v25 = vpop.f32.mrb[17].mxu0 }
 0x118   :  { %v4080_v38 = vadd.f32 %v4079_v25, %v4078_v43  ;;  %v4143_v58 = vpop.f32.mrb[17].mxu1  ;;  %v4081_v60 = vpop.f32.mrb[18].mxu0  ;;  %v6449_v43 = vld [vmem:[%s7366_s4 + $0x128] sm:$0xff]  }
 0x119   :  { %v4144_v33 = vadd.f32 %v4143_v58, %v4142_v24  ;;  %v4145_v16 = vpop.f32.mrb[18].mxu1  ;;  %v4082_v5 = vpop.f32.mrb[19].mxu0  ;;  %7404 = vst [vmem:[#allocation14_spill] sm:$0xff] %v6449_v43  ;;  %4581 = vmatpush3.bf16.msra.mxu0 %v6449_v43  ;;  %v6456_v24 = vld [vmem:[%s7366_s4 + $0x170] sm:$0xff]  }
 0x11a   :  { %v867_v25 = vadd.f32 %v4080_v38, %v6247_v36  ;;  %v4083_v14 = vadd.f32 %v4082_v5, %v4081_v60  ;;  %v4146_v0 = vpop.f32.mrb[19].mxu1  ;;  %7405 = vst [vmem:[#allocation15_spill] sm:$0xff] %v6456_v24  ;;  %4582 = vmatprep.subr.bf16.mxu0 %v6456_v24  ;;  %v6465_v5 = vld [vmem:[%s7366_s4 + $0x130] sm:$0xff]  }
 0x11b   :  { %v4147_v58 = vadd.f32 %v4146_v0, %v4145_v16  ;;  %2417 = vmatmul.mubr.bf16.gmra.mrb[124].mxu0 %v5158_v29  ;;  %7406 = vst [vmem:[#allocation16_spill] sm:$0xff] %v6465_v5  ;;  %v6473_v0 = vld [vmem:[%s7366_s4 + $0x178] sm:$0xff]  }
 0x11c   :  { %v6459_v59 = vadd.f32 %v4144_v33, %v867_v25  ;;  %v870_v47 = vadd.f32 %v4083_v14, %v6247_v36  ;;  %2514 = vmatmul.mubr.bf16.gmra.mrb[124].mxu1 %v5159_v62  ;;  %2424 = vmatprep.mubr.bf16.mxu0 %v5160_v35  ;;  %7407 = vst [vmem:[#allocation17_spill] sm:$0xff] %v6473_v0  ;;  %v5166_v16 = vld [vmem:[%s7369_s2 + $0x11c] ss:$28 sps:$4 sm:$0xff]  }
 0x11d   :  { %2521 = vmatprep.mubr.bf16.mxu1 %v5162_v13  ;;  %4583 = vmatpush3.bf16.msra.mxu0 %v6465_v5  ;;  %v5164_v13 = vld [vmem:[%s7369_s2 + $0xe0] ss:$28 sps:$4 sm:$0xff]  }
 0x11e   :  { %v6468_v38 = vadd.f32 %v4147_v58, %v870_v47  ;;  %v4084_v60 = vpop.f32.mrb[20].mxu0  ;;  %4584 = vmatprep.subr.bf16.mxu0 %v6473_v0  ;;  %v5165_v47 = vld [vmem:[%s7369_s2 + $0xe8] ss:$28 sps:$4 sm:$0xff]  }
 0x11f   :  { %v4148_v14 = vpop.f32.mrb[20].mxu1  ;;  %v4085_v29 = vpop.f32.mrb[21].mxu0  ;;  %v5168_v5 = vld [vmem:[%s7369_s2 + $0x124] ss:$28 sps:$4 sm:$0xff]  }
 0x120   :  { %v4086_v62 = vadd.f32 %v4085_v29, %v4084_v60  ;;  %v4149_v35 = vpop.f32.mrb[21].mxu1  ;;  %v4087_v33 = vpop.f32.mrb[22].mxu0  ;;  %v6491_v60 = vld [vmem:[%s7366_s4 + $0x138] sm:$0xff]  }
 0x121   :  { %v4150_v25 = vadd.f32 %v4149_v35, %v4148_v14  ;;  %v4151_v58 = vpop.f32.mrb[22].mxu1  ;;  %v4088_v0 = vpop.f32.mrb[23].mxu0  ;;  %7408 = vst [vmem:[#allocation18_spill] sm:$0xff] %v6491_v60  ;;  %4585 = vmatpush3.bf16.msra.mxu0 %v6491_v60 }
 0x122   :  { %v875_v29 = vadd.f32 %v4086_v62, %v6247_v36  ;;  %v4089_v24 = vadd.f32 %v4088_v0, %v4087_v33  ;;  %v4152_v43 = vpop.f32.mrb[23].mxu1  ;;  %4708 = vmatprep.subr.bf16.mxu0 %v5956_v37  ;;  %v5170_v0 = vld [vmem:[%s7369_s2 + $0x118] ss:$28 sps:$4 sm:$0xff]  }
 0x123   :  { %v4153_v14 = vadd.f32 %v4152_v43, %v4151_v58  ;;  %2425 = vmatmul.mubr.bf16.gmra.mrb[128].mxu0 %v5164_v13  ;;  %v5171_v13 = vld [vmem:[%s7369_s2 + $0x120] ss:$28 sps:$4 sm:$0xff]  }
 0x124   :  { %v6496_v35 = vadd.f32 %v4150_v25, %v875_v29  ;;  %v878_v41 = vadd.f32 %v4089_v24, %v6247_v36  ;;  %2522 = vmatmul.mubr.bf16.gmra.mrb[128].mxu1 %v5165_v47  ;;  %2432 = vmatprep.mubr.bf16.mxu0 %v5166_v16  ;;  %v5172_v24 = vld [vmem:[%s7369_s2 + $0x154] ss:$28 sps:$4 sm:$0xff]   ;;  %v5174_v47 = vld [vmem:[%s7369_s2 + $0x15c] ss:$28 sps:$4 sm:$0xff]  }
 0x125   :  { %2529 = vmatprep.mubr.bf16.mxu1 %v5168_v5 }
 0x126   :  { %v6499_v53 = vadd.f32 %v4153_v14, %v878_v41  ;;  %v4090_v21 = vpop.f32.mrb[24].mxu0 }
 0x127   :  { %v4154_v32 = vpop.f32.mrb[24].mxu1  ;;  %v4091_v60 = vpop.f32.mrb[25].mxu0 }
 0x128   :  { %v4092_v62 = vadd.f32 %v4091_v60, %v4090_v21  ;;  %v4155_v37 = vpop.f32.mrb[25].mxu1  ;;  %v4093_v43 = vpop.f32.mrb[26].mxu0 }
 0x129   :  { %v4156_v41 = vadd.f32 %v4155_v37, %v4154_v32  ;;  %v4157_v5 = vpop.f32.mrb[26].mxu1  ;;  %v4094_v33 = vpop.f32.mrb[27].mxu0 }
 0x12a   :  { %v883_v16 = vadd.f32 %v4092_v62, %v6247_v36  ;;  %v4095_v21 = vadd.f32 %v4094_v33, %v4093_v43  ;;  %v4158_v25 = vpop.f32.mrb[27].mxu1  ;;  %v5176_v62 = vld [vmem:[%s7369_s2 + $0x150] ss:$28 sps:$4 sm:$0xff]  }
 0x12b   :  { %v4159_v58 = vadd.f32 %v4158_v25, %v4157_v5  ;;  %2433 = vmatmul.mubr.bf16.gmra.mrb[132].mxu0 %v5170_v0  ;;  %v5177_v0 = vld [vmem:[%s7369_s2 + $0x158] ss:$28 sps:$4 sm:$0xff]  }
 0x12c   :  { %v6514_v60 = vadd.f32 %v4156_v41, %v883_v16  ;;  %v886_v29 = vadd.f32 %v4095_v21, %v6247_v36  ;;  %2530 = vmatmul.mubr.bf16.gmra.mrb[132].mxu1 %v5171_v13  ;;  %2440 = vmatprep.mubr.bf16.mxu0 %v5172_v24  ;;  %v5178_v13 = vld [vmem:[%s7369_s2 + $0x18c] ss:$28 sps:$4 sm:$0xff]   ;;  %v5180_v16 = vld [vmem:[%s7369_s2 + $0x194] ss:$28 sps:$4 sm:$0xff]  }
 0x12d   :  { %2537 = vmatprep.mubr.bf16.mxu1 %v5174_v47 }
 0x12e   :  { %7409 = vst [vmem:[#allocation19_spill] sm:$0xff] %v6514_v60  ;;  %v6517_v32 = vadd.f32 %v4159_v58, %v886_v29  ;;  %v4096_v14 = vpop.f32.mrb[28].mxu0 }
 0x12f   :  { %v4160_v37 = vpop.f32.mrb[28].mxu1  ;;  %v4097_v50 = vpop.f32.mrb[29].mxu0 }
 0x130   :  { %7410 = vst [vmem:[#allocation20_spill] sm:$0xff] %v6517_v32  ;;  %v4098_v43 = vadd.f32 %v4097_v50, %v4096_v14  ;;  %v4161_v33 = vpop.f32.mrb[29].mxu1  ;;  %v4099_v5 = vpop.f32.mrb[30].mxu0 }
 0x131   :  { %v4162_v24 = vadd.f32 %v4161_v33, %v4160_v37  ;;  %v4163_v41 = vpop.f32.mrb[30].mxu1  ;;  %v4100_v47 = vpop.f32.mrb[31].mxu0 }
 0x132   :  { %v891_v21 = vadd.f32 %v4098_v43, %v6247_v36  ;;  %v4101_v50 = vadd.f32 %v4100_v47, %v4099_v5  ;;  %v4164_v25 = vpop.f32.mrb[31].mxu1  ;;  %v5182_v43 = vld [vmem:[%s7369_s2 + $0x188] ss:$28 sps:$4 sm:$0xff]  }
 0x133   :  { %v4165_v58 = vadd.f32 %v4164_v25, %v4163_v41  ;;  %2441 = vmatmul.mubr.bf16.gmra.mrb[136].mxu0 %v5176_v62  ;;  %v5183_v62 = vld [vmem:[%s7369_s2 + $0x190] ss:$28 sps:$4 sm:$0xff]  }
 0x134   :  { %v6532_v29 = vadd.f32 %v4162_v24, %v891_v21  ;;  %v894_v14 = vadd.f32 %v4101_v50, %v6247_v36  ;;  %2538 = vmatmul.mubr.bf16.gmra.mrb[136].mxu1 %v5177_v0  ;;  %2448 = vmatprep.mubr.bf16.mxu0 %v5178_v13  ;;  %v5186_v0 = vld [vmem:[%s7369_s2 + $0x14] ss:$28 sps:$4 sm:$0xff]  }
 0x135   :  { %2545 = vmatprep.mubr.bf16.mxu1 %v5180_v16  ;;  %v5187_v16 = vld [vmem:[%s7369_s2 + $0x18] ss:$28 sps:$4 sm:$0xff]  }
 0x136   :  { %v6535_v37 = vadd.f32 %v4165_v58, %v894_v14  ;;  %v4182_v33 = vpop.f32.mrb[32].mxu0 }
 0x137   :  { %v4852_v32 = vpop.f32.mrb[32].mxu1  ;;  %v4183_v60 = vpop.f32.mrb[33].mxu0 }
 0x138   :  { %7411 = vst [vmem:[#allocation21_spill] sm:$0xff] %v6535_v37  ;;  %v4184_v5 = vadd.f32 %v4183_v60, %v4182_v33  ;;  %v1125_v47 = vpop.f32.mrb[33].mxu1  ;;  %v4185_v41 = vpop.f32.mrb[34].mxu0 }
 0x139   :  { %v4853_v13 = vpop.f32.mrb[34].mxu1  ;;  %v4186_v24 = vpop.f32.mrb[35].mxu0 }
 0x13a   :  { %v1029_v21 = vadd.f32 %v4184_v5, %v6282_v4  ;;  %v4187_v50 = vadd.f32 %v4186_v24, %v4185_v41  ;;  %v1128_v60 = vpop.f32.mrb[35].mxu1  ;;  %v5184_v4 = vld [vmem:[%s7369_s2 + $0x10] ss:$28 sps:$4 sm:$0xff]  }
 0x13b   :  { %2449 = vmatmul.mubr.bf16.gmra.mrb[140].mxu0 %v5182_v43 }
 0x13c   :  { %v6550_v25 = vadd.f32 %v1125_v47, %v1029_v21  ;;  %v1032_v58 = vadd.f32 %v4187_v50, %v6297_v12  ;;  %2546 = vmatmul.mubr.bf16.gmra.mrb[140].mxu1 %v5183_v62  ;;  %2586 = vmatprep.mubr.bf16.mxu0 %v5186_v0  ;;  %v5188_v12 = vld [vmem:[%s7369_s2 + $0x50] ss:$28 sps:$4 sm:$0xff]  }
 0x13d   :  { %4890 = vmatprep.mubr.msk.bf16.mxu1 %vm775_vm0, %v5187_v16  ;;  %v5189_v0 = vld [vmem:[%s7369_s2 + $0x4c] ss:$28 sps:$4 sm:$0xff]  }
 0x13e   :  { %v6554_v14 = vadd.f32 %v1128_v60, %v1032_v58  ;;  %v4188_v33 = vpop.f32.mrb[36].mxu0 }
 0x13f   :  { %v6556_v36 = vpop.f32.mrb[36].mxu1  ;;  %v4189_v37 = vpop.f32.mrb[37].mxu0 }
 0x140   :  { %v4190_v5 = vadd.f32 %v4189_v37, %v4188_v33  ;;  %v1141_v43 = vpop.f32.mrb[37].mxu1  ;;  %v4191_v47 = vpop.f32.mrb[38].mxu0  ;;  %v5191_v37 = vld [vmem:[%s7369_s2 + $0x88] ss:$28 sps:$4 sm:$0xff]  }
 0x141   :  { %v6564_v41 = vpop.f32.mrb[38].mxu1  ;;  %v4192_v62 = vpop.f32.mrb[39].mxu0 }
 0x142   :  { %v1037_v24 = vadd.f32 %v4190_v5, %v6324_v40  ;;  %v4193_v16 = vadd.f32 %v4192_v62, %v4191_v47  ;;  %v1144_v21 = vpop.f32.mrb[39].mxu1 }
 0x143   :  { %2587 = vmatmul.mubr.bf16.vlgmr.msra.gmra.mrb[144].mxu0 %v5184_v4 }
 0x144   :  { %v6573_v50 = vadd.f32 %v4852_v32, %v1037_v24  ;;  %v1040_v60 = vadd.f32 %v4193_v16, %v6334_v52  ;;  %4891 = vmatmul.mubr.msk.bf16.vlgmr.msra.gmra.mrb[144].mxu1 %vm775_vm0, %v5188_v12  ;;  %4709 = vmatpush3.bf16.msra.mxu0 %v6019_v46  ;;  %v5192_v52 = vld [vmem:[%s7369_s2 + $0x48] ss:$28 sps:$4 sm:$0xff]  }
 0x145   :  { %4645 = vmatpush3.bf16.msra.mxu1 %v6165_v18  ;;  %2594 = vmatprep.mubr.bf16.mxu0 %v5189_v0 }
 0x146   :  { %v6579_v58 = vadd.f32 %v4853_v13, %v1040_v60  ;;  %v4194_v40 = vpop.f32.mrb[40].mxu0  ;;  %4646 = vmatprep.subr.bf16.mxu1 %v6171_v19  ;;  %4894 = vmatprep.mubr.msk.bf16.mxu1 %vm775_vm0, %v5191_v37  ;;  %v5193_v13 = vld [vmem:[%s7369_s2 + $0xc0] ss:$28 sps:$4 sm:$0xff]  }
 0x147   :  { %v6583_v33 = vpop.f32.mrb[40].mxu1  ;;  %v4195_v32 = vpop.f32.mrb[41].mxu0  ;;  %4710 = vmatprep.subr.bf16.mxu0 %v6025_v49  ;;  %v5194_v19 = vld [vmem:[%s7369_s2 + $0x84] ss:$28 sps:$4 sm:$0xff]   ;;  %v5196_v49 = vld [vmem:[%s7369_s2 + $0xf8] ss:$28 sps:$4 sm:$0xff]  }
 0x148   :  { %v4196_v46 = vadd.f32 %v4195_v32, %v4194_v40  ;;  %v6589_v4 = vpop.f32.mrb[41].mxu1  ;;  %v4197_v18 = vpop.f32.mrb[42].mxu0  ;;  %4711 = vmatpush3.bf16.msra.mxu0 %v6040_v1 }
 0x149   :  { %v6598_v5 = vpop.f32.mrb[42].mxu1  ;;  %4647 = vmatpush3.bf16.msra.mxu1 %v6184_v22  ;;  %v4198_v47 = vpop.f32.mrb[43].mxu0  ;;  %4712 = vmatprep.subr.bf16.mxu0 %v6049_v56 }
 0x14a   :  { %v1045_v12 = vadd.f32 %v4196_v46, %v6375_v63  ;;  %v4199_v62 = vadd.f32 %v4198_v47, %v4197_v18  ;;  %v6606_v0 = vpop.f32.mrb[43].mxu1  ;;  %4648 = vmatprep.subr.bf16.mxu1 %v6190_v23 }
 0x14b   :  { %2595 = vmatmul.mubr.bf16.gmra.mrb[148].mxu0 %v5192_v52 }
 0x14c   :  { %v6609_v1 = vadd.f32 %v1141_v43, %v1045_v12  ;;  %v1048_v24 = vadd.f32 %v4199_v62, %v6384_v55  ;;  %4895 = vmatmul.mubr.msk.bf16.gmra.mrb[148].mxu1 %vm775_vm0, %v5193_v13  ;;  %2602 = vmatprep.mubr.bf16.mxu0 %v5194_v19  ;;  %v5197_v55 = vld [vmem:[%s7369_s2 + $0x80] ss:$28 sps:$4 sm:$0xff]  }
 0x14d   :  { %4649 = vmatpush3.bf16.msra.mxu1 %v6203_v26  ;;  %4898 = vmatprep.mubr.msk.bf16.mxu1 %vm775_vm0, %v5196_v49 }
 0x14e   :  { %v6615_v56 = vadd.f32 %v1144_v21, %v1048_v24  ;;  %v4200_v22 = vpop.f32.mrb[44].mxu0  ;;  %4650 = vmatprep.subr.bf16.mxu1 %v6209_v27  ;;  %4713 = vmatpush3.bf16.msra.mxu0 %v6055_v57  ;;  %v5198_v21 = vld [vmem:[%s7369_s2 + $0x130] ss:$28 sps:$4 sm:$0xff]   ;;  %v5199_v57 = vld [vmem:[%s7369_s2 + $0xbc] ss:$28 sps:$4 sm:$0xff]  }
 0x14f   :  { %v6619_v23 = vpop.f32.mrb[44].mxu1  ;;  %v4201_v63 = vpop.f32.mrb[45].mxu0  ;;  %4714 = vmatprep.subr.bf16.mxu0 %v6061_v61  ;;  %v5201_v61 = vld [vmem:[%s7369_s2 + $0x168] ss:$28 sps:$4 sm:$0xff]  }
 0x150   :  { %v4202_v43 = vadd.f32 %v4201_v63, %v4200_v22  ;;  %v6625_v26 = vpop.f32.mrb[45].mxu1  ;;  %v4203_v16 = vpop.f32.mrb[46].mxu0 }
 0x151   :  { %v6633_v27 = vpop.f32.mrb[46].mxu1  ;;  %4651 = vmatpush3.bf16.msra.mxu1 %v6222_v30  ;;  %v4204_v37 = vpop.f32.mrb[47].mxu0 }
 0x152   :  { %v1053_v60 = vadd.f32 %v4202_v43, %v6417_v34  ;;  %v4205_v40 = vadd.f32 %v4204_v37, %v4203_v16  ;;  %v6640_v32 = vpop.f32.mrb[47].mxu1  ;;  %4652 = vmatprep.subr.bf16.mxu1 %v6228_v31  ;;  %4715 = vmatpush3.bf16.msra.mxu0 %v6079_v42  ;;  %v7412_v37 = vld [vmem:[#allocation3_spill] sm:$0xff] }
 0x153   :  { %2603 = vmatmul.mubr.bf16.gmra.mrb[152].mxu0 %v5197_v55  ;;  %4716 = vmatprep.subr.bf16.mxu0 %v6085_v45 }
 0x154   :  { %v6646_v52 = vadd.f32 %v6556_v36, %v1053_v60  ;;  %v1056_v30 = vadd.f32 %v4205_v40, %v6426_v20  ;;  %4899 = vmatmul.mubr.msk.bf16.gmra.mrb[152].mxu1 %vm775_vm0, %v5198_v21  ;;  %2610 = vmatprep.mubr.bf16.mxu0 %v5199_v57  ;;  %v5202_v36 = vld [vmem:[%s7369_s2 + $0xb8] ss:$28 sps:$4 sm:$0xff]  }
 0x155   :  { %4653 = vmatpush3.bf16.msra.mxu1 %v6241_v44  ;;  %4902 = vmatprep.mubr.msk.bf16.mxu1 %vm775_vm0, %v5201_v61 }
 0x156   :  { %v6653_v34 = vadd.f32 %v6564_v41, %v1056_v30  ;;  %v4206_v31 = vpop.f32.mrb[48].mxu0  ;;  %4654 = vmatprep.subr.bf16.mxu1 %v6252_v48  ;;  %4717 = vmatpush3.bf16.msra.mxu0 %v6091_v2  ;;  %v5203_v41 = vld [vmem:[%s7369_s2 + $0x1a0] ss:$28 sps:$4 sm:$0xff]   ;;  %v5204_v48 = vld [vmem:[%s7369_s2 + $0xf4] ss:$28 sps:$4 sm:$0xff]  }
 0x157   :  { %v4256_v42 = vpop.f32.mrb[48].mxu1  ;;  %v4207_v45 = vpop.f32.mrb[49].mxu0  ;;  %4718 = vmatprep.subr.bf16.mxu0 %v6097_v3  ;;  %v5208_v3 = vld [vmem:[%s7370_s3 + $0x4] ss:$28 sps:$4 sm:$0xff]   ;;  %v5215_v30 = vld [vmem:[%s7370_s3 + $0x38] ss:$28 sps:$4 sm:$0xff]  }
 0x158   :  { %v4208_v20 = vadd.f32 %v4207_v45, %v4206_v31  ;;  %v4257_v44 = vpop.f32.mrb[49].mxu1  ;;  %v4209_v46 = vpop.f32.mrb[50].mxu0 }
 0x159   :  { %v6667_v2 = vadd.f32 %v4257_v44, %v4256_v42  ;;  %v4259_v18 = vpop.f32.mrb[50].mxu1  ;;  %4655 = vmatpush3.bf16.msra.mxu1 %v6265_v39  ;;  %v4210_v13 = vpop.f32.mrb[51].mxu0  ;;  %v7415_v44 = vld [vmem:[#allocation19_spill] sm:$0xff] }
 0x15a   :  { %v1061_v19 = vadd.f32 %v4208_v20, %v6459_v59  ;;  %v4211_v47 = vadd.f32 %v4210_v13, %v4209_v46  ;;  %v4260_v49 = vpop.f32.mrb[51].mxu1  ;;  %4656 = vmatprep.subr.bf16.mxu1 %v6271_v51  ;;  %4719 = vmatpush3.bf16.msra.mxu0 %v6115_v8  ;;  %v5218_v20 = vld [vmem:[%s7370_s3 + $0x74] ss:$28 sps:$4 sm:$0xff]  }
 0x15b   :  { %v6676_v12 = vadd.f32 %v4260_v49, %v4259_v18  ;;  %2611 = vmatmul.mubr.bf16.gmra.mrb[156].mxu0 %v5202_v36  ;;  %4720 = vmatprep.subr.bf16.mxu0 %v6121_v9  ;;  %v7414_v36 = vld [vmem:[#allocation6_spill] sm:$0xff]  ;;  %v7416_v18 = vld [vmem:[#allocation7_spill] sm:$0xff]  ;;  %v7418_v49 = vld [vmem:[#allocation8_spill] sm:$0xff] }
 0x15c   :  { %v6680_v39 = vadd.f32 %v6589_v4, %v1061_v19  ;;  %v1064_v62 = vadd.f32 %v4211_v47, %v6468_v38  ;;  %4903 = vmatmul.mubr.msk.bf16.gmra.mrb[156].mxu1 %vm775_vm0, %v5203_v41  ;;  %2618 = vmatprep.mubr.bf16.mxu0 %v5204_v48  ;;  %v5209_v38 = vld [vmem:[%s7369_s2 + $0xf0] ss:$28 sps:$4 sm:$0xff]  }
 0x15d   :  { %4657 = vmatpush3.bf16.msra.mxu1 %v6288_v6  ;;  %3164 = vmatprep.mubr.bf16.mxu1 %v5208_v3  ;;  %v7417_v19 = vld [vmem:[#allocation20_spill] sm:$0xff] }
 0x15e   :  { %v6686_v51 = vadd.f32 %v6606_v0, %v1064_v62  ;;  %v4212_v8 = vpop.f32.mrb[52].mxu0  ;;  %4658 = vmatprep.subr.bf16.mxu1 %v6294_v7  ;;  %4721 = vmatpush3.bf16.msra.mxu0 %v6128_v10  ;;  %v5206_v0 = vld [vmem:[%s7370_s3] ss:$28 sps:$4 sm:$0xff]   ;;  %v5210_v7 = vld [vmem:[%s7369_s2 + $0x12c] ss:$28 sps:$4 sm:$0xff]  }
 0x15f   :  { %v4262_v9 = vpop.f32.mrb[52].mxu1  ;;  %v4213_v59 = vpop.f32.mrb[53].mxu0  ;;  %4722 = vmatprep.subr.bf16.mxu0 %v6134_v11  ;;  %v5212_v11 = vld [vmem:[%s7370_s3 + $0x3c] ss:$28 sps:$4 sm:$0xff]  }
 0x160   :  { %v4214_v4 = vadd.f32 %v4213_v59, %v4212_v8  ;;  %v4263_v24 = vpop.f32.mrb[53].mxu1  ;;  %v4215_v6 = vpop.f32.mrb[54].mxu0 }
 0x161   :  { %v6700_v10 = vadd.f32 %v4263_v24, %v4262_v9  ;;  %v4265_v22 = vpop.f32.mrb[54].mxu1  ;;  %4659 = vmatpush3.bf16.msra.mxu1 %v6305_v28  ;;  %v4216_v63 = vpop.f32.mrb[55].mxu0  ;;  %v7419_v9 = vld [vmem:[#allocation9_spill] sm:$0xff] }
 0x162   :  { %v1069_v55 = vadd.f32 %v4214_v4, %v6496_v35  ;;  %v4217_v43 = vadd.f32 %v4216_v63, %v4215_v6  ;;  %v4266_v16 = vpop.f32.mrb[55].mxu1  ;;  %4772 = vmatprep.subr.bf16.mxu1 %v6314_v54  ;;  %4723 = vmatpush3.bf16.msra.mxu0 %v6149_v15  ;;  %v7413_v15 = vld [vmem:[#allocation4_spill] sm:$0xff] }
 0x163   :  { %v6709_v21 = vadd.f32 %v4266_v16, %v4265_v22  ;;  %2619 = vmatmul.mubr.bf16.gmra.mrb[160].mxu0 %v5209_v38  ;;  %4906 = vmatprep.subr.bf16.mxu0 %v6158_v17  ;;  %v5214_v17 = vld [vmem:[%s7369_s2 + $0x128] ss:$28 sps:$4 sm:$0xff]  }
 0x164   :  { %v6713_v28 = vadd.f32 %v6583_v33, %v1069_v55  ;;  %v1072_v57 = vadd.f32 %v4217_v43, %v6499_v53  ;;  %3165 = vmatmul.mubr.bf16.vlgmr.msra.gmra.mrb[160].mxu1 %v5206_v0  ;;  %2626 = vmatprep.mubr.bf16.mxu0 %v5210_v7  ;;  %v5221_v0 = vld [vmem:[%s7370_s3 + $0x70] ss:$28 sps:$4 sm:$0xff]   ;;  %v7420_v55 = vld [vmem:[#allocation10_spill] sm:$0xff] }
 0x165   :  { %4773 = vmatpush3.bf16.msra.mxu1 %v7412_v37  ;;  %3172 = vmatprep.mubr.bf16.mxu1 %v5212_v11  ;;  %v5224_v11 = vld [vmem:[%s7370_s3 + $0xac] ss:$28 sps:$4 sm:$0xff]  }
 0x166   :  { %v6718_v35 = vadd.f32 %v6598_v5, %v1072_v57  ;;  %v4218_v54 = vpop.f32.mrb[56].mxu0  ;;  %4774 = vmatprep.subr.bf16.mxu1 %v7413_v15  ;;  %v5216_v5 = vld [vmem:[%s7369_s2 + $0x164] ss:$28 sps:$4 sm:$0xff]   ;;  %v7421_v37 = vld [vmem:[#allocation11_spill] sm:$0xff] }
 0x167   :  { %v4268_v61 = vpop.f32.mrb[56].mxu1  ;;  %v4219_v60 = vpop.f32.mrb[57].mxu0 }
 0x168   :  { %v4220_v33 = vadd.f32 %v4219_v60, %v4218_v54  ;;  %v4269_v40 = vpop.f32.mrb[57].mxu1  ;;  %v4221_v53 = vpop.f32.mrb[58].mxu0 }
 0x169   :  { %v6730_v31 = vadd.f32 %v4269_v40, %v4268_v61  ;;  %v4271_v42 = vpop.f32.mrb[58].mxu1  ;;  %v4222_v45 = vpop.f32.mrb[59].mxu0  ;;  %4775 = vmatpush3.bf16.msra.mxu1 %v7414_v36  ;;  %v7422_v61 = vld [vmem:[#allocation21_spill] sm:$0xff] }
 0x16a   :  { %v1077_v46 = vadd.f32 %v4220_v33, %v7415_v44  ;;  %v4223_v41 = vadd.f32 %v4222_v45, %v4221_v53  ;;  %v4272_v48 = vpop.f32.mrb[59].mxu1  ;;  %4776 = vmatprep.subr.bf16.mxu1 %v7416_v18  ;;  %v7424_v40 = vld [vmem:[#allocation13_spill] sm:$0xff]  ;;  %v5232_v44 = vld [vmem:[%s7370_s3 + $0xc] ss:$28 sps:$4 sm:$0xff]   ;;  %v5228_v18 = vld [vmem:[%s7370_s3 + $0xe4] ss:$28 sps:$4 sm:$0xff]  }
 0x16b   :  { %v6738_v13 = vadd.f32 %v4272_v48, %v4271_v42  ;;  %2627 = vmatmul.mubr.bf16.gmra.mrb[164].mxu0 %v5214_v17  ;;  %v7423_v17 = vld [vmem:[#allocation12_spill] sm:$0xff] }
 0x16c   :  { %v6741_v3 = vadd.f32 %v6625_v26, %v1077_v46  ;;  %v1080_v47 = vadd.f32 %v4223_v41, %v7417_v19  ;;  %3173 = vmatmul.mubr.bf16.gmra.mrb[164].mxu1 %v5215_v30  ;;  %2634 = vmatprep.mubr.bf16.mxu0 %v5216_v5  ;;  %v5220_v26 = vld [vmem:[%s7369_s2 + $0x160] ss:$28 sps:$4 sm:$0xff]  }
 0x16d   :  { %3180 = vmatprep.mubr.bf16.mxu1 %v5218_v20  ;;  %4777 = vmatpush3.bf16.msra.mxu1 %v7418_v49  ;;  %v7425_v5 = vld [vmem:[#allocation2_spill] sm:$0xff] }
 0x16e   :  { %v6746_v62 = vadd.f32 %v6640_v32, %v1080_v47  ;;  %v4224_v8 = vpop.f32.mrb[60].mxu0  ;;  %4778 = vmatprep.subr.bf16.mxu1 %v7419_v9  ;;  %v5222_v32 = vld [vmem:[%s7369_s2 + $0x19c] ss:$28 sps:$4 sm:$0xff]   ;;  %v1607_v42 = vadd.f32 %v6667_v2, %v7425_v5  ;;  %v7426_v2 = vld [vmem:[#allocation14_spill] sm:$0xff]  ;;  %v1610_v19 = vadd.f32 %v6676_v12, %v7425_v5  ;;  %v7427_v9 = vld [vmem:[#allocation15_spill] sm:$0xff] }
 0x16f   :  { %v4274_v59 = vpop.f32.mrb[60].mxu1  ;;  %v4225_v38 = vpop.f32.mrb[61].mxu0 }
 0x170   :  { %v4226_v4 = vadd.f32 %v4225_v38, %v4224_v8  ;;  %v4275_v24 = vpop.f32.mrb[61].mxu1  ;;  %v4227_v6 = vpop.f32.mrb[62].mxu0 }
 0x171   :  { %v6758_v7 = vadd.f32 %v4275_v24, %v4274_v59  ;;  %v4277_v22 = vpop.f32.mrb[62].mxu1  ;;  %v4228_v63 = vpop.f32.mrb[63].mxu0  ;;  %4779 = vmatpush3.bf16.msra.mxu1 %v7420_v55  ;;  %v7429_v24 = vld [vmem:[#allocation17_spill] sm:$0xff] }
 0x172   :  { %v1085_v43 = vadd.f32 %v4226_v4, %v6532_v29  ;;  %v4229_v16 = vadd.f32 %v4228_v63, %v4227_v6  ;;  %v4278_v57 = vpop.f32.mrb[63].mxu1  ;;  %4780 = vmatprep.subr.bf16.mxu1 %v7421_v37  ;;  %v5233_v55 = vld [vmem:[%s7370_s3 + $0xe0] ss:$28 sps:$4 sm:$0xff]  }
 0x173   :  { %v6766_v54 = vadd.f32 %v4278_v57, %v4277_v22  ;;  %2635 = vmatmul.mubr.bf16.gmra.mrb[168].mxu0 %v5220_v26  ;;  %v7428_v26 = vld [vmem:[#allocation16_spill] sm:$0xff]  ;;  %v5234_v37 = vld [vmem:[%s7370_s3 + $0x11c] ss:$28 sps:$4 sm:$0xff]  }
 0x174   :  { %v6769_v15 = vadd.f32 %v6619_v23, %v1085_v43  ;;  %v1088_v60 = vadd.f32 %v4229_v16, %v7422_v61  ;;  %3181 = vmatmul.mubr.bf16.gmra.mrb[168].mxu1 %v5221_v0  ;;  %2642 = vmatprep.mubr.bf16.mxu0 %v5222_v32  ;;  %v5226_v23 = vld [vmem:[%s7369_s2 + $0x198] ss:$28 sps:$4 sm:$0xff]   ;;  %v5230_v0 = vld [vmem:[%s7370_s3 + $0x8] ss:$28 sps:$4 sm:$0xff]   ;;  %v1615_v32 = vadd.f32 %v6700_v10, %v7425_v5 }
 0x175   :  { %3188 = vmatprep.mubr.bf16.mxu1 %v5224_v11  ;;  %4781 = vmatpush3.bf16.msra.mxu1 %v7423_v17  ;;  %v5236_v61 = vld [vmem:[%s7370_s3 + $0x44] ss:$28 sps:$4 sm:$0xff]  }
 0x176   :  { %v6774_v33 = vadd.f32 %v6633_v27, %v1088_v60  ;;  %v4320_v29 = vpop.f32.mrb[64].mxu0  ;;  %4782 = vmatprep.subr.bf16.mxu1 %v7424_v40  ;;  %v5227_v27 = vld [vmem:[%s7370_s3 + $0xa8] ss:$28 sps:$4 sm:$0xff]   ;;  %v1618_v60 = vadd.f32 %v6709_v21, %v7425_v5 }
 0x177   :  { %v4280_v53 = vpop.f32.mrb[64].mxu1  ;;  %v4321_v30 = vpop.f32.mrb[65].mxu0  ;;  %v7430_v10 = vld [vmem:[#allocation18_spill] sm:$0xff] }
 0x178   :  { %v4281_v45 = vpop.f32.mrb[65].mxu1  ;;  %v4322_v36 = vadd.f32 %v4321_v30, %v4320_v29  ;;  %v4323_v20 = vpop.f32.mrb[66].mxu0 }
 0x179   :  { %v6788_v46 = vadd.f32 %v4281_v45, %v4280_v53  ;;  %v4283_v41 = vpop.f32.mrb[66].mxu1  ;;  %v4324_v48 = vpop.f32.mrb[67].mxu0  ;;  %4783 = vmatpush3.bf16.msra.mxu1 %v7426_v2  ;;  %v7431_v45 = vld [vmem:[#allocation5_spill] sm:$0xff] }
 0x17a   :  { %v6796_v47 = vadd.f32 %v4322_v36, %v1607_v42  ;;  %v4284_v49 = vpop.f32.mrb[67].mxu1  ;;  %v4325_v8 = vadd.f32 %v4324_v48, %v4323_v20  ;;  %4784 = vmatprep.subr.bf16.mxu1 %v7427_v9  ;;  %v5239_v36 = vld [vmem:[%s7370_s3 + $0x40] ss:$28 sps:$4 sm:$0xff]  }
 0x17b   :  { %v6799_v59 = vadd.f32 %v4284_v49, %v4283_v41  ;;  %2643 = vmatmul.mubr.bf16.gmra.mrb[172].mxu0 %v5226_v23  ;;  %v5346_v23 = vld [vmem:[%s7366_s4 + $0x180] sm:$0xff]   ;;  %v5242_v2 = vld [vmem:[%s7370_s3 + $0x7c] ss:$28 sps:$4 sm:$0xff]  }
 0x17c   :  { %v6801_v38 = vadd.f32 %v4325_v8, %v1610_v19  ;;  %3189 = vmatmul.mubr.bf16.gmra.mrb[172].mxu1 %v5227_v27  ;;  %3261 = vmatprep.mubr.bf16.mxu0 %v5232_v44  ;;  %v6840_v20 = vld [vmem:[%s7371_s5] ss:$0 sm:$0xff] }
 0x17d   :  { %3196 = vmatprep.mubr.bf16.mxu1 %v5228_v18  ;;  %4785 = vmatpush3.bf16.msra.mxu1 %v7428_v26  ;;  %v1623_v27 = vadd.f32 %v6840_v20, %v6730_v31  ;;  %v5238_v18 = vld [vmem:[%s7370_s3 + $0x118] ss:$28 sps:$4 sm:$0xff]   ;;  %v1626_v9 = vadd.f32 %v6840_v20, %v6738_v13  ;;  %v1631_v13 = vadd.f32 %v6840_v20, %v6758_v7 }
 0x17e   :  { %v4326_v4 = vpop.f32.mrb[68].mxu0  ;;  %4786 = vmatprep.subr.bf16.mxu1 %v7429_v24  ;;  %v5240_v31 = vld [vmem:[%s7370_s3 + $0x154] ss:$28 sps:$4 sm:$0xff]   ;;  %v1634_v7 = vadd.f32 %v6840_v20, %v6766_v54  ;;  %v1639_v54 = vadd.f32 %v6840_v20, %v6788_v46  ;;  %v1642_v46 = vadd.f32 %v6840_v20, %v6799_v59 }
 0x17f   :  { %v4286_v12 = vpop.f32.mrb[68].mxu1  ;;  %v4327_v6 = vpop.f32.mrb[69].mxu0 }
 0x180   :  { %v4287_v22 = vpop.f32.mrb[69].mxu1  ;;  %v4328_v63 = vadd.f32 %v4327_v6, %v4326_v4  ;;  %v4329_v11 = vpop.f32.mrb[70].mxu0 }
 0x181   :  { %v6813_v43 = vadd.f32 %v4287_v22, %v4286_v12  ;;  %v4289_v16 = vpop.f32.mrb[70].mxu1  ;;  %v4330_v57 = vpop.f32.mrb[71].mxu0  ;;  %4787 = vmatpush3.bf16.msra.mxu1 %v7430_v10 }
 0x182   :  { %v6824_v17 = vadd.f32 %v4328_v63, %v1615_v32  ;;  %v4290_v29 = vpop.f32.mrb[71].mxu1  ;;  %v4331_v40 = vadd.f32 %v4330_v57, %v4329_v11  ;;  %v5245_v63 = vld [vmem:[%s7370_s3 + $0x78] ss:$28 sps:$4 sm:$0xff]   ;;  %v5244_v57 = vld [vmem:[%s7370_s3 + $0x150] ss:$28 sps:$4 sm:$0xff]  }
 0x183   :  { %v6826_v53 = vadd.f32 %v4290_v29, %v4289_v16  ;;  %3262 = vmatmul.mubr.bf16.vlgmr.msra.gmra.mrb[176].mxu0 %v5230_v0  ;;  %v5246_v29 = vld [vmem:[%s7370_s3 + $0x18c] ss:$28 sps:$4 sm:$0xff]  }
 0x184   :  { %v6828_v30 = vadd.f32 %v4331_v40, %v1618_v60  ;;  %3197 = vmatmul.mubr.bf16.gmra.mrb[176].mxu1 %v5233_v55  ;;  %4907 = vmatpush3.bf16.msra.mxu0 %v5346_v23 }
 0x185   :  { %3204 = vmatprep.mubr.bf16.mxu1 %v5234_v37  ;;  %3269 = vmatprep.mubr.bf16.mxu0 %v5236_v61  ;;  %v5248_v37 = vld [vmem:[%s7370_s3 + $0xb4] ss:$28 sps:$4 sm:$0xff]  }
 0x186   :  { %v4332_v42 = vpop.f32.mrb[72].mxu0  ;;  %4908 = vmatprep.subr.bf16.mxu0 %v7431_v45 }
 0x187   :  { %v4292_v21 = vpop.f32.mrb[72].mxu1  ;;  %v4333_v5 = vpop.f32.mrb[73].mxu0 }
 0x188   :  { %v4293_v44 = vpop.f32.mrb[73].mxu1  ;;  %v4334_v41 = vadd.f32 %v4333_v5, %v4332_v42  ;;  %v4335_v48 = vpop.f32.mrb[74].mxu0  ;;  %4909 = vmatpush3.bf16.msra.mxu0 %v7431_v45 }
 0x189   :  { %v6851_v19 = vadd.f32 %v4293_v44, %v4292_v21  ;;  %v4295_v49 = vpop.f32.mrb[74].mxu1  ;;  %v4336_v8 = vpop.f32.mrb[75].mxu0  ;;  %v5251_v44 = vld [vmem:[%s7370_s3 + $0xb0] ss:$28 sps:$4 sm:$0xff]  }
 0x18a   :  { %v6858_v26 = vadd.f32 %v4334_v41, %v1623_v27  ;;  %v4296_v4 = vpop.f32.mrb[75].mxu1  ;;  %v4337_v24 = vadd.f32 %v4336_v8, %v4335_v48 }
 0x18b   :  { %v6860_v12 = vadd.f32 %v4296_v4, %v4295_v49  ;;  %3270 = vmatmul.mubr.bf16.gmra.mrb[180].mxu0 %v5239_v36  ;;  %v5252_v49 = vld [vmem:[%s7370_s3 + $0xec] ss:$28 sps:$4 sm:$0xff]   ;;  %v5256_v4 = vld [vmem:[%s7370_s3 + $0x14] ss:$28 sps:$4 sm:$0xff]  }
 0x18c   :  { %v6862_v6 = vadd.f32 %v4337_v24, %v1626_v9  ;;  %3205 = vmatmul.mubr.bf16.gmra.mrb[180].mxu1 %v5238_v18  ;;  %3277 = vmatprep.mubr.bf16.mxu0 %v5242_v2  ;;  %v5250_v2 = vld [vmem:[%s7370_s3 + $0x188] ss:$28 sps:$4 sm:$0xff]  }
 0x18d   :  { %3212 = vmatprep.mubr.bf16.mxu1 %v5240_v31 }
 0x18e   :  { %v4338_v0 = vpop.f32.mrb[76].mxu0 }
 0x18f   :  { %v4298_v32 = vpop.f32.mrb[76].mxu1  ;;  %v4339_v22 = vpop.f32.mrb[77].mxu0 }
 0x190   :  { %v4299_v11 = vpop.f32.mrb[77].mxu1  ;;  %v4340_v55 = vadd.f32 %v4339_v22, %v4338_v0  ;;  %v4341_v16 = vpop.f32.mrb[78].mxu0 }
 0x191   :  { %v6875_v61 = vadd.f32 %v4299_v11, %v4298_v32  ;;  %v4301_v10 = vpop.f32.mrb[78].mxu1  ;;  %v4342_v60 = vpop.f32.mrb[79].mxu0 }
 0x192   :  { %v6882_v40 = vadd.f32 %v4340_v55, %v1631_v13  ;;  %v4302_v23 = vpop.f32.mrb[79].mxu1  ;;  %v4343_v42 = vadd.f32 %v4342_v60, %v4341_v16 }
 0x193   :  { %v6884_v45 = vadd.f32 %v4302_v23, %v4301_v10  ;;  %3278 = vmatmul.mubr.bf16.gmra.mrb[184].mxu0 %v5245_v63 }
 0x194   :  { %v6886_v21 = vadd.f32 %v4343_v42, %v1634_v7  ;;  %3213 = vmatmul.mubr.bf16.gmra.mrb[184].mxu1 %v5244_v57  ;;  %3285 = vmatprep.mubr.bf16.mxu0 %v5248_v37  ;;  %v5257_v57 = vld [vmem:[%s7370_s3 + $0xe8] ss:$28 sps:$4 sm:$0xff]   ;;  %v1647_v37 = vadd.f32 %v6840_v20, %v6813_v43  ;;  %v1650_v43 = vadd.f32 %v6840_v20, %v6826_v53  ;;  %v5262_v53 = vld [vmem:[%s7370_s3 + $0x120] ss:$28 sps:$4 sm:$0xff]  }
 0x195   :  { %3220 = vmatprep.mubr.bf16.mxu1 %v5246_v29  ;;  %v5254_v29 = vld [vmem:[%s7370_s3 + $0x10] ss:$28 sps:$4 sm:$0xff]  }
 0x196   :  { %v4344_v5 = vpop.f32.mrb[80].mxu0 }
 0x197   :  { %v4384_v36 = vpop.f32.mrb[80].mxu1  ;;  %v4345_v27 = vpop.f32.mrb[81].mxu0 }
 0x198   :  { %v4346_v41 = vadd.f32 %v4345_v27, %v4344_v5  ;;  %v4385_v48 = vpop.f32.mrb[81].mxu1  ;;  %v4347_v18 = vpop.f32.mrb[82].mxu0  ;;  %v5260_v5 = vld [vmem:[%s7370_s3 + $0x4c] ss:$28 sps:$4 sm:$0xff]  }
 0x199   :  { %v4386_v8 = vadd.f32 %v4385_v48, %v4384_v36  ;;  %v4387_v31 = vpop.f32.mrb[82].mxu1  ;;  %v4348_v9 = vpop.f32.mrb[83].mxu0 }
 0x19a   :  { %v6904_v24 = vadd.f32 %v4346_v41, %v1639_v54  ;;  %v4349_v0 = vadd.f32 %v4348_v9, %v4347_v18  ;;  %v4388_v32 = vpop.f32.mrb[83].mxu1 }
 0x19b   :  { %v4389_v22 = vadd.f32 %v4388_v32, %v4387_v31  ;;  %3286 = vmatmul.mubr.bf16.gmra.mrb[188].mxu0 %v5251_v44  ;;  %v6907_v63 = vadd.f32 %v4386_v8, %v6796_v47  ;;  %v1655_v31 = vadd.f32 %v6840_v20, %v6851_v19  ;;  %v1658_v19 = vadd.f32 %v6840_v20, %v6860_v12 }
 0x19c   :  { %v6909_v13 = vadd.f32 %v4349_v0, %v1642_v46  ;;  %3221 = vmatmul.mubr.bf16.gmra.mrb[188].mxu1 %v5250_v2  ;;  %3293 = vmatprep.mubr.bf16.mxu0 %v5252_v49  ;;  %v5263_v46 = vld [vmem:[%s7370_s3 + $0x48] ss:$28 sps:$4 sm:$0xff]  }
 0x19d   :  { %3358 = vmatprep.mubr.bf16.mxu1 %v5256_v4  ;;  %v6912_v11 = vadd.f32 %v4389_v22, %v6801_v38  ;;  %v5258_v38 = vld [vmem:[%s7370_s3 + $0x124] ss:$28 sps:$4 sm:$0xff]  }
 0x19e   :  { %v4350_v55 = vpop.f32.mrb[84].mxu0 }
 0x19f   :  { %v4390_v16 = vpop.f32.mrb[84].mxu1  ;;  %v4351_v59 = vpop.f32.mrb[85].mxu0 }
 0x1a0   :  { %v4352_v47 = vadd.f32 %v4351_v59, %v4350_v55  ;;  %v4391_v10 = vpop.f32.mrb[85].mxu1  ;;  %v4353_v60 = vpop.f32.mrb[86].mxu0  ;;  %v5266_v55 = vld [vmem:[%s7370_s3 + $0x84] ss:$28 sps:$4 sm:$0xff]  }
 0x1a1   :  { %v4392_v7 = vadd.f32 %v4391_v10, %v4390_v16  ;;  %v4393_v23 = vpop.f32.mrb[86].mxu1  ;;  %v4354_v42 = vpop.f32.mrb[87].mxu0 }
 0x1a2   :  { %v6930_v36 = vadd.f32 %v4352_v47, %v1647_v37  ;;  %v4355_v27 = vadd.f32 %v4354_v42, %v4353_v60  ;;  %v4394_v44 = vpop.f32.mrb[87].mxu1 }
 0x1a3   :  { %v4395_v54 = vadd.f32 %v4394_v44, %v4393_v23  ;;  %3294 = vmatmul.mubr.bf16.gmra.mrb[192].mxu0 %v5257_v57  ;;  %v1809_v41 = vadd.f32 %v4392_v7, %v6824_v17  ;;  %v5268_v7 = vld [vmem:[%s7370_s3 + $0x158] ss:$28 sps:$4 sm:$0xff]   ;;  %v1663_v23 = vadd.f32 %v6840_v20, %v6875_v61  ;;  %v1666_v61 = vadd.f32 %v6840_v20, %v6884_v45  ;;  %v5274_v45 = vld [vmem:[%s7370_s3 + $0x190] ss:$28 sps:$4 sm:$0xff]  }
 0x1a4   :  { %v6933_v48 = vadd.f32 %v4355_v27, %v1650_v43  ;;  %3359 = vmatmul.mubr.bf16.vlgmr.msra.gmra.mrb[192].mxu1 %v5254_v29  ;;  %3301 = vmatprep.mubr.bf16.mxu0 %v5258_v38  ;;  %v5269_v43 = vld [vmem:[%s7370_s3 + $0x80] ss:$28 sps:$4 sm:$0xff]  }
 0x1a5   :  { %3366 = vmatprep.mubr.bf16.mxu1 %v5260_v5  ;;  %v6936_v18 = vadd.f32 %v4395_v54, %v6828_v30  ;;  %v5264_v30 = vld [vmem:[%s7370_s3 + $0x15c] ss:$28 sps:$4 sm:$0xff]  }
 0x1a6   :  { %v4356_v2 = vpop.f32.mrb[88].mxu0 }
 0x1a7   :  { %v4396_v49 = vpop.f32.mrb[88].mxu1  ;;  %v4357_v8 = vpop.f32.mrb[89].mxu0 }
 0x1a8   :  { %v4358_v9 = vadd.f32 %v4357_v8, %v4356_v2  ;;  %v4397_v17 = vpop.f32.mrb[89].mxu1  ;;  %v4359_v4 = vpop.f32.mrb[90].mxu0  ;;  %v5272_v2 = vld [vmem:[%s7370_s3 + $0xbc] ss:$28 sps:$4 sm:$0xff]  }
 0x1a9   :  { %v4398_v0 = vadd.f32 %v4397_v17, %v4396_v49  ;;  %v4399_v32 = vpop.f32.mrb[90].mxu1  ;;  %v4360_v22 = vpop.f32.mrb[91].mxu0 }
 0x1aa   :  { %v6954_v16 = vadd.f32 %v4358_v9, %v1655_v31  ;;  %v4361_v59 = vadd.f32 %v4360_v22, %v4359_v4  ;;  %v4400_v57 = vpop.f32.mrb[91].mxu1 }
 0x1ab   :  { %v4401_v37 = vadd.f32 %v4400_v57, %v4399_v32  ;;  %3302 = vmatmul.mubr.bf16.gmra.mrb[196].mxu0 %v5262_v53  ;;  %v6957_v47 = vadd.f32 %v4398_v0, %v6858_v26 }
 0x1ac   :  { %v6959_v10 = vadd.f32 %v4361_v59, %v1658_v19  ;;  %3367 = vmatmul.mubr.bf16.gmra.mrb[196].mxu1 %v5263_v46  ;;  %3309 = vmatprep.mubr.bf16.mxu0 %v5264_v30  ;;  %v1190_v59 = vmax.f32 %v6573_v50, 0.0 }
 0x1ad   :  { %3374 = vmatprep.mubr.bf16.mxu1 %v5266_v55  ;;  %v6962_v60 = vadd.f32 %v4401_v37, %v6862_v6  ;;  %v5270_v6 = vld [vmem:[%s7370_s3 + $0x194] ss:$28 sps:$4 sm:$0xff]  }
 0x1ae   :  { %v4362_v29 = vpop.f32.mrb[92].mxu0 }
 0x1af   :  { %v4402_v38 = vpop.f32.mrb[92].mxu1  ;;  %v4363_v12 = vpop.f32.mrb[93].mxu0 }
 0x1b0   :  { %v4364_v26 = vadd.f32 %v4363_v12, %v4362_v29  ;;  %v4403_v42 = vpop.f32.mrb[93].mxu1  ;;  %v4365_v5 = vpop.f32.mrb[94].mxu0  ;;  %v1188_v12 = vmax.f32 %v6550_v25, 0.0 }
 0x1b1   :  { %v4404_v27 = vadd.f32 %v4403_v42, %v4402_v38  ;;  %v4405_v44 = vpop.f32.mrb[94].mxu1  ;;  %v4366_v54 = vpop.f32.mrb[95].mxu0 }
 0x1b2   :  { %v6980_v49 = vadd.f32 %v4364_v26, %v1663_v23  ;;  %v4367_v8 = vadd.f32 %v4366_v54, %v4365_v5  ;;  %v4406_v53 = vpop.f32.mrb[95].mxu1  ;;  %v1191_v23 = vmax.f32 %v6579_v58, 0.0 }
 0x1b3   :  { %v4407_v31 = vadd.f32 %v4406_v53, %v4405_v44  ;;  %3310 = vmatmul.mubr.bf16.gmra.mrb[200].mxu0 %v5268_v7  ;;  %v1825_v9 = vadd.f32 %v4404_v27, %v6882_v40  ;;  %v5275_v40 = vld [vmem:[%s7370_s3 + $0xb8] ss:$28 sps:$4 sm:$0xff]  }
 0x1b4   :  { %v6983_v17 = vadd.f32 %v4367_v8, %v1666_v61  ;;  %3375 = vmatmul.mubr.bf16.gmra.mrb[200].mxu1 %v5269_v43  ;;  %3317 = vmatprep.mubr.bf16.mxu0 %v5270_v6  ;;  %v1189_v6 = vmax.f32 %v6554_v14, 0.0  ;;  %v5280_v14 = vld [vmem:[%s7370_s3 + $0x50] ss:$28 sps:$4 sm:$0xff]  }
 0x1b5   :  { %3382 = vmatprep.mubr.bf16.mxu1 %v5272_v2  ;;  %v1828_v4 = vadd.f32 %v4407_v31, %v6886_v21  ;;  %v5278_v21 = vld [vmem:[%s7370_s3 + $0x18] ss:$28 sps:$4 sm:$0xff]  }
 0x1b6   :  { %v4872_v46 = vpop.f32.mrb[96].mxu0 }
 0x1b7   :  { %v4408_v30 = vpop.f32.mrb[96].mxu1  ;;  %v1906_v0 = vadd.f32 %v4872_v46, %v1809_v41  ;;  %v1897_v32 = vpop.f32.mrb[97].mxu0  ;;  %v5279_v46 = vld [vmem:[%s7370_s3 + $0xf0] ss:$28 sps:$4 sm:$0xff]  }
 0x1b8   :  { %v4409_v22 = vpop.f32.mrb[97].mxu1  ;;  %v1898_v55 = vadd.f32 %v1897_v32, %v6907_v63  ;;  %v4873_v19 = vpop.f32.mrb[98].mxu0  ;;  %v5276_v63 = vld [vmem:[%s7370_s3 + $0xf4] ss:$28 sps:$4 sm:$0xff]  }
 0x1b9   :  { %v1962_v41 = vmax.f32 %v1906_v0, 0.0  ;;  %v4410_v57 = vadd.f32 %v4409_v22, %v4408_v30  ;;  %v4411_v37 = vpop.f32.mrb[98].mxu1  ;;  %v1909_v29 = vadd.f32 %v4873_v19, %v6936_v18  ;;  %v1900_v38 = vpop.f32.mrb[99].mxu0  ;;  %v1194_v30 = vmax.f32 %v6646_v52, 0.0 }
 0x1ba   :  { %v1960_v7 = vmax.f32 %v1898_v55, 0.0  ;;  %v4412_v26 = vpop.f32.mrb[99].mxu1  ;;  %v1901_v42 = vadd.f32 %v1900_v38, %v6912_v11  ;;  %v1192_v55 = vmax.f32 %v6609_v1, 0.0 }
 0x1bb   :  { %v7004_v5 = vmax.f32 %v1190_v59, %v1962_v41  ;;  %v1963_v50 = vmax.f32 %v1909_v29, 0.0  ;;  %v4413_v43 = vadd.f32 %v4412_v26, %v4411_v37  ;;  %3318 = vmatmul.mubr.bf16.gmra.mrb[204].mxu0 %v5274_v45  ;;  %v1833_v18 = vadd.f32 %v4410_v57, %v6904_v24 }
 0x1bc   :  { %v7008_v27 = vmax.f32 %v1188_v12, %v1960_v7  ;;  %v1961_v44 = vmax.f32 %v1901_v42, 0.0  ;;  %3383 = vmatmul.mubr.bf16.gmra.mrb[204].mxu1 %v5275_v40  ;;  %4910 = vmatprep.mubr.msk.bf16.mxu0 %vm775_vm0, %v5278_v21  ;;  %v1195_v40 = vmax.f32 %v6653_v34, 0.0  ;;  %v1193_v29 = vmax.f32 %v6615_v56, 0.0 }
 0x1bd   :  { %v7011_v25 = vmax.f32 %v1191_v23, %v1963_v50  ;;  %3390 = vmatprep.mubr.bf16.mxu1 %v5276_v63  ;;  %v1836_v58 = vadd.f32 %v4413_v43, %v6909_v13  ;;  %v5283_v13 = vld [vmem:[%s7370_s3 + $0x88] ss:$28 sps:$4 sm:$0xff]   ;;  %v1198_v43 = vmax.f32 %v6713_v28, 0.0 }
 0x1be   :  { %v7014_v11 = vmax.f32 %v1189_v6, %v1961_v44  ;;  %v4876_v54 = vpop.f32.mrb[100].mxu0  ;;  %v5284_v50 = vld [vmem:[%s7370_s3 + $0x128] ss:$28 sps:$4 sm:$0xff]  }
 0x1bf   :  { %v4414_v2 = vpop.f32.mrb[100].mxu1  ;;  %v1922_v61 = vadd.f32 %v4876_v54, %v1825_v9  ;;  %v1913_v8 = vpop.f32.mrb[101].mxu0 }
 0x1c0   :  { %v4415_v24 = vpop.f32.mrb[101].mxu1  ;;  %v1914_v53 = vadd.f32 %v1913_v8, %v6957_v47  ;;  %v4877_v31 = vpop.f32.mrb[102].mxu0  ;;  %v5281_v47 = vld [vmem:[%s7370_s3 + $0x12c] ss:$28 sps:$4 sm:$0xff]   ;;  %v1196_v8 = vmax.f32 %v6680_v39, 0.0 }
 0x1c1   :  { %v1966_v9 = vmax.f32 %v1922_v61, 0.0  ;;  %v4416_v0 = vadd.f32 %v4415_v24, %v4414_v2  ;;  %v4417_v32 = vpop.f32.mrb[102].mxu1  ;;  %v1925_v45 = vadd.f32 %v4877_v31, %v1828_v4  ;;  %v1916_v22 = vpop.f32.mrb[103].mxu0  ;;  %v1199_v24 = vmax.f32 %v6718_v35, 0.0 }
 0x1c2   :  { %v1964_v19 = vmax.f32 %v1914_v53, 0.0  ;;  %v4418_v21 = vpop.f32.mrb[103].mxu1  ;;  %v1917_v59 = vadd.f32 %v1916_v22, %v6962_v60 }
 0x1c3   :  { %v7033_v41 = vmax.f32 %v1194_v30, %v1966_v9  ;;  %v1967_v52 = vmax.f32 %v1925_v45, 0.0  ;;  %v4419_v57 = vadd.f32 %v4418_v21, %v4417_v32  ;;  %4911 = vmatmul.mubr.msk.bf16.vlgmr.msra.gmra.mrb[208].mxu0 %vm775_vm0, %v5280_v14  ;;  %v1841_v4 = vadd.f32 %v4416_v0, %v6930_v36  ;;  %v5285_v36 = vld [vmem:[%s7370_s3 + $0xc0] ss:$28 sps:$4 sm:$0xff]  }
 0x1c4   :  { %v7037_v37 = vmax.f32 %v1192_v55, %v1964_v19  ;;  %v1965_v38 = vmax.f32 %v1917_v59, 0.0  ;;  %3391 = vmatmul.mubr.bf16.gmra.mrb[208].mxu1 %v5279_v46  ;;  %4914 = vmatprep.mubr.msk.bf16.mxu0 %vm775_vm0, %v5283_v13  ;;  %v1197_v0 = vmax.f32 %v6686_v51, 0.0 }
 0x1c5   :  { %v7041_v1 = vmax.f32 %v1195_v40, %v1967_v52  ;;  %v1844_v34 = vadd.f32 %v4419_v57, %v6933_v48  ;;  %3398 = vmatprep.mubr.bf16.mxu1 %v5281_v47  ;;  %v5288_v48 = vld [vmem:[%s7370_s3 + $0xf8] ss:$28 sps:$4 sm:$0xff]   ;;  %v5289_v40 = vld [vmem:[%s7370_s3 + $0x160] ss:$28 sps:$4 sm:$0xff]  }
 0x1c6   :  { %v7044_v60 = vmax.f32 %v1193_v29, %v1965_v38  ;;  %v4880_v63 = vpop.f32.mrb[104].mxu0  ;;  %v5291_v57 = vld [vmem:[%s7370_s3 + $0x19c] ss:$28 sps:$4 sm:$0xff]  }
 0x1c7   :  { %v4420_v12 = vpop.f32.mrb[104].mxu1  ;;  %v1938_v7 = vadd.f32 %v4880_v63, %v1841_v4  ;;  %v1929_v23 = vpop.f32.mrb[105].mxu0  ;;  %v1200_v4 = vmax.f32 %v6741_v3, 0.0 }
 0x1c8   :  { %v4421_v56 = vpop.f32.mrb[105].mxu1  ;;  %v1930_v26 = vadd.f32 %v1929_v23, %v1833_v18  ;;  %v4881_v42 = vpop.f32.mrb[106].mxu0  ;;  %v5286_v18 = vld [vmem:[%s7370_s3 + $0x164] ss:$28 sps:$4 sm:$0xff]   ;;  %v1201_v23 = vmax.f32 %v6746_v62, 0.0 }
 0x1c9   :  { %v1970_v6 = vmax.f32 %v1938_v7, 0.0  ;;  %v4422_v44 = vadd.f32 %v4421_v56, %v4420_v12  ;;  %v4423_v54 = vpop.f32.mrb[106].mxu1  ;;  %v1941_v2 = vadd.f32 %v4881_v42, %v1844_v34  ;;  %v1932_v61 = vpop.f32.mrb[107].mxu0  ;;  %v5295_v62 = vld [vmem:[%s7370_s3 + $0x1a0] ss:$28 sps:$4 sm:$0xff]  }
 0x1ca   :  { %v1968_v14 = vmax.f32 %v1930_v26, 0.0  ;;  %v4424_v53 = vpop.f32.mrb[107].mxu1  ;;  %v1933_v31 = vadd.f32 %v1932_v61, %v1836_v58  ;;  %v1203_v61 = vmax.f32 %v6774_v33, 0.0 }
 0x1cb   :  { %v7061_v46 = vmax.f32 %v1198_v43, %v1970_v6  ;;  %v1971_v13 = vmax.f32 %v1941_v2, 0.0  ;;  %v4425_v28 = vadd.f32 %v4424_v53, %v4423_v54  ;;  %4915 = vmatmul.mubr.msk.bf16.gmra.mrb[212].mxu0 %vm775_vm0, %v5285_v36  ;;  %v1849_v30 = vadd.f32 %v4422_v44, %v6954_v16  ;;  %v5290_v16 = vld [vmem:[%s7370_s3 + $0x130] ss:$28 sps:$4 sm:$0xff]  }
 0x1cc   :  { %v7065_v9 = vmax.f32 %v1196_v8, %v1968_v14  ;;  %v1969_v32 = vmax.f32 %v1933_v31, 0.0  ;;  %3399 = vmatmul.mubr.bf16.gmra.mrb[212].mxu1 %v5284_v50  ;;  %4918 = vmatprep.mubr.msk.bf16.mxu0 %vm775_vm0, %v5288_v48 }
 0x1cd   :  { %v7069_v39 = vmax.f32 %v1199_v24, %v1971_v13  ;;  %v1852_v35 = vadd.f32 %v4425_v28, %v6959_v10  ;;  %3406 = vmatprep.mubr.bf16.mxu1 %v5286_v18  ;;  %v5293_v10 = vld [vmem:[%s7370_s3 + $0x168] ss:$28 sps:$4 sm:$0xff]  }
 0x1ce   :  { %v7072_v58 = vmax.f32 %v1197_v0, %v1969_v32  ;;  %v4884_v45 = vpop.f32.mrb[108].mxu0 }
 0x1cf   :  { %v4426_v22 = vpop.f32.mrb[108].mxu1  ;;  %v1945_v47 = vpop.f32.mrb[109].mxu0 }
 0x1d0   :  { %v4427_v55 = vpop.f32.mrb[109].mxu1  ;;  %v1946_v51 = vadd.f32 %v1945_v47, %v1849_v30  ;;  %v4885_v19 = vpop.f32.mrb[110].mxu0 }
 0x1d1   :  { %v4428_v21 = vadd.f32 %v4427_v55, %v4426_v22  ;;  %v4429_v59 = vpop.f32.mrb[110].mxu1  ;;  %v1948_v52 = vpop.f32.mrb[111].mxu0 }
 0x1d2   :  { %v1972_v29 = vmax.f32 %v1946_v51, 0.0  ;;  %v4430_v38 = vpop.f32.mrb[111].mxu1  ;;  %v1949_v34 = vadd.f32 %v1948_v52, %v1852_v35 }
 0x1d3   :  { %v1857_v63 = vadd.f32 %v4428_v21, %v6980_v49  ;;  %v4431_v12 = vadd.f32 %v4430_v38, %v4429_v59  ;;  %4919 = vmatmul.mubr.msk.bf16.gmra.mrb[216].mxu0 %vm775_vm0, %v5290_v16  ;;  %v1202_v49 = vmax.f32 %v6769_v15, 0.0 }
 0x1d4   :  { %v7089_v7 = vmax.f32 %v1200_v4, %v1972_v29  ;;  %v1973_v36 = vmax.f32 %v1949_v34, 0.0  ;;  %3407 = vmatmul.mubr.bf16.gmra.mrb[216].mxu1 %v5289_v40  ;;  %4922 = vmatprep.mubr.msk.bf16.mxu0 %vm775_vm0, %v5293_v10 }
 0x1d5   :  { %v1954_v56 = vadd.f32 %v4884_v45, %v1857_v63  ;;  %v1860_v26 = vadd.f32 %v4431_v12, %v6983_v17  ;;  %3414 = vmatprep.mubr.bf16.mxu1 %v5291_v57  ;;  %v5294_v17 = vld [vmem:[%s7370_s3 + $0x198] ss:$28 sps:$4 sm:$0xff]  }
 0x1d6   :  { %v7094_v3 = vmax.f32 %v1201_v23, %v1973_v36  ;;  %v4458_v42 = vpop.f32.mrb[112].mxu0 }
 0x1d7   :  { %v1974_v50 = vmax.f32 %v1954_v56, 0.0  ;;  %v1957_v48 = vadd.f32 %v4885_v19, %v1860_v26  ;;  %v4522_v43 = vpop.f32.mrb[112].mxu1  ;;  %v4459_v6 = vpop.f32.mrb[113].mxu0 }
 0x1d8   :  { %7432 = vst [vmem:[#allocation3_spill] sm:$0xff] %v7094_v3  ;;  %v4460_v44 = vadd.f32 %v4459_v6, %v4458_v42  ;;  %v4523_v54 = vpop.f32.mrb[113].mxu1  ;;  %v4461_v2 = vpop.f32.mrb[114].mxu0 }
 0x1d9   :  { %v7104_v18 = vmax.f32 %v1202_v49, %v1974_v50  ;;  %v1975_v15 = vmax.f32 %v1957_v48, 0.0  ;;  %v4524_v8 = vadd.f32 %v4523_v54, %v4522_v43  ;;  %v4525_v14 = vpop.f32.mrb[114].mxu1  ;;  %v4462_v24 = vpop.f32.mrb[115].mxu0 }
 0x1da   :  { %v2395_v53 = vadd.f32 %v6840_v20, %v4460_v44  ;;  %v4463_v31 = vadd.f32 %v4462_v24, %v4461_v2  ;;  %v4526_v13 = vpop.f32.mrb[115].mxu1 }
 0x1db   :  { %7433 = vst [vmem:[#allocation4_spill] sm:$0xff] %v7104_v18  ;;  %v7107_v28 = vmax.f32 %v1203_v61, %v1975_v15  ;;  %v4527_v30 = vadd.f32 %v4526_v13, %v4525_v14  ;;  %4923 = vmatmul.mubr.msk.bf16.gmra.mrb[220].mxu0 %vm775_vm0, %v5295_v62 }
 0x1dc   :  { %v7110_v0 = vadd.f32 %v4524_v8, %v2395_v53  ;;  %v2398_v32 = vadd.f32 %v6840_v20, %v4463_v31  ;;  %3415 = vmatmul.mubr.bf16.gmra.mrb[220].mxu1 %v5294_v17 }
 0x1dd   :  { %7434 = vst [vmem:[#allocation6_spill] sm:$0xff] %v7107_v28 }
 0x1de   :  { %v7113_v33 = vadd.f32 %v4527_v30, %v2398_v32  ;;  %v4464_v35 = vpop.f32.mrb[116].mxu0 }
 0x1df   :  { %v4528_v45 = vpop.f32.mrb[116].mxu1  ;;  %v4465_v22 = vpop.f32.mrb[117].mxu0 }
 0x1e0   :  { %v4466_v47 = vadd.f32 %v4465_v22, %v4464_v35  ;;  %v4529_v16 = vpop.f32.mrb[117].mxu1  ;;  %v4467_v55 = vpop.f32.mrb[118].mxu0 }
 0x1e1   :  { %v4530_v51 = vadd.f32 %v4529_v16, %v4528_v45  ;;  %v4531_v19 = vpop.f32.mrb[118].mxu1  ;;  %v4468_v40 = vpop.f32.mrb[119].mxu0 }
 0x1e2   :  { %v2403_v10 = vadd.f32 %v6840_v20, %v4466_v47  ;;  %v4469_v21 = vadd.f32 %v4468_v40, %v4467_v55  ;;  %v4532_v59 = vpop.f32.mrb[119].mxu1 }
 0x1e3   :  { %v4533_v52 = vadd.f32 %v4532_v59, %v4531_v19 }
 0x1e4   :  { %v7116_v57 = vadd.f32 %v4530_v51, %v2403_v10  ;;  %v2406_v4 = vadd.f32 %v6840_v20, %v4469_v21 }
 0x1e6   :  { %v7119_v29 = vadd.f32 %v4533_v52, %v2406_v4  ;;  %v4470_v38 = vpop.f32.mrb[120].mxu0 }
 0x1e7   :  { %v4534_v34 = vpop.f32.mrb[120].mxu1  ;;  %v4471_v63 = vpop.f32.mrb[121].mxu0 }
 0x1e8   :  { %v4472_v12 = vadd.f32 %v4471_v63, %v4470_v38  ;;  %v4535_v23 = vpop.f32.mrb[121].mxu1  ;;  %v4473_v36 = vpop.f32.mrb[122].mxu0 }
 0x1e9   :  { %v4536_v56 = vadd.f32 %v4535_v23, %v4534_v34  ;;  %v4537_v26 = vpop.f32.mrb[122].mxu1  ;;  %v4474_v42 = vpop.f32.mrb[123].mxu0 }
 0x1ea   :  { %v2411_v49 = vadd.f32 %v6840_v20, %v4472_v12  ;;  %v4475_v50 = vadd.f32 %v4474_v42, %v4473_v36  ;;  %v4538_v48 = vpop.f32.mrb[123].mxu1 }
 0x1eb   :  { %v4539_v43 = vadd.f32 %v4538_v48, %v4537_v26 }
 0x1ec   :  { %v7122_v6 = vadd.f32 %v4536_v56, %v2411_v49  ;;  %v2414_v62 = vadd.f32 %v6840_v20, %v4475_v50 }
 0x1ee   :  { %v7125_v44 = vadd.f32 %v4539_v43, %v2414_v62  ;;  %v4476_v54 = vpop.f32.mrb[124].mxu0 }
 0x1ef   :  { %v4540_v2 = vpop.f32.mrb[124].mxu1  ;;  %v4477_v17 = vpop.f32.mrb[125].mxu0 }
 0x1f0   :  { %v4478_v61 = vadd.f32 %v4477_v17, %v4476_v54  ;;  %v4541_v15 = vpop.f32.mrb[125].mxu1  ;;  %v4479_v8 = vpop.f32.mrb[126].mxu0 }
 0x1f1   :  { %v4542_v14 = vadd.f32 %v4541_v15, %v4540_v2  ;;  %v4543_v24 = vpop.f32.mrb[126].mxu1  ;;  %v4480_v53 = vpop.f32.mrb[127].mxu0 }
 0x1f2   :  { %v2419_v31 = vadd.f32 %v6840_v20, %v4478_v61  ;;  %v4481_v13 = vadd.f32 %v4480_v53, %v4479_v8  ;;  %v4544_v30 = vpop.f32.mrb[127].mxu1 }
 0x1f3   :  { %v4545_v32 = vadd.f32 %v4544_v30, %v4543_v24 }
 0x1f4   :  { %v7128_v35 = vadd.f32 %v4542_v14, %v2419_v31  ;;  %v2422_v45 = vadd.f32 %v6840_v20, %v4481_v13 }
 0x1f6   :  { %v7131_v22 = vadd.f32 %v4545_v32, %v2422_v45  ;;  %v4482_v47 = vpop.f32.mrb[128].mxu0 }
 0x1f7   :  { %v4546_v16 = vpop.f32.mrb[128].mxu1  ;;  %v4483_v55 = vpop.f32.mrb[129].mxu0 }
 0x1f8   :  { %v4484_v51 = vadd.f32 %v4483_v55, %v4482_v47  ;;  %v4547_v19 = vpop.f32.mrb[129].mxu1  ;;  %v4485_v40 = vpop.f32.mrb[130].mxu0 }
 0x1f9   :  { %v4548_v10 = vadd.f32 %v4547_v19, %v4546_v16  ;;  %v4549_v21 = vpop.f32.mrb[130].mxu1  ;;  %v4486_v59 = vpop.f32.mrb[131].mxu0 }
 0x1fa   :  { %v2427_v52 = vadd.f32 %v6840_v20, %v4484_v51  ;;  %v4487_v4 = vadd.f32 %v4486_v59, %v4485_v40  ;;  %v4550_v38 = vpop.f32.mrb[131].mxu1 }
 0x1fb   :  { %v4551_v34 = vadd.f32 %v4550_v38, %v4549_v21 }
 0x1fc   :  { %v7134_v63 = vadd.f32 %v4548_v10, %v2427_v52  ;;  %v2430_v12 = vadd.f32 %v6840_v20, %v4487_v4 }
 0x1fe   :  { %v7137_v23 = vadd.f32 %v4551_v34, %v2430_v12  ;;  %v4488_v36 = vpop.f32.mrb[132].mxu0 }
 0x1ff   :  { %v4552_v56 = vpop.f32.mrb[132].mxu1  ;;  %v4489_v26 = vpop.f32.mrb[133].mxu0 }
 0x200   :  { %v4490_v42 = vadd.f32 %v4489_v26, %v4488_v36  ;;  %v4553_v49 = vpop.f32.mrb[133].mxu1  ;;  %v4491_v50 = vpop.f32.mrb[134].mxu0 }
 0x201   :  { %v4554_v48 = vadd.f32 %v4553_v49, %v4552_v56  ;;  %v4555_v43 = vpop.f32.mrb[134].mxu1  ;;  %v4492_v62 = vpop.f32.mrb[135].mxu0 }
 0x202   :  { %v2435_v54 = vadd.f32 %v6840_v20, %v4490_v42  ;;  %v4493_v2 = vadd.f32 %v4492_v62, %v4491_v50  ;;  %v4556_v17 = vpop.f32.mrb[135].mxu1 }
 0x203   :  { %v4557_v61 = vadd.f32 %v4556_v17, %v4555_v43 }
 0x204   :  { %v7140_v15 = vadd.f32 %v4554_v48, %v2435_v54  ;;  %v2438_v8 = vadd.f32 %v6840_v20, %v4493_v2 }
 0x206   :  { %v7143_v14 = vadd.f32 %v4557_v61, %v2438_v8  ;;  %v4494_v24 = vpop.f32.mrb[136].mxu0 }
 0x207   :  { %v4558_v53 = vpop.f32.mrb[136].mxu1  ;;  %v4495_v31 = vpop.f32.mrb[137].mxu0 }
 0x208   :  { %v4496_v13 = vadd.f32 %v4495_v31, %v4494_v24  ;;  %v4559_v30 = vpop.f32.mrb[137].mxu1  ;;  %v4497_v32 = vpop.f32.mrb[138].mxu0 }
 0x209   :  { %v4560_v45 = vadd.f32 %v4559_v30, %v4558_v53  ;;  %v4561_v47 = vpop.f32.mrb[138].mxu1  ;;  %v4498_v16 = vpop.f32.mrb[139].mxu0 }
 0x20a   :  { %v2443_v55 = vadd.f32 %v6840_v20, %v4496_v13  ;;  %v4499_v51 = vadd.f32 %v4498_v16, %v4497_v32  ;;  %v4562_v19 = vpop.f32.mrb[139].mxu1 }
 0x20b   :  { %v4563_v40 = vadd.f32 %v4562_v19, %v4561_v47 }
 0x20c   :  { %v7146_v10 = vadd.f32 %v4560_v45, %v2443_v55  ;;  %v2446_v21 = vadd.f32 %v6840_v20, %v4499_v51 }
 0x20e   :  { %v7149_v59 = vadd.f32 %v4563_v40, %v2446_v21  ;;  %v4500_v52 = vpop.f32.mrb[140].mxu0 }
 0x20f   :  { %v4564_v4 = vpop.f32.mrb[140].mxu1  ;;  %v4501_v38 = vpop.f32.mrb[141].mxu0 }
 0x210   :  { %v4502_v34 = vadd.f32 %v4501_v38, %v4500_v52  ;;  %v4565_v12 = vpop.f32.mrb[141].mxu1  ;;  %v4503_v36 = vpop.f32.mrb[142].mxu0 }
 0x211   :  { %v4566_v56 = vadd.f32 %v4565_v12, %v4564_v4  ;;  %v4567_v26 = vpop.f32.mrb[142].mxu1  ;;  %v4504_v42 = vpop.f32.mrb[143].mxu0 }
 0x212   :  { %v2451_v49 = vadd.f32 %v6840_v20, %v4502_v34  ;;  %v4505_v50 = vadd.f32 %v4504_v42, %v4503_v36  ;;  %v4568_v48 = vpop.f32.mrb[143].mxu1 }
 0x213   :  { %v4569_v43 = vadd.f32 %v4568_v48, %v4567_v26 }
 0x214   :  { %v7152_v62 = vadd.f32 %v4566_v56, %v2451_v49  ;;  %v2454_v54 = vadd.f32 %v6840_v20, %v4505_v50 }
 0x216   :  { %v7155_v2 = vadd.f32 %v4569_v43, %v2454_v54  ;;  %v4586_v17 = vpop.f32.mrb[144].mxu0 }
 0x217   :  { %v4892_v61 = vpop.f32.mrb[144].mxu1  ;;  %v4587_v8 = vpop.f32.mrb[145].mxu0 }
 0x218   :  { %v4588_v24 = vadd.f32 %v4587_v8, %v4586_v17  ;;  %v2685_v53 = vpop.f32.mrb[145].mxu1  ;;  %v4589_v31 = vpop.f32.mrb[146].mxu0 }
 0x219   :  { %v4893_v13 = vpop.f32.mrb[146].mxu1  ;;  %v4590_v30 = vpop.f32.mrb[147].mxu0 }
 0x21a   :  { %v2589_v32 = vadd.f32 %v4588_v24, %v7110_v0  ;;  %v4591_v45 = vadd.f32 %v4590_v30, %v4589_v31  ;;  %v2688_v47 = vpop.f32.mrb[147].mxu1 }
 0x21c   :  { %v7158_v16 = vadd.f32 %v2685_v53, %v2589_v32  ;;  %v2592_v55 = vadd.f32 %v4591_v45, %v7113_v33 }
 0x21e   :  { %v7161_v51 = vadd.f32 %v2688_v47, %v2592_v55  ;;  %v4592_v20 = vpop.f32.mrb[148].mxu0 }
 0x21f   :  { %v4896_v19 = vpop.f32.mrb[148].mxu1  ;;  %v4593_v40 = vpop.f32.mrb[149].mxu0 }
 0x220   :  { %v4594_v21 = vadd.f32 %v4593_v40, %v4592_v20  ;;  %v2701_v52 = vpop.f32.mrb[149].mxu1  ;;  %v4595_v4 = vpop.f32.mrb[150].mxu0 }
 0x221   :  { %v4897_v38 = vpop.f32.mrb[150].mxu1  ;;  %v4596_v34 = vpop.f32.mrb[151].mxu0 }
 0x222   :  { %v2597_v12 = vadd.f32 %v4594_v21, %v7116_v57  ;;  %v4597_v36 = vadd.f32 %v4596_v34, %v4595_v4  ;;  %v2704_v0 = vpop.f32.mrb[151].mxu1 }
 0x224   :  { %v7164_v56 = vadd.f32 %v4892_v61, %v2597_v12  ;;  %v2600_v26 = vadd.f32 %v4597_v36, %v7119_v29 }
 0x226   :  { %v7167_v42 = vadd.f32 %v4893_v13, %v2600_v26  ;;  %v4598_v33 = vpop.f32.mrb[152].mxu0 }
 0x227   :  { %v4900_v49 = vpop.f32.mrb[152].mxu1  ;;  %v4599_v50 = vpop.f32.mrb[153].mxu0 }
 0x228   :  { %v4600_v48 = vadd.f32 %v4599_v50, %v4598_v33  ;;  %v2717_v43 = vpop.f32.mrb[153].mxu1  ;;  %v4601_v54 = vpop.f32.mrb[154].mxu0 }
 0x229   :  { %v4901_v17 = vpop.f32.mrb[154].mxu1  ;;  %v4602_v8 = vpop.f32.mrb[155].mxu0 }
 0x22a   :  { %v2605_v24 = vadd.f32 %v4600_v48, %v7122_v6  ;;  %v4603_v53 = vadd.f32 %v4602_v8, %v4601_v54  ;;  %v2720_v57 = vpop.f32.mrb[155].mxu1 }
 0x22c   :  { %v7170_v31 = vadd.f32 %v2701_v52, %v2605_v24  ;;  %v2608_v61 = vadd.f32 %v4603_v53, %v7125_v44 }
 0x22e   :  { %v7173_v30 = vadd.f32 %v2704_v0, %v2608_v61  ;;  %v4604_v29 = vpop.f32.mrb[156].mxu0 }
 0x22f   :  { %v7175_v13 = vpop.f32.mrb[156].mxu1  ;;  %v4605_v32 = vpop.f32.mrb[157].mxu0 }
 0x230   :  { %v4606_v45 = vadd.f32 %v4605_v32, %v4604_v29  ;;  %v2733_v47 = vpop.f32.mrb[157].mxu1  ;;  %v4607_v55 = vpop.f32.mrb[158].mxu0 }
 0x231   :  { %v7177_v20 = vpop.f32.mrb[158].mxu1  ;;  %v4608_v40 = vpop.f32.mrb[159].mxu0 }
 0x232   :  { %v2613_v6 = vadd.f32 %v4606_v45, %v7128_v35  ;;  %v4609_v21 = vadd.f32 %v4608_v40, %v4607_v55  ;;  %v2736_v4 = vpop.f32.mrb[159].mxu1 }
 0x234   :  { %v7180_v52 = vadd.f32 %v4896_v19, %v2613_v6  ;;  %v2616_v44 = vadd.f32 %v4609_v21, %v7131_v22 }
 0x236   :  { %v7183_v34 = vadd.f32 %v4897_v38, %v2616_v44  ;;  %v4610_v12 = vpop.f32.mrb[160].mxu0 }
 0x237   :  { %v4660_v36 = vpop.f32.mrb[160].mxu1  ;;  %v4611_v0 = vpop.f32.mrb[161].mxu0 }
 0x238   :  { %v4612_v26 = vadd.f32 %v4611_v0, %v4610_v12  ;;  %v4661_v33 = vpop.f32.mrb[161].mxu1  ;;  %v4613_v50 = vpop.f32.mrb[162].mxu0 }
 0x239   :  { %v4662_v48 = vadd.f32 %v4661_v33, %v4660_v36  ;;  %v4663_v54 = vpop.f32.mrb[162].mxu1  ;;  %v4614_v8 = vpop.f32.mrb[163].mxu0 }
 0x23a   :  { %v2621_v24 = vadd.f32 %v4612_v26, %v7134_v63  ;;  %v4615_v35 = vadd.f32 %v4614_v8, %v4613_v50  ;;  %v4664_v53 = vpop.f32.mrb[163].mxu1 }
 0x23b   :  { %v7186_v61 = vadd.f32 %v4664_v53, %v4663_v54 }
 0x23c   :  { %v7188_v19 = vadd.f32 %v2717_v43, %v2621_v24  ;;  %v2624_v22 = vadd.f32 %v4615_v35, %v7137_v23 }
 0x23e   :  { %v7191_v38 = vadd.f32 %v2720_v57, %v2624_v22  ;;  %v4616_v29 = vpop.f32.mrb[164].mxu0 }
 0x23f   :  { %v4666_v32 = vpop.f32.mrb[164].mxu1  ;;  %v4617_v45 = vpop.f32.mrb[165].mxu0 }
 0x240   :  { %v4618_v55 = vadd.f32 %v4617_v45, %v4616_v29  ;;  %v4667_v40 = vpop.f32.mrb[165].mxu1  ;;  %v4619_v6 = vpop.f32.mrb[166].mxu0 }
 0x241   :  { %v4668_v21 = vadd.f32 %v4667_v40, %v4666_v32  ;;  %v4669_v44 = vpop.f32.mrb[166].mxu1  ;;  %v4620_v12 = vpop.f32.mrb[167].mxu0 }
 0x242   :  { %v2629_v63 = vadd.f32 %v4618_v55, %v7140_v15  ;;  %v4621_v36 = vadd.f32 %v4620_v12, %v4619_v6  ;;  %v4670_v0 = vpop.f32.mrb[167].mxu1 }
 0x243   :  { %v7194_v26 = vadd.f32 %v4670_v0, %v4669_v44 }
 0x244   :  { %v7196_v43 = vadd.f32 %v4900_v49, %v2629_v63  ;;  %v2632_v23 = vadd.f32 %v4621_v36, %v7143_v14 }
 0x246   :  { %v7199_v57 = vadd.f32 %v4901_v17, %v2632_v23  ;;  %v4622_v33 = vpop.f32.mrb[168].mxu0 }
 0x247   :  { %v4672_v50 = vpop.f32.mrb[168].mxu1  ;;  %v4623_v54 = vpop.f32.mrb[169].mxu0 }
 0x248   :  { %v4624_v8 = vadd.f32 %v4623_v54, %v4622_v33  ;;  %v4673_v24 = vpop.f32.mrb[169].mxu1  ;;  %v4625_v35 = vpop.f32.mrb[170].mxu0 }
 0x249   :  { %v4674_v53 = vadd.f32 %v4673_v24, %v4672_v50  ;;  %v4675_v22 = vpop.f32.mrb[170].mxu1  ;;  %v4626_v29 = vpop.f32.mrb[171].mxu0 }
 0x24a   :  { %v2637_v15 = vadd.f32 %v4624_v8, %v7146_v10  ;;  %v4627_v32 = vadd.f32 %v4626_v29, %v4625_v35  ;;  %v4676_v45 = vpop.f32.mrb[171].mxu1  ;;  %v7222_v29 = vld [vmem:[%s7371_s5] ss:$0 sm:$0xff] }
 0x24b   :  { %v7202_v55 = vadd.f32 %v4676_v45, %v4675_v22 }
 0x24c   :  { %v7204_v49 = vadd.f32 %v2733_v47, %v2637_v15  ;;  %v2640_v14 = vadd.f32 %v4627_v32, %v7149_v59 }
 0x24e   :  { %v7207_v17 = vadd.f32 %v2736_v4, %v2640_v14  ;;  %v4628_v40 = vpop.f32.mrb[172].mxu0 }
 0x24f   :  { %v4678_v6 = vpop.f32.mrb[172].mxu1  ;;  %v4629_v44 = vpop.f32.mrb[173].mxu0 }
 0x250   :  { %v4630_v12 = vadd.f32 %v4629_v44, %v4628_v40  ;;  %v4679_v63 = vpop.f32.mrb[173].mxu1  ;;  %v4631_v36 = vpop.f32.mrb[174].mxu0 }
 0x251   :  { %v4680_v0 = vadd.f32 %v4679_v63, %v4678_v6  ;;  %v4681_v23 = vpop.f32.mrb[174].mxu1  ;;  %v4632_v33 = vpop.f32.mrb[175].mxu0 }
 0x252   :  { %v2645_v10 = vadd.f32 %v4630_v12, %v7152_v62  ;;  %v4633_v50 = vadd.f32 %v4632_v33, %v4631_v36  ;;  %v4682_v54 = vpop.f32.mrb[175].mxu1  ;;  %v3167_v62 = vadd.f32 %v7222_v29, %v4662_v48  ;;  %v3175_v48 = vadd.f32 %v7222_v29, %v4668_v21 }
 0x253   :  { %v7210_v8 = vadd.f32 %v4682_v54, %v4681_v23  ;;  %v3183_v21 = vadd.f32 %v7222_v29, %v4674_v53 }
 0x254   :  { %v7213_v47 = vadd.f32 %v7175_v13, %v2645_v10  ;;  %v2648_v59 = vadd.f32 %v4633_v50, %v7155_v2  ;;  %v3170_v2 = vadd.f32 %v7222_v29, %v7186_v61  ;;  %v3178_v61 = vadd.f32 %v7222_v29, %v7194_v26 }
 0x255   :  { %v3186_v26 = vadd.f32 %v7222_v29, %v7202_v55 }
 0x256   :  { %7435 = vst [vmem:[#allocation19_spill] sm:$0xff] %v7213_v47  ;;  %v7217_v4 = vadd.f32 %v7177_v20, %v2648_v59  ;;  %v4724_v24 = vpop.f32.mrb[176].mxu0 }
 0x257   :  { %v4684_v35 = vpop.f32.mrb[176].mxu1  ;;  %v4725_v22 = vpop.f32.mrb[177].mxu0 }
 0x258   :  { %7436 = vst [vmem:[#allocation7_spill] sm:$0xff] %v7217_v4  ;;  %v4685_v15 = vpop.f32.mrb[177].mxu1  ;;  %v4726_v32 = vadd.f32 %v4725_v22, %v4724_v24  ;;  %v4727_v45 = vpop.f32.mrb[178].mxu0 }
 0x259   :  { %v4686_v13 = vadd.f32 %v4685_v15, %v4684_v35  ;;  %v4687_v14 = vpop.f32.mrb[178].mxu1  ;;  %v4728_v40 = vpop.f32.mrb[179].mxu0 }
 0x25a   :  { %v7227_v20 = vadd.f32 %v4726_v32, %v3167_v62  ;;  %v4688_v6 = vpop.f32.mrb[179].mxu1  ;;  %v4729_v44 = vadd.f32 %v4728_v40, %v4727_v45 }
 0x25b   :  { %v4689_v12 = vadd.f32 %v4688_v6, %v4687_v14 }
 0x25c   :  { %v7229_v63 = vadd.f32 %v4729_v44, %v3170_v2 }
 0x25e   :  { %v4730_v36 = vpop.f32.mrb[180].mxu0 }
 0x25f   :  { %v4690_v23 = vpop.f32.mrb[180].mxu1  ;;  %v4731_v33 = vpop.f32.mrb[181].mxu0 }
 0x260   :  { %v4691_v10 = vpop.f32.mrb[181].mxu1  ;;  %v4732_v50 = vadd.f32 %v4731_v33, %v4730_v36  ;;  %v4733_v54 = vpop.f32.mrb[182].mxu0 }
 0x261   :  { %v4692_v59 = vadd.f32 %v4691_v10, %v4690_v23  ;;  %v4693_v24 = vpop.f32.mrb[182].mxu1  ;;  %v4734_v35 = vpop.f32.mrb[183].mxu0 }
 0x262   :  { %v7234_v22 = vadd.f32 %v4732_v50, %v3175_v48  ;;  %v4694_v62 = vpop.f32.mrb[183].mxu1  ;;  %v4735_v15 = vadd.f32 %v4734_v35, %v4733_v54 }
 0x263   :  { %v4695_v32 = vadd.f32 %v4694_v62, %v4693_v24 }
 0x264   :  { %v7236_v45 = vadd.f32 %v4735_v15, %v3178_v61  ;;  %v3191_v15 = vadd.f32 %v7222_v29, %v4680_v0 }
 0x266   :  { %v4736_v14 = vpop.f32.mrb[184].mxu0 }
 0x267   :  { %v4696_v40 = vpop.f32.mrb[184].mxu1  ;;  %v4737_v2 = vpop.f32.mrb[185].mxu0 }
 0x268   :  { %v4697_v6 = vpop.f32.mrb[185].mxu1  ;;  %v4738_v44 = vadd.f32 %v4737_v2, %v4736_v14  ;;  %v4739_v36 = vpop.f32.mrb[186].mxu0 }
 0x269   :  { %v7239_v23 = vadd.f32 %v4697_v6, %v4696_v40  ;;  %v4699_v33 = vpop.f32.mrb[186].mxu1  ;;  %v4740_v10 = vpop.f32.mrb[187].mxu0 }
 0x26a   :  { %v7243_v48 = vadd.f32 %v4738_v44, %v3183_v21  ;;  %v4700_v50 = vpop.f32.mrb[187].mxu1  ;;  %v4741_v54 = vadd.f32 %v4740_v10, %v4739_v36  ;;  %v3194_v21 = vadd.f32 %v7222_v29, %v7210_v8  ;;  %v3202_v8 = vadd.f32 %v7222_v29, %v4689_v12 }
 0x26b   :  { %v7245_v24 = vadd.f32 %v4700_v50, %v4699_v33 }
 0x26c   :  { %v7247_v35 = vadd.f32 %v4741_v54, %v3186_v26 }
 0x26e   :  { %v4742_v61 = vpop.f32.mrb[188].mxu0 }
 0x26f   :  { %v4702_v53 = vpop.f32.mrb[188].mxu1  ;;  %v4743_v62 = vpop.f32.mrb[189].mxu0 }
 0x270   :  { %v4703_v14 = vpop.f32.mrb[189].mxu1  ;;  %v4744_v40 = vadd.f32 %v4743_v62, %v4742_v61  ;;  %v4745_v2 = vpop.f32.mrb[190].mxu0  ;;  %v3199_v61 = vadd.f32 %v7222_v29, %v4686_v13 }
 0x271   :  { %v7250_v6 = vadd.f32 %v4703_v14, %v4702_v53  ;;  %v4705_v28 = vpop.f32.mrb[190].mxu1  ;;  %v4746_v55 = vpop.f32.mrb[191].mxu0 }
 0x272   :  { %v7254_v44 = vadd.f32 %v4744_v40, %v3191_v15  ;;  %v4706_v36 = vpop.f32.mrb[191].mxu1  ;;  %v4747_v33 = vadd.f32 %v4746_v55, %v4745_v2 }
 0x273   :  { %v7256_v10 = vadd.f32 %v4706_v36, %v4705_v28 }
 0x274   :  { %v7258_v26 = vadd.f32 %v4747_v33, %v3194_v21 }
 0x276   :  { %v4748_v50 = vpop.f32.mrb[192].mxu0 }
 0x277   :  { %v4788_v0 = vpop.f32.mrb[192].mxu1  ;;  %v4749_v54 = vpop.f32.mrb[193].mxu0 }
 0x278   :  { %v4750_v53 = vadd.f32 %v4749_v54, %v4748_v50  ;;  %v4789_v62 = vpop.f32.mrb[193].mxu1  ;;  %v4751_v14 = vpop.f32.mrb[194].mxu0 }
 0x279   :  { %v4790_v18 = vadd.f32 %v4789_v62, %v4788_v0  ;;  %v4791_v4 = vpop.f32.mrb[194].mxu1  ;;  %v4752_v3 = vpop.f32.mrb[195].mxu0  ;;  %v3207_v0 = vadd.f32 %v7222_v29, %v4692_v59 }
 0x27a   :  { %v7262_v15 = vadd.f32 %v4750_v53, %v3199_v61  ;;  %v4753_v40 = vadd.f32 %v4752_v3, %v4751_v14  ;;  %v4792_v28 = vpop.f32.mrb[195].mxu1 }
 0x27b   :  { %v4793_v2 = vadd.f32 %v4792_v28, %v4791_v4  ;;  %v3361_v55 = vadd.f32 %v4790_v18, %v7227_v20  ;;  %v3210_v4 = vadd.f32 %v7222_v29, %v4695_v32 }
 0x27c   :  { %v7265_v21 = vadd.f32 %v4753_v40, %v3202_v8 }
 0x27d   :  { %v7268_v36 = vadd.f32 %v4793_v2, %v7229_v63 }
 0x27e   :  { %v4754_v13 = vpop.f32.mrb[196].mxu0 }
 0x27f   :  { %v4794_v33 = vpop.f32.mrb[196].mxu1  ;;  %v4755_v50 = vpop.f32.mrb[197].mxu0 }
 0x280   :  { %v4756_v54 = vadd.f32 %v4755_v50, %v4754_v13  ;;  %v4795_v62 = vpop.f32.mrb[197].mxu1  ;;  %v4757_v12 = vpop.f32.mrb[198].mxu0 }
 0x281   :  { %v4796_v61 = vadd.f32 %v4795_v62, %v4794_v33  ;;  %v4797_v53 = vpop.f32.mrb[198].mxu1  ;;  %v4758_v3 = vpop.f32.mrb[199].mxu0  ;;  %v3215_v33 = vadd.f32 %v7222_v29, %v7239_v23 }
 0x282   :  { %v7272_v14 = vadd.f32 %v4756_v54, %v3207_v0  ;;  %v4759_v18 = vadd.f32 %v4758_v3, %v4757_v12  ;;  %v4798_v20 = vpop.f32.mrb[199].mxu1 }
 0x283   :  { %v4799_v8 = vadd.f32 %v4798_v20, %v4797_v53  ;;  %v3369_v63 = vadd.f32 %v4796_v61, %v7234_v22  ;;  %v3218_v53 = vadd.f32 %v7222_v29, %v7245_v24 }
 0x284   :  { %v7275_v40 = vadd.f32 %v4759_v18, %v3210_v4 }
 0x285   :  { %v3372_v28 = vadd.f32 %v4799_v8, %v7236_v45 }
 0x286   :  { %v4760_v59 = vpop.f32.mrb[200].mxu0 }
 0x287   :  { %v4800_v2 = vpop.f32.mrb[200].mxu1  ;;  %v4761_v13 = vpop.f32.mrb[201].mxu0 }
 0x288   :  { %v4762_v50 = vadd.f32 %v4761_v13, %v4760_v59  ;;  %v4801_v62 = vpop.f32.mrb[201].mxu1  ;;  %v4763_v32 = vpop.f32.mrb[202].mxu0 }
 0x289   :  { %v4802_v0 = vadd.f32 %v4801_v62, %v4800_v2  ;;  %v4803_v54 = vpop.f32.mrb[202].mxu1  ;;  %v4764_v12 = vpop.f32.mrb[203].mxu0  ;;  %v3223_v2 = vadd.f32 %v7222_v29, %v7250_v6 }
 0x28a   :  { %v7282_v22 = vadd.f32 %v4762_v50, %v3215_v33  ;;  %v4765_v61 = vadd.f32 %v4764_v12, %v4763_v32  ;;  %v4804_v3 = vpop.f32.mrb[203].mxu1 }
 0x28b   :  { %v4805_v45 = vadd.f32 %v4804_v3, %v4803_v54  ;;  %v3377_v4 = vadd.f32 %v4802_v0, %v7243_v48  ;;  %v3226_v48 = vadd.f32 %v7222_v29, %v7256_v10  ;;  %v2750_v29 = vmax.f32 %v7164_v56, 0.0 }
 0x28c   :  { %v7285_v18 = vadd.f32 %v4765_v61, %v3218_v53  ;;  %v2749_v56 = vmax.f32 %v7161_v51, 0.0  ;;  %v2754_v51 = vmax.f32 %v7180_v52, 0.0 }
 0x28d   :  { %v7288_v23 = vadd.f32 %v4805_v45, %v7247_v35 }
 0x28e   :  { %v4766_v20 = vpop.f32.mrb[204].mxu0 }
 0x28f   :  { %v4806_v8 = vpop.f32.mrb[204].mxu1  ;;  %v4767_v59 = vpop.f32.mrb[205].mxu0 }
 0x290   :  { %v4768_v13 = vadd.f32 %v4767_v59, %v4766_v20  ;;  %v4807_v24 = vpop.f32.mrb[205].mxu1  ;;  %v4769_v33 = vpop.f32.mrb[206].mxu0 }
 0x291   :  { %v4808_v50 = vadd.f32 %v4807_v24, %v4806_v8  ;;  %v4809_v62 = vpop.f32.mrb[206].mxu1  ;;  %v4770_v32 = vpop.f32.mrb[207].mxu0 }
 0x292   :  { %v7294_v0 = vadd.f32 %v4768_v13, %v3223_v2  ;;  %v4771_v54 = vadd.f32 %v4770_v32, %v4769_v33  ;;  %v4810_v35 = vpop.f32.mrb[207].mxu1  ;;  %v2751_v32 = vmax.f32 %v7167_v42, 0.0 }
 0x293   :  { %v4811_v12 = vadd.f32 %v4810_v35, %v4809_v62  ;;  %v3385_v53 = vadd.f32 %v4808_v50, %v7254_v44  ;;  %v2748_v44 = vmax.f32 %v7158_v16, 0.0 }
 0x294   :  { %v7297_v61 = vadd.f32 %v4771_v54, %v3226_v48 }
 0x295   :  { %v3388_v6 = vadd.f32 %v4811_v12, %v7258_v26 }
 0x296   :  { %v4912_v3 = vpop.f32.mrb[208].mxu0 }
 0x297   :  { %v4812_v45 = vpop.f32.mrb[208].mxu1  ;;  %v3466_v20 = vadd.f32 %v4912_v3, %v3369_v63  ;;  %v3457_v8 = vpop.f32.mrb[209].mxu0 }
 0x298   :  { %v4813_v59 = vpop.f32.mrb[209].mxu1  ;;  %v3458_v24 = vadd.f32 %v3457_v8, %v3361_v55  ;;  %v4913_v47 = vpop.f32.mrb[210].mxu0 }
 0x299   :  { %v3522_v10 = vmax.f32 %v3466_v20, 0.0  ;;  %v4814_v2 = vadd.f32 %v4813_v59, %v4812_v45  ;;  %v4815_v13 = vpop.f32.mrb[210].mxu1  ;;  %v3469_v33 = vadd.f32 %v4913_v47, %v3372_v28  ;;  %v3460_v62 = vpop.f32.mrb[211].mxu0 }
 0x29a   :  { %v3520_v50 = vmax.f32 %v3458_v24, 0.0  ;;  %v4816_v26 = vpop.f32.mrb[211].mxu1  ;;  %v3461_v48 = vadd.f32 %v3460_v62, %v7268_v36 }
 0x29b   :  { %v3538_v63 = vmax.f32 %v2750_v29, %v3522_v10  ;;  %v3523_v54 = vmax.f32 %v3469_v33, 0.0  ;;  %v4817_v35 = vadd.f32 %v4816_v26, %v4815_v13  ;;  %v3393_v55 = vadd.f32 %v4814_v2, %v7262_v15 }
 0x29c   :  { %v3536_v12 = vmax.f32 %v2748_v44, %v3520_v50  ;;  %v3521_v3 = vmax.f32 %v3461_v48, 0.0  ;;  %v2752_v10 = vmax.f32 %v7170_v31, 0.0  ;;  %v2753_v48 = vmax.f32 %v7173_v30, 0.0 }
 0x29d   :  { %v3554_v47 = vmax.f32 %v7004_v5, %v3538_v63  ;;  %v3539_v28 = vmax.f32 %v2751_v32, %v3523_v54  ;;  %v3396_v16 = vadd.f32 %v4817_v35, %v7265_v21 }
 0x29e   :  { %v3552_v45 = vmax.f32 %v7008_v27, %v3536_v12  ;;  %v3537_v42 = vmax.f32 %v2749_v56, %v3521_v3  ;;  %v4916_v20 = vpop.f32.mrb[212].mxu0 }
 0x29f   :  { %v3555_v36 = vmax.f32 %v7011_v25, %v3539_v28  ;;  %v4818_v8 = vpop.f32.mrb[212].mxu1  ;;  %v3482_v59 = vadd.f32 %v4916_v20, %v3385_v53  ;;  %v3473_v24 = vpop.f32.mrb[213].mxu0  ;;  %v2755_v53 = vmax.f32 %v7183_v34, 0.0  ;;  %v2756_v20 = vmax.f32 %v7188_v19, 0.0 }
 0x2a0   :  { %v3553_v15 = vmax.f32 %v7014_v11, %v3537_v42  ;;  %v4819_v29 = vpop.f32.mrb[213].mxu1  ;;  %v3474_v5 = vadd.f32 %v3473_v24, %v3377_v4  ;;  %v4917_v2 = vpop.f32.mrb[214].mxu0  ;;  %v2758_v42 = vmax.f32 %v7196_v43, 0.0 }
 0x2a1   :  { %v3999_v13 = vpack.c.bf16 %v3555_v36, %v3554_v47  ;;  %v3526_v21 = vmax.f32 %v3482_v59, 0.0  ;;  %v4820_v33 = vadd.f32 %v4819_v29, %v4818_v8  ;;  %v4821_v27 = vpop.f32.mrb[214].mxu1  ;;  %v3485_v62 = vadd.f32 %v4917_v2, %v3388_v6  ;;  %v3476_v44 = vpop.f32.mrb[215].mxu0 }
 0x2a2   :  { %v3994_v50 = vpack.c.bf16 %v3553_v15, %v3552_v45  ;;  %v3524_v25 = vmax.f32 %v3474_v5, 0.0  ;;  %v4822_v32 = vpop.f32.mrb[215].mxu1  ;;  %v3477_v11 = vadd.f32 %v3476_v44, %v7288_v23  ;;  %v2759_v29 = vmax.f32 %v7199_v57, 0.0 }
 0x2a3   :  { %4031 = vst [vmem:[%s7372_s6 + $0x8] sm:$0xff] %v3999_v13   ;;  %v3542_v31 = vmax.f32 %v2754_v51, %v3526_v21  ;;  %v3527_v52 = vmax.f32 %v3485_v62, 0.0  ;;  %v4823_v4 = vadd.f32 %v4822_v32, %v4821_v27  ;;  %v3401_v26 = vadd.f32 %v4820_v33, %v7272_v14 }
 0x2a4   :  { %3995 = vst [vmem:[%s7372_s6] sm:$0xff] %v3994_v50   ;;  %v3540_v6 = vmax.f32 %v2752_v10, %v3524_v25  ;;  %v3525_v34 = vmax.f32 %v3477_v11, 0.0  ;;  %v2757_v13 = vmax.f32 %v7191_v38, 0.0 }
 0x2a5   :  { %v3558_v63 = vmax.f32 %v7033_v41, %v3542_v31  ;;  %v3543_v23 = vmax.f32 %v2755_v53, %v3527_v52  ;;  %v3404_v54 = vadd.f32 %v4823_v4, %v7275_v40 }
 0x2a6   :  { %v3556_v35 = vmax.f32 %v7037_v37, %v3540_v6  ;;  %v3541_v56 = vmax.f32 %v2753_v48, %v3525_v34  ;;  %v4920_v12 = vpop.f32.mrb[216].mxu0 }
 0x2a7   :  { %v3559_v3 = vmax.f32 %v7041_v1, %v3543_v23  ;;  %v4824_v14 = vpop.f32.mrb[216].mxu1  ;;  %v3498_v47 = vadd.f32 %v4920_v12, %v3401_v26  ;;  %v3489_v28 = vpop.f32.mrb[217].mxu0  ;;  %v7437_v12 = vld [vmem:[#allocation19_spill] sm:$0xff] }
 0x2a8   :  { %v3557_v45 = vmax.f32 %v7044_v60, %v3541_v56  ;;  %v4825_v30 = vpop.f32.mrb[217].mxu1  ;;  %v3490_v41 = vadd.f32 %v3489_v28, %v3393_v55  ;;  %v4921_v36 = vpop.f32.mrb[218].mxu0 }
 0x2a9   :  { %v4009_v8 = vpack.c.bf16 %v3559_v3, %v3558_v63  ;;  %v3530_v40 = vmax.f32 %v3498_v47, 0.0  ;;  %v4826_v59 = vadd.f32 %v4825_v30, %v4824_v14  ;;  %v4827_v37 = vpop.f32.mrb[218].mxu1  ;;  %v3501_v24 = vadd.f32 %v4921_v36, %v3404_v54  ;;  %v3492_v15 = vpop.f32.mrb[219].mxu0  ;;  %v7440_v36 = vld [vmem:[#allocation4_spill] sm:$0xff] }
 0x2aa   :  { %v4004_v51 = vpack.c.bf16 %v3557_v45, %v3556_v35  ;;  %v3528_v1 = vmax.f32 %v3490_v41, 0.0  ;;  %v4828_v10 = vpop.f32.mrb[219].mxu1  ;;  %v3493_v5 = vadd.f32 %v3492_v15, %v3396_v16  ;;  %v2761_v63 = vmax.f32 %v7207_v17, 0.0  ;;  %v7439_v45 = vld [vmem:[#allocation7_spill] sm:$0xff] }
 0x2ab   :  { %4033 = vst [vmem:[%s7372_s6 + $0x18] sm:$0xff] %v4009_v8   ;;  %v3546_v60 = vmax.f32 %v2758_v42, %v3530_v40  ;;  %v3531_v19 = vmax.f32 %v3501_v24, 0.0  ;;  %v4829_v43 = vadd.f32 %v4828_v10, %v4827_v37  ;;  %v3409_v55 = vadd.f32 %v4826_v59, %v7282_v22 }
 0x2ac   :  { %4032 = vst [vmem:[%s7372_s6 + $0x10] sm:$0xff] %v4004_v51   ;;  %v3544_v2 = vmax.f32 %v2756_v20, %v3528_v1  ;;  %v3529_v21 = vmax.f32 %v3493_v5, 0.0  ;;  %v2762_v3 = vmax.f32 %v7437_v12, 0.0  ;;  %v2763_v42 = vmax.f32 %v7439_v45, 0.0 }
 0x2ad   :  { %v3562_v57 = vmax.f32 %v7061_v46, %v3546_v60  ;;  %v3547_v16 = vmax.f32 %v2759_v29, %v3531_v19  ;;  %v3412_v33 = vadd.f32 %v4829_v43, %v7285_v18  ;;  %v2760_v18 = vmax.f32 %v7204_v49, 0.0 }
 0x2ae   :  { %v3560_v27 = vmax.f32 %v7065_v9, %v3544_v2  ;;  %v3545_v62 = vmax.f32 %v2757_v13, %v3529_v21  ;;  %v4924_v44 = vpop.f32.mrb[220].mxu0 }
 0x2af   :  { %v3563_v50 = vmax.f32 %v7069_v39, %v3547_v16  ;;  %v4830_v22 = vpop.f32.mrb[220].mxu1  ;;  %v3505_v25 = vpop.f32.mrb[221].mxu0 }
 0x2b0   :  { %v3561_v53 = vmax.f32 %v7072_v58, %v3545_v62  ;;  %v4831_v32 = vpop.f32.mrb[221].mxu1  ;;  %v3506_v11 = vadd.f32 %v3505_v25, %v3409_v55  ;;  %v4925_v31 = vpop.f32.mrb[222].mxu0 }
 0x2b1   :  { %v4019_v38 = vpack.c.bf16 %v3563_v50, %v3562_v57  ;;  %v4832_v52 = vadd.f32 %v4831_v32, %v4830_v22  ;;  %v4833_v4 = vpop.f32.mrb[222].mxu1  ;;  %v3508_v46 = vpop.f32.mrb[223].mxu0 }
 0x2b2   :  { %v4014_v26 = vpack.c.bf16 %v3561_v53, %v3560_v27  ;;  %v3532_v6 = vmax.f32 %v3506_v11, 0.0  ;;  %v4834_v9 = vpop.f32.mrb[223].mxu1  ;;  %v3509_v48 = vadd.f32 %v3508_v46, %v3412_v33 }
 0x2b3   :  { %4035 = vst [vmem:[%s7372_s6 + $0x28] sm:$0xff] %v4019_v38   ;;  %v3417_v39 = vadd.f32 %v4832_v52, %v7294_v0  ;;  %v4835_v58 = vadd.f32 %v4834_v9, %v4833_v4  ;;  %v7438_v0 = vld [vmem:[#allocation3_spill] sm:$0xff] }
 0x2b4   :  { %4034 = vst [vmem:[%s7372_s6 + $0x20] sm:$0xff] %v4014_v26   ;;  %v3548_v34 = vmax.f32 %v2760_v18, %v3532_v6  ;;  %v3533_v23 = vmax.f32 %v3509_v48, 0.0 }
 0x2b5   :  { %v3514_v54 = vadd.f32 %v4924_v44, %v3417_v39  ;;  %v3420_v49 = vadd.f32 %v4835_v58, %v7297_v61 }
 0x2b6   :  { %v3564_v35 = vmax.f32 %v7089_v7, %v3548_v34  ;;  %v3549_v56 = vmax.f32 %v2761_v63, %v3533_v23  ;;  %v7441_v7 = vld [vmem:[#allocation6_spill] sm:$0xff] }
 0x2b7   :  { %v3534_v14 = vmax.f32 %v3514_v54, 0.0  ;;  %v3517_v47 = vadd.f32 %v4925_v31, %v3420_v49 }
 0x2b8   :  { %v3565_v28 = vmax.f32 %v7438_v0, %v3549_v56 }
 0x2b9   :  { %v3550_v30 = vmax.f32 %v2762_v3, %v3534_v14  ;;  %v3535_v20 = vmax.f32 %v3517_v47, 0.0 }
 0x2ba   :  { %v4024_v41 = vpack.c.bf16 %v3565_v28, %v3564_v35 }
 0x2bb   :  { %v3566_v17 = vmax.f32 %v7440_v36, %v3550_v30  ;;  %v3551_v8 = vmax.f32 %v2763_v42, %v3535_v20 }
 0x2bc   :  { %4036 = vst [vmem:[%s7372_s6 + $0x30] sm:$0xff] %v4024_v41  }
 0x2bd   :  { %v3567_v61 = vmax.f32 %v7441_v7, %v3551_v8 }
 0x2bf   :  { %v4029_v40 = vpack.c.bf16 %v3567_v61, %v3566_v17 }
 0x2c1   :  { %4037 = vst [vmem:[%s7372_s6 + $0x38] sm:$0xff] %v4029_v40  }

// kernel: convnet_forward.5
= control target key start
LH: loop header
LB: loop body
LE: loop exit
PB: predicated region body
PF: predicated region fallthrough
CT: control target
= control target key end

     0   :  { %10 = vsyncpa [#allocation4], 0  ;;  %s10191_s18 = smov 0   ;;  %s11647_s0 = inlined_call_operand.vmem [shape: bf16[2,4096], index: 0, kind: input, shape index: {}]   ;;  %s11648_s1 = inlined_call_operand.vmem [shape: bf16[4096,1024], index: 1, kind: input, shape index: {}]   ;;  %s11649_s2 = inlined_call_operand.vmem [shape: f32[1,1024], index: 2, kind: input, shape index: {}]   ;;  %s11650_s3 = inlined_call_operand.vmem [shape: bf16[1024,128], index: 3, kind: input, shape index: {}]   ;;  %s11651_s4 = inlined_call_operand.vmem [shape: f32[1,128], index: 4, kind: input, shape index: {}]   ;;  %s11652_s5 = inlined_call_operand.hbm [shape: f32[2,128], index: 5, kind: output, shape index: {}]  }
   0x1 LB: > { %s10197_s19 = sadd.s32 4294967295, %s10155_s18   ;;  %p8734_p0 = scmp.ge.s32.totalorder %s10155_s18, 1  ;;  %s10155_s18 = sphi %s10191_s18, %s16_s18  }
   0x2   : > { %p195_p1 = scmp.lt.s32.totalorder %s10155_s18, 3 }
   0x4   : > { %p196_p2 = pnand %p8734_p0, %p195_p1 }
   0x5   : > { %s8735_s20 = sshll.u32 (!%p196_p2), %s10197_s19, 4  ;;  %s8736_s21 = sshll.u32 (!%p196_p2), %s10197_s19, 8 }
   0x6   : > { %199 = sbr.rel (%p196_p2) target bundleno = 1551 (0x60f), region = 40  ;;  %p224_p3 = scmp.lt.s32.totalorder (!%p196_p2), %s8735_s20, 31 }
   0x7   : > { %p229_p4 = scmp.lt.s32.totalorder (!%p196_p2), %s8736_s21, 511  ;;  %p8739_p5 = scmp.ne.s32.totalorder (!%p196_p2), %s10197_s19, 0 }
   0xd   : > { %s11654_s20 = smov (!%p224_p3, %s8735_s20), 31  ;;  %s11656_s21 = smov (!%p229_p4, %s8736_s21), 511 }
   0xe   : > { %s10206_s24 = scalar_lea.vmem %s11647_s0, %s11654_s20  ;;  %s9834_s25 = sshll.u32 %s11656_s21, 5  ;;  %v10157_v0 = vmov (!%p8739_p5), 0.0  }
   0xf   : > { %s10211_s28 = scalar_lea.vmem %s11648_s1, %s9834_s25  ;;  %239 = sbr.rel (%p8739_p5) target bundleno = 22 (0x16), region = 44  ;;  %240 = vst [vmem:[#allocation2] sm:$0xff] (!%p8739_p5), %v10157_v0  ;;  %241 = vst [vmem:[#allocation2 + $0x8] sm:$0xff] (!%p8739_p5), %v10157_v0 }
  0x16 PF: > { %v246_v1 = vld [vmem:[%s10211_s28] sm:$0xff]  ;;  %v247_v3 = vld [vmem:[%s10211_s28 + $0x8] sm:$0xff]  ;;  %v10158_v33 = vmov 1966171168   ;;  %v1276_v35 = vlaneseq  ;;  %p9764_p6 = scmp.ne.s32.totalorder %s10197_s19, 1 }
  0x17   : > { %v250_v2 = vld [vmem:[%s10211_s28 + $0x20] sm:$0xff]  ;;  %v251_v5 = vld [vmem:[%s10211_s28 + $0x28] sm:$0xff]  ;;  %v1274_v34 = vunpack.c.l.s4 %v10158_v33 }
  0x18   : > { %v8741_v4 = vcombine.high %v246_v1, %v250_v2  ;;  %v8740_v6 = vcombine.low %v246_v1, %v250_v2  ;;  %v254_v7 = vld [vmem:[%s10211_s28 + $0x40] sm:$0xff]  ;;  %v8743_v9 = vcombine.high %v247_v3, %v251_v5  ;;  %v8742_v10 = vcombine.low %v247_v3, %v251_v5  ;;  %v255_v12 = vld [vmem:[%s10211_s28 + $0x48] sm:$0xff] }
  0x19   : > { %v258_v8 = vld [vmem:[%s10211_s28 + $0x60] sm:$0xff]  ;;  %v259_v13 = vld [vmem:[%s10211_s28 + $0x68] sm:$0xff]  ;;  %v1275_v44 = vunpack.c.0.s8 %v1274_v34  ;;  %v10236_v45 = vshrl.u32 %v1276_v35, 7 }
  0x1a   : > { %v8749_v11 = vcombine.high %v254_v7, %v258_v8  ;;  %v262_v14 = vld [vmem:[%s10211_s28 + $0x80] sm:$0xff]  ;;  %6506 = vmatprep.subr.bf16.mxu0 %v8741_v4  ;;  %v8751_v15 = vcombine.high %v255_v12, %v259_v13  ;;  %v263_v17 = vld [vmem:[%s10211_s28 + $0x88] sm:$0xff]  ;;  %6834 = vmatprep.subr.bf16.mxu1 %v8743_v9  ;;  %v8748_v19 = vcombine.low %v254_v7, %v258_v8 }
  0x1b   : > { %v266_v16 = vld [vmem:[%s10211_s28 + $0xa0] sm:$0xff]  ;;  %v267_v18 = vld [vmem:[%s10211_s28 + $0xa8] sm:$0xff]  ;;  %6507 = vmatpush1.bf16.msra.mxu0 %v8740_v6  ;;  %6835 = vmatpush1.bf16.msra.mxu1 %v8742_v10  ;;  %v8750_v20 = vcombine.low %v255_v12, %v259_v13  ;;  %v10243_v54 = vsub.s32 %v1275_v44, %v10236_v45 }
  0x1c   : > { %6508 = vmatprep.subr.bf16.mxu0 %v8749_v11  ;;  %v8757_v21 = vcombine.high %v262_v14, %v266_v16  ;;  %6836 = vmatprep.subr.bf16.mxu1 %v8751_v15  ;;  %v8759_v22 = vcombine.high %v263_v17, %v267_v18  ;;  %v270_v23 = vld [vmem:[%s10211_s28 + $0xc0] sm:$0xff]  ;;  %v271_v25 = vld [vmem:[%s10211_s28 + $0xc8] sm:$0xff]  ;;  %v8756_v27 = vcombine.low %v262_v14, %v266_v16 }
  0x1d   : > { %v274_v24 = vld [vmem:[%s10211_s28 + $0xe0] sm:$0xff]  ;;  %v275_v26 = vld [vmem:[%s10211_s28 + $0xe8] sm:$0xff]  ;;  %v8758_v28 = vcombine.low %v263_v17, %v267_v18 }
  0x1e   : > { %v8765_v29 = vcombine.high %v270_v23, %v274_v24  ;;  %v8767_v30 = vcombine.high %v271_v25, %v275_v26  ;;  %v278_v31 = vld [vmem:[%s10211_s28 + $0x100] sm:$0xff]  ;;  %v279_v36 = vld [vmem:[%s10211_s28 + $0x108] sm:$0xff]  ;;  %v8764_v38 = vcombine.low %v270_v23, %v274_v24  ;;  %v8766_v39 = vcombine.low %v271_v25, %v275_v26 }
  0x1f   : > { %6509 = vmatpush1.bf16.msra.mxu0 %v8748_v19  ;;  %6837 = vmatpush1.bf16.msra.mxu1 %v8750_v20  ;;  %v282_v32 = vld [vmem:[%s10211_s28 + $0x120] sm:$0xff]  ;;  %v283_v37 = vld [vmem:[%s10211_s28 + $0x128] sm:$0xff] }
  0x20   : > { %6510 = vmatprep.subr.bf16.mxu0 %v8757_v21  ;;  %6838 = vmatprep.subr.bf16.mxu1 %v8759_v22  ;;  %v8773_v40 = vcombine.high %v278_v31, %v282_v32  ;;  %v8775_v41 = vcombine.high %v279_v36, %v283_v37  ;;  %v286_v42 = vld [vmem:[%s10211_s28 + $0x140] sm:$0xff]  ;;  %v287_v46 = vld [vmem:[%s10211_s28 + $0x148] sm:$0xff]  ;;  %v8772_v48 = vcombine.low %v278_v31, %v282_v32 }
  0x21   : > { %v290_v43 = vld [vmem:[%s10211_s28 + $0x160] sm:$0xff]  ;;  %v291_v47 = vld [vmem:[%s10211_s28 + $0x168] sm:$0xff]  ;;  %v8774_v49 = vcombine.low %v279_v36, %v283_v37 }
  0x22   : > { %v8781_v50 = vcombine.high %v286_v42, %v290_v43  ;;  %v8783_v51 = vcombine.high %v287_v46, %v291_v47  ;;  %v294_v52 = vld [vmem:[%s10211_s28 + $0x180] sm:$0xff]  ;;  %v295_v55 = vld [vmem:[%s10211_s28 + $0x188] sm:$0xff]  ;;  %v8780_v57 = vcombine.low %v286_v42, %v290_v43  ;;  %v8782_v58 = vcombine.low %v287_v46, %v291_v47 }
  0x23   : > { %6511 = vmatpush1.bf16.msra.mxu0 %v8756_v27  ;;  %6839 = vmatpush1.bf16.msra.mxu1 %v8758_v28  ;;  %v298_v53 = vld [vmem:[%s10211_s28 + $0x1a0] sm:$0xff]  ;;  %v299_v56 = vld [vmem:[%s10211_s28 + $0x1a8] sm:$0xff] }
  0x24   : > { %6512 = vmatprep.subr.bf16.mxu0 %v8765_v29  ;;  %6840 = vmatprep.subr.bf16.mxu1 %v8767_v30  ;;  %v8789_v59 = vcombine.high %v294_v52, %v298_v53  ;;  %v10248_v60 = vld [vmem:[%s10206_s24] sm:$0xff]  ;;  %v8791_v61 = vcombine.high %v295_v55, %v299_v56  ;;  %v303_v1 = vld [vmem:[%s10211_s28 + $0x1c8] sm:$0xff]  ;;  %v8788_v3 = vcombine.low %v294_v52, %v298_v53 }
  0x25   : > { %v302_v62 = vld [vmem:[%s10211_s28 + $0x1c0] sm:$0xff]  ;;  %v10254_v0 = vrot.slane %v10248_v60, %v10243_v54  ;;  %v307_v2 = vld [vmem:[%s10211_s28 + $0x1e8] sm:$0xff]  ;;  %v8790_v5 = vcombine.low %v295_v55, %v299_v56 }
  0x26   : > { %v306_v63 = vld [vmem:[%s10211_s28 + $0x1e0] sm:$0xff]  ;;  %v8799_v7 = vcombine.high %v303_v1, %v307_v2  ;;  %v311_v11 = vld [vmem:[%s10211_s28 + $0x208] sm:$0xff]  ;;  %v8798_v14 = vcombine.low %v303_v1, %v307_v2 }
  0x27   : > { %6513 = vmatpush1.bf16.msra.mxu0 %v8764_v38  ;;  %6841 = vmatpush1.bf16.msra.mxu1 %v8766_v39  ;;  %v1287_v4 = vcombine.high %v10254_v0, %v10254_v0  ;;  %v8797_v6 = vcombine.high %v302_v62, %v306_v63  ;;  %v310_v8 = vld [vmem:[%s10211_s28 + $0x200] sm:$0xff]  ;;  %v315_v12 = vld [vmem:[%s10211_s28 + $0x228] sm:$0xff]  ;;  %v8796_v13 = vcombine.low %v302_v62, %v306_v63 }
  0x28   : > { %6514 = vmatprep.subr.bf16.mxu0 %v8773_v40  ;;  %6842 = vmatprep.subr.bf16.mxu1 %v8775_v41  ;;  %v314_v9 = vld [vmem:[%s10211_s28 + $0x220] sm:$0xff]  ;;  %v8807_v16 = vcombine.high %v311_v11, %v315_v12  ;;  %v319_v19 = vld [vmem:[%s10211_s28 + $0x248] sm:$0xff]  ;;  %v8806_v22 = vcombine.low %v311_v11, %v315_v12 }
  0x29   : > { %v10263_v10 = vrot.slane %v1287_v4, %v10243_v54  ;;  %v8805_v15 = vcombine.high %v310_v8, %v314_v9  ;;  %v318_v17 = vld [vmem:[%s10211_s28 + $0x240] sm:$0xff]  ;;  %v323_v20 = vld [vmem:[%s10211_s28 + $0x268] sm:$0xff]  ;;  %v8804_v21 = vcombine.low %v310_v8, %v314_v9 }
  0x2a   : > { %v322_v18 = vld [vmem:[%s10211_s28 + $0x260] sm:$0xff]  ;;  %v8815_v24 = vcombine.high %v319_v19, %v323_v20  ;;  %v327_v27 = vld [vmem:[%s10211_s28 + $0x288] sm:$0xff]  ;;  %v8814_v30 = vcombine.low %v319_v19, %v323_v20 }
  0x2b   : > { %6515 = vmatpush1.bf16.msra.mxu0 %v8772_v48  ;;  %6843 = vmatpush1.bf16.msra.mxu1 %v8774_v49  ;;  %v8813_v23 = vcombine.high %v318_v17, %v322_v18  ;;  %v326_v25 = vld [vmem:[%s10211_s28 + $0x280] sm:$0xff]  ;;  %v331_v28 = vld [vmem:[%s10211_s28 + $0x2a8] sm:$0xff]  ;;  %v8812_v29 = vcombine.low %v318_v17, %v322_v18 }
  0x2c   : > { %6516 = vmatprep.subr.bf16.mxu0 %v8781_v50  ;;  %6844 = vmatprep.subr.bf16.mxu1 %v8783_v51  ;;  %v330_v26 = vld [vmem:[%s10211_s28 + $0x2a0] sm:$0xff]  ;;  %v8823_v32 = vcombine.high %v327_v27, %v331_v28  ;;  %v335_v35 = vld [vmem:[%s10211_s28 + $0x2c8] sm:$0xff]  ;;  %v8822_v38 = vcombine.low %v327_v27, %v331_v28 }
  0x2d   : > { %6538 = vmatprep.mubr.bf16.mxu0 %v10263_v10  ;;  %6866 = vmatprep.mubr.bf16.mxu1 %v10263_v10  ;;  %v8821_v31 = vcombine.high %v326_v25, %v330_v26  ;;  %v334_v33 = vld [vmem:[%s10211_s28 + $0x2c0] sm:$0xff]  ;;  %v339_v36 = vld [vmem:[%s10211_s28 + $0x2e8] sm:$0xff]  ;;  %v8820_v37 = vcombine.low %v326_v25, %v330_v26 }
  0x2e   : > { %v338_v34 = vld [vmem:[%s10211_s28 + $0x2e0] sm:$0xff]  ;;  %v8831_v40 = vcombine.high %v335_v35, %v339_v36  ;;  %v343_v43 = vld [vmem:[%s10211_s28 + $0x308] sm:$0xff]  ;;  %v8830_v47 = vcombine.low %v335_v35, %v339_v36 }
  0x2f   : > { %6517 = vmatpush1.bf16.msra.mxu0 %v8780_v57  ;;  %6845 = vmatpush1.bf16.msra.mxu1 %v8782_v58  ;;  %v8829_v39 = vcombine.high %v334_v33, %v338_v34  ;;  %v342_v41 = vld [vmem:[%s10211_s28 + $0x300] sm:$0xff]  ;;  %v347_v44 = vld [vmem:[%s10211_s28 + $0x328] sm:$0xff]  ;;  %v8828_v46 = vcombine.low %v334_v33, %v338_v34  ;;  %v10313_v33 = vcombine.high %v10263_v10, %v10263_v10 }
  0x30   : > { %6518 = vmatprep.subr.bf16.mxu0 %v8789_v59  ;;  %6846 = vmatprep.subr.bf16.mxu1 %v8791_v61  ;;  %v346_v42 = vld [vmem:[%s10211_s28 + $0x320] sm:$0xff]  ;;  %v8839_v49 = vcombine.high %v343_v43, %v347_v44  ;;  %v351_v52 = vld [vmem:[%s10211_s28 + $0x348] sm:$0xff]  ;;  %v8838_v56 = vcombine.low %v343_v43, %v347_v44 }
  0x31   : > { %v8837_v48 = vcombine.high %v342_v41, %v346_v42  ;;  %v350_v50 = vld [vmem:[%s10211_s28 + $0x340] sm:$0xff]  ;;  %v355_v53 = vld [vmem:[%s10211_s28 + $0x368] sm:$0xff]  ;;  %v8836_v55 = vcombine.low %v342_v41, %v346_v42 }
  0x32   : > { %v354_v51 = vld [vmem:[%s10211_s28 + $0x360] sm:$0xff]  ;;  %v8847_v58 = vcombine.high %v351_v52, %v355_v53  ;;  %v359_v62 = vld [vmem:[%s10211_s28 + $0x388] sm:$0xff]  ;;  %v8846_v2 = vcombine.low %v351_v52, %v355_v53 }
  0x33   : > { %6519 = vmatpush1.bf16.msra.mxu0 %v8788_v3  ;;  %6847 = vmatpush1.bf16.msra.mxu1 %v8790_v5  ;;  %v8845_v57 = vcombine.high %v350_v50, %v354_v51  ;;  %v358_v59 = vld [vmem:[%s10211_s28 + $0x380] sm:$0xff]  ;;  %v363_v63 = vld [vmem:[%s10211_s28 + $0x3a8] sm:$0xff]  ;;  %v8844_v1 = vcombine.low %v350_v50, %v354_v51 }
  0x34   : > { %6520 = vmatprep.subr.bf16.mxu0 %v8797_v6  ;;  %6848 = vmatprep.subr.bf16.mxu1 %v8799_v7  ;;  %v362_v61 = vld [vmem:[%s10211_s28 + $0x3a0] sm:$0xff]  ;;  %v8855_v4 = vcombine.high %v359_v62, %v363_v63  ;;  %v367_v7 = vld [vmem:[%s10211_s28 + $0x3c8] sm:$0xff]  ;;  %v8854_v11 = vcombine.low %v359_v62, %v363_v63 }
  0x35   : > { %v8853_v3 = vcombine.high %v358_v59, %v362_v61  ;;  %v366_v5 = vld [vmem:[%s10211_s28 + $0x3c0] sm:$0xff]  ;;  %v371_v8 = vld [vmem:[%s10211_s28 + $0x3e8] sm:$0xff]  ;;  %v8852_v9 = vcombine.low %v358_v59, %v362_v61 }
  0x36   : > { %v370_v6 = vld [vmem:[%s10211_s28 + $0x3e0] sm:$0xff]  ;;  %v379_v17 = vld [vmem:[%s10211_s28 + $0x428] sm:$0xff]  ;;  %v8862_v19 = vcombine.low %v367_v7, %v371_v8 }
  0x37   : > { %6521 = vmatpush1.bf16.msra.mxu0 %v8796_v13  ;;  %6849 = vmatpush1.bf16.msra.mxu1 %v8798_v14  ;;  %v8861_v12 = vcombine.high %v366_v5, %v370_v6  ;;  %v8863_v13 = vcombine.high %v367_v7, %v371_v8  ;;  %v374_v14 = vld [vmem:[%s10211_s28 + $0x400] sm:$0xff]  ;;  %v8860_v18 = vcombine.low %v366_v5, %v370_v6  ;;  %v383_v25 = vld [vmem:[%s10211_s28 + $0x448] sm:$0xff] }
  0x38   : > { %6522 = vmatprep.subr.bf16.mxu0 %v8805_v15  ;;  %6850 = vmatprep.subr.bf16.mxu1 %v8807_v16  ;;  %v378_v15 = vld [vmem:[%s10211_s28 + $0x420] sm:$0xff]  ;;  %v375_v16 = vld [vmem:[%s10211_s28 + $0x408] sm:$0xff] }
  0x39   : > { %v8869_v20 = vcombine.high %v374_v14, %v378_v15  ;;  %v387_v26 = vld [vmem:[%s10211_s28 + $0x468] sm:$0xff]  ;;  %v8868_v27 = vcombine.low %v374_v14, %v378_v15  ;;  %v8870_v28 = vcombine.low %v375_v16, %v379_v17 }
  0x3a   : > { %v395_v34 = vld [vmem:[%s10211_s28 + $0x4a8] sm:$0xff]  ;;  %v8878_v36 = vcombine.low %v383_v25, %v387_v26 }
  0x3b   : > { %6523 = vmatpush1.bf16.msra.mxu0 %v8804_v21  ;;  %6851 = vmatpush1.bf16.msra.mxu1 %v8806_v22  ;;  %v8871_v21 = vcombine.high %v375_v16, %v379_v17  ;;  %v382_v22 = vld [vmem:[%s10211_s28 + $0x440] sm:$0xff]  ;;  %v399_v41 = vld [vmem:[%s10211_s28 + $0x4c8] sm:$0xff] }
  0x3c   : > { %6524 = vmatprep.subr.bf16.mxu0 %v8813_v23  ;;  %6852 = vmatprep.subr.bf16.mxu1 %v8815_v24  ;;  %v386_v23 = vld [vmem:[%s10211_s28 + $0x460] sm:$0xff]  ;;  %v10305_v24 = vrot.slane %v10254_v0, %v10243_v54  ;;  %v391_v0 = vld [vmem:[%s10211_s28 + $0x488] sm:$0xff] }
  0x3d   : > { %v8876_v35 = vcombine.low %v382_v22, %v386_v23  ;;  %v403_v42 = vld [vmem:[%s10211_s28 + $0x4e8] sm:$0xff]  ;;  %v8886_v44 = vcombine.low %v391_v0, %v395_v34 }
  0x3e   : > { %v407_v50 = vld [vmem:[%s10211_s28 + $0x508] sm:$0xff]  ;;  %v8894_v53 = vcombine.low %v399_v41, %v403_v42 }
  0x3f   : > { %6525 = vmatpush1.bf16.msra.mxu0 %v8812_v29  ;;  %6853 = vmatpush1.bf16.msra.mxu1 %v8814_v30  ;;  %v8877_v29 = vcombine.high %v382_v22, %v386_v23  ;;  %v8879_v30 = vcombine.high %v383_v25, %v387_v26  ;;  %v411_v51 = vld [vmem:[%s10211_s28 + $0x528] sm:$0xff] }
  0x40   : > { %6526 = vmatprep.subr.bf16.mxu0 %v8821_v31  ;;  %6854 = vmatprep.subr.bf16.mxu1 %v8823_v32  ;;  %v390_v31 = vld [vmem:[%s10211_s28 + $0x480] sm:$0xff]  ;;  %v415_v59 = vld [vmem:[%s10211_s28 + $0x548] sm:$0xff]  ;;  %v8902_v63 = vcombine.low %v407_v50, %v411_v51 }
  0x41   : > { %v394_v32 = vld [vmem:[%s10211_s28 + $0x4a0] sm:$0xff]  ;;  %v419_v61 = vld [vmem:[%s10211_s28 + $0x568] sm:$0xff] }
  0x42   : > { %v8884_v43 = vcombine.low %v390_v31, %v394_v32  ;;  %v423_v5 = vld [vmem:[%s10211_s28 + $0x588] sm:$0xff]  ;;  %v8910_v8 = vcombine.low %v415_v59, %v419_v61 }
  0x43   : > { %6527 = vmatpush1.bf16.msra.mxu0 %v8820_v37  ;;  %6855 = vmatpush1.bf16.msra.mxu1 %v8822_v38  ;;  %v8885_v37 = vcombine.high %v390_v31, %v394_v32  ;;  %v8887_v38 = vcombine.high %v391_v0, %v395_v34  ;;  %v427_v6 = vld [vmem:[%s10211_s28 + $0x5a8] sm:$0xff] }
  0x44   : > { %6528 = vmatprep.subr.bf16.mxu0 %v8829_v39  ;;  %6856 = vmatprep.subr.bf16.mxu1 %v8831_v40  ;;  %v398_v39 = vld [vmem:[%s10211_s28 + $0x4c0] sm:$0xff]  ;;  %v431_v14 = vld [vmem:[%s10211_s28 + $0x5c8] sm:$0xff]  ;;  %v8918_v17 = vcombine.low %v423_v5, %v427_v6 }
  0x45   : > { %v402_v40 = vld [vmem:[%s10211_s28 + $0x4e0] sm:$0xff]  ;;  %v435_v15 = vld [vmem:[%s10211_s28 + $0x5e8] sm:$0xff] }
  0x46   : > { %v8892_v52 = vcombine.low %v398_v39, %v402_v40  ;;  %v439_v22 = vld [vmem:[%s10211_s28 + $0x608] sm:$0xff]  ;;  %v8926_v26 = vcombine.low %v431_v14, %v435_v15 }
  0x47   : > { %6529 = vmatpush1.bf16.msra.mxu0 %v8828_v46  ;;  %6857 = vmatpush1.bf16.msra.mxu1 %v8830_v47  ;;  %v8893_v46 = vcombine.high %v398_v39, %v402_v40  ;;  %v8895_v47 = vcombine.high %v399_v41, %v403_v42  ;;  %v443_v23 = vld [vmem:[%s10211_s28 + $0x628] sm:$0xff] }
  0x48   : > { %6530 = vmatprep.subr.bf16.mxu0 %v8837_v48  ;;  %6858 = vmatprep.subr.bf16.mxu1 %v8839_v49  ;;  %v406_v48 = vld [vmem:[%s10211_s28 + $0x500] sm:$0xff]  ;;  %v447_v31 = vld [vmem:[%s10211_s28 + $0x648] sm:$0xff]  ;;  %v8934_v34 = vcombine.low %v439_v22, %v443_v23 }
  0x49   : > { %v410_v49 = vld [vmem:[%s10211_s28 + $0x520] sm:$0xff]  ;;  %v451_v32 = vld [vmem:[%s10211_s28 + $0x668] sm:$0xff] }
  0x4a   : > { %v8900_v62 = vcombine.low %v406_v48, %v410_v49  ;;  %v455_v39 = vld [vmem:[%s10211_s28 + $0x688] sm:$0xff]  ;;  %v8942_v42 = vcombine.low %v447_v31, %v451_v32 }
  0x4b   : > { %6531 = vmatpush1.bf16.msra.mxu0 %v8836_v55  ;;  %6859 = vmatpush1.bf16.msra.mxu1 %v8838_v56  ;;  %v8901_v55 = vcombine.high %v406_v48, %v410_v49  ;;  %v8903_v56 = vcombine.high %v407_v50, %v411_v51  ;;  %v459_v40 = vld [vmem:[%s10211_s28 + $0x6a8] sm:$0xff] }
  0x4c   : > { %6532 = vmatprep.subr.bf16.mxu0 %v8845_v57  ;;  %6860 = vmatprep.subr.bf16.mxu1 %v8847_v58  ;;  %v414_v57 = vld [vmem:[%s10211_s28 + $0x540] sm:$0xff]  ;;  %v463_v48 = vld [vmem:[%s10211_s28 + $0x6c8] sm:$0xff]  ;;  %v8950_v51 = vcombine.low %v455_v39, %v459_v40 }
  0x4d   : > { %v418_v58 = vld [vmem:[%s10211_s28 + $0x560] sm:$0xff]  ;;  %v467_v49 = vld [vmem:[%s10211_s28 + $0x6e8] sm:$0xff] }
  0x4e   : > { %v8908_v7 = vcombine.low %v414_v57, %v418_v58 }
  0x4f   : > { %6533 = vmatpush1.bf16.msra.mxu0 %v8844_v1  ;;  %6861 = vmatpush1.bf16.msra.mxu1 %v8846_v2  ;;  %v8909_v1 = vcombine.high %v414_v57, %v418_v58  ;;  %v8911_v2 = vcombine.high %v415_v59, %v419_v61  ;;  %v471_v57 = vld [vmem:[%s10211_s28 + $0x708] sm:$0xff]  ;;  %v8958_v61 = vcombine.low %v463_v48, %v467_v49 }
  0x50   : > { %6534 = vmatprep.subr.bf16.mxu0 %v8853_v3  ;;  %6862 = vmatprep.subr.bf16.mxu1 %v8855_v4  ;;  %v422_v3 = vld [vmem:[%s10211_s28 + $0x580] sm:$0xff]  ;;  %v475_v58 = vld [vmem:[%s10211_s28 + $0x728] sm:$0xff] }
  0x51   : > { %v426_v4 = vld [vmem:[%s10211_s28 + $0x5a0] sm:$0xff] }
  0x52   : > { %v8916_v16 = vcombine.low %v422_v3, %v426_v4 }
  0x53   : > { %6535 = vmatpush1.bf16.msra.mxu0 %v8852_v9  ;;  %6863 = vmatpush1.bf16.msra.mxu1 %v8854_v11  ;;  %v8917_v9 = vcombine.high %v422_v3, %v426_v4  ;;  %v8919_v11 = vcombine.high %v423_v5, %v427_v6  ;;  %v479_v3 = vld [vmem:[%s10211_s28 + $0x748] sm:$0xff]  ;;  %v8966_v6 = vcombine.low %v471_v57, %v475_v58 }
  0x54   : > { %6536 = vmatprep.subr.bf16.mxu0 %v8861_v12  ;;  %6864 = vmatprep.subr.bf16.mxu1 %v8863_v13  ;;  %v430_v12 = vld [vmem:[%s10211_s28 + $0x5c0] sm:$0xff]  ;;  %v483_v4 = vld [vmem:[%s10211_s28 + $0x768] sm:$0xff] }
  0x55   : > { %v434_v13 = vld [vmem:[%s10211_s28 + $0x5e0] sm:$0xff] }
  0x56   : > { %v8924_v25 = vcombine.low %v430_v12, %v434_v13 }
  0x57   : > { %6537 = vmatpush1.bf16.msra.mxu0 %v8860_v18  ;;  %6865 = vmatpush1.bf16.msra.mxu1 %v8862_v19  ;;  %v8925_v18 = vcombine.high %v430_v12, %v434_v13  ;;  %v8927_v19 = vcombine.high %v431_v14, %v435_v15  ;;  %v487_v12 = vld [vmem:[%s10211_s28 + $0x788] sm:$0xff]  ;;  %v8974_v15 = vcombine.low %v479_v3, %v483_v4 }
  0x58   : > { %6547 = vmatprep.subr.bf16.mxu0 %v8869_v20  ;;  %6875 = vmatprep.subr.bf16.mxu1 %v8871_v21  ;;  %v438_v20 = vld [vmem:[%s10211_s28 + $0x600] sm:$0xff]  ;;  %v491_v13 = vld [vmem:[%s10211_s28 + $0x7a8] sm:$0xff] }
  0x59   : > { %v442_v21 = vld [vmem:[%s10211_s28 + $0x620] sm:$0xff] }
  0x5a   : > { %6539 = vmatmul.mubr.bf16.vlgmr.msra.gmra.mrb[0].mxu0 %v10305_v24  ;;  %6867 = vmatmul.mubr.bf16.vlgmr.msra.gmra.mrb[0].mxu1 %v10305_v24  ;;  %v8932_v0 = vcombine.low %v438_v20, %v442_v21 }
  0x5b   : > { %6548 = vmatpush1.bf16.msra.mxu0 %v8868_v27  ;;  %6876 = vmatpush1.bf16.msra.mxu1 %v8870_v28  ;;  %v8933_v27 = vcombine.high %v438_v20, %v442_v21  ;;  %v8935_v28 = vcombine.high %v439_v22, %v443_v23  ;;  %v1272_v20 = vcombine.high %v10248_v60, %v10248_v60  ;;  %v495_v21 = vld [vmem:[%s10211_s28 + $0x7c8] sm:$0xff] }
  0x5c   : > { %6549 = vmatprep.subr.bf16.mxu0 %v8877_v29  ;;  %6877 = vmatprep.subr.bf16.mxu1 %v8879_v30  ;;  %v446_v29 = vld [vmem:[%s10211_s28 + $0x640] sm:$0xff]  ;;  %v499_v22 = vld [vmem:[%s10211_s28 + $0x7e8] sm:$0xff] }
  0x5d   : > { %6579 = vmatprep.mubr.bf16.mxu0 %v10313_v33  ;;  %6907 = vmatprep.mubr.bf16.mxu1 %v10313_v33  ;;  %v450_v30 = vld [vmem:[%s10211_s28 + $0x660] sm:$0xff]  ;;  %v503_v60 = vld [vmem:[%s10211_s28 + $0x808] sm:$0xff] }
  0x5e   : > { %v8940_v41 = vcombine.low %v446_v29, %v450_v30 }
  0x5f   : > { %6550 = vmatpush1.bf16.msra.mxu0 %v8876_v35  ;;  %6878 = vmatpush1.bf16.msra.mxu1 %v8878_v36  ;;  %v8941_v35 = vcombine.high %v446_v29, %v450_v30  ;;  %v8943_v36 = vcombine.high %v447_v31, %v451_v32  ;;  %v506_v29 = vld [vmem:[%s10211_s28 + $0x820] sm:$0xff]  ;;  %v10378_v30 = vrot.slane %v1272_v20, %v10243_v54  ;;  %v507_v31 = vld [vmem:[%s10211_s28 + $0x828] sm:$0xff] }
  0x60   : > { %6551 = vmatprep.subr.bf16.mxu0 %v8885_v37  ;;  %6879 = vmatprep.subr.bf16.mxu1 %v8887_v38  ;;  %v454_v37 = vld [vmem:[%s10211_s28 + $0x680] sm:$0xff] }
  0x61   : > { %v458_v38 = vld [vmem:[%s10211_s28 + $0x6a0] sm:$0xff] }
  0x62   : > { %v8948_v50 = vcombine.low %v454_v37, %v458_v38  ;;  %v550_v20 = vld [vmem:[%s10211_s28 + $0x980] sm:$0xff] }
  0x63   : > { %6552 = vmatpush1.bf16.msra.mxu0 %v8884_v43  ;;  %6880 = vmatpush1.bf16.msra.mxu1 %v8886_v44  ;;  %v8949_v43 = vcombine.high %v454_v37, %v458_v38  ;;  %v8951_v44 = vcombine.high %v455_v39, %v459_v40  ;;  %v514_v37 = vld [vmem:[%s10211_s28 + $0x860] sm:$0xff]  ;;  %v1288_v38 = vcombine.high %v10378_v30, %v10378_v30  ;;  %v511_v40 = vld [vmem:[%s10211_s28 + $0x848] sm:$0xff] }
  0x64   : > { %6553 = vmatprep.subr.bf16.mxu0 %v8893_v46  ;;  %6881 = vmatprep.subr.bf16.mxu1 %v8895_v47  ;;  %v462_v46 = vld [vmem:[%s10211_s28 + $0x6c0] sm:$0xff]  ;;  %v10388_v39 = vcombine.high %v10305_v24, %v10305_v24 }
  0x65   : > { %v466_v47 = vld [vmem:[%s10211_s28 + $0x6e0] sm:$0xff] }
  0x66   : > { %v8956_v59 = vcombine.low %v462_v46, %v466_v47 }
  0x67   : > { %6554 = vmatpush1.bf16.msra.mxu0 %v8892_v52  ;;  %6882 = vmatpush1.bf16.msra.mxu1 %v8894_v53  ;;  %v8957_v52 = vcombine.high %v462_v46, %v466_v47  ;;  %v8959_v53 = vcombine.high %v463_v48, %v467_v49  ;;  %v518_v47 = vld [vmem:[%s10211_s28 + $0x880] sm:$0xff]  ;;  %v10395_v49 = vrot.slane %v1288_v38, %v10243_v54 }
  0x68   : > { %6555 = vmatprep.subr.bf16.mxu0 %v8901_v55  ;;  %6883 = vmatprep.subr.bf16.mxu1 %v8903_v56  ;;  %v470_v55 = vld [vmem:[%s10211_s28 + $0x700] sm:$0xff] }
  0x69   : > { %v474_v56 = vld [vmem:[%s10211_s28 + $0x720] sm:$0xff] }
  0x6a   : > { %v8964_v5 = vcombine.low %v470_v55, %v474_v56  ;;  %v522_v48 = vld [vmem:[%s10211_s28 + $0x8a0] sm:$0xff] }
  0x6b   : > { %6556 = vmatpush1.bf16.msra.mxu0 %v8900_v62  ;;  %6884 = vmatpush1.bf16.msra.mxu1 %v8902_v63  ;;  %v8965_v62 = vcombine.high %v470_v55, %v474_v56  ;;  %v8967_v63 = vcombine.high %v471_v57, %v475_v58  ;;  %v9013_v55 = vcombine.high %v518_v47, %v522_v48  ;;  %v526_v57 = vld [vmem:[%s10211_s28 + $0x8c0] sm:$0xff] }
  0x6c   : > { %6557 = vmatprep.subr.bf16.mxu0 %v8909_v1  ;;  %6885 = vmatprep.subr.bf16.mxu1 %v8911_v2  ;;  %v478_v1 = vld [vmem:[%s10211_s28 + $0x740] sm:$0xff] }
  0x6d   : > { %v482_v2 = vld [vmem:[%s10211_s28 + $0x760] sm:$0xff] }
  0x6e   : > { %v8972_v14 = vcombine.low %v478_v1, %v482_v2  ;;  %v530_v58 = vld [vmem:[%s10211_s28 + $0x8e0] sm:$0xff] }
  0x6f   : > { %6558 = vmatpush1.bf16.msra.mxu0 %v8908_v7  ;;  %6886 = vmatpush1.bf16.msra.mxu1 %v8910_v8  ;;  %v8973_v7 = vcombine.high %v478_v1, %v482_v2  ;;  %v8975_v8 = vcombine.high %v479_v3, %v483_v4  ;;  %v9021_v1 = vcombine.high %v526_v57, %v530_v58  ;;  %v534_v3 = vld [vmem:[%s10211_s28 + $0x900] sm:$0xff] }
  0x70   : > { %6559 = vmatprep.subr.bf16.mxu0 %v8917_v9  ;;  %6887 = vmatprep.subr.bf16.mxu1 %v8919_v11  ;;  %v486_v9 = vld [vmem:[%s10211_s28 + $0x780] sm:$0xff] }
  0x71   : > { %v490_v11 = vld [vmem:[%s10211_s28 + $0x7a0] sm:$0xff] }
  0x72   : > { %v8980_v23 = vcombine.low %v486_v9, %v490_v11  ;;  %v538_v4 = vld [vmem:[%s10211_s28 + $0x920] sm:$0xff] }
  0x73   : > { %6560 = vmatpush1.bf16.msra.mxu0 %v8916_v16  ;;  %6888 = vmatpush1.bf16.msra.mxu1 %v8918_v17  ;;  %v8981_v16 = vcombine.high %v486_v9, %v490_v11  ;;  %v8983_v17 = vcombine.high %v487_v12, %v491_v13  ;;  %v9029_v9 = vcombine.high %v534_v3, %v538_v4  ;;  %v570_v38 = vld [vmem:[%s10211_s28 + $0xa20] sm:$0xff] }
  0x74   : > { %6561 = vmatprep.subr.bf16.mxu0 %v8925_v18  ;;  %6889 = vmatprep.subr.bf16.mxu1 %v8927_v19  ;;  %v494_v18 = vld [vmem:[%s10211_s28 + $0x7c0] sm:$0xff] }
  0x75   : > { %v498_v19 = vld [vmem:[%s10211_s28 + $0x7e0] sm:$0xff] }
  0x76   : > { %v8988_v32 = vcombine.low %v494_v18, %v498_v19 }
  0x77   : > { %6562 = vmatpush1.bf16.msra.mxu0 %v8924_v25  ;;  %6890 = vmatpush1.bf16.msra.mxu1 %v8926_v26  ;;  %v8982_v25 = vcombine.low %v487_v12, %v491_v13  ;;  %v8989_v26 = vcombine.high %v494_v18, %v498_v19  ;;  %v542_v12 = vld [vmem:[%s10211_s28 + $0x940] sm:$0xff] }
  0x78   : > { %6563 = vmatprep.subr.bf16.mxu0 %v8933_v27  ;;  %6891 = vmatprep.subr.bf16.mxu1 %v8935_v28  ;;  %v8991_v27 = vcombine.high %v495_v21, %v499_v22  ;;  %v502_v28 = vld [vmem:[%s10211_s28 + $0x800] sm:$0xff] }
  0x79   : > { %v546_v13 = vld [vmem:[%s10211_s28 + $0x960] sm:$0xff] }
  0x7a   : > { %v9037_v18 = vcombine.high %v542_v12, %v546_v13 }
  0x7b   : > { %6564 = vmatpush1.bf16.msra.mxu0 %v8932_v0  ;;  %6892 = vmatpush1.bf16.msra.mxu1 %v8934_v34  ;;  %v8990_v0 = vcombine.low %v495_v21, %v499_v22  ;;  %v8997_v34 = vcombine.high %v502_v28, %v506_v29  ;;  %v554_v21 = vld [vmem:[%s10211_s28 + $0x9a0] sm:$0xff]  ;;  %v551_v22 = vld [vmem:[%s10211_s28 + $0x988] sm:$0xff] }
  0x7c   : > { %6565 = vmatprep.subr.bf16.mxu0 %v8941_v35  ;;  %6893 = vmatprep.subr.bf16.mxu1 %v8943_v36  ;;  %v8999_v35 = vcombine.high %v503_v60, %v507_v31  ;;  %v510_v36 = vld [vmem:[%s10211_s28 + $0x840] sm:$0xff] }
  0x7f   : > { %6566 = vmatpush1.bf16.msra.mxu0 %v8940_v41  ;;  %6894 = vmatpush1.bf16.msra.mxu1 %v8942_v42  ;;  %v515_v41 = vld [vmem:[%s10211_s28 + $0x868] sm:$0xff]  ;;  %v8996_v42 = vcombine.low %v502_v28, %v506_v29  ;;  %v558_v29 = vld [vmem:[%s10211_s28 + $0x9c0] sm:$0xff] }
  0x80   : > { %6567 = vmatprep.subr.bf16.mxu0 %v8949_v43  ;;  %6895 = vmatprep.subr.bf16.mxu1 %v8951_v44  ;;  %v8998_v43 = vcombine.low %v503_v60, %v507_v31  ;;  %v9005_v44 = vcombine.high %v510_v36, %v514_v37  ;;  %v9007_v46 = vcombine.high %v511_v40, %v515_v41  ;;  %v562_v60 = vld [vmem:[%s10211_s28 + $0x9e0] sm:$0xff]  ;;  %v559_v31 = vld [vmem:[%s10211_s28 + $0x9c8] sm:$0xff] }
  0x83   : > { %6568 = vmatpush1.bf16.msra.mxu0 %v8948_v50  ;;  %6896 = vmatpush1.bf16.msra.mxu1 %v8950_v51  ;;  %v519_v50 = vld [vmem:[%s10211_s28 + $0x888] sm:$0xff] }
  0x84   : > { %6569 = vmatprep.subr.bf16.mxu0 %v8957_v52  ;;  %6897 = vmatprep.subr.bf16.mxu1 %v8959_v53  ;;  %v523_v51 = vld [vmem:[%s10211_s28 + $0x8a8] sm:$0xff]  ;;  %v9004_v52 = vcombine.low %v510_v36, %v514_v37  ;;  %v9006_v53 = vcombine.low %v511_v40, %v515_v41  ;;  %v566_v37 = vld [vmem:[%s10211_s28 + $0xa00] sm:$0xff] }
  0x85   : > { %v9015_v56 = vcombine.high %v519_v50, %v523_v51  ;;  %v567_v40 = vld [vmem:[%s10211_s28 + $0xa08] sm:$0xff] }
  0x86   : > { %v571_v41 = vld [vmem:[%s10211_s28 + $0xa28] sm:$0xff] }
  0x87   : > { %6570 = vmatpush1.bf16.msra.mxu0 %v8956_v59  ;;  %6898 = vmatpush1.bf16.msra.mxu1 %v8958_v61  ;;  %v527_v59 = vld [vmem:[%s10211_s28 + $0x8c8] sm:$0xff] }
  0x88   : > { %6571 = vmatprep.subr.bf16.mxu0 %v8965_v62  ;;  %6899 = vmatprep.subr.bf16.mxu1 %v8967_v63  ;;  %v531_v61 = vld [vmem:[%s10211_s28 + $0x8e8] sm:$0xff]  ;;  %v9012_v62 = vcombine.low %v518_v47, %v522_v48  ;;  %v9014_v63 = vcombine.low %v519_v50, %v523_v51  ;;  %v574_v47 = vld [vmem:[%s10211_s28 + $0xa40] sm:$0xff] }
  0x89   : > { %v9023_v2 = vcombine.high %v527_v59, %v531_v61  ;;  %v578_v48 = vld [vmem:[%s10211_s28 + $0xa60] sm:$0xff]  ;;  %v575_v50 = vld [vmem:[%s10211_s28 + $0xa48] sm:$0xff] }
  0x8a   : > { %v579_v51 = vld [vmem:[%s10211_s28 + $0xa68] sm:$0xff] }
  0x8b   : > { %6572 = vmatpush1.bf16.msra.mxu0 %v8964_v5  ;;  %6900 = vmatpush1.bf16.msra.mxu1 %v8966_v6  ;;  %v535_v5 = vld [vmem:[%s10211_s28 + $0x908] sm:$0xff] }
  0x8c   : > { %6573 = vmatprep.subr.bf16.mxu0 %v8973_v7  ;;  %6901 = vmatprep.subr.bf16.mxu1 %v8975_v8  ;;  %v539_v6 = vld [vmem:[%s10211_s28 + $0x928] sm:$0xff]  ;;  %v9020_v7 = vcombine.low %v526_v57, %v530_v58  ;;  %v9022_v8 = vcombine.low %v527_v59, %v531_v61  ;;  %v582_v57 = vld [vmem:[%s10211_s28 + $0xa80] sm:$0xff] }
  0x8d   : > { %v9031_v11 = vcombine.high %v535_v5, %v539_v6  ;;  %v586_v58 = vld [vmem:[%s10211_s28 + $0xaa0] sm:$0xff]  ;;  %v583_v59 = vld [vmem:[%s10211_s28 + $0xa88] sm:$0xff] }
  0x8e   : > { %v587_v61 = vld [vmem:[%s10211_s28 + $0xaa8] sm:$0xff] }
  0x8f   : > { %6574 = vmatpush1.bf16.msra.mxu0 %v8972_v14  ;;  %6902 = vmatpush1.bf16.msra.mxu1 %v8974_v15  ;;  %v543_v14 = vld [vmem:[%s10211_s28 + $0x948] sm:$0xff] }
  0x90   : > { %6575 = vmatprep.subr.bf16.mxu0 %v8981_v16  ;;  %6903 = vmatprep.subr.bf16.mxu1 %v8983_v17  ;;  %v547_v15 = vld [vmem:[%s10211_s28 + $0x968] sm:$0xff]  ;;  %v9028_v16 = vcombine.low %v534_v3, %v538_v4  ;;  %v9030_v17 = vcombine.low %v535_v5, %v539_v6  ;;  %v590_v3 = vld [vmem:[%s10211_s28 + $0xac0] sm:$0xff] }
  0x91   : > { %v9039_v19 = vcombine.high %v543_v14, %v547_v15  ;;  %v594_v4 = vld [vmem:[%s10211_s28 + $0xae0] sm:$0xff]  ;;  %v591_v5 = vld [vmem:[%s10211_s28 + $0xac8] sm:$0xff] }
  0x92   : > { %v595_v6 = vld [vmem:[%s10211_s28 + $0xae8] sm:$0xff] }
  0x93   : > { %6576 = vmatpush1.bf16.msra.mxu0 %v8980_v23  ;;  %6904 = vmatpush1.bf16.msra.mxu1 %v8982_v25  ;;  %v555_v23 = vld [vmem:[%s10211_s28 + $0x9a8] sm:$0xff]  ;;  %v9036_v25 = vcombine.low %v542_v12, %v546_v13  ;;  %v598_v12 = vld [vmem:[%s10211_s28 + $0xb00] sm:$0xff] }
  0x94   : > { %6577 = vmatprep.subr.bf16.mxu0 %v8989_v26  ;;  %6905 = vmatprep.subr.bf16.mxu1 %v8991_v27  ;;  %v9038_v26 = vcombine.low %v543_v14, %v547_v15  ;;  %v9045_v27 = vcombine.high %v550_v20, %v554_v21  ;;  %v9047_v28 = vcombine.high %v551_v22, %v555_v23  ;;  %v602_v13 = vld [vmem:[%s10211_s28 + $0xb20] sm:$0xff]  ;;  %v599_v14 = vld [vmem:[%s10211_s28 + $0xb08] sm:$0xff] }
  0x95   : > { %v603_v15 = vld [vmem:[%s10211_s28 + $0xb28] sm:$0xff] }
  0x97   : > { %6578 = vmatpush1.bf16.msra.mxu0 %v8988_v32  ;;  %6906 = vmatpush1.bf16.msra.mxu1 %v8990_v0  ;;  %v563_v32 = vld [vmem:[%s10211_s28 + $0x9e8] sm:$0xff]  ;;  %v9044_v0 = vcombine.low %v550_v20, %v554_v21  ;;  %v606_v20 = vld [vmem:[%s10211_s28 + $0xb40] sm:$0xff] }
  0x98   : > { %6588 = vmatprep.subr.bf16.mxu0 %v8997_v34  ;;  %6916 = vmatprep.subr.bf16.mxu1 %v8999_v35  ;;  %v9046_v34 = vcombine.low %v551_v22, %v555_v23  ;;  %v9053_v35 = vcombine.high %v558_v29, %v562_v60  ;;  %v9055_v36 = vcombine.high %v559_v31, %v563_v32  ;;  %v610_v21 = vld [vmem:[%s10211_s28 + $0xb60] sm:$0xff]  ;;  %v607_v22 = vld [vmem:[%s10211_s28 + $0xb48] sm:$0xff] }
  0x99   : > { %v611_v23 = vld [vmem:[%s10211_s28 + $0xb68] sm:$0xff] }
  0x9a   : > { %6580 = vmatmul.mubr.bf16.vlgmr.msra.gmra.mrb[0].mxu0 %v10388_v39  ;;  %6908 = vmatmul.mubr.bf16.vlgmr.msra.gmra.mrb[0].mxu1 %v10388_v39 }
  0x9b   : > { %6589 = vmatpush1.bf16.msra.mxu0 %v8996_v42  ;;  %6917 = vmatpush1.bf16.msra.mxu1 %v8998_v43  ;;  %v9052_v42 = vcombine.low %v558_v29, %v562_v60  ;;  %v9054_v43 = vcombine.low %v559_v31, %v563_v32  ;;  %v614_v29 = vld [vmem:[%s10211_s28 + $0xb80] sm:$0xff]  ;;  %v615_v31 = vld [vmem:[%s10211_s28 + $0xb88] sm:$0xff] }
  0x9c   : > { %6590 = vmatprep.subr.bf16.mxu0 %v9005_v44  ;;  %6918 = vmatprep.subr.bf16.mxu1 %v9007_v46  ;;  %v9061_v44 = vcombine.high %v566_v37, %v570_v38  ;;  %v9063_v46 = vcombine.high %v567_v40, %v571_v41  ;;  %v618_v60 = vld [vmem:[%s10211_s28 + $0xba0] sm:$0xff]  ;;  %v619_v32 = vld [vmem:[%s10211_s28 + $0xba8] sm:$0xff] }
  0x9d   : > { %6620 = vmatprep.mubr.bf16.mxu0 %v10395_v49  ;;  %6948 = vmatprep.mubr.bf16.mxu1 %v10395_v49 }
  0x9f   : > { %6591 = vmatpush1.bf16.msra.mxu0 %v9004_v52  ;;  %6919 = vmatpush1.bf16.msra.mxu1 %v9006_v53  ;;  %v9060_v52 = vcombine.low %v566_v37, %v570_v38  ;;  %v9062_v53 = vcombine.low %v567_v40, %v571_v41  ;;  %v622_v37 = vld [vmem:[%s10211_s28 + $0xbc0] sm:$0xff]  ;;  %v623_v40 = vld [vmem:[%s10211_s28 + $0xbc8] sm:$0xff] }
  0xa0   : > { %6592 = vmatprep.subr.bf16.mxu0 %v9013_v55  ;;  %6920 = vmatprep.subr.bf16.mxu1 %v9015_v56  ;;  %v9069_v55 = vcombine.high %v574_v47, %v578_v48  ;;  %v9071_v56 = vcombine.high %v575_v50, %v579_v51  ;;  %v626_v38 = vld [vmem:[%s10211_s28 + $0xbe0] sm:$0xff]  ;;  %v627_v41 = vld [vmem:[%s10211_s28 + $0xbe8] sm:$0xff] }
  0xa3   : > { %6593 = vmatpush1.bf16.msra.mxu0 %v9012_v62  ;;  %6921 = vmatpush1.bf16.msra.mxu1 %v9014_v63  ;;  %v9068_v62 = vcombine.low %v574_v47, %v578_v48  ;;  %v9070_v63 = vcombine.low %v575_v50, %v579_v51  ;;  %v630_v47 = vld [vmem:[%s10211_s28 + $0xc00] sm:$0xff]  ;;  %v631_v50 = vld [vmem:[%s10211_s28 + $0xc08] sm:$0xff] }
  0xa4   : > { %6594 = vmatprep.subr.bf16.mxu0 %v9021_v1  ;;  %6922 = vmatprep.subr.bf16.mxu1 %v9023_v2  ;;  %v9077_v1 = vcombine.high %v582_v57, %v586_v58  ;;  %v9079_v2 = vcombine.high %v583_v59, %v587_v61  ;;  %v634_v48 = vld [vmem:[%s10211_s28 + $0xc20] sm:$0xff]  ;;  %v635_v51 = vld [vmem:[%s10211_s28 + $0xc28] sm:$0xff] }
  0xa7   : > { %6595 = vmatpush1.bf16.msra.mxu0 %v9020_v7  ;;  %6923 = vmatpush1.bf16.msra.mxu1 %v9022_v8  ;;  %v9076_v7 = vcombine.low %v582_v57, %v586_v58  ;;  %v9078_v8 = vcombine.low %v583_v59, %v587_v61  ;;  %v638_v57 = vld [vmem:[%s10211_s28 + $0xc40] sm:$0xff]  ;;  %v10463_v59 = vrot.slane %v10378_v30, %v10243_v54  ;;  %v639_v61 = vld [vmem:[%s10211_s28 + $0xc48] sm:$0xff] }
  0xa8   : > { %6596 = vmatprep.subr.bf16.mxu0 %v9029_v9  ;;  %6924 = vmatprep.subr.bf16.mxu1 %v9031_v11  ;;  %v9085_v9 = vcombine.high %v590_v3, %v594_v4  ;;  %v9087_v11 = vcombine.high %v591_v5, %v595_v6  ;;  %v642_v58 = vld [vmem:[%s10211_s28 + $0xc60] sm:$0xff]  ;;  %v647_v30 = vld [vmem:[%s10211_s28 + $0xc88] sm:$0xff] }
  0xab   : > { %6597 = vmatpush1.bf16.msra.mxu0 %v9028_v16  ;;  %6925 = vmatpush1.bf16.msra.mxu1 %v9030_v17  ;;  %v9084_v16 = vcombine.low %v590_v3, %v594_v4  ;;  %v9086_v17 = vcombine.low %v591_v5, %v595_v6  ;;  %v646_v4 = vld [vmem:[%s10211_s28 + $0xc80] sm:$0xff]  ;;  %v10471_v6 = vcombine.high %v10395_v49, %v10395_v49 }
  0xac   : > { %6598 = vmatprep.subr.bf16.mxu0 %v9037_v18  ;;  %6926 = vmatprep.subr.bf16.mxu1 %v9039_v19  ;;  %v9093_v18 = vcombine.high %v598_v12, %v602_v13  ;;  %v9095_v19 = vcombine.high %v599_v14, %v603_v15  ;;  %v650_v5 = vld [vmem:[%s10211_s28 + $0xca0] sm:$0xff] }
  0xaf   : > { %6599 = vmatpush1.bf16.msra.mxu0 %v9036_v25  ;;  %6927 = vmatpush1.bf16.msra.mxu1 %v9038_v26  ;;  %v9092_v25 = vcombine.low %v598_v12, %v602_v13  ;;  %v9094_v26 = vcombine.low %v599_v14, %v603_v15  ;;  %v654_v13 = vld [vmem:[%s10211_s28 + $0xcc0] sm:$0xff]  ;;  %v655_v15 = vld [vmem:[%s10211_s28 + $0xcc8] sm:$0xff] }
  0xb0   : > { %6600 = vmatprep.subr.bf16.mxu0 %v9045_v27  ;;  %6928 = vmatprep.subr.bf16.mxu1 %v9047_v28  ;;  %v9101_v27 = vcombine.high %v606_v20, %v610_v21  ;;  %v9103_v28 = vcombine.high %v607_v22, %v611_v23  ;;  %v658_v14 = vld [vmem:[%s10211_s28 + $0xce0] sm:$0xff] }
  0xb3   : > { %6601 = vmatpush1.bf16.msra.mxu0 %v9044_v0  ;;  %6929 = vmatpush1.bf16.msra.mxu1 %v9046_v34  ;;  %v9100_v0 = vcombine.low %v606_v20, %v610_v21  ;;  %v9102_v34 = vcombine.low %v607_v22, %v611_v23  ;;  %v662_v21 = vld [vmem:[%s10211_s28 + $0xd00] sm:$0xff]  ;;  %v663_v23 = vld [vmem:[%s10211_s28 + $0xd08] sm:$0xff] }
  0xb4   : > { %6602 = vmatprep.subr.bf16.mxu0 %v9053_v35  ;;  %6930 = vmatprep.subr.bf16.mxu1 %v9055_v36  ;;  %v9109_v35 = vcombine.high %v614_v29, %v618_v60  ;;  %v9111_v36 = vcombine.high %v615_v31, %v619_v32  ;;  %v666_v22 = vld [vmem:[%s10211_s28 + $0xd20] sm:$0xff] }
  0xb7   : > { %6603 = vmatpush1.bf16.msra.mxu0 %v9052_v42  ;;  %6931 = vmatpush1.bf16.msra.mxu1 %v9054_v43  ;;  %v9108_v42 = vcombine.low %v614_v29, %v618_v60  ;;  %v9110_v43 = vcombine.low %v615_v31, %v619_v32  ;;  %v670_v60 = vld [vmem:[%s10211_s28 + $0xd40] sm:$0xff]  ;;  %v671_v32 = vld [vmem:[%s10211_s28 + $0xd48] sm:$0xff] }
  0xb8   : > { %6604 = vmatprep.subr.bf16.mxu0 %v9061_v44  ;;  %6932 = vmatprep.subr.bf16.mxu1 %v9063_v46  ;;  %v9117_v44 = vcombine.high %v622_v37, %v626_v38  ;;  %v9119_v46 = vcombine.high %v623_v40, %v627_v41  ;;  %v674_v31 = vld [vmem:[%s10211_s28 + $0xd60] sm:$0xff] }
  0xbb   : > { %6605 = vmatpush1.bf16.msra.mxu0 %v9060_v52  ;;  %6933 = vmatpush1.bf16.msra.mxu1 %v9062_v53  ;;  %v9116_v52 = vcombine.low %v622_v37, %v626_v38  ;;  %v9118_v53 = vcombine.low %v623_v40, %v627_v41  ;;  %v678_v38 = vld [vmem:[%s10211_s28 + $0xd80] sm:$0xff]  ;;  %v679_v41 = vld [vmem:[%s10211_s28 + $0xd88] sm:$0xff] }
  0xbc   : > { %6606 = vmatprep.subr.bf16.mxu0 %v9069_v55  ;;  %6934 = vmatprep.subr.bf16.mxu1 %v9071_v56  ;;  %v9125_v55 = vcombine.high %v630_v47, %v634_v48  ;;  %v9127_v56 = vcombine.high %v631_v50, %v635_v51  ;;  %v682_v40 = vld [vmem:[%s10211_s28 + $0xda0] sm:$0xff] }
  0xbf   : > { %6607 = vmatpush1.bf16.msra.mxu0 %v9068_v62  ;;  %6935 = vmatpush1.bf16.msra.mxu1 %v9070_v63  ;;  %v643_v62 = vld [vmem:[%s10211_s28 + $0xc68] sm:$0xff]  ;;  %v9124_v63 = vcombine.low %v630_v47, %v634_v48  ;;  %v686_v48 = vld [vmem:[%s10211_s28 + $0xdc0] sm:$0xff] }
  0xc0   : > { %6608 = vmatprep.subr.bf16.mxu0 %v9077_v1  ;;  %6936 = vmatprep.subr.bf16.mxu1 %v9079_v2  ;;  %v9126_v1 = vcombine.low %v631_v50, %v635_v51  ;;  %v9133_v2 = vcombine.high %v638_v57, %v642_v58  ;;  %v9135_v3 = vcombine.high %v639_v61, %v643_v62  ;;  %v690_v50 = vld [vmem:[%s10211_s28 + $0xde0] sm:$0xff]  ;;  %v687_v51 = vld [vmem:[%s10211_s28 + $0xdc8] sm:$0xff] }
  0xc3   : > { %6609 = vmatpush1.bf16.msra.mxu0 %v9076_v7  ;;  %6937 = vmatpush1.bf16.msra.mxu1 %v9078_v8  ;;  %v651_v7 = vld [vmem:[%s10211_s28 + $0xca8] sm:$0xff]  ;;  %v9132_v8 = vcombine.low %v638_v57, %v642_v58  ;;  %v694_v58 = vld [vmem:[%s10211_s28 + $0xe00] sm:$0xff] }
  0xc4   : > { %6610 = vmatprep.subr.bf16.mxu0 %v9085_v9  ;;  %6938 = vmatprep.subr.bf16.mxu1 %v9087_v11  ;;  %v9134_v9 = vcombine.low %v639_v61, %v643_v62  ;;  %v9141_v11 = vcombine.high %v646_v4, %v650_v5  ;;  %v9143_v12 = vcombine.high %v647_v30, %v651_v7  ;;  %v698_v61 = vld [vmem:[%s10211_s28 + $0xe20] sm:$0xff]  ;;  %v695_v62 = vld [vmem:[%s10211_s28 + $0xe08] sm:$0xff] }
  0xc7   : > { %6611 = vmatpush1.bf16.msra.mxu0 %v9084_v16  ;;  %6939 = vmatpush1.bf16.msra.mxu1 %v9086_v17  ;;  %v659_v16 = vld [vmem:[%s10211_s28 + $0xce8] sm:$0xff]  ;;  %v9140_v17 = vcombine.low %v646_v4, %v650_v5  ;;  %v702_v5 = vld [vmem:[%s10211_s28 + $0xe40] sm:$0xff] }
  0xc8   : > { %6612 = vmatprep.subr.bf16.mxu0 %v9093_v18  ;;  %6940 = vmatprep.subr.bf16.mxu1 %v9095_v19  ;;  %v9142_v18 = vcombine.low %v647_v30, %v651_v7  ;;  %v9149_v19 = vcombine.high %v654_v13, %v658_v14  ;;  %v9151_v20 = vcombine.high %v655_v15, %v659_v16  ;;  %v706_v30 = vld [vmem:[%s10211_s28 + $0xe60] sm:$0xff]  ;;  %v703_v7 = vld [vmem:[%s10211_s28 + $0xe48] sm:$0xff] }
  0xcb   : > { %6613 = vmatpush1.bf16.msra.mxu0 %v9092_v25  ;;  %6941 = vmatpush1.bf16.msra.mxu1 %v9094_v26  ;;  %v667_v25 = vld [vmem:[%s10211_s28 + $0xd28] sm:$0xff]  ;;  %v9148_v26 = vcombine.low %v654_v13, %v658_v14  ;;  %v710_v14 = vld [vmem:[%s10211_s28 + $0xe80] sm:$0xff] }
  0xcc   : > { %6614 = vmatprep.subr.bf16.mxu0 %v9101_v27  ;;  %6942 = vmatprep.subr.bf16.mxu1 %v9103_v28  ;;  %v9150_v27 = vcombine.low %v655_v15, %v659_v16  ;;  %v9157_v28 = vcombine.high %v662_v21, %v666_v22  ;;  %v9159_v29 = vcombine.high %v663_v23, %v667_v25  ;;  %v714_v15 = vld [vmem:[%s10211_s28 + $0xea0] sm:$0xff]  ;;  %v711_v16 = vld [vmem:[%s10211_s28 + $0xe88] sm:$0xff] }
  0xcf   : > { %6615 = vmatpush1.bf16.msra.mxu0 %v9100_v0  ;;  %6943 = vmatpush1.bf16.msra.mxu1 %v9102_v34  ;;  %v675_v0 = vld [vmem:[%s10211_s28 + $0xd68] sm:$0xff]  ;;  %v9156_v34 = vcombine.low %v662_v21, %v666_v22  ;;  %v718_v22 = vld [vmem:[%s10211_s28 + $0xec0] sm:$0xff] }
  0xd0   : > { %6616 = vmatprep.subr.bf16.mxu0 %v9109_v35  ;;  %6944 = vmatprep.subr.bf16.mxu1 %v9111_v36  ;;  %v9158_v35 = vcombine.low %v663_v23, %v667_v25  ;;  %v9165_v36 = vcombine.high %v670_v60, %v674_v31  ;;  %v9167_v37 = vcombine.high %v671_v32, %v675_v0  ;;  %v722_v23 = vld [vmem:[%s10211_s28 + $0xee0] sm:$0xff]  ;;  %v719_v25 = vld [vmem:[%s10211_s28 + $0xec8] sm:$0xff] }
  0xd3   : > { %6617 = vmatpush1.bf16.msra.mxu0 %v9108_v42  ;;  %6945 = vmatpush1.bf16.msra.mxu1 %v9110_v43  ;;  %v683_v42 = vld [vmem:[%s10211_s28 + $0xda8] sm:$0xff]  ;;  %v9164_v43 = vcombine.low %v670_v60, %v674_v31  ;;  %v726_v31 = vld [vmem:[%s10211_s28 + $0xf00] sm:$0xff] }
  0xd4   : > { %6618 = vmatprep.subr.bf16.mxu0 %v9117_v44  ;;  %6946 = vmatprep.subr.bf16.mxu1 %v9119_v46  ;;  %v9166_v44 = vcombine.low %v671_v32, %v675_v0  ;;  %v9173_v46 = vcombine.high %v678_v38, %v682_v40  ;;  %v9175_v47 = vcombine.high %v679_v41, %v683_v42  ;;  %v730_v32 = vld [vmem:[%s10211_s28 + $0xf20] sm:$0xff]  ;;  %v727_v0 = vld [vmem:[%s10211_s28 + $0xf08] sm:$0xff] }
  0xd7   : > { %6619 = vmatpush1.bf16.msra.mxu0 %v9116_v52  ;;  %6947 = vmatpush1.bf16.msra.mxu1 %v9118_v53  ;;  %v691_v52 = vld [vmem:[%s10211_s28 + $0xde8] sm:$0xff]  ;;  %v9172_v53 = vcombine.low %v678_v38, %v682_v40  ;;  %v734_v40 = vld [vmem:[%s10211_s28 + $0xf40] sm:$0xff] }
  0xd8   : > { %6629 = vmatprep.subr.bf16.mxu0 %v9125_v55  ;;  %6957 = vmatprep.subr.bf16.mxu1 %v9127_v56  ;;  %v9174_v55 = vcombine.low %v679_v41, %v683_v42  ;;  %v9181_v56 = vcombine.high %v686_v48, %v690_v50  ;;  %v9183_v57 = vcombine.high %v687_v51, %v691_v52  ;;  %v738_v41 = vld [vmem:[%s10211_s28 + $0xf60] sm:$0xff]  ;;  %v735_v42 = vld [vmem:[%s10211_s28 + $0xf48] sm:$0xff] }
  0xda   : > { %6621 = vmatmul.mubr.bf16.vlgmr.msra.gmra.mrb[0].mxu0 %v10463_v59  ;;  %6949 = vmatmul.mubr.bf16.vlgmr.msra.gmra.mrb[0].mxu1 %v10463_v59 }
  0xdb   : > { %6630 = vmatpush1.bf16.msra.mxu0 %v9124_v63  ;;  %6958 = vmatpush1.bf16.msra.mxu1 %v9126_v1  ;;  %v699_v63 = vld [vmem:[%s10211_s28 + $0xe28] sm:$0xff]  ;;  %v9180_v1 = vcombine.low %v686_v48, %v690_v50  ;;  %v742_v50 = vld [vmem:[%s10211_s28 + $0xf80] sm:$0xff] }
  0xdc   : > { %6631 = vmatprep.subr.bf16.mxu0 %v9133_v2  ;;  %6959 = vmatprep.subr.bf16.mxu1 %v9135_v3  ;;  %v9182_v2 = vcombine.low %v687_v51, %v691_v52  ;;  %v9189_v3 = vcombine.high %v694_v58, %v698_v61  ;;  %v9191_v4 = vcombine.high %v695_v62, %v699_v63  ;;  %v746_v51 = vld [vmem:[%s10211_s28 + $0xfa0] sm:$0xff]  ;;  %v743_v52 = vld [vmem:[%s10211_s28 + $0xf88] sm:$0xff] }
  0xdd   : > { %6661 = vmatprep.mubr.bf16.mxu0 %v10471_v6  ;;  %6989 = vmatprep.mubr.bf16.mxu1 %v10471_v6 }
  0xdf   : > { %6632 = vmatpush1.bf16.msra.mxu0 %v9132_v8  ;;  %6960 = vmatpush1.bf16.msra.mxu1 %v9134_v9  ;;  %v707_v8 = vld [vmem:[%s10211_s28 + $0xe68] sm:$0xff]  ;;  %v9188_v9 = vcombine.low %v694_v58, %v698_v61  ;;  %v750_v61 = vld [vmem:[%s10211_s28 + $0xfc0] sm:$0xff] }
  0xe0   : > { %6633 = vmatprep.subr.bf16.mxu0 %v9141_v11  ;;  %6961 = vmatprep.subr.bf16.mxu1 %v9143_v12  ;;  %v9190_v11 = vcombine.low %v695_v62, %v699_v63  ;;  %v9197_v12 = vcombine.high %v702_v5, %v706_v30  ;;  %v9199_v13 = vcombine.high %v703_v7, %v707_v8  ;;  %v754_v62 = vld [vmem:[%s10211_s28 + $0xfe0] sm:$0xff]  ;;  %v751_v63 = vld [vmem:[%s10211_s28 + $0xfc8] sm:$0xff] }
  0xe3   : > { %6634 = vmatpush1.bf16.msra.mxu0 %v9140_v17  ;;  %6962 = vmatpush1.bf16.msra.mxu1 %v9142_v18  ;;  %v715_v17 = vld [vmem:[%s10211_s28 + $0xea8] sm:$0xff]  ;;  %v9196_v18 = vcombine.low %v702_v5, %v706_v30  ;;  %v9245_v5 = vcombine.high %v750_v61, %v754_v62 }
  0xe4   : > { %6635 = vmatprep.subr.bf16.mxu0 %v9149_v19  ;;  %6963 = vmatprep.subr.bf16.mxu1 %v9151_v20  ;;  %v9198_v19 = vcombine.low %v703_v7, %v707_v8  ;;  %v9205_v20 = vcombine.high %v710_v14, %v714_v15  ;;  %v9207_v21 = vcombine.high %v711_v16, %v715_v17  ;;  %v758_v7 = vld [vmem:[%s10211_s28 + $0x1000] sm:$0xff] }
  0xe5   : > { %v762_v8 = vld [vmem:[%s10211_s28 + $0x1020] sm:$0xff] }
  0xe7   : > { %6636 = vmatpush1.bf16.msra.mxu0 %v9148_v26  ;;  %6964 = vmatpush1.bf16.msra.mxu1 %v9150_v27  ;;  %v723_v26 = vld [vmem:[%s10211_s28 + $0xee8] sm:$0xff]  ;;  %v9204_v27 = vcombine.low %v710_v14, %v714_v15  ;;  %v9253_v15 = vcombine.high %v758_v7, %v762_v8 }
  0xe8   : > { %6637 = vmatprep.subr.bf16.mxu0 %v9157_v28  ;;  %6965 = vmatprep.subr.bf16.mxu1 %v9159_v29  ;;  %v9206_v28 = vcombine.low %v711_v16, %v715_v17  ;;  %v9213_v29 = vcombine.high %v718_v22, %v722_v23  ;;  %v9215_v60 = vcombine.high %v719_v25, %v723_v26  ;;  %v766_v17 = vld [vmem:[%s10211_s28 + $0x1040] sm:$0xff] }
  0xeb   : > { %6638 = vmatpush1.bf16.msra.mxu0 %v9156_v34  ;;  %6966 = vmatpush1.bf16.msra.mxu1 %v9158_v35  ;;  %v731_v34 = vld [vmem:[%s10211_s28 + $0xf28] sm:$0xff]  ;;  %v9212_v35 = vcombine.low %v718_v22, %v722_v23  ;;  %v9252_v23 = vcombine.low %v758_v7, %v762_v8 }
  0xec   : > { %6639 = vmatprep.subr.bf16.mxu0 %v9165_v36  ;;  %6967 = vmatprep.subr.bf16.mxu1 %v9167_v37  ;;  %v9214_v36 = vcombine.low %v719_v25, %v723_v26  ;;  %v9221_v37 = vcombine.high %v726_v31, %v730_v32  ;;  %v9223_v38 = vcombine.high %v727_v0, %v731_v34  ;;  %v771_v22 = vld [vmem:[%s10211_s28 + $0x1068] sm:$0xff] }
  0xed   : > { %v807_v7 = vld [vmem:[%s10211_s28 + $0x1188] sm:$0xff] }
  0xee   : > { %v811_v8 = vld [vmem:[%s10211_s28 + $0x11a8] sm:$0xff] }
  0xef   : > { %6640 = vmatpush1.bf16.msra.mxu0 %v9164_v43  ;;  %6968 = vmatpush1.bf16.msra.mxu1 %v9166_v44  ;;  %v739_v43 = vld [vmem:[%s10211_s28 + $0xf68] sm:$0xff]  ;;  %v9220_v44 = vcombine.low %v726_v31, %v730_v32 }
  0xf0   : > { %6641 = vmatprep.subr.bf16.mxu0 %v9173_v46  ;;  %6969 = vmatprep.subr.bf16.mxu1 %v9175_v47  ;;  %v9222_v46 = vcombine.low %v727_v0, %v731_v34  ;;  %v9229_v47 = vcombine.high %v734_v40, %v738_v41  ;;  %v9231_v48 = vcombine.high %v735_v42, %v739_v43  ;;  %v775_v31 = vld [vmem:[%s10211_s28 + $0x1088] sm:$0xff] }
  0xf1   : > { %v779_v32 = vld [vmem:[%s10211_s28 + $0x10a8] sm:$0xff] }
  0xf3   : > { %6642 = vmatpush1.bf16.msra.mxu0 %v9172_v53  ;;  %6970 = vmatpush1.bf16.msra.mxu1 %v9174_v55  ;;  %v747_v53 = vld [vmem:[%s10211_s28 + $0xfa8] sm:$0xff]  ;;  %v9228_v55 = vcombine.low %v734_v40, %v738_v41 }
  0xf4   : > { %6643 = vmatprep.subr.bf16.mxu0 %v9181_v56  ;;  %6971 = vmatprep.subr.bf16.mxu1 %v9183_v57  ;;  %v9230_v56 = vcombine.low %v735_v42, %v739_v43  ;;  %v9237_v57 = vcombine.high %v742_v50, %v746_v51  ;;  %v9239_v58 = vcombine.high %v743_v52, %v747_v53  ;;  %v783_v40 = vld [vmem:[%s10211_s28 + $0x10c8] sm:$0xff] }
  0xf5   : > { %v787_v41 = vld [vmem:[%s10211_s28 + $0x10e8] sm:$0xff]  ;;  %v9270_v43 = vcombine.low %v775_v31, %v779_v32 }
  0xf7   : > { %6644 = vmatpush1.bf16.msra.mxu0 %v9180_v1  ;;  %6972 = vmatpush1.bf16.msra.mxu1 %v9182_v2  ;;  %v755_v1 = vld [vmem:[%s10211_s28 + $0xfe8] sm:$0xff] }
  0xf8   : > { %6645 = vmatprep.subr.bf16.mxu0 %v9189_v3  ;;  %6973 = vmatprep.subr.bf16.mxu1 %v9191_v4  ;;  %v10532_v2 = vld [vmem:[%s10206_s24 + $0x8] sm:$0xff]  ;;  %v9236_v3 = vcombine.low %v742_v50, %v746_v51  ;;  %v9238_v4 = vcombine.low %v743_v52, %v747_v53  ;;  %v9247_v30 = vcombine.high %v751_v63, %v755_v1 }
  0xf9   : > { %v9246_v14 = vcombine.low %v751_v63, %v755_v1  ;;  %v791_v50 = vld [vmem:[%s10211_s28 + $0x1108] sm:$0xff]  ;;  %v9278_v53 = vcombine.low %v783_v40, %v787_v41 }
  0xfa   : > { %v795_v51 = vld [vmem:[%s10211_s28 + $0x1128] sm:$0xff] }
  0xfb   : > { %6646 = vmatpush1.bf16.msra.mxu0 %v9188_v9  ;;  %6974 = vmatpush1.bf16.msra.mxu1 %v9190_v11  ;;  %v10538_v9 = vrot.slane %v10532_v2, %v10243_v54  ;;  %v759_v11 = vld [vmem:[%s10211_s28 + $0x1008] sm:$0xff]  ;;  %v9286_v1 = vcombine.low %v791_v50, %v795_v51 }
  0xfc   : > { %6647 = vmatprep.subr.bf16.mxu0 %v9197_v12  ;;  %6975 = vmatprep.subr.bf16.mxu1 %v9199_v13  ;;  %v763_v12 = vld [vmem:[%s10211_s28 + $0x1028] sm:$0xff]  ;;  %v9244_v13 = vcombine.low %v750_v61, %v754_v62 }
  0xfd   : > { %v9255_v16 = vcombine.high %v759_v11, %v763_v12  ;;  %v9254_v25 = vcombine.low %v759_v11, %v763_v12  ;;  %v799_v61 = vld [vmem:[%s10211_s28 + $0x1148] sm:$0xff] }
  0xfe   : > { %v803_v62 = vld [vmem:[%s10211_s28 + $0x1168] sm:$0xff] }
  0xff   : > { %6648 = vmatpush1.bf16.msra.mxu0 %v9196_v18  ;;  %6976 = vmatpush1.bf16.msra.mxu1 %v9198_v19  ;;  %v770_v18 = vld [vmem:[%s10211_s28 + $0x1060] sm:$0xff]  ;;  %v1336_v19 = vcombine.high %v10538_v9, %v10538_v9  ;;  %v9294_v12 = vcombine.low %v799_v61, %v803_v62 }
 0x100   : > { %6649 = vmatprep.subr.bf16.mxu0 %v9205_v20  ;;  %6977 = vmatprep.subr.bf16.mxu1 %v9207_v21  ;;  %v10548_v20 = vcombine.high %v10463_v59, %v10463_v59  ;;  %v767_v21 = vld [vmem:[%s10211_s28 + $0x1048] sm:$0xff]  ;;  %v9261_v26 = vcombine.high %v766_v17, %v770_v18  ;;  %v9260_v0 = vcombine.low %v766_v17, %v770_v18 }
 0x101   : > { %v9262_v34 = vcombine.low %v767_v21, %v771_v22  ;;  %v815_v17 = vld [vmem:[%s10211_s28 + $0x11c8] sm:$0xff] }
 0x102   : > { %v819_v18 = vld [vmem:[%s10211_s28 + $0x11e8] sm:$0xff] }
 0x103   : > { %6650 = vmatpush1.bf16.msra.mxu0 %v9204_v27  ;;  %6978 = vmatpush1.bf16.msra.mxu1 %v9206_v28  ;;  %v9263_v27 = vcombine.high %v767_v21, %v771_v22  ;;  %v774_v28 = vld [vmem:[%s10211_s28 + $0x1080] sm:$0xff]  ;;  %v9302_v21 = vcombine.low %v807_v7, %v811_v8 }
 0x104   : > { %6651 = vmatprep.subr.bf16.mxu0 %v9213_v29  ;;  %6979 = vmatprep.subr.bf16.mxu1 %v9215_v60  ;;  %v778_v29 = vld [vmem:[%s10211_s28 + $0x10a0] sm:$0xff]  ;;  %v10555_v60 = vrot.slane %v1336_v19, %v10243_v54 }
 0x105   : > { %v9268_v42 = vcombine.low %v774_v28, %v778_v29 }
 0x107   : > { %6652 = vmatpush1.bf16.msra.mxu0 %v9212_v35  ;;  %6980 = vmatpush1.bf16.msra.mxu1 %v9214_v36  ;;  %v9269_v35 = vcombine.high %v774_v28, %v778_v29  ;;  %v9271_v36 = vcombine.high %v775_v31, %v779_v32  ;;  %v827_v28 = vld [vmem:[%s10211_s28 + $0x1228] sm:$0xff]  ;;  %v9310_v31 = vcombine.low %v815_v17, %v819_v18 }
 0x108   : > { %6653 = vmatprep.subr.bf16.mxu0 %v9221_v37  ;;  %6981 = vmatprep.subr.bf16.mxu1 %v9223_v38  ;;  %v782_v37 = vld [vmem:[%s10211_s28 + $0x10c0] sm:$0xff] }
 0x109   : > { %v786_v38 = vld [vmem:[%s10211_s28 + $0x10e0] sm:$0xff] }
 0x10a   : > { %v9276_v52 = vcombine.low %v782_v37, %v786_v38 }
 0x10b   : > { %6654 = vmatpush1.bf16.msra.mxu0 %v9220_v44  ;;  %6982 = vmatpush1.bf16.msra.mxu1 %v9222_v46  ;;  %v9277_v44 = vcombine.high %v782_v37, %v786_v38  ;;  %v9279_v46 = vcombine.high %v783_v40, %v787_v41  ;;  %v835_v37 = vld [vmem:[%s10211_s28 + $0x1268] sm:$0xff] }
 0x10c   : > { %6655 = vmatprep.subr.bf16.mxu0 %v9229_v47  ;;  %6983 = vmatprep.subr.bf16.mxu1 %v9231_v48  ;;  %v790_v47 = vld [vmem:[%s10211_s28 + $0x1100] sm:$0xff] }
 0x10d   : > { %v794_v48 = vld [vmem:[%s10211_s28 + $0x1120] sm:$0xff] }
 0x10e   : > { %v9284_v63 = vcombine.low %v790_v47, %v794_v48 }
 0x10f   : > { %6656 = vmatpush1.bf16.msra.mxu0 %v9228_v55  ;;  %6984 = vmatpush1.bf16.msra.mxu1 %v9230_v56  ;;  %v9285_v55 = vcombine.high %v790_v47, %v794_v48  ;;  %v9287_v56 = vcombine.high %v791_v50, %v795_v51  ;;  %v843_v47 = vld [vmem:[%s10211_s28 + $0x12a8] sm:$0xff] }
 0x110   : > { %6657 = vmatprep.subr.bf16.mxu0 %v9237_v57  ;;  %6985 = vmatprep.subr.bf16.mxu1 %v9239_v58  ;;  %v798_v57 = vld [vmem:[%s10211_s28 + $0x1140] sm:$0xff] }
 0x111   : > { %v802_v58 = vld [vmem:[%s10211_s28 + $0x1160] sm:$0xff] }
 0x112   : > { %v9292_v11 = vcombine.low %v798_v57, %v802_v58 }
 0x113   : > { %6658 = vmatpush1.bf16.msra.mxu0 %v9236_v3  ;;  %6986 = vmatpush1.bf16.msra.mxu1 %v9238_v4  ;;  %v9293_v3 = vcombine.high %v798_v57, %v802_v58  ;;  %v9295_v4 = vcombine.high %v799_v61, %v803_v62  ;;  %v851_v57 = vld [vmem:[%s10211_s28 + $0x12e8] sm:$0xff] }
 0x114   : > { %6659 = vmatprep.subr.bf16.mxu0 %v9245_v5  ;;  %6987 = vmatprep.subr.bf16.mxu1 %v9247_v30  ;;  %v806_v5 = vld [vmem:[%s10211_s28 + $0x1180] sm:$0xff] }
 0x115   : > { %v810_v30 = vld [vmem:[%s10211_s28 + $0x11a0] sm:$0xff] }
 0x116   : > { %v9300_v19 = vcombine.low %v806_v5, %v810_v30 }
 0x117   : > { %6660 = vmatpush1.bf16.msra.mxu0 %v9244_v13  ;;  %6988 = vmatpush1.bf16.msra.mxu1 %v9246_v14  ;;  %v9301_v13 = vcombine.high %v806_v5, %v810_v30  ;;  %v9303_v14 = vcombine.high %v807_v7, %v811_v8  ;;  %v859_v5 = vld [vmem:[%s10211_s28 + $0x1328] sm:$0xff] }
 0x118   : > { %6670 = vmatprep.subr.bf16.mxu0 %v9253_v15  ;;  %6998 = vmatprep.subr.bf16.mxu1 %v9255_v16  ;;  %v814_v15 = vld [vmem:[%s10211_s28 + $0x11c0] sm:$0xff] }
 0x119   : > { %v818_v16 = vld [vmem:[%s10211_s28 + $0x11e0] sm:$0xff] }
 0x11a   : > { %6662 = vmatmul.mubr.bf16.vlgmr.msra.gmra.mrb[0].mxu0 %v10548_v20  ;;  %6990 = vmatmul.mubr.bf16.vlgmr.msra.gmra.mrb[0].mxu1 %v10548_v20  ;;  %v9309_v22 = vcombine.high %v814_v15, %v818_v16  ;;  %v9308_v29 = vcombine.low %v814_v15, %v818_v16  ;;  %v867_v15 = vld [vmem:[%s10211_s28 + $0x1368] sm:$0xff] }
 0x11b   : > { %6671 = vmatpush1.bf16.msra.mxu0 %v9252_v23  ;;  %6999 = vmatpush1.bf16.msra.mxu1 %v9254_v25  ;;  %v9311_v23 = vcombine.high %v815_v17, %v819_v18  ;;  %v822_v25 = vld [vmem:[%s10211_s28 + $0x1200] sm:$0xff] }
 0x11c   : > { %6672 = vmatprep.subr.bf16.mxu0 %v9261_v26  ;;  %7000 = vmatprep.subr.bf16.mxu1 %v9263_v27  ;;  %v826_v26 = vld [vmem:[%s10211_s28 + $0x1220] sm:$0xff]  ;;  %v823_v27 = vld [vmem:[%s10211_s28 + $0x1208] sm:$0xff] }
 0x11d   : > { %6702 = vmatprep.mubr.bf16.mxu0 %v10555_v60  ;;  %7030 = vmatprep.mubr.bf16.mxu1 %v10555_v60  ;;  %v9317_v32 = vcombine.high %v822_v25, %v826_v26  ;;  %v9316_v38 = vcombine.low %v822_v25, %v826_v26  ;;  %v9318_v40 = vcombine.low %v823_v27, %v827_v28  ;;  %v875_v25 = vld [vmem:[%s10211_s28 + $0x13a8] sm:$0xff] }
 0x11f   : > { %6673 = vmatpush1.bf16.msra.mxu0 %v9260_v0  ;;  %7001 = vmatpush1.bf16.msra.mxu1 %v9262_v34  ;;  %v9319_v0 = vcombine.high %v823_v27, %v827_v28  ;;  %v830_v34 = vld [vmem:[%s10211_s28 + $0x1240] sm:$0xff] }
 0x120   : > { %6674 = vmatprep.subr.bf16.mxu0 %v9269_v35  ;;  %7002 = vmatprep.subr.bf16.mxu1 %v9271_v36  ;;  %v834_v35 = vld [vmem:[%s10211_s28 + $0x1260] sm:$0xff]  ;;  %v831_v36 = vld [vmem:[%s10211_s28 + $0x1248] sm:$0xff] }
 0x121   : > { %v9325_v41 = vcombine.high %v830_v34, %v834_v35  ;;  %v9324_v48 = vcombine.low %v830_v34, %v834_v35  ;;  %v9326_v50 = vcombine.low %v831_v36, %v835_v37  ;;  %v883_v34 = vld [vmem:[%s10211_s28 + $0x13e8] sm:$0xff] }
 0x123   : > { %6675 = vmatpush1.bf16.msra.mxu0 %v9268_v42  ;;  %7003 = vmatpush1.bf16.msra.mxu1 %v9270_v43  ;;  %v9327_v42 = vcombine.high %v831_v36, %v835_v37  ;;  %v838_v43 = vld [vmem:[%s10211_s28 + $0x1280] sm:$0xff] }
 0x124   : > { %6676 = vmatprep.subr.bf16.mxu0 %v9277_v44  ;;  %7004 = vmatprep.subr.bf16.mxu1 %v9279_v46  ;;  %v842_v44 = vld [vmem:[%s10211_s28 + $0x12a0] sm:$0xff]  ;;  %v839_v46 = vld [vmem:[%s10211_s28 + $0x1288] sm:$0xff] }
 0x125   : > { %v9333_v51 = vcombine.high %v838_v43, %v842_v44  ;;  %v9332_v58 = vcombine.low %v838_v43, %v842_v44  ;;  %v9334_v61 = vcombine.low %v839_v46, %v843_v47  ;;  %v891_v43 = vld [vmem:[%s10211_s28 + $0x1428] sm:$0xff] }
 0x127   : > { %6677 = vmatpush1.bf16.msra.mxu0 %v9276_v52  ;;  %7005 = vmatpush1.bf16.msra.mxu1 %v9278_v53  ;;  %v9335_v52 = vcombine.high %v839_v46, %v843_v47  ;;  %v846_v53 = vld [vmem:[%s10211_s28 + $0x12c0] sm:$0xff] }
 0x128   : > { %6678 = vmatprep.subr.bf16.mxu0 %v9285_v55  ;;  %7006 = vmatprep.subr.bf16.mxu1 %v9287_v56  ;;  %v850_v55 = vld [vmem:[%s10211_s28 + $0x12e0] sm:$0xff]  ;;  %v847_v56 = vld [vmem:[%s10211_s28 + $0x12c8] sm:$0xff] }
 0x129   : > { %v9341_v62 = vcombine.high %v846_v53, %v850_v55  ;;  %v9340_v30 = vcombine.low %v846_v53, %v850_v55  ;;  %v9342_v7 = vcombine.low %v847_v56, %v851_v57  ;;  %v895_v53 = vld [vmem:[%s10211_s28 + $0x1448] sm:$0xff] }
 0x12a   : > { %v899_v55 = vld [vmem:[%s10211_s28 + $0x1468] sm:$0xff] }
 0x12b   : > { %6679 = vmatpush1.bf16.msra.mxu0 %v9284_v63  ;;  %7007 = vmatpush1.bf16.msra.mxu1 %v9286_v1  ;;  %v9343_v63 = vcombine.high %v847_v56, %v851_v57  ;;  %v854_v1 = vld [vmem:[%s10211_s28 + $0x1300] sm:$0xff] }
 0x12c   : > { %6680 = vmatprep.subr.bf16.mxu0 %v9293_v3  ;;  %7008 = vmatprep.subr.bf16.mxu1 %v9295_v4  ;;  %v858_v3 = vld [vmem:[%s10211_s28 + $0x1320] sm:$0xff]  ;;  %v855_v4 = vld [vmem:[%s10211_s28 + $0x1308] sm:$0xff] }
 0x12d   : > { %v9349_v8 = vcombine.high %v854_v1, %v858_v3  ;;  %v9348_v16 = vcombine.low %v854_v1, %v858_v3  ;;  %v9350_v17 = vcombine.low %v855_v4, %v859_v5  ;;  %v10631_v1 = vcombine.high %v10555_v60, %v10555_v60  ;;  %v907_v3 = vld [vmem:[%s10211_s28 + $0x14a8] sm:$0xff] }
 0x12f   : > { %6681 = vmatpush1.bf16.msra.mxu0 %v9292_v11  ;;  %7009 = vmatpush1.bf16.msra.mxu1 %v9294_v12  ;;  %v9351_v11 = vcombine.high %v855_v4, %v859_v5  ;;  %v862_v12 = vld [vmem:[%s10211_s28 + $0x1340] sm:$0xff]  ;;  %v9390_v5 = vcombine.low %v895_v53, %v899_v55 }
 0x130   : > { %6682 = vmatprep.subr.bf16.mxu0 %v9301_v13  ;;  %7010 = vmatprep.subr.bf16.mxu1 %v9303_v14  ;;  %v866_v13 = vld [vmem:[%s10211_s28 + $0x1360] sm:$0xff]  ;;  %v863_v14 = vld [vmem:[%s10211_s28 + $0x1348] sm:$0xff] }
 0x131   : > { %v9357_v18 = vcombine.high %v862_v12, %v866_v13  ;;  %v9356_v26 = vcombine.low %v862_v12, %v866_v13  ;;  %v9358_v27 = vcombine.low %v863_v14, %v867_v15  ;;  %v911_v12 = vld [vmem:[%s10211_s28 + $0x14c8] sm:$0xff] }
 0x132   : > { %v915_v13 = vld [vmem:[%s10211_s28 + $0x14e8] sm:$0xff] }
 0x133   : > { %6683 = vmatpush1.bf16.msra.mxu0 %v9300_v19  ;;  %7011 = vmatpush1.bf16.msra.mxu1 %v9302_v21  ;;  %v9359_v19 = vcombine.high %v863_v14, %v867_v15  ;;  %v870_v21 = vld [vmem:[%s10211_s28 + $0x1380] sm:$0xff] }
 0x134   : > { %6684 = vmatprep.subr.bf16.mxu0 %v9309_v22  ;;  %7012 = vmatprep.subr.bf16.mxu1 %v9311_v23  ;;  %v874_v22 = vld [vmem:[%s10211_s28 + $0x13a0] sm:$0xff]  ;;  %v871_v23 = vld [vmem:[%s10211_s28 + $0x1388] sm:$0xff] }
 0x135   : > { %v9365_v28 = vcombine.high %v870_v21, %v874_v22  ;;  %v9364_v35 = vcombine.low %v870_v21, %v874_v22  ;;  %v9366_v36 = vcombine.low %v871_v23, %v875_v25  ;;  %v919_v21 = vld [vmem:[%s10211_s28 + $0x1508] sm:$0xff] }
 0x136   : > { %v923_v22 = vld [vmem:[%s10211_s28 + $0x1528] sm:$0xff] }
 0x137   : > { %6685 = vmatpush1.bf16.msra.mxu0 %v9308_v29  ;;  %7013 = vmatpush1.bf16.msra.mxu1 %v9310_v31  ;;  %v9367_v29 = vcombine.high %v871_v23, %v875_v25  ;;  %v878_v31 = vld [vmem:[%s10211_s28 + $0x13c0] sm:$0xff]  ;;  %v9406_v25 = vcombine.low %v911_v12, %v915_v13 }
 0x138   : > { %6686 = vmatprep.subr.bf16.mxu0 %v9317_v32  ;;  %7014 = vmatprep.subr.bf16.mxu1 %v9319_v0  ;;  %v882_v32 = vld [vmem:[%s10211_s28 + $0x13e0] sm:$0xff]  ;;  %v879_v0 = vld [vmem:[%s10211_s28 + $0x13c8] sm:$0xff] }
 0x139   : > { %v9373_v37 = vcombine.high %v878_v31, %v882_v32  ;;  %v9372_v44 = vcombine.low %v878_v31, %v882_v32  ;;  %v9374_v46 = vcombine.low %v879_v0, %v883_v34  ;;  %v927_v31 = vld [vmem:[%s10211_s28 + $0x1548] sm:$0xff] }
 0x13a   : > { %v931_v32 = vld [vmem:[%s10211_s28 + $0x1568] sm:$0xff] }
 0x13b   : > { %6687 = vmatpush1.bf16.msra.mxu0 %v9316_v38  ;;  %7015 = vmatpush1.bf16.msra.mxu1 %v9318_v40  ;;  %v9375_v38 = vcombine.high %v879_v0, %v883_v34  ;;  %v886_v40 = vld [vmem:[%s10211_s28 + $0x1400] sm:$0xff]  ;;  %v9414_v34 = vcombine.low %v919_v21, %v923_v22 }
 0x13c   : > { %6688 = vmatprep.subr.bf16.mxu0 %v9325_v41  ;;  %7016 = vmatprep.subr.bf16.mxu1 %v9327_v42  ;;  %v890_v41 = vld [vmem:[%s10211_s28 + $0x1420] sm:$0xff]  ;;  %v887_v42 = vld [vmem:[%s10211_s28 + $0x1408] sm:$0xff] }
 0x13d   : > { %v9381_v47 = vcombine.high %v886_v40, %v890_v41  ;;  %v9380_v56 = vcombine.low %v886_v40, %v890_v41  ;;  %v9382_v57 = vcombine.low %v887_v42, %v891_v43  ;;  %v935_v40 = vld [vmem:[%s10211_s28 + $0x1588] sm:$0xff] }
 0x13e   : > { %v939_v41 = vld [vmem:[%s10211_s28 + $0x15a8] sm:$0xff] }
 0x13f   : > { %6689 = vmatpush1.bf16.msra.mxu0 %v9324_v48  ;;  %7017 = vmatpush1.bf16.msra.mxu1 %v9326_v50  ;;  %v9383_v48 = vcombine.high %v887_v42, %v891_v43  ;;  %v894_v50 = vld [vmem:[%s10211_s28 + $0x1440] sm:$0xff]  ;;  %v9422_v43 = vcombine.low %v927_v31, %v931_v32 }
 0x140   : > { %6690 = vmatprep.subr.bf16.mxu0 %v9333_v51  ;;  %7018 = vmatprep.subr.bf16.mxu1 %v9335_v52  ;;  %v898_v51 = vld [vmem:[%s10211_s28 + $0x1460] sm:$0xff]  ;;  %v10623_v52 = vrot.slane %v10538_v9, %v10243_v54  ;;  %v903_v9 = vld [vmem:[%s10211_s28 + $0x1488] sm:$0xff] }
 0x141   : > { %v9388_v4 = vcombine.low %v894_v50, %v898_v51  ;;  %v9398_v15 = vcombine.low %v903_v9, %v907_v3 }
 0x143   : > { %6691 = vmatpush1.bf16.msra.mxu0 %v9332_v58  ;;  %7019 = vmatpush1.bf16.msra.mxu1 %v9334_v61  ;;  %v9389_v58 = vcombine.high %v894_v50, %v898_v51  ;;  %v9391_v61 = vcombine.high %v895_v53, %v899_v55  ;;  %v943_v50 = vld [vmem:[%s10211_s28 + $0x15c8] sm:$0xff]  ;;  %v9430_v55 = vcombine.low %v935_v40, %v939_v41 }
 0x144   : > { %6692 = vmatprep.subr.bf16.mxu0 %v9341_v62  ;;  %7020 = vmatprep.subr.bf16.mxu1 %v9343_v63  ;;  %v902_v62 = vld [vmem:[%s10211_s28 + $0x1480] sm:$0xff]  ;;  %v947_v51 = vld [vmem:[%s10211_s28 + $0x15e8] sm:$0xff] }
 0x145   : > { %v906_v63 = vld [vmem:[%s10211_s28 + $0x14a0] sm:$0xff] }
 0x146   : > { %v9396_v14 = vcombine.low %v902_v62, %v906_v63 }
 0x147   : > { %6693 = vmatpush1.bf16.msra.mxu0 %v9340_v30  ;;  %7021 = vmatpush1.bf16.msra.mxu1 %v9342_v7  ;;  %v9397_v30 = vcombine.high %v902_v62, %v906_v63  ;;  %v9399_v7 = vcombine.high %v903_v9, %v907_v3  ;;  %v951_v62 = vld [vmem:[%s10211_s28 + $0x1608] sm:$0xff]  ;;  %v9438_v3 = vcombine.low %v943_v50, %v947_v51 }
 0x148   : > { %6694 = vmatprep.subr.bf16.mxu0 %v9349_v8  ;;  %7022 = vmatprep.subr.bf16.mxu1 %v9351_v11  ;;  %v910_v8 = vld [vmem:[%s10211_s28 + $0x14c0] sm:$0xff]  ;;  %v955_v63 = vld [vmem:[%s10211_s28 + $0x1628] sm:$0xff] }
 0x149   : > { %v914_v11 = vld [vmem:[%s10211_s28 + $0x14e0] sm:$0xff] }
 0x14a   : > { %v9404_v23 = vcombine.low %v910_v8, %v914_v11 }
 0x14b   : > { %6695 = vmatpush1.bf16.msra.mxu0 %v9348_v16  ;;  %7023 = vmatpush1.bf16.msra.mxu1 %v9350_v17  ;;  %v9405_v16 = vcombine.high %v910_v8, %v914_v11  ;;  %v9407_v17 = vcombine.high %v911_v12, %v915_v13  ;;  %v959_v8 = vld [vmem:[%s10211_s28 + $0x1648] sm:$0xff]  ;;  %v9446_v13 = vcombine.low %v951_v62, %v955_v63 }
 0x14c   : > { %6696 = vmatprep.subr.bf16.mxu0 %v9357_v18  ;;  %7024 = vmatprep.subr.bf16.mxu1 %v9359_v19  ;;  %v918_v18 = vld [vmem:[%s10211_s28 + $0x1500] sm:$0xff]  ;;  %v963_v11 = vld [vmem:[%s10211_s28 + $0x1668] sm:$0xff] }
 0x14d   : > { %v922_v19 = vld [vmem:[%s10211_s28 + $0x1520] sm:$0xff] }
 0x14e   : > { %v9412_v0 = vcombine.low %v918_v18, %v922_v19 }
 0x14f   : > { %6697 = vmatpush1.bf16.msra.mxu0 %v9356_v26  ;;  %7025 = vmatpush1.bf16.msra.mxu1 %v9358_v27  ;;  %v9413_v26 = vcombine.high %v918_v18, %v922_v19  ;;  %v9415_v27 = vcombine.high %v919_v21, %v923_v22  ;;  %v967_v18 = vld [vmem:[%s10211_s28 + $0x1688] sm:$0xff]  ;;  %v9454_v22 = vcombine.low %v959_v8, %v963_v11 }
 0x150   : > { %6698 = vmatprep.subr.bf16.mxu0 %v9365_v28  ;;  %7026 = vmatprep.subr.bf16.mxu1 %v9367_v29  ;;  %v926_v28 = vld [vmem:[%s10211_s28 + $0x1540] sm:$0xff]  ;;  %v971_v19 = vld [vmem:[%s10211_s28 + $0x16a8] sm:$0xff] }
 0x151   : > { %v930_v29 = vld [vmem:[%s10211_s28 + $0x1560] sm:$0xff] }
 0x152   : > { %v9420_v42 = vcombine.low %v926_v28, %v930_v29 }
 0x153   : > { %6699 = vmatpush1.bf16.msra.mxu0 %v9364_v35  ;;  %7027 = vmatpush1.bf16.msra.mxu1 %v9366_v36  ;;  %v9421_v35 = vcombine.high %v926_v28, %v930_v29  ;;  %v9423_v36 = vcombine.high %v927_v31, %v931_v32  ;;  %v975_v28 = vld [vmem:[%s10211_s28 + $0x16c8] sm:$0xff]  ;;  %v9462_v32 = vcombine.low %v967_v18, %v971_v19 }
 0x154   : > { %6700 = vmatprep.subr.bf16.mxu0 %v9373_v37  ;;  %7028 = vmatprep.subr.bf16.mxu1 %v9375_v38  ;;  %v934_v37 = vld [vmem:[%s10211_s28 + $0x1580] sm:$0xff]  ;;  %v979_v29 = vld [vmem:[%s10211_s28 + $0x16e8] sm:$0xff] }
 0x155   : > { %v938_v38 = vld [vmem:[%s10211_s28 + $0x15a0] sm:$0xff] }
 0x156   : > { %v9428_v53 = vcombine.low %v934_v37, %v938_v38 }
 0x157   : > { %6701 = vmatpush1.bf16.msra.mxu0 %v9372_v44  ;;  %7029 = vmatpush1.bf16.msra.mxu1 %v9374_v46  ;;  %v9429_v44 = vcombine.high %v934_v37, %v938_v38  ;;  %v9431_v46 = vcombine.high %v935_v40, %v939_v41  ;;  %v983_v37 = vld [vmem:[%s10211_s28 + $0x1708] sm:$0xff]  ;;  %v9470_v41 = vcombine.low %v975_v28, %v979_v29 }
 0x158   : > { %6711 = vmatprep.subr.bf16.mxu0 %v9381_v47  ;;  %7039 = vmatprep.subr.bf16.mxu1 %v9383_v48  ;;  %v942_v47 = vld [vmem:[%s10211_s28 + $0x15c0] sm:$0xff]  ;;  %v987_v38 = vld [vmem:[%s10211_s28 + $0x1728] sm:$0xff] }
 0x159   : > { %v946_v48 = vld [vmem:[%s10211_s28 + $0x15e0] sm:$0xff] }
 0x15a   : > { %6703 = vmatmul.mubr.bf16.vlgmr.msra.gmra.mrb[0].mxu0 %v10623_v52  ;;  %7031 = vmatmul.mubr.bf16.vlgmr.msra.gmra.mrb[0].mxu1 %v10623_v52  ;;  %v9436_v9 = vcombine.low %v942_v47, %v946_v48 }
 0x15b   : > { %6712 = vmatpush1.bf16.msra.mxu0 %v9380_v56  ;;  %7040 = vmatpush1.bf16.msra.mxu1 %v9382_v57  ;;  %v9437_v56 = vcombine.high %v942_v47, %v946_v48  ;;  %v9439_v57 = vcombine.high %v943_v50, %v947_v51  ;;  %v991_v47 = vld [vmem:[%s10211_s28 + $0x1748] sm:$0xff]  ;;  %v9478_v51 = vcombine.low %v983_v37, %v987_v38 }
 0x15c   : > { %6713 = vmatprep.subr.bf16.mxu0 %v9389_v58  ;;  %7041 = vmatprep.subr.bf16.mxu1 %v9391_v61  ;;  %v950_v58 = vld [vmem:[%s10211_s28 + $0x1600] sm:$0xff]  ;;  %v995_v48 = vld [vmem:[%s10211_s28 + $0x1768] sm:$0xff] }
 0x15d   : > { %6743 = vmatprep.mubr.bf16.mxu0 %v10631_v1  ;;  %7071 = vmatprep.mubr.bf16.mxu1 %v10631_v1  ;;  %v954_v61 = vld [vmem:[%s10211_s28 + $0x1620] sm:$0xff] }
 0x15e   : > { %v9444_v12 = vcombine.low %v950_v58, %v954_v61 }
 0x15f   : > { %6714 = vmatpush1.bf16.msra.mxu0 %v9388_v4  ;;  %7042 = vmatpush1.bf16.msra.mxu1 %v9390_v5  ;;  %v9445_v4 = vcombine.high %v950_v58, %v954_v61  ;;  %v9447_v5 = vcombine.high %v951_v62, %v955_v63  ;;  %v999_v58 = vld [vmem:[%s10211_s28 + $0x1788] sm:$0xff]  ;;  %v9486_v63 = vcombine.low %v991_v47, %v995_v48 }
 0x160   : > { %6715 = vmatprep.subr.bf16.mxu0 %v9397_v30  ;;  %7043 = vmatprep.subr.bf16.mxu1 %v9399_v7  ;;  %v958_v30 = vld [vmem:[%s10211_s28 + $0x1640] sm:$0xff]  ;;  %v1003_v61 = vld [vmem:[%s10211_s28 + $0x17a8] sm:$0xff] }
 0x161   : > { %v962_v7 = vld [vmem:[%s10211_s28 + $0x1660] sm:$0xff] }
 0x162   : > { %v9452_v21 = vcombine.low %v958_v30, %v962_v7 }
 0x163   : > { %6716 = vmatpush1.bf16.msra.mxu0 %v9396_v14  ;;  %7044 = vmatpush1.bf16.msra.mxu1 %v9398_v15  ;;  %v9453_v14 = vcombine.high %v958_v30, %v962_v7  ;;  %v9455_v15 = vcombine.high %v959_v8, %v963_v11  ;;  %v1321_v30 = vcombine.high %v10532_v2, %v10532_v2  ;;  %v1007_v7 = vld [vmem:[%s10211_s28 + $0x17c8] sm:$0xff] }
 0x164   : > { %6717 = vmatprep.subr.bf16.mxu0 %v9405_v16  ;;  %7045 = vmatprep.subr.bf16.mxu1 %v9407_v17  ;;  %v966_v16 = vld [vmem:[%s10211_s28 + $0x1680] sm:$0xff]  ;;  %v1011_v8 = vld [vmem:[%s10211_s28 + $0x17e8] sm:$0xff] }
 0x165   : > { %v970_v17 = vld [vmem:[%s10211_s28 + $0x16a0] sm:$0xff]  ;;  %v1015_v2 = vld [vmem:[%s10211_s28 + $0x1808] sm:$0xff] }
 0x166   : > { %v9460_v31 = vcombine.low %v966_v16, %v970_v17 }
 0x167   : > { %6718 = vmatpush1.bf16.msra.mxu0 %v9404_v23  ;;  %7046 = vmatpush1.bf16.msra.mxu1 %v9406_v25  ;;  %v9461_v23 = vcombine.high %v966_v16, %v970_v17  ;;  %v9463_v25 = vcombine.high %v967_v18, %v971_v19  ;;  %v1018_v16 = vld [vmem:[%s10211_s28 + $0x1820] sm:$0xff]  ;;  %v10696_v17 = vrot.slane %v1321_v30, %v10243_v54  ;;  %v1019_v18 = vld [vmem:[%s10211_s28 + $0x1828] sm:$0xff] }
 0x168   : > { %6719 = vmatprep.subr.bf16.mxu0 %v9413_v26  ;;  %7047 = vmatprep.subr.bf16.mxu1 %v9415_v27  ;;  %v974_v26 = vld [vmem:[%s10211_s28 + $0x16c0] sm:$0xff] }
 0x169   : > { %v978_v27 = vld [vmem:[%s10211_s28 + $0x16e0] sm:$0xff] }
 0x16a   : > { %v9468_v40 = vcombine.low %v974_v26, %v978_v27  ;;  %v1054_v30 = vld [vmem:[%s10211_s28 + $0x1940] sm:$0xff] }
 0x16b   : > { %6720 = vmatpush1.bf16.msra.mxu0 %v9412_v0  ;;  %7048 = vmatpush1.bf16.msra.mxu1 %v9414_v34  ;;  %v9469_v0 = vcombine.high %v974_v26, %v978_v27  ;;  %v9471_v34 = vcombine.high %v975_v28, %v979_v29  ;;  %v1026_v26 = vld [vmem:[%s10211_s28 + $0x1860] sm:$0xff]  ;;  %v1337_v27 = vcombine.high %v10696_v17, %v10696_v17  ;;  %v1023_v29 = vld [vmem:[%s10211_s28 + $0x1848] sm:$0xff] }
 0x16c   : > { %6721 = vmatprep.subr.bf16.mxu0 %v9421_v35  ;;  %7049 = vmatprep.subr.bf16.mxu1 %v9423_v36  ;;  %v982_v35 = vld [vmem:[%s10211_s28 + $0x1700] sm:$0xff]  ;;  %v10706_v28 = vcombine.high %v10623_v52, %v10623_v52 }
 0x16d   : > { %v986_v36 = vld [vmem:[%s10211_s28 + $0x1720] sm:$0xff] }
 0x16e   : > { %v9476_v50 = vcombine.low %v982_v35, %v986_v36 }
 0x16f   : > { %6722 = vmatpush1.bf16.msra.mxu0 %v9420_v42  ;;  %7050 = vmatpush1.bf16.msra.mxu1 %v9422_v43  ;;  %v9477_v42 = vcombine.high %v982_v35, %v986_v36  ;;  %v9479_v43 = vcombine.high %v983_v37, %v987_v38  ;;  %v1030_v36 = vld [vmem:[%s10211_s28 + $0x1880] sm:$0xff]  ;;  %v10713_v38 = vrot.slane %v1337_v27, %v10243_v54 }
 0x170   : > { %6723 = vmatprep.subr.bf16.mxu0 %v9429_v44  ;;  %7051 = vmatprep.subr.bf16.mxu1 %v9431_v46  ;;  %v990_v44 = vld [vmem:[%s10211_s28 + $0x1740] sm:$0xff] }
 0x171   : > { %v994_v46 = vld [vmem:[%s10211_s28 + $0x1760] sm:$0xff] }
 0x172   : > { %v9484_v62 = vcombine.low %v990_v44, %v994_v46  ;;  %v1034_v37 = vld [vmem:[%s10211_s28 + $0x18a0] sm:$0xff] }
 0x173   : > { %6724 = vmatpush1.bf16.msra.mxu0 %v9428_v53  ;;  %7052 = vmatpush1.bf16.msra.mxu1 %v9430_v55  ;;  %v9485_v53 = vcombine.high %v990_v44, %v994_v46  ;;  %v9487_v55 = vcombine.high %v991_v47, %v995_v48  ;;  %v9525_v44 = vcombine.high %v1030_v36, %v1034_v37  ;;  %v1038_v47 = vld [vmem:[%s10211_s28 + $0x18c0] sm:$0xff] }
 0x174   : > { %6725 = vmatprep.subr.bf16.mxu0 %v9437_v56  ;;  %7053 = vmatprep.subr.bf16.mxu1 %v9439_v57  ;;  %v998_v56 = vld [vmem:[%s10211_s28 + $0x1780] sm:$0xff] }
 0x175   : > { %v1002_v57 = vld [vmem:[%s10211_s28 + $0x17a0] sm:$0xff] }
 0x176   : > { %v9492_v11 = vcombine.low %v998_v56, %v1002_v57  ;;  %v1042_v48 = vld [vmem:[%s10211_s28 + $0x18e0] sm:$0xff] }
 0x177   : > { %6726 = vmatpush1.bf16.msra.mxu0 %v9436_v9  ;;  %7054 = vmatpush1.bf16.msra.mxu1 %v9438_v3  ;;  %v9493_v9 = vcombine.high %v998_v56, %v1002_v57  ;;  %v9495_v3 = vcombine.high %v999_v58, %v1003_v61  ;;  %v9533_v56 = vcombine.high %v1038_v47, %v1042_v48  ;;  %v1074_v27 = vld [vmem:[%s10211_s28 + $0x19e0] sm:$0xff] }
 0x178   : > { %6727 = vmatprep.subr.bf16.mxu0 %v9445_v4  ;;  %7055 = vmatprep.subr.bf16.mxu1 %v9447_v5  ;;  %v1006_v4 = vld [vmem:[%s10211_s28 + $0x17c0] sm:$0xff] }
 0x179   : > { %v1010_v5 = vld [vmem:[%s10211_s28 + $0x17e0] sm:$0xff] }
 0x17a   : > { %v9500_v19 = vcombine.low %v1006_v4, %v1010_v5 }
 0x17b   : > { %6728 = vmatpush1.bf16.msra.mxu0 %v9444_v12  ;;  %7056 = vmatpush1.bf16.msra.mxu1 %v9446_v13  ;;  %v9494_v12 = vcombine.low %v999_v58, %v1003_v61  ;;  %v9501_v13 = vcombine.high %v1006_v4, %v1010_v5  ;;  %v1046_v58 = vld [vmem:[%s10211_s28 + $0x1900] sm:$0xff] }
 0x17c   : > { %6729 = vmatprep.subr.bf16.mxu0 %v9453_v14  ;;  %7057 = vmatprep.subr.bf16.mxu1 %v9455_v15  ;;  %v9503_v14 = vcombine.high %v1007_v7, %v1011_v8  ;;  %v1014_v15 = vld [vmem:[%s10211_s28 + $0x1800] sm:$0xff] }
 0x17d   : > { %v1050_v61 = vld [vmem:[%s10211_s28 + $0x1920] sm:$0xff] }
 0x17e   : > { %v9541_v4 = vcombine.high %v1046_v58, %v1050_v61 }
 0x17f   : > { %6730 = vmatpush1.bf16.msra.mxu0 %v9452_v21  ;;  %7058 = vmatpush1.bf16.msra.mxu1 %v9454_v22  ;;  %v9502_v21 = vcombine.low %v1007_v7, %v1011_v8  ;;  %v9509_v22 = vcombine.high %v1014_v15, %v1018_v16  ;;  %v1058_v7 = vld [vmem:[%s10211_s28 + $0x1960] sm:$0xff]  ;;  %v1055_v8 = vld [vmem:[%s10211_s28 + $0x1948] sm:$0xff] }
 0x180   : > { %6731 = vmatprep.subr.bf16.mxu0 %v9461_v23  ;;  %7059 = vmatprep.subr.bf16.mxu1 %v9463_v25  ;;  %v9511_v23 = vcombine.high %v1015_v2, %v1019_v18  ;;  %v1022_v25 = vld [vmem:[%s10211_s28 + $0x1840] sm:$0xff] }
 0x183   : > { %6732 = vmatpush1.bf16.msra.mxu0 %v9460_v31  ;;  %7060 = vmatpush1.bf16.msra.mxu1 %v9462_v32  ;;  %v1027_v31 = vld [vmem:[%s10211_s28 + $0x1868] sm:$0xff]  ;;  %v9508_v32 = vcombine.low %v1014_v15, %v1018_v16  ;;  %v1062_v16 = vld [vmem:[%s10211_s28 + $0x1980] sm:$0xff] }
 0x184   : > { %6733 = vmatprep.subr.bf16.mxu0 %v9469_v0  ;;  %7061 = vmatprep.subr.bf16.mxu1 %v9471_v34  ;;  %v9510_v0 = vcombine.low %v1015_v2, %v1019_v18  ;;  %v9517_v34 = vcombine.high %v1022_v25, %v1026_v26  ;;  %v9519_v35 = vcombine.high %v1023_v29, %v1027_v31  ;;  %v1066_v2 = vld [vmem:[%s10211_s28 + $0x19a0] sm:$0xff]  ;;  %v1063_v18 = vld [vmem:[%s10211_s28 + $0x1988] sm:$0xff] }
 0x187   : > { %6734 = vmatpush1.bf16.msra.mxu0 %v9468_v40  ;;  %7062 = vmatpush1.bf16.msra.mxu1 %v9470_v41  ;;  %v1031_v40 = vld [vmem:[%s10211_s28 + $0x1888] sm:$0xff] }
 0x188   : > { %6735 = vmatprep.subr.bf16.mxu0 %v9477_v42  ;;  %7063 = vmatprep.subr.bf16.mxu1 %v9479_v43  ;;  %v1035_v41 = vld [vmem:[%s10211_s28 + $0x18a8] sm:$0xff]  ;;  %v9516_v42 = vcombine.low %v1022_v25, %v1026_v26  ;;  %v9518_v43 = vcombine.low %v1023_v29, %v1027_v31  ;;  %v1070_v26 = vld [vmem:[%s10211_s28 + $0x19c0] sm:$0xff] }
 0x189   : > { %v9527_v46 = vcombine.high %v1031_v40, %v1035_v41  ;;  %v1071_v29 = vld [vmem:[%s10211_s28 + $0x19c8] sm:$0xff] }
 0x18a   : > { %v1075_v31 = vld [vmem:[%s10211_s28 + $0x19e8] sm:$0xff] }
 0x18b   : > { %6736 = vmatpush1.bf16.msra.mxu0 %v9476_v50  ;;  %7064 = vmatpush1.bf16.msra.mxu1 %v9478_v51  ;;  %v1039_v50 = vld [vmem:[%s10211_s28 + $0x18c8] sm:$0xff] }
 0x18c   : > { %6737 = vmatprep.subr.bf16.mxu0 %v9485_v53  ;;  %7065 = vmatprep.subr.bf16.mxu1 %v9487_v55  ;;  %v1043_v51 = vld [vmem:[%s10211_s28 + $0x18e8] sm:$0xff]  ;;  %v9524_v53 = vcombine.low %v1030_v36, %v1034_v37  ;;  %v9526_v55 = vcombine.low %v1031_v40, %v1035_v41  ;;  %v1078_v36 = vld [vmem:[%s10211_s28 + $0x1a00] sm:$0xff] }
 0x18d   : > { %v9535_v57 = vcombine.high %v1039_v50, %v1043_v51  ;;  %v1082_v37 = vld [vmem:[%s10211_s28 + $0x1a20] sm:$0xff]  ;;  %v1079_v40 = vld [vmem:[%s10211_s28 + $0x1a08] sm:$0xff] }
 0x18e   : > { %v1083_v41 = vld [vmem:[%s10211_s28 + $0x1a28] sm:$0xff] }
 0x18f   : > { %6738 = vmatpush1.bf16.msra.mxu0 %v9484_v62  ;;  %7066 = vmatpush1.bf16.msra.mxu1 %v9486_v63  ;;  %v1047_v62 = vld [vmem:[%s10211_s28 + $0x1908] sm:$0xff] }
 0x190   : > { %6739 = vmatprep.subr.bf16.mxu0 %v9493_v9  ;;  %7067 = vmatprep.subr.bf16.mxu1 %v9495_v3  ;;  %v1051_v63 = vld [vmem:[%s10211_s28 + $0x1928] sm:$0xff]  ;;  %v9532_v9 = vcombine.low %v1038_v47, %v1042_v48  ;;  %v9534_v3 = vcombine.low %v1039_v50, %v1043_v51  ;;  %v1086_v47 = vld [vmem:[%s10211_s28 + $0x1a40] sm:$0xff] }
 0x191   : > { %v9543_v5 = vcombine.high %v1047_v62, %v1051_v63  ;;  %v1090_v48 = vld [vmem:[%s10211_s28 + $0x1a60] sm:$0xff]  ;;  %v1087_v50 = vld [vmem:[%s10211_s28 + $0x1a48] sm:$0xff] }
 0x192   : > { %v1091_v51 = vld [vmem:[%s10211_s28 + $0x1a68] sm:$0xff] }
 0x193   : > { %6740 = vmatpush1.bf16.msra.mxu0 %v9492_v11  ;;  %7068 = vmatpush1.bf16.msra.mxu1 %v9494_v12  ;;  %v1059_v11 = vld [vmem:[%s10211_s28 + $0x1968] sm:$0xff]  ;;  %v9540_v12 = vcombine.low %v1046_v58, %v1050_v61  ;;  %v1094_v58 = vld [vmem:[%s10211_s28 + $0x1a80] sm:$0xff] }
 0x194   : > { %6741 = vmatprep.subr.bf16.mxu0 %v9501_v13  ;;  %7069 = vmatprep.subr.bf16.mxu1 %v9503_v14  ;;  %v9542_v13 = vcombine.low %v1047_v62, %v1051_v63  ;;  %v9549_v14 = vcombine.high %v1054_v30, %v1058_v7  ;;  %v9551_v15 = vcombine.high %v1055_v8, %v1059_v11  ;;  %v1098_v61 = vld [vmem:[%s10211_s28 + $0x1aa0] sm:$0xff]  ;;  %v1095_v62 = vld [vmem:[%s10211_s28 + $0x1a88] sm:$0xff] }
 0x195   : > { %v1099_v63 = vld [vmem:[%s10211_s28 + $0x1aa8] sm:$0xff] }
 0x197   : > { %6742 = vmatpush1.bf16.msra.mxu0 %v9500_v19  ;;  %7070 = vmatpush1.bf16.msra.mxu1 %v9502_v21  ;;  %v1067_v19 = vld [vmem:[%s10211_s28 + $0x19a8] sm:$0xff]  ;;  %v9548_v21 = vcombine.low %v1054_v30, %v1058_v7  ;;  %v1102_v30 = vld [vmem:[%s10211_s28 + $0x1ac0] sm:$0xff] }
 0x198   : > { %6752 = vmatprep.subr.bf16.mxu0 %v9509_v22  ;;  %7080 = vmatprep.subr.bf16.mxu1 %v9511_v23  ;;  %v9550_v22 = vcombine.low %v1055_v8, %v1059_v11  ;;  %v9557_v23 = vcombine.high %v1062_v16, %v1066_v2  ;;  %v9559_v25 = vcombine.high %v1063_v18, %v1067_v19  ;;  %v1106_v7 = vld [vmem:[%s10211_s28 + $0x1ae0] sm:$0xff]  ;;  %v1103_v8 = vld [vmem:[%s10211_s28 + $0x1ac8] sm:$0xff] }
 0x199   : > { %v1107_v11 = vld [vmem:[%s10211_s28 + $0x1ae8] sm:$0xff] }
 0x19a   : > { %6744 = vmatmul.mubr.bf16.vlgmr.msra.gmra.mrb[0].mxu0 %v10706_v28  ;;  %7072 = vmatmul.mubr.bf16.vlgmr.msra.gmra.mrb[0].mxu1 %v10706_v28 }
 0x19b   : > { %6753 = vmatpush1.bf16.msra.mxu0 %v9508_v32  ;;  %7081 = vmatpush1.bf16.msra.mxu1 %v9510_v0  ;;  %v9556_v32 = vcombine.low %v1062_v16, %v1066_v2  ;;  %v9558_v0 = vcombine.low %v1063_v18, %v1067_v19  ;;  %v1110_v16 = vld [vmem:[%s10211_s28 + $0x1b00] sm:$0xff]  ;;  %v1111_v18 = vld [vmem:[%s10211_s28 + $0x1b08] sm:$0xff] }
 0x19c   : > { %6754 = vmatprep.subr.bf16.mxu0 %v9517_v34  ;;  %7082 = vmatprep.subr.bf16.mxu1 %v9519_v35  ;;  %v9565_v34 = vcombine.high %v1070_v26, %v1074_v27  ;;  %v9567_v35 = vcombine.high %v1071_v29, %v1075_v31  ;;  %v1114_v2 = vld [vmem:[%s10211_s28 + $0x1b20] sm:$0xff]  ;;  %v1115_v19 = vld [vmem:[%s10211_s28 + $0x1b28] sm:$0xff] }
 0x19d   : > { %6784 = vmatprep.mubr.bf16.mxu0 %v10713_v38  ;;  %7112 = vmatprep.mubr.bf16.mxu1 %v10713_v38 }
 0x19f   : > { %6755 = vmatpush1.bf16.msra.mxu0 %v9516_v42  ;;  %7083 = vmatpush1.bf16.msra.mxu1 %v9518_v43  ;;  %v9564_v42 = vcombine.low %v1070_v26, %v1074_v27  ;;  %v9566_v43 = vcombine.low %v1071_v29, %v1075_v31  ;;  %v1118_v26 = vld [vmem:[%s10211_s28 + $0x1b40] sm:$0xff]  ;;  %v1119_v29 = vld [vmem:[%s10211_s28 + $0x1b48] sm:$0xff] }
 0x1a0   : > { %6756 = vmatprep.subr.bf16.mxu0 %v9525_v44  ;;  %7084 = vmatprep.subr.bf16.mxu1 %v9527_v46  ;;  %v9573_v44 = vcombine.high %v1078_v36, %v1082_v37  ;;  %v9575_v46 = vcombine.high %v1079_v40, %v1083_v41  ;;  %v1122_v27 = vld [vmem:[%s10211_s28 + $0x1b60] sm:$0xff]  ;;  %v1123_v31 = vld [vmem:[%s10211_s28 + $0x1b68] sm:$0xff] }
 0x1a3   : > { %6757 = vmatpush1.bf16.msra.mxu0 %v9524_v53  ;;  %7085 = vmatpush1.bf16.msra.mxu1 %v9526_v55  ;;  %v9572_v53 = vcombine.low %v1078_v36, %v1082_v37  ;;  %v9574_v55 = vcombine.low %v1079_v40, %v1083_v41  ;;  %v1126_v36 = vld [vmem:[%s10211_s28 + $0x1b80] sm:$0xff]  ;;  %v1127_v40 = vld [vmem:[%s10211_s28 + $0x1b88] sm:$0xff] }
 0x1a4   : > { %6758 = vmatprep.subr.bf16.mxu0 %v9533_v56  ;;  %7086 = vmatprep.subr.bf16.mxu1 %v9535_v57  ;;  %v9581_v56 = vcombine.high %v1086_v47, %v1090_v48  ;;  %v9583_v57 = vcombine.high %v1087_v50, %v1091_v51  ;;  %v1130_v37 = vld [vmem:[%s10211_s28 + $0x1ba0] sm:$0xff]  ;;  %v1131_v41 = vld [vmem:[%s10211_s28 + $0x1ba8] sm:$0xff] }
 0x1a7   : > { %6759 = vmatpush1.bf16.msra.mxu0 %v9532_v9  ;;  %7087 = vmatpush1.bf16.msra.mxu1 %v9534_v3  ;;  %v9580_v9 = vcombine.low %v1086_v47, %v1090_v48  ;;  %v9582_v3 = vcombine.low %v1087_v50, %v1091_v51  ;;  %v1134_v47 = vld [vmem:[%s10211_s28 + $0x1bc0] sm:$0xff]  ;;  %v1135_v50 = vld [vmem:[%s10211_s28 + $0x1bc8] sm:$0xff] }
 0x1a8   : > { %6760 = vmatprep.subr.bf16.mxu0 %v9541_v4  ;;  %7088 = vmatprep.subr.bf16.mxu1 %v9543_v5  ;;  %v9589_v4 = vcombine.high %v1094_v58, %v1098_v61  ;;  %v9591_v5 = vcombine.high %v1095_v62, %v1099_v63  ;;  %v1138_v48 = vld [vmem:[%s10211_s28 + $0x1be0] sm:$0xff]  ;;  %v1139_v51 = vld [vmem:[%s10211_s28 + $0x1be8] sm:$0xff] }
 0x1ab   : > { %6761 = vmatpush1.bf16.msra.mxu0 %v9540_v12  ;;  %7089 = vmatpush1.bf16.msra.mxu1 %v9542_v13  ;;  %v9588_v12 = vcombine.low %v1094_v58, %v1098_v61  ;;  %v9590_v13 = vcombine.low %v1095_v62, %v1099_v63  ;;  %v1142_v58 = vld [vmem:[%s10211_s28 + $0x1c00] sm:$0xff]  ;;  %v1143_v62 = vld [vmem:[%s10211_s28 + $0x1c08] sm:$0xff] }
 0x1ac   : > { %6762 = vmatprep.subr.bf16.mxu0 %v9549_v14  ;;  %7090 = vmatprep.subr.bf16.mxu1 %v9551_v15  ;;  %v9597_v14 = vcombine.high %v1102_v30, %v1106_v7  ;;  %v9599_v15 = vcombine.high %v1103_v8, %v1107_v11  ;;  %v1146_v61 = vld [vmem:[%s10211_s28 + $0x1c20] sm:$0xff]  ;;  %v1147_v63 = vld [vmem:[%s10211_s28 + $0x1c28] sm:$0xff] }
 0x1af   : > { %6763 = vmatpush1.bf16.msra.mxu0 %v9548_v21  ;;  %7091 = vmatpush1.bf16.msra.mxu1 %v9550_v22  ;;  %v9596_v21 = vcombine.low %v1102_v30, %v1106_v7  ;;  %v9598_v22 = vcombine.low %v1103_v8, %v1107_v11  ;;  %v1150_v30 = vld [vmem:[%s10211_s28 + $0x1c40] sm:$0xff]  ;;  %v10781_v8 = vrot.slane %v10696_v17, %v10243_v54  ;;  %v1151_v11 = vld [vmem:[%s10211_s28 + $0x1c48] sm:$0xff] }
 0x1b0   : > { %6764 = vmatprep.subr.bf16.mxu0 %v9557_v23  ;;  %7092 = vmatprep.subr.bf16.mxu1 %v9559_v25  ;;  %v9605_v23 = vcombine.high %v1110_v16, %v1114_v2  ;;  %v9607_v25 = vcombine.high %v1111_v18, %v1115_v19  ;;  %v1154_v7 = vld [vmem:[%s10211_s28 + $0x1c60] sm:$0xff]  ;;  %v1159_v54 = vld [vmem:[%s10211_s28 + $0x1c88] sm:$0xff] }
 0x1b1   : > { %v1163_v17 = vld [vmem:[%s10211_s28 + $0x1ca8] sm:$0xff] }
 0x1b3   : > { %6765 = vmatpush1.bf16.msra.mxu0 %v9556_v32  ;;  %7093 = vmatpush1.bf16.msra.mxu1 %v9558_v0  ;;  %v9604_v32 = vcombine.low %v1110_v16, %v1114_v2  ;;  %v9606_v0 = vcombine.low %v1111_v18, %v1115_v19  ;;  %v1158_v2 = vld [vmem:[%s10211_s28 + $0x1c80] sm:$0xff]  ;;  %v10789_v19 = vcombine.high %v10713_v38, %v10713_v38 }
 0x1b4   : > { %6766 = vmatprep.subr.bf16.mxu0 %v9565_v34  ;;  %7094 = vmatprep.subr.bf16.mxu1 %v9567_v35  ;;  %v9613_v34 = vcombine.high %v1118_v26, %v1122_v27  ;;  %v9615_v35 = vcombine.high %v1119_v29, %v1123_v31  ;;  %v1162_v18 = vld [vmem:[%s10211_s28 + $0x1ca0] sm:$0xff] }
 0x1b7   : > { %6767 = vmatpush1.bf16.msra.mxu0 %v9564_v42  ;;  %7095 = vmatpush1.bf16.msra.mxu1 %v9566_v43  ;;  %v9612_v42 = vcombine.low %v1118_v26, %v1122_v27  ;;  %v9614_v43 = vcombine.low %v1119_v29, %v1123_v31  ;;  %v1166_v26 = vld [vmem:[%s10211_s28 + $0x1cc0] sm:$0xff]  ;;  %v1167_v29 = vld [vmem:[%s10211_s28 + $0x1cc8] sm:$0xff] }
 0x1b8   : > { %6768 = vmatprep.subr.bf16.mxu0 %v9573_v44  ;;  %7096 = vmatprep.subr.bf16.mxu1 %v9575_v46  ;;  %v9621_v44 = vcombine.high %v1126_v36, %v1130_v37  ;;  %v9623_v46 = vcombine.high %v1127_v40, %v1131_v41  ;;  %v1170_v27 = vld [vmem:[%s10211_s28 + $0x1ce0] sm:$0xff]  ;;  %v1171_v31 = vld [vmem:[%s10211_s28 + $0x1ce8] sm:$0xff] }
 0x1bb   : > { %6769 = vmatpush1.bf16.msra.mxu0 %v9572_v53  ;;  %7097 = vmatpush1.bf16.msra.mxu1 %v9574_v55  ;;  %v9620_v53 = vcombine.low %v1126_v36, %v1130_v37  ;;  %v9622_v55 = vcombine.low %v1127_v40, %v1131_v41  ;;  %v1174_v36 = vld [vmem:[%s10211_s28 + $0x1d00] sm:$0xff]  ;;  %v1175_v40 = vld [vmem:[%s10211_s28 + $0x1d08] sm:$0xff] }
 0x1bc   : > { %6770 = vmatprep.subr.bf16.mxu0 %v9581_v56  ;;  %7098 = vmatprep.subr.bf16.mxu1 %v9583_v57  ;;  %v9629_v56 = vcombine.high %v1134_v47, %v1138_v48  ;;  %v9631_v57 = vcombine.high %v1135_v50, %v1139_v51  ;;  %v1178_v37 = vld [vmem:[%s10211_s28 + $0x1d20] sm:$0xff]  ;;  %v1179_v41 = vld [vmem:[%s10211_s28 + $0x1d28] sm:$0xff] }
 0x1bf   : > { %6771 = vmatpush1.bf16.msra.mxu0 %v9580_v9  ;;  %7099 = vmatpush1.bf16.msra.mxu1 %v9582_v3  ;;  %v9628_v9 = vcombine.low %v1134_v47, %v1138_v48  ;;  %v9630_v3 = vcombine.low %v1135_v50, %v1139_v51  ;;  %v1182_v47 = vld [vmem:[%s10211_s28 + $0x1d40] sm:$0xff]  ;;  %v1183_v50 = vld [vmem:[%s10211_s28 + $0x1d48] sm:$0xff] }
 0x1c0   : > { %6772 = vmatprep.subr.bf16.mxu0 %v9589_v4  ;;  %7100 = vmatprep.subr.bf16.mxu1 %v9591_v5  ;;  %v9637_v4 = vcombine.high %v1142_v58, %v1146_v61  ;;  %v9639_v5 = vcombine.high %v1143_v62, %v1147_v63  ;;  %v1186_v48 = vld [vmem:[%s10211_s28 + $0x1d60] sm:$0xff]  ;;  %v1187_v51 = vld [vmem:[%s10211_s28 + $0x1d68] sm:$0xff] }
 0x1c3   : > { %6773 = vmatpush1.bf16.msra.mxu0 %v9588_v12  ;;  %7101 = vmatpush1.bf16.msra.mxu1 %v9590_v13  ;;  %v1155_v12 = vld [vmem:[%s10211_s28 + $0x1c68] sm:$0xff]  ;;  %v9636_v13 = vcombine.low %v1142_v58, %v1146_v61  ;;  %v1190_v58 = vld [vmem:[%s10211_s28 + $0x1d80] sm:$0xff] }
 0x1c4   : > { %6774 = vmatprep.subr.bf16.mxu0 %v9597_v14  ;;  %7102 = vmatprep.subr.bf16.mxu1 %v9599_v15  ;;  %v9638_v14 = vcombine.low %v1143_v62, %v1147_v63  ;;  %v9645_v15 = vcombine.high %v1150_v30, %v1154_v7  ;;  %v9647_v16 = vcombine.high %v1151_v11, %v1155_v12  ;;  %v1194_v61 = vld [vmem:[%s10211_s28 + $0x1da0] sm:$0xff]  ;;  %v1191_v62 = vld [vmem:[%s10211_s28 + $0x1d88] sm:$0xff] }
 0x1c5   : > { %v1195_v63 = vld [vmem:[%s10211_s28 + $0x1da8] sm:$0xff] }
 0x1c7   : > { %6775 = vmatpush1.bf16.msra.mxu0 %v9596_v21  ;;  %7103 = vmatpush1.bf16.msra.mxu1 %v9598_v22  ;;  %v9644_v21 = vcombine.low %v1150_v30, %v1154_v7  ;;  %v9646_v22 = vcombine.low %v1151_v11, %v1155_v12  ;;  %v1198_v30 = vld [vmem:[%s10211_s28 + $0x1dc0] sm:$0xff]  ;;  %v1199_v11 = vld [vmem:[%s10211_s28 + $0x1dc8] sm:$0xff] }
 0x1c8   : > { %6776 = vmatprep.subr.bf16.mxu0 %v9605_v23  ;;  %7104 = vmatprep.subr.bf16.mxu1 %v9607_v25  ;;  %v9653_v23 = vcombine.high %v1158_v2, %v1162_v18  ;;  %v9655_v25 = vcombine.high %v1159_v54, %v1163_v17  ;;  %v1202_v7 = vld [vmem:[%s10211_s28 + $0x1de0] sm:$0xff]  ;;  %v1203_v12 = vld [vmem:[%s10211_s28 + $0x1de8] sm:$0xff] }
 0x1cb   : > { %6777 = vmatpush1.bf16.msra.mxu0 %v9604_v32  ;;  %7105 = vmatpush1.bf16.msra.mxu1 %v9606_v0  ;;  %v9652_v32 = vcombine.low %v1158_v2, %v1162_v18  ;;  %v9654_v0 = vcombine.low %v1159_v54, %v1163_v17  ;;  %v1206_v2 = vld [vmem:[%s10211_s28 + $0x1e00] sm:$0xff]  ;;  %v1207_v54 = vld [vmem:[%s10211_s28 + $0x1e08] sm:$0xff] }
 0x1cc   : > { %6778 = vmatprep.subr.bf16.mxu0 %v9613_v34  ;;  %7106 = vmatprep.subr.bf16.mxu1 %v9615_v35  ;;  %v9661_v34 = vcombine.high %v1166_v26, %v1170_v27  ;;  %v9663_v35 = vcombine.high %v1167_v29, %v1171_v31  ;;  %v1210_v18 = vld [vmem:[%s10211_s28 + $0x1e20] sm:$0xff]  ;;  %v1211_v17 = vld [vmem:[%s10211_s28 + $0x1e28] sm:$0xff] }
 0x1cf   : > { %6779 = vmatpush1.bf16.msra.mxu0 %v9612_v42  ;;  %7107 = vmatpush1.bf16.msra.mxu1 %v9614_v43  ;;  %v9660_v42 = vcombine.low %v1166_v26, %v1170_v27  ;;  %v9662_v43 = vcombine.low %v1167_v29, %v1171_v31  ;;  %v1214_v26 = vld [vmem:[%s10211_s28 + $0x1e40] sm:$0xff]  ;;  %v1215_v29 = vld [vmem:[%s10211_s28 + $0x1e48] sm:$0xff] }
 0x1d0   : > { %6780 = vmatprep.subr.bf16.mxu0 %v9621_v44  ;;  %7108 = vmatprep.subr.bf16.mxu1 %v9623_v46  ;;  %v9669_v44 = vcombine.high %v1174_v36, %v1178_v37  ;;  %v9671_v46 = vcombine.high %v1175_v40, %v1179_v41  ;;  %v1218_v27 = vld [vmem:[%s10211_s28 + $0x1e60] sm:$0xff]  ;;  %v1219_v31 = vld [vmem:[%s10211_s28 + $0x1e68] sm:$0xff] }
 0x1d3   : > { %6781 = vmatpush1.bf16.msra.mxu0 %v9620_v53  ;;  %7109 = vmatpush1.bf16.msra.mxu1 %v9622_v55  ;;  %v9668_v53 = vcombine.low %v1174_v36, %v1178_v37  ;;  %v9670_v55 = vcombine.low %v1175_v40, %v1179_v41  ;;  %v1222_v36 = vld [vmem:[%s10211_s28 + $0x1e80] sm:$0xff]  ;;  %v1223_v40 = vld [vmem:[%s10211_s28 + $0x1e88] sm:$0xff] }
 0x1d4   : > { %6782 = vmatprep.subr.bf16.mxu0 %v9629_v56  ;;  %7110 = vmatprep.subr.bf16.mxu1 %v9631_v57  ;;  %v9677_v56 = vcombine.high %v1182_v47, %v1186_v48  ;;  %v9679_v57 = vcombine.high %v1183_v50, %v1187_v51  ;;  %v1226_v37 = vld [vmem:[%s10211_s28 + $0x1ea0] sm:$0xff]  ;;  %v1227_v41 = vld [vmem:[%s10211_s28 + $0x1ea8] sm:$0xff] }
 0x1d7   : > { %6783 = vmatpush1.bf16.msra.mxu0 %v9628_v9  ;;  %7111 = vmatpush1.bf16.msra.mxu1 %v9630_v3  ;;  %v9676_v9 = vcombine.low %v1182_v47, %v1186_v48  ;;  %v9678_v3 = vcombine.low %v1183_v50, %v1187_v51  ;;  %v1230_v47 = vld [vmem:[%s10211_s28 + $0x1ec0] sm:$0xff]  ;;  %v1231_v50 = vld [vmem:[%s10211_s28 + $0x1ec8] sm:$0xff] }
 0x1d8   : > { %6793 = vmatprep.subr.bf16.mxu0 %v9637_v4  ;;  %7121 = vmatprep.subr.bf16.mxu1 %v9639_v5  ;;  %v9685_v4 = vcombine.high %v1190_v58, %v1194_v61  ;;  %v9687_v5 = vcombine.high %v1191_v62, %v1195_v63  ;;  %v1234_v48 = vld [vmem:[%s10211_s28 + $0x1ee0] sm:$0xff]  ;;  %v1235_v51 = vld [vmem:[%s10211_s28 + $0x1ee8] sm:$0xff] }
 0x1da   : > { %6785 = vmatmul.mubr.bf16.vlgmr.msra.gmra.mrb[0].mxu0 %v10781_v8  ;;  %7113 = vmatmul.mubr.bf16.vlgmr.msra.gmra.mrb[0].mxu1 %v10781_v8 }
 0x1db   : > { %6794 = vmatpush1.bf16.msra.mxu0 %v9636_v13  ;;  %7122 = vmatpush1.bf16.msra.mxu1 %v9638_v14  ;;  %v9684_v13 = vcombine.low %v1190_v58, %v1194_v61  ;;  %v9686_v14 = vcombine.low %v1191_v62, %v1195_v63  ;;  %v1238_v58 = vld [vmem:[%s10211_s28 + $0x1f00] sm:$0xff]  ;;  %v1239_v62 = vld [vmem:[%s10211_s28 + $0x1f08] sm:$0xff] }
 0x1dc   : > { %6795 = vmatprep.subr.bf16.mxu0 %v9645_v15  ;;  %7123 = vmatprep.subr.bf16.mxu1 %v9647_v16  ;;  %v9693_v15 = vcombine.high %v1198_v30, %v1202_v7  ;;  %v9695_v16 = vcombine.high %v1199_v11, %v1203_v12  ;;  %v1242_v61 = vld [vmem:[%s10211_s28 + $0x1f20] sm:$0xff]  ;;  %v1243_v63 = vld [vmem:[%s10211_s28 + $0x1f28] sm:$0xff] }
 0x1dd   : > { %6825 = vmatprep.mubr.bf16.mxu0 %v10789_v19  ;;  %7153 = vmatprep.mubr.bf16.mxu1 %v10789_v19 }
 0x1df   : > { %6796 = vmatpush1.bf16.msra.mxu0 %v9644_v21  ;;  %7124 = vmatpush1.bf16.msra.mxu1 %v9646_v22  ;;  %v9692_v21 = vcombine.low %v1198_v30, %v1202_v7  ;;  %v9694_v22 = vcombine.low %v1199_v11, %v1203_v12  ;;  %v1246_v30 = vld [vmem:[%s10211_s28 + $0x1f40] sm:$0xff]  ;;  %v1247_v11 = vld [vmem:[%s10211_s28 + $0x1f48] sm:$0xff] }
 0x1e0   : > { %6797 = vmatprep.subr.bf16.mxu0 %v9653_v23  ;;  %7125 = vmatprep.subr.bf16.mxu1 %v9655_v25  ;;  %v9701_v23 = vcombine.high %v1206_v2, %v1210_v18  ;;  %v9703_v25 = vcombine.high %v1207_v54, %v1211_v17  ;;  %v1250_v7 = vld [vmem:[%s10211_s28 + $0x1f60] sm:$0xff]  ;;  %v1251_v12 = vld [vmem:[%s10211_s28 + $0x1f68] sm:$0xff] }
 0x1e3   : > { %6798 = vmatpush1.bf16.msra.mxu0 %v9652_v32  ;;  %7126 = vmatpush1.bf16.msra.mxu1 %v9654_v0  ;;  %v9700_v32 = vcombine.low %v1206_v2, %v1210_v18  ;;  %v9702_v0 = vcombine.low %v1207_v54, %v1211_v17  ;;  %v1254_v2 = vld [vmem:[%s10211_s28 + $0x1f80] sm:$0xff]  ;;  %v1255_v54 = vld [vmem:[%s10211_s28 + $0x1f88] sm:$0xff] }
 0x1e4   : > { %6799 = vmatprep.subr.bf16.mxu0 %v9661_v34  ;;  %7127 = vmatprep.subr.bf16.mxu1 %v9663_v35  ;;  %v9709_v34 = vcombine.high %v1214_v26, %v1218_v27  ;;  %v9711_v35 = vcombine.high %v1215_v29, %v1219_v31  ;;  %v1258_v18 = vld [vmem:[%s10211_s28 + $0x1fa0] sm:$0xff]  ;;  %v1259_v17 = vld [vmem:[%s10211_s28 + $0x1fa8] sm:$0xff] }
 0x1e7   : > { %6800 = vmatpush1.bf16.msra.mxu0 %v9660_v42  ;;  %7128 = vmatpush1.bf16.msra.mxu1 %v9662_v43  ;;  %v9708_v42 = vcombine.low %v1214_v26, %v1218_v27  ;;  %v9710_v43 = vcombine.low %v1215_v29, %v1219_v31  ;;  %v1262_v26 = vld [vmem:[%s10211_s28 + $0x1fc0] sm:$0xff]  ;;  %v1263_v29 = vld [vmem:[%s10211_s28 + $0x1fc8] sm:$0xff] }
 0x1e8   : > { %6801 = vmatprep.subr.bf16.mxu0 %v9669_v44  ;;  %7129 = vmatprep.subr.bf16.mxu1 %v9671_v46  ;;  %v9717_v44 = vcombine.high %v1222_v36, %v1226_v37  ;;  %v9719_v46 = vcombine.high %v1223_v40, %v1227_v41  ;;  %v1266_v27 = vld [vmem:[%s10211_s28 + $0x1fe0] sm:$0xff]  ;;  %v1267_v31 = vld [vmem:[%s10211_s28 + $0x1fe8] sm:$0xff] }
 0x1eb   : > { %6802 = vmatpush1.bf16.msra.mxu0 %v9668_v53  ;;  %7130 = vmatpush1.bf16.msra.mxu1 %v9670_v55  ;;  %v9716_v53 = vcombine.low %v1222_v36, %v1226_v37  ;;  %v9718_v55 = vcombine.low %v1223_v40, %v1227_v41  ;;  %v248_v36 = vld [vmem:[%s10211_s28 + $0x10] sm:$0xff]  ;;  %v249_v40 = vld [vmem:[%s10211_s28 + $0x18] sm:$0xff] }
 0x1ec   : > { %6803 = vmatprep.subr.bf16.mxu0 %v9677_v56  ;;  %7131 = vmatprep.subr.bf16.mxu1 %v9679_v57  ;;  %v9725_v56 = vcombine.high %v1230_v47, %v1234_v48  ;;  %v9727_v57 = vcombine.high %v1231_v50, %v1235_v51  ;;  %v252_v37 = vld [vmem:[%s10211_s28 + $0x30] sm:$0xff]  ;;  %v253_v41 = vld [vmem:[%s10211_s28 + $0x38] sm:$0xff] }
 0x1ef   : > { %6804 = vmatpush1.bf16.msra.mxu0 %v9676_v9  ;;  %7132 = vmatpush1.bf16.msra.mxu1 %v9678_v3  ;;  %v9724_v9 = vcombine.low %v1230_v47, %v1234_v48  ;;  %v9726_v3 = vcombine.low %v1231_v50, %v1235_v51  ;;  %v256_v47 = vld [vmem:[%s10211_s28 + $0x50] sm:$0xff]  ;;  %v10857_v50 = vcombine.high %v10781_v8, %v10781_v8  ;;  %v257_v51 = vld [vmem:[%s10211_s28 + $0x58] sm:$0xff] }
 0x1f0   : > { %6805 = vmatprep.subr.bf16.mxu0 %v9685_v4  ;;  %7133 = vmatprep.subr.bf16.mxu1 %v9687_v5  ;;  %v9733_v4 = vcombine.high %v1238_v58, %v1242_v61  ;;  %v9735_v5 = vcombine.high %v1239_v62, %v1243_v63  ;;  %v260_v48 = vld [vmem:[%s10211_s28 + $0x70] sm:$0xff] }
 0x1f3   : > { %6806 = vmatpush1.bf16.msra.mxu0 %v9684_v13  ;;  %7134 = vmatpush1.bf16.msra.mxu1 %v9686_v14  ;;  %v9732_v13 = vcombine.low %v1238_v58, %v1242_v61  ;;  %v9734_v14 = vcombine.low %v1239_v62, %v1243_v63  ;;  %v264_v61 = vld [vmem:[%s10211_s28 + $0x90] sm:$0xff]  ;;  %v265_v63 = vld [vmem:[%s10211_s28 + $0x98] sm:$0xff] }
 0x1f4   : > { %6807 = vmatprep.subr.bf16.mxu0 %v9693_v15  ;;  %7135 = vmatprep.subr.bf16.mxu1 %v9695_v16  ;;  %v9741_v15 = vcombine.high %v1246_v30, %v1250_v7  ;;  %v9743_v16 = vcombine.high %v1247_v11, %v1251_v12  ;;  %v268_v62 = vld [vmem:[%s10211_s28 + $0xb0] sm:$0xff] }
 0x1f7   : > { %6808 = vmatpush1.bf16.msra.mxu0 %v9692_v21  ;;  %7136 = vmatpush1.bf16.msra.mxu1 %v9694_v22  ;;  %v9740_v21 = vcombine.low %v1246_v30, %v1250_v7  ;;  %v9742_v22 = vcombine.low %v1247_v11, %v1251_v12  ;;  %v272_v7 = vld [vmem:[%s10211_s28 + $0xd0] sm:$0xff]  ;;  %v273_v12 = vld [vmem:[%s10211_s28 + $0xd8] sm:$0xff] }
 0x1f8   : > { %6809 = vmatprep.subr.bf16.mxu0 %v9701_v23  ;;  %7137 = vmatprep.subr.bf16.mxu1 %v9703_v25  ;;  %v9749_v23 = vcombine.high %v1254_v2, %v1258_v18  ;;  %v9751_v25 = vcombine.high %v1255_v54, %v1259_v17  ;;  %v276_v11 = vld [vmem:[%s10211_s28 + $0xf0] sm:$0xff] }
 0x1fb   : > { %6810 = vmatpush1.bf16.msra.mxu0 %v9700_v32  ;;  %7138 = vmatpush1.bf16.msra.mxu1 %v9702_v0  ;;  %v9748_v32 = vcombine.low %v1254_v2, %v1258_v18  ;;  %v9750_v0 = vcombine.low %v1255_v54, %v1259_v17  ;;  %v280_v18 = vld [vmem:[%s10211_s28 + $0x110] sm:$0xff]  ;;  %v281_v17 = vld [vmem:[%s10211_s28 + $0x118] sm:$0xff] }
 0x1fc   : > { %6811 = vmatprep.subr.bf16.mxu0 %v9709_v34  ;;  %7139 = vmatprep.subr.bf16.mxu1 %v9711_v35  ;;  %v9757_v34 = vcombine.high %v1262_v26, %v1266_v27  ;;  %v9759_v35 = vcombine.high %v1263_v29, %v1267_v31  ;;  %v284_v54 = vld [vmem:[%s10211_s28 + $0x130] sm:$0xff] }
 0x1ff   : > { %6812 = vmatpush1.bf16.msra.mxu0 %v9708_v42  ;;  %7140 = vmatpush1.bf16.msra.mxu1 %v9710_v43  ;;  %v9756_v42 = vcombine.low %v1262_v26, %v1266_v27  ;;  %v9758_v43 = vcombine.low %v1263_v29, %v1267_v31  ;;  %v288_v26 = vld [vmem:[%s10211_s28 + $0x150] sm:$0xff]  ;;  %v289_v29 = vld [vmem:[%s10211_s28 + $0x158] sm:$0xff] }
 0x200   : > { %6813 = vmatprep.subr.bf16.mxu0 %v9717_v44  ;;  %7141 = vmatprep.subr.bf16.mxu1 %v9719_v46  ;;  %v8745_v44 = vcombine.high %v248_v36, %v252_v37  ;;  %v8747_v46 = vcombine.high %v249_v40, %v253_v41  ;;  %v292_v27 = vld [vmem:[%s10211_s28 + $0x170] sm:$0xff]  ;;  %v293_v31 = vld [vmem:[%s10211_s28 + $0x178] sm:$0xff] }
 0x203   : > { %6814 = vmatpush1.bf16.msra.mxu0 %v9716_v53  ;;  %7142 = vmatpush1.bf16.msra.mxu1 %v9718_v55  ;;  %v261_v53 = vld [vmem:[%s10211_s28 + $0x78] sm:$0xff]  ;;  %v8744_v55 = vcombine.low %v248_v36, %v252_v37  ;;  %v296_v36 = vld [vmem:[%s10211_s28 + $0x190] sm:$0xff] }
 0x204   : > { %6815 = vmatprep.subr.bf16.mxu0 %v9725_v56  ;;  %7143 = vmatprep.subr.bf16.mxu1 %v9727_v57  ;;  %v8746_v56 = vcombine.low %v249_v40, %v253_v41  ;;  %v8753_v57 = vcombine.high %v256_v47, %v260_v48  ;;  %v8755_v58 = vcombine.high %v257_v51, %v261_v53  ;;  %v300_v37 = vld [vmem:[%s10211_s28 + $0x1b0] sm:$0xff]  ;;  %v297_v40 = vld [vmem:[%s10211_s28 + $0x198] sm:$0xff] }
 0x205   : > { %v301_v41 = vld [vmem:[%s10211_s28 + $0x1b8] sm:$0xff] }
 0x207   : > { %6816 = vmatpush1.bf16.msra.mxu0 %v9724_v9  ;;  %7144 = vmatpush1.bf16.msra.mxu1 %v9726_v3  ;;  %v269_v9 = vld [vmem:[%s10211_s28 + $0xb8] sm:$0xff]  ;;  %v8752_v3 = vcombine.low %v256_v47, %v260_v48  ;;  %v304_v47 = vld [vmem:[%s10211_s28 + $0x1d0] sm:$0xff] }
 0x208   : > { %6817 = vmatprep.subr.bf16.mxu0 %v9733_v4  ;;  %7145 = vmatprep.subr.bf16.mxu1 %v9735_v5  ;;  %v8754_v4 = vcombine.low %v257_v51, %v261_v53  ;;  %v8761_v5 = vcombine.high %v264_v61, %v268_v62  ;;  %v8763_v30 = vcombine.high %v265_v63, %v269_v9  ;;  %v308_v48 = vld [vmem:[%s10211_s28 + $0x1f0] sm:$0xff]  ;;  %v305_v51 = vld [vmem:[%s10211_s28 + $0x1d8] sm:$0xff] }
 0x209   : > { %v309_v53 = vld [vmem:[%s10211_s28 + $0x1f8] sm:$0xff] }
 0x20b   : > { %6818 = vmatpush1.bf16.msra.mxu0 %v9732_v13  ;;  %7146 = vmatpush1.bf16.msra.mxu1 %v9734_v14  ;;  %v277_v13 = vld [vmem:[%s10211_s28 + $0xf8] sm:$0xff]  ;;  %v8760_v14 = vcombine.low %v264_v61, %v268_v62  ;;  %v312_v61 = vld [vmem:[%s10211_s28 + $0x210] sm:$0xff] }
 0x20c   : > { %6819 = vmatprep.subr.bf16.mxu0 %v9741_v15  ;;  %7147 = vmatprep.subr.bf16.mxu1 %v9743_v16  ;;  %v8762_v15 = vcombine.low %v265_v63, %v269_v9  ;;  %v8769_v16 = vcombine.high %v272_v7, %v276_v11  ;;  %v8771_v2 = vcombine.high %v273_v12, %v277_v13  ;;  %v316_v62 = vld [vmem:[%s10211_s28 + $0x230] sm:$0xff]  ;;  %v313_v63 = vld [vmem:[%s10211_s28 + $0x218] sm:$0xff] }
 0x20d   : > { %v317_v9 = vld [vmem:[%s10211_s28 + $0x238] sm:$0xff] }
 0x20f   : > { %6820 = vmatpush1.bf16.msra.mxu0 %v9740_v21  ;;  %7148 = vmatpush1.bf16.msra.mxu1 %v9742_v22  ;;  %v285_v21 = vld [vmem:[%s10211_s28 + $0x138] sm:$0xff]  ;;  %v8768_v22 = vcombine.low %v272_v7, %v276_v11  ;;  %v320_v7 = vld [vmem:[%s10211_s28 + $0x250] sm:$0xff] }
 0x210   : > { %6821 = vmatprep.subr.bf16.mxu0 %v9749_v23  ;;  %7149 = vmatprep.subr.bf16.mxu1 %v9751_v25  ;;  %v8777_v23 = vcombine.high %v280_v18, %v284_v54  ;;  %v8779_v25 = vcombine.high %v281_v17, %v285_v21  ;;  %v324_v11 = vld [vmem:[%s10211_s28 + $0x270] sm:$0xff] }
 0x213   : > { %6822 = vmatpush1.bf16.msra.mxu0 %v9748_v32  ;;  %7150 = vmatpush1.bf16.msra.mxu1 %v9750_v0  ;;  %v8776_v32 = vcombine.low %v280_v18, %v284_v54  ;;  %v8778_v0 = vcombine.low %v281_v17, %v285_v21  ;;  %v328_v18 = vld [vmem:[%s10211_s28 + $0x290] sm:$0xff]  ;;  %v329_v17 = vld [vmem:[%s10211_s28 + $0x298] sm:$0xff] }
 0x214   : > { %6823 = vmatprep.subr.bf16.mxu0 %v9757_v34  ;;  %7151 = vmatprep.subr.bf16.mxu1 %v9759_v35  ;;  %v8785_v34 = vcombine.high %v288_v26, %v292_v27  ;;  %v8787_v35 = vcombine.high %v289_v29, %v293_v31  ;;  %v332_v54 = vld [vmem:[%s10211_s28 + $0x2b0] sm:$0xff]  ;;  %v333_v21 = vld [vmem:[%s10211_s28 + $0x2b8] sm:$0xff] }
 0x217   : > { %6824 = vmatpush1.bf16.msra.mxu0 %v9756_v42  ;;  %7152 = vmatpush1.bf16.msra.mxu1 %v9758_v43  ;;  %v8784_v42 = vcombine.low %v288_v26, %v292_v27  ;;  %v8786_v43 = vcombine.low %v289_v29, %v293_v31  ;;  %v336_v26 = vld [vmem:[%s10211_s28 + $0x2d0] sm:$0xff]  ;;  %v337_v29 = vld [vmem:[%s10211_s28 + $0x2d8] sm:$0xff] }
 0x218   : > { %7162 = vmatprep.subr.bf16.mxu0 %v8745_v44  ;;  %7490 = vmatprep.subr.bf16.mxu1 %v8747_v46  ;;  %v8793_v44 = vcombine.high %v296_v36, %v300_v37  ;;  %v8795_v46 = vcombine.high %v297_v40, %v301_v41  ;;  %v340_v27 = vld [vmem:[%s10211_s28 + $0x2f0] sm:$0xff]  ;;  %v341_v31 = vld [vmem:[%s10211_s28 + $0x2f8] sm:$0xff] }
 0x21a   : > { %6826 = vmatmul.mubr.bf16.vlgmr.msra.gmra.mrb[0].mxu0 %v10857_v50  ;;  %7154 = vmatmul.mubr.bf16.vlgmr.msra.gmra.mrb[0].mxu1 %v10857_v50 }
 0x21b   : > { %7163 = vmatpush1.bf16.msra.mxu0 %v8744_v55  ;;  %7491 = vmatpush1.bf16.msra.mxu1 %v8746_v56  ;;  %v8792_v55 = vcombine.low %v296_v36, %v300_v37  ;;  %v8794_v56 = vcombine.low %v297_v40, %v301_v41  ;;  %v344_v36 = vld [vmem:[%s10211_s28 + $0x310] sm:$0xff]  ;;  %v345_v40 = vld [vmem:[%s10211_s28 + $0x318] sm:$0xff] }
 0x21c   : > { %7164 = vmatprep.subr.bf16.mxu0 %v8753_v57  ;;  %7492 = vmatprep.subr.bf16.mxu1 %v8755_v58  ;;  %v8801_v57 = vcombine.high %v304_v47, %v308_v48  ;;  %v8803_v58 = vcombine.high %v305_v51, %v309_v53  ;;  %v348_v37 = vld [vmem:[%s10211_s28 + $0x330] sm:$0xff]  ;;  %v349_v41 = vld [vmem:[%s10211_s28 + $0x338] sm:$0xff] }
 0x21d   : > { %7194 = vmatprep.mubr.bf16.mxu0 %v10263_v10  ;;  %7522 = vmatprep.mubr.bf16.mxu1 %v10263_v10  ;;  %v8770_v10 = vcombine.low %v273_v12, %v277_v13  ;;  %v321_v12 = vld [vmem:[%s10211_s28 + $0x258] sm:$0xff] }
 0x21e   : > { %v325_v13 = vld [vmem:[%s10211_s28 + $0x278] sm:$0xff] }
 0x21f   : > { %7165 = vmatpush1.bf16.msra.mxu0 %v8752_v3  ;;  %7493 = vmatpush1.bf16.msra.mxu1 %v8754_v4  ;;  %v8800_v3 = vcombine.low %v304_v47, %v308_v48  ;;  %v8802_v4 = vcombine.low %v305_v51, %v309_v53  ;;  %v352_v47 = vld [vmem:[%s10211_s28 + $0x350] sm:$0xff]  ;;  %v353_v51 = vld [vmem:[%s10211_s28 + $0x358] sm:$0xff] }
 0x220   : > { %7166 = vmatprep.subr.bf16.mxu0 %v8761_v5  ;;  %7494 = vmatprep.subr.bf16.mxu1 %v8763_v30  ;;  %v8809_v5 = vcombine.high %v312_v61, %v316_v62  ;;  %v8811_v30 = vcombine.high %v313_v63, %v317_v9  ;;  %v356_v48 = vld [vmem:[%s10211_s28 + $0x370] sm:$0xff]  ;;  %v357_v53 = vld [vmem:[%s10211_s28 + $0x378] sm:$0xff] }
 0x223   : > { %7167 = vmatpush1.bf16.msra.mxu0 %v8760_v14  ;;  %7495 = vmatpush1.bf16.msra.mxu1 %v8762_v15  ;;  %v8808_v14 = vcombine.low %v312_v61, %v316_v62  ;;  %v8810_v15 = vcombine.low %v313_v63, %v317_v9  ;;  %v360_v61 = vld [vmem:[%s10211_s28 + $0x390] sm:$0xff]  ;;  %v361_v63 = vld [vmem:[%s10211_s28 + $0x398] sm:$0xff] }
 0x224   : > { %7168 = vmatprep.subr.bf16.mxu0 %v8769_v16  ;;  %7496 = vmatprep.subr.bf16.mxu1 %v8771_v2  ;;  %v8817_v16 = vcombine.high %v320_v7, %v324_v11  ;;  %v8819_v2 = vcombine.high %v321_v12, %v325_v13  ;;  %v364_v62 = vld [vmem:[%s10211_s28 + $0x3b0] sm:$0xff]  ;;  %v365_v9 = vld [vmem:[%s10211_s28 + $0x3b8] sm:$0xff] }
 0x227   : > { %7169 = vmatpush1.bf16.msra.mxu0 %v8768_v22  ;;  %7497 = vmatpush1.bf16.msra.mxu1 %v8770_v10  ;;  %v8816_v22 = vcombine.low %v320_v7, %v324_v11  ;;  %v8818_v10 = vcombine.low %v321_v12, %v325_v13  ;;  %v368_v7 = vld [vmem:[%s10211_s28 + $0x3d0] sm:$0xff]  ;;  %v369_v12 = vld [vmem:[%s10211_s28 + $0x3d8] sm:$0xff] }
 0x228   : > { %7170 = vmatprep.subr.bf16.mxu0 %v8777_v23  ;;  %7498 = vmatprep.subr.bf16.mxu1 %v8779_v25  ;;  %v8825_v23 = vcombine.high %v328_v18, %v332_v54  ;;  %v8827_v25 = vcombine.high %v329_v17, %v333_v21  ;;  %v372_v11 = vld [vmem:[%s10211_s28 + $0x3f0] sm:$0xff]  ;;  %v373_v13 = vld [vmem:[%s10211_s28 + $0x3f8] sm:$0xff] }
 0x22b   : > { %7171 = vmatpush1.bf16.msra.mxu0 %v8776_v32  ;;  %7499 = vmatpush1.bf16.msra.mxu1 %v8778_v0  ;;  %v8824_v32 = vcombine.low %v328_v18, %v332_v54  ;;  %v8826_v0 = vcombine.low %v329_v17, %v333_v21  ;;  %v376_v18 = vld [vmem:[%s10211_s28 + $0x410] sm:$0xff]  ;;  %v377_v17 = vld [vmem:[%s10211_s28 + $0x418] sm:$0xff] }
 0x22c   : > { %7172 = vmatprep.subr.bf16.mxu0 %v8785_v34  ;;  %7500 = vmatprep.subr.bf16.mxu1 %v8787_v35  ;;  %v8833_v34 = vcombine.high %v336_v26, %v340_v27  ;;  %v8835_v35 = vcombine.high %v337_v29, %v341_v31  ;;  %v380_v54 = vld [vmem:[%s10211_s28 + $0x430] sm:$0xff]  ;;  %v381_v21 = vld [vmem:[%s10211_s28 + $0x438] sm:$0xff] }
 0x22f   : > { %7173 = vmatpush1.bf16.msra.mxu0 %v8784_v42  ;;  %7501 = vmatpush1.bf16.msra.mxu1 %v8786_v43  ;;  %v8832_v42 = vcombine.low %v336_v26, %v340_v27  ;;  %v8834_v43 = vcombine.low %v337_v29, %v341_v31  ;;  %v384_v26 = vld [vmem:[%s10211_s28 + $0x450] sm:$0xff]  ;;  %v385_v29 = vld [vmem:[%s10211_s28 + $0x458] sm:$0xff] }
 0x230   : > { %7174 = vmatprep.subr.bf16.mxu0 %v8793_v44  ;;  %7502 = vmatprep.subr.bf16.mxu1 %v8795_v46  ;;  %v8841_v44 = vcombine.high %v344_v36, %v348_v37  ;;  %v8843_v46 = vcombine.high %v345_v40, %v349_v41  ;;  %v388_v27 = vld [vmem:[%s10211_s28 + $0x470] sm:$0xff]  ;;  %v389_v31 = vld [vmem:[%s10211_s28 + $0x478] sm:$0xff] }
 0x233   : > { %7175 = vmatpush1.bf16.msra.mxu0 %v8792_v55  ;;  %7503 = vmatpush1.bf16.msra.mxu1 %v8794_v56  ;;  %v8840_v55 = vcombine.low %v344_v36, %v348_v37  ;;  %v8842_v56 = vcombine.low %v345_v40, %v349_v41  ;;  %v392_v36 = vld [vmem:[%s10211_s28 + $0x490] sm:$0xff]  ;;  %v393_v40 = vld [vmem:[%s10211_s28 + $0x498] sm:$0xff] }
 0x234   : > { %7176 = vmatprep.subr.bf16.mxu0 %v8801_v57  ;;  %7504 = vmatprep.subr.bf16.mxu1 %v8803_v58  ;;  %v8849_v57 = vcombine.high %v352_v47, %v356_v48  ;;  %v8851_v58 = vcombine.high %v353_v51, %v357_v53  ;;  %v396_v37 = vld [vmem:[%s10211_s28 + $0x4b0] sm:$0xff]  ;;  %v397_v41 = vld [vmem:[%s10211_s28 + $0x4b8] sm:$0xff] }
 0x237   : > { %7177 = vmatpush1.bf16.msra.mxu0 %v8800_v3  ;;  %7505 = vmatpush1.bf16.msra.mxu1 %v8802_v4  ;;  %v8848_v3 = vcombine.low %v352_v47, %v356_v48  ;;  %v8850_v4 = vcombine.low %v353_v51, %v357_v53  ;;  %v400_v47 = vld [vmem:[%s10211_s28 + $0x4d0] sm:$0xff]  ;;  %v401_v51 = vld [vmem:[%s10211_s28 + $0x4d8] sm:$0xff] }
 0x238   : > { %7178 = vmatprep.subr.bf16.mxu0 %v8809_v5  ;;  %7506 = vmatprep.subr.bf16.mxu1 %v8811_v30  ;;  %v8857_v5 = vcombine.high %v360_v61, %v364_v62  ;;  %v8859_v30 = vcombine.high %v361_v63, %v365_v9  ;;  %v404_v48 = vld [vmem:[%s10211_s28 + $0x4f0] sm:$0xff]  ;;  %v405_v53 = vld [vmem:[%s10211_s28 + $0x4f8] sm:$0xff] }
 0x23b   : > { %7179 = vmatpush1.bf16.msra.mxu0 %v8808_v14  ;;  %7507 = vmatpush1.bf16.msra.mxu1 %v8810_v15  ;;  %v8856_v14 = vcombine.low %v360_v61, %v364_v62  ;;  %v8858_v15 = vcombine.low %v361_v63, %v365_v9  ;;  %v412_v61 = vld [vmem:[%s10211_s28 + $0x530] sm:$0xff]  ;;  %v409_v62 = vld [vmem:[%s10211_s28 + $0x518] sm:$0xff]  ;;  %v8896_v9 = vcombine.low %v400_v47, %v404_v48 }
 0x23c   : > { %7180 = vmatprep.subr.bf16.mxu0 %v8817_v16  ;;  %7508 = vmatprep.subr.bf16.mxu1 %v8819_v2  ;;  %v8865_v16 = vcombine.high %v368_v7, %v372_v11  ;;  %v8867_v2 = vcombine.high %v369_v12, %v373_v13  ;;  %v413_v63 = vld [vmem:[%s10211_s28 + $0x538] sm:$0xff] }
 0x23f   : > { %7181 = vmatpush1.bf16.msra.mxu0 %v8816_v22  ;;  %7509 = vmatpush1.bf16.msra.mxu1 %v8818_v10  ;;  %v8864_v22 = vcombine.low %v368_v7, %v372_v11  ;;  %v8866_v10 = vcombine.low %v369_v12, %v373_v13  ;;  %v417_v7 = vld [vmem:[%s10211_s28 + $0x558] sm:$0xff]  ;;  %v8906_v13 = vcombine.low %v409_v62, %v413_v63 }
 0x240   : > { %7182 = vmatprep.subr.bf16.mxu0 %v8825_v23  ;;  %7510 = vmatprep.subr.bf16.mxu1 %v8827_v25  ;;  %v8873_v23 = vcombine.high %v376_v18, %v380_v54  ;;  %v8875_v25 = vcombine.high %v377_v17, %v381_v21  ;;  %v421_v11 = vld [vmem:[%s10211_s28 + $0x578] sm:$0xff] }
 0x243   : > { %7183 = vmatpush1.bf16.msra.mxu0 %v8824_v32  ;;  %7511 = vmatpush1.bf16.msra.mxu1 %v8826_v0  ;;  %v8872_v32 = vcombine.low %v376_v18, %v380_v54  ;;  %v8874_v0 = vcombine.low %v377_v17, %v381_v21  ;;  %v425_v18 = vld [vmem:[%s10211_s28 + $0x598] sm:$0xff]  ;;  %v8914_v21 = vcombine.low %v417_v7, %v421_v11 }
 0x244   : > { %7184 = vmatprep.subr.bf16.mxu0 %v8833_v34  ;;  %7512 = vmatprep.subr.bf16.mxu1 %v8835_v35  ;;  %v8881_v34 = vcombine.high %v384_v26, %v388_v27  ;;  %v8883_v35 = vcombine.high %v385_v29, %v389_v31  ;;  %v429_v54 = vld [vmem:[%s10211_s28 + $0x5b8] sm:$0xff] }
 0x247   : > { %7185 = vmatpush1.bf16.msra.mxu0 %v8832_v42  ;;  %7513 = vmatpush1.bf16.msra.mxu1 %v8834_v43  ;;  %v8880_v42 = vcombine.low %v384_v26, %v388_v27  ;;  %v8882_v43 = vcombine.low %v385_v29, %v389_v31  ;;  %v433_v26 = vld [vmem:[%s10211_s28 + $0x5d8] sm:$0xff]  ;;  %v8922_v31 = vcombine.low %v425_v18, %v429_v54 }
 0x248   : > { %7186 = vmatprep.subr.bf16.mxu0 %v8841_v44  ;;  %7514 = vmatprep.subr.bf16.mxu1 %v8843_v46  ;;  %v8889_v44 = vcombine.high %v392_v36, %v396_v37  ;;  %v8891_v46 = vcombine.high %v393_v40, %v397_v41  ;;  %v437_v27 = vld [vmem:[%s10211_s28 + $0x5f8] sm:$0xff] }
 0x24b   : > { %7187 = vmatpush1.bf16.msra.mxu0 %v8840_v55  ;;  %7515 = vmatpush1.bf16.msra.mxu1 %v8842_v56  ;;  %v8890_v55 = vcombine.low %v393_v40, %v397_v41  ;;  %v8897_v56 = vcombine.high %v400_v47, %v404_v48  ;;  %v8930_v41 = vcombine.low %v433_v26, %v437_v27  ;;  %v449_v47 = vld [vmem:[%s10211_s28 + $0x658] sm:$0xff] }
 0x24c   : > { %7188 = vmatprep.subr.bf16.mxu0 %v8849_v57  ;;  %7516 = vmatprep.subr.bf16.mxu1 %v8851_v58  ;;  %v8899_v57 = vcombine.high %v401_v51, %v405_v53  ;;  %v408_v58 = vld [vmem:[%s10211_s28 + $0x510] sm:$0xff]  ;;  %v453_v48 = vld [vmem:[%s10211_s28 + $0x678] sm:$0xff] }
 0x24d   : > { %v8904_v12 = vcombine.low %v408_v58, %v412_v61 }
 0x24f   : > { %7189 = vmatpush1.bf16.msra.mxu0 %v8848_v3  ;;  %7517 = vmatpush1.bf16.msra.mxu1 %v8850_v4  ;;  %v8905_v3 = vcombine.high %v408_v58, %v412_v61  ;;  %v8907_v4 = vcombine.high %v409_v62, %v413_v63  ;;  %v457_v58 = vld [vmem:[%s10211_s28 + $0x698] sm:$0xff]  ;;  %v8946_v63 = vcombine.low %v449_v47, %v453_v48 }
 0x250   : > { %7190 = vmatprep.subr.bf16.mxu0 %v8857_v5  ;;  %7518 = vmatprep.subr.bf16.mxu1 %v8859_v30  ;;  %v416_v5 = vld [vmem:[%s10211_s28 + $0x550] sm:$0xff]  ;;  %v461_v61 = vld [vmem:[%s10211_s28 + $0x6b8] sm:$0xff] }
 0x251   : > { %v420_v30 = vld [vmem:[%s10211_s28 + $0x570] sm:$0xff] }
 0x252   : > { %v8912_v17 = vcombine.low %v416_v5, %v420_v30 }
 0x253   : > { %7191 = vmatpush1.bf16.msra.mxu0 %v8856_v14  ;;  %7519 = vmatpush1.bf16.msra.mxu1 %v8858_v15  ;;  %v8913_v14 = vcombine.high %v416_v5, %v420_v30  ;;  %v8915_v15 = vcombine.high %v417_v7, %v421_v11  ;;  %v465_v5 = vld [vmem:[%s10211_s28 + $0x6d8] sm:$0xff]  ;;  %v8954_v11 = vcombine.low %v457_v58, %v461_v61 }
 0x254   : > { %7192 = vmatprep.subr.bf16.mxu0 %v8865_v16  ;;  %7520 = vmatprep.subr.bf16.mxu1 %v8867_v2  ;;  %v424_v16 = vld [vmem:[%s10211_s28 + $0x590] sm:$0xff]  ;;  %v469_v30 = vld [vmem:[%s10211_s28 + $0x6f8] sm:$0xff] }
 0x255   : > { %v428_v2 = vld [vmem:[%s10211_s28 + $0x5b0] sm:$0xff] }
 0x256   : > { %v8920_v29 = vcombine.low %v424_v16, %v428_v2 }
 0x257   : > { %7193 = vmatpush1.bf16.msra.mxu0 %v8864_v22  ;;  %7521 = vmatpush1.bf16.msra.mxu1 %v8866_v10  ;;  %v8921_v22 = vcombine.high %v424_v16, %v428_v2  ;;  %v8923_v10 = vcombine.high %v425_v18, %v429_v54  ;;  %v473_v16 = vld [vmem:[%s10211_s28 + $0x718] sm:$0xff]  ;;  %v8962_v54 = vcombine.low %v465_v5, %v469_v30 }
 0x258   : > { %7203 = vmatprep.subr.bf16.mxu0 %v8873_v23  ;;  %7531 = vmatprep.subr.bf16.mxu1 %v8875_v25  ;;  %v432_v23 = vld [vmem:[%s10211_s28 + $0x5d0] sm:$0xff]  ;;  %v477_v2 = vld [vmem:[%s10211_s28 + $0x738] sm:$0xff] }
 0x259   : > { %v436_v25 = vld [vmem:[%s10211_s28 + $0x5f0] sm:$0xff] }
 0x25a   : > { %7195 = vmatmul.mubr.bf16.vlgmr.msra.gmra.mrb[4].mxu0 %v10305_v24  ;;  %7523 = vmatmul.mubr.bf16.vlgmr.msra.gmra.mrb[4].mxu1 %v10305_v24  ;;  %v8888_v24 = vcombine.low %v392_v36, %v396_v37  ;;  %v441_v36 = vld [vmem:[%s10211_s28 + $0x618] sm:$0xff]  ;;  %v8928_v40 = vcombine.low %v432_v23, %v436_v25 }
 0x25b   : > { %7204 = vmatpush1.bf16.msra.mxu0 %v8872_v32  ;;  %7532 = vmatpush1.bf16.msra.mxu1 %v8874_v0  ;;  %v8929_v32 = vcombine.high %v432_v23, %v436_v25  ;;  %v8931_v0 = vcombine.high %v433_v26, %v437_v27  ;;  %v445_v37 = vld [vmem:[%s10211_s28 + $0x638] sm:$0xff]  ;;  %v8970_v27 = vcombine.low %v473_v16, %v477_v2 }
 0x25c   : > { %7205 = vmatprep.subr.bf16.mxu0 %v8881_v34  ;;  %7533 = vmatprep.subr.bf16.mxu1 %v8883_v35  ;;  %v440_v34 = vld [vmem:[%s10211_s28 + $0x610] sm:$0xff]  ;;  %v481_v23 = vld [vmem:[%s10211_s28 + $0x758] sm:$0xff] }
 0x25d   : > { %7235 = vmatprep.mubr.bf16.mxu0 %v10313_v33  ;;  %7563 = vmatprep.mubr.bf16.mxu1 %v10313_v33  ;;  %v8898_v33 = vcombine.low %v401_v51, %v405_v53  ;;  %v444_v35 = vld [vmem:[%s10211_s28 + $0x630] sm:$0xff]  ;;  %v8938_v53 = vcombine.low %v441_v36, %v445_v37  ;;  %v485_v25 = vld [vmem:[%s10211_s28 + $0x778] sm:$0xff] }
 0x25e   : > { %v8936_v51 = vcombine.low %v440_v34, %v444_v35 }
 0x25f   : > { %7206 = vmatpush1.bf16.msra.mxu0 %v8880_v42  ;;  %7534 = vmatpush1.bf16.msra.mxu1 %v8882_v43  ;;  %v8937_v42 = vcombine.high %v440_v34, %v444_v35  ;;  %v8939_v43 = vcombine.high %v441_v36, %v445_v37  ;;  %v489_v34 = vld [vmem:[%s10211_s28 + $0x798] sm:$0xff]  ;;  %v8978_v37 = vcombine.low %v481_v23, %v485_v25 }
 0x260   : > { %7207 = vmatprep.subr.bf16.mxu0 %v8889_v44  ;;  %7535 = vmatprep.subr.bf16.mxu1 %v8891_v46  ;;  %v448_v44 = vld [vmem:[%s10211_s28 + $0x650] sm:$0xff]  ;;  %v493_v35 = vld [vmem:[%s10211_s28 + $0x7b8] sm:$0xff] }
 0x261   : > { %v452_v46 = vld [vmem:[%s10211_s28 + $0x670] sm:$0xff] }
 0x262   : > { %v8944_v62 = vcombine.low %v448_v44, %v452_v46 }
 0x263   : > { %7208 = vmatpush1.bf16.msra.mxu0 %v8888_v24  ;;  %7536 = vmatpush1.bf16.msra.mxu1 %v8890_v55  ;;  %v8945_v24 = vcombine.high %v448_v44, %v452_v46  ;;  %v8947_v55 = vcombine.high %v449_v47, %v453_v48  ;;  %v497_v44 = vld [vmem:[%s10211_s28 + $0x7d8] sm:$0xff]  ;;  %v8986_v48 = vcombine.low %v489_v34, %v493_v35 }
 0x264   : > { %7209 = vmatprep.subr.bf16.mxu0 %v8897_v56  ;;  %7537 = vmatprep.subr.bf16.mxu1 %v8899_v57  ;;  %v456_v56 = vld [vmem:[%s10211_s28 + $0x690] sm:$0xff]  ;;  %v501_v46 = vld [vmem:[%s10211_s28 + $0x7f8] sm:$0xff] }
 0x265   : > { %v460_v57 = vld [vmem:[%s10211_s28 + $0x6b0] sm:$0xff] }
 0x266   : > { %v8952_v7 = vcombine.low %v456_v56, %v460_v57 }
 0x267   : > { %7210 = vmatpush1.bf16.msra.mxu0 %v8896_v9  ;;  %7538 = vmatpush1.bf16.msra.mxu1 %v8898_v33  ;;  %v8953_v9 = vcombine.high %v456_v56, %v460_v57  ;;  %v8955_v33 = vcombine.high %v457_v58, %v461_v61  ;;  %v505_v56 = vld [vmem:[%s10211_s28 + $0x818] sm:$0xff]  ;;  %v8994_v61 = vcombine.low %v497_v44, %v501_v46 }
 0x268   : > { %7211 = vmatprep.subr.bf16.mxu0 %v8905_v3  ;;  %7539 = vmatprep.subr.bf16.mxu1 %v8907_v4  ;;  %v464_v3 = vld [vmem:[%s10211_s28 + $0x6d0] sm:$0xff]  ;;  %v509_v57 = vld [vmem:[%s10211_s28 + $0x838] sm:$0xff] }
 0x269   : > { %v468_v4 = vld [vmem:[%s10211_s28 + $0x6f0] sm:$0xff] }
 0x26a   : > { %v8960_v18 = vcombine.low %v464_v3, %v468_v4 }
 0x26b   : > { %7212 = vmatpush1.bf16.msra.mxu0 %v8904_v12  ;;  %7540 = vmatpush1.bf16.msra.mxu1 %v8906_v13  ;;  %v8961_v12 = vcombine.high %v464_v3, %v468_v4  ;;  %v8963_v13 = vcombine.high %v465_v5, %v469_v30  ;;  %v513_v3 = vld [vmem:[%s10211_s28 + $0x858] sm:$0xff]  ;;  %v9002_v30 = vcombine.low %v505_v56, %v509_v57 }
 0x26c   : > { %7213 = vmatprep.subr.bf16.mxu0 %v8913_v14  ;;  %7541 = vmatprep.subr.bf16.mxu1 %v8915_v15  ;;  %v472_v14 = vld [vmem:[%s10211_s28 + $0x710] sm:$0xff]  ;;  %v517_v4 = vld [vmem:[%s10211_s28 + $0x878] sm:$0xff] }
 0x26d   : > { %v476_v15 = vld [vmem:[%s10211_s28 + $0x730] sm:$0xff] }
 0x26e   : > { %v8968_v26 = vcombine.low %v472_v14, %v476_v15 }
 0x26f   : > { %7214 = vmatpush1.bf16.msra.mxu0 %v8912_v17  ;;  %7542 = vmatpush1.bf16.msra.mxu1 %v8914_v21  ;;  %v8969_v17 = vcombine.high %v472_v14, %v476_v15  ;;  %v8971_v21 = vcombine.high %v473_v16, %v477_v2  ;;  %v521_v14 = vld [vmem:[%s10211_s28 + $0x898] sm:$0xff]  ;;  %v9010_v2 = vcombine.low %v513_v3, %v517_v4 }
 0x270   : > { %7215 = vmatprep.subr.bf16.mxu0 %v8921_v22  ;;  %7543 = vmatprep.subr.bf16.mxu1 %v8923_v10  ;;  %v480_v22 = vld [vmem:[%s10211_s28 + $0x750] sm:$0xff]  ;;  %v525_v15 = vld [vmem:[%s10211_s28 + $0x8b8] sm:$0xff] }
 0x271   : > { %v484_v10 = vld [vmem:[%s10211_s28 + $0x770] sm:$0xff] }
 0x272   : > { %v8976_v36 = vcombine.low %v480_v22, %v484_v10 }
 0x273   : > { %7216 = vmatpush1.bf16.msra.mxu0 %v8920_v29  ;;  %7544 = vmatpush1.bf16.msra.mxu1 %v8922_v31  ;;  %v8977_v29 = vcombine.high %v480_v22, %v484_v10  ;;  %v8979_v31 = vcombine.high %v481_v23, %v485_v25  ;;  %v529_v22 = vld [vmem:[%s10211_s28 + $0x8d8] sm:$0xff]  ;;  %v9018_v23 = vcombine.low %v521_v14, %v525_v15 }
 0x274   : > { %7217 = vmatprep.subr.bf16.mxu0 %v8929_v32  ;;  %7545 = vmatprep.subr.bf16.mxu1 %v8931_v0  ;;  %v488_v32 = vld [vmem:[%s10211_s28 + $0x790] sm:$0xff]  ;;  %v533_v10 = vld [vmem:[%s10211_s28 + $0x8f8] sm:$0xff] }
 0x275   : > { %v492_v0 = vld [vmem:[%s10211_s28 + $0x7b0] sm:$0xff] }
 0x276   : > { %v8984_v47 = vcombine.low %v488_v32, %v492_v0 }
 0x277   : > { %7218 = vmatpush1.bf16.msra.mxu0 %v8928_v40  ;;  %7546 = vmatpush1.bf16.msra.mxu1 %v8930_v41  ;;  %v8985_v40 = vcombine.high %v488_v32, %v492_v0  ;;  %v8987_v41 = vcombine.high %v489_v34, %v493_v35  ;;  %v541_v32 = vld [vmem:[%s10211_s28 + $0x938] sm:$0xff] }
 0x278   : > { %7219 = vmatprep.subr.bf16.mxu0 %v8937_v42  ;;  %7547 = vmatprep.subr.bf16.mxu1 %v8939_v43  ;;  %v496_v42 = vld [vmem:[%s10211_s28 + $0x7d0] sm:$0xff] }
 0x279   : > { %v500_v43 = vld [vmem:[%s10211_s28 + $0x7f0] sm:$0xff] }
 0x27a   : > { %v8992_v58 = vcombine.low %v496_v42, %v500_v43 }
 0x27b   : > { %7220 = vmatpush1.bf16.msra.mxu0 %v8936_v51  ;;  %7548 = vmatpush1.bf16.msra.mxu1 %v8938_v53  ;;  %v8993_v51 = vcombine.high %v496_v42, %v500_v43  ;;  %v8995_v53 = vcombine.high %v497_v44, %v501_v46 }
 0x27c   : > { %7221 = vmatprep.subr.bf16.mxu0 %v8945_v24  ;;  %7549 = vmatprep.subr.bf16.mxu1 %v8947_v55  ;;  %v504_v24 = vld [vmem:[%s10211_s28 + $0x810] sm:$0xff] }
 0x27d   : > { %v508_v55 = vld [vmem:[%s10211_s28 + $0x830] sm:$0xff] }
 0x27e   : > { %v9000_v5 = vcombine.low %v504_v24, %v508_v55 }
 0x27f   : > { %7222 = vmatpush1.bf16.msra.mxu0 %v8944_v62  ;;  %7550 = vmatpush1.bf16.msra.mxu1 %v8946_v63  ;;  %v9001_v62 = vcombine.high %v504_v24, %v508_v55  ;;  %v9003_v63 = vcombine.high %v505_v56, %v509_v57 }
 0x280   : > { %7223 = vmatprep.subr.bf16.mxu0 %v8953_v9  ;;  %7551 = vmatprep.subr.bf16.mxu1 %v8955_v33  ;;  %v512_v9 = vld [vmem:[%s10211_s28 + $0x850] sm:$0xff] }
 0x281   : > { %v516_v33 = vld [vmem:[%s10211_s28 + $0x870] sm:$0xff] }
 0x282   : > { %v9008_v16 = vcombine.low %v512_v9, %v516_v33 }
 0x283   : > { %7224 = vmatpush1.bf16.msra.mxu0 %v8952_v7  ;;  %7552 = vmatpush1.bf16.msra.mxu1 %v8954_v11  ;;  %v9009_v7 = vcombine.high %v512_v9, %v516_v33  ;;  %v9011_v11 = vcombine.high %v513_v3, %v517_v4 }
 0x284   : > { %7225 = vmatprep.subr.bf16.mxu0 %v8961_v12  ;;  %7553 = vmatprep.subr.bf16.mxu1 %v8963_v13  ;;  %v520_v12 = vld [vmem:[%s10211_s28 + $0x890] sm:$0xff] }
 0x285   : > { %v524_v13 = vld [vmem:[%s10211_s28 + $0x8b0] sm:$0xff] }
 0x287   : > { %7226 = vmatpush1.bf16.msra.mxu0 %v8960_v18  ;;  %7554 = vmatpush1.bf16.msra.mxu1 %v8962_v54  ;;  %v9017_v18 = vcombine.high %v520_v12, %v524_v13  ;;  %v9019_v54 = vcombine.high %v521_v14, %v525_v15 }
 0x288   : > { %7227 = vmatprep.subr.bf16.mxu0 %v8969_v17  ;;  %7555 = vmatprep.subr.bf16.mxu1 %v8971_v21  ;;  %v528_v17 = vld [vmem:[%s10211_s28 + $0x8d0] sm:$0xff] }
 0x289   : > { %v532_v21 = vld [vmem:[%s10211_s28 + $0x8f0] sm:$0xff] }
 0x28a   : > { %v9025_v25 = vcombine.high %v528_v17, %v532_v21  ;;  %v9024_v0 = vcombine.low %v528_v17, %v532_v21 }
 0x28b   : > { %7228 = vmatpush1.bf16.msra.mxu0 %v8968_v26  ;;  %7556 = vmatpush1.bf16.msra.mxu1 %v8970_v27  ;;  %v9027_v26 = vcombine.high %v529_v22, %v533_v10  ;;  %v536_v27 = vld [vmem:[%s10211_s28 + $0x910] sm:$0xff] }
 0x28c   : > { %7229 = vmatprep.subr.bf16.mxu0 %v8977_v29  ;;  %7557 = vmatprep.subr.bf16.mxu1 %v8979_v31  ;;  %v540_v29 = vld [vmem:[%s10211_s28 + $0x930] sm:$0xff]  ;;  %v537_v31 = vld [vmem:[%s10211_s28 + $0x918] sm:$0xff] }
 0x28d   : > { %v9033_v34 = vcombine.high %v536_v27, %v540_v29  ;;  %v9035_v35 = vcombine.high %v537_v31, %v541_v32  ;;  %v9032_v42 = vcombine.low %v536_v27, %v540_v29  ;;  %v9034_v43 = vcombine.low %v537_v31, %v541_v32 }
 0x28f   : > { %7230 = vmatpush1.bf16.msra.mxu0 %v8976_v36  ;;  %7558 = vmatpush1.bf16.msra.mxu1 %v8978_v37  ;;  %v544_v36 = vld [vmem:[%s10211_s28 + $0x950] sm:$0xff] }
 0x290   : > { %7231 = vmatprep.subr.bf16.mxu0 %v8985_v40  ;;  %7559 = vmatprep.subr.bf16.mxu1 %v8987_v41  ;;  %v548_v37 = vld [vmem:[%s10211_s28 + $0x970] sm:$0xff]  ;;  %v545_v40 = vld [vmem:[%s10211_s28 + $0x958] sm:$0xff] }
 0x291   : > { %v549_v41 = vld [vmem:[%s10211_s28 + $0x978] sm:$0xff]  ;;  %v9041_v44 = vcombine.high %v544_v36, %v548_v37  ;;  %v9040_v24 = vcombine.low %v544_v36, %v548_v37 }
 0x292   : > { %v9043_v46 = vcombine.high %v545_v40, %v549_v41  ;;  %v9042_v55 = vcombine.low %v545_v40, %v549_v41 }
 0x293   : > { %7232 = vmatpush1.bf16.msra.mxu0 %v8984_v47  ;;  %7560 = vmatpush1.bf16.msra.mxu1 %v8986_v48  ;;  %v552_v47 = vld [vmem:[%s10211_s28 + $0x990] sm:$0xff] }
 0x294   : > { %7233 = vmatprep.subr.bf16.mxu0 %v8993_v51  ;;  %7561 = vmatprep.subr.bf16.mxu1 %v8995_v53  ;;  %v556_v48 = vld [vmem:[%s10211_s28 + $0x9b0] sm:$0xff]  ;;  %v553_v51 = vld [vmem:[%s10211_s28 + $0x998] sm:$0xff] }
 0x295   : > { %v557_v53 = vld [vmem:[%s10211_s28 + $0x9b8] sm:$0xff]  ;;  %v9049_v56 = vcombine.high %v552_v47, %v556_v48  ;;  %v9048_v9 = vcombine.low %v552_v47, %v556_v48 }
 0x296   : > { %v9051_v57 = vcombine.high %v553_v51, %v557_v53  ;;  %v9050_v33 = vcombine.low %v553_v51, %v557_v53 }
 0x297   : > { %7234 = vmatpush1.bf16.msra.mxu0 %v8992_v58  ;;  %7562 = vmatpush1.bf16.msra.mxu1 %v8994_v61  ;;  %v560_v58 = vld [vmem:[%s10211_s28 + $0x9d0] sm:$0xff] }
 0x298   : > { %7244 = vmatprep.subr.bf16.mxu0 %v9001_v62  ;;  %7572 = vmatprep.subr.bf16.mxu1 %v9003_v63  ;;  %v564_v61 = vld [vmem:[%s10211_s28 + $0x9f0] sm:$0xff]  ;;  %v561_v62 = vld [vmem:[%s10211_s28 + $0x9d8] sm:$0xff] }
 0x299   : > { %v565_v63 = vld [vmem:[%s10211_s28 + $0x9f8] sm:$0xff]  ;;  %v9057_v3 = vcombine.high %v560_v58, %v564_v61 }
 0x29a   : > { %7236 = vmatmul.mubr.bf16.vlgmr.msra.gmra.mrb[4].mxu0 %v10388_v39  ;;  %7564 = vmatmul.mubr.bf16.vlgmr.msra.gmra.mrb[4].mxu1 %v10388_v39  ;;  %v9016_v39 = vcombine.low %v520_v12, %v524_v13  ;;  %v9059_v4 = vcombine.high %v561_v62, %v565_v63  ;;  %v9056_v12 = vcombine.low %v560_v58, %v564_v61 }
 0x29b   : > { %7245 = vmatpush1.bf16.msra.mxu0 %v9000_v5  ;;  %7573 = vmatpush1.bf16.msra.mxu1 %v9002_v30  ;;  %v568_v5 = vld [vmem:[%s10211_s28 + $0xa10] sm:$0xff]  ;;  %v9058_v13 = vcombine.low %v561_v62, %v565_v63 }
 0x29c   : > { %7246 = vmatprep.subr.bf16.mxu0 %v9009_v7  ;;  %7574 = vmatprep.subr.bf16.mxu1 %v9011_v11  ;;  %v572_v30 = vld [vmem:[%s10211_s28 + $0xa30] sm:$0xff]  ;;  %v569_v7 = vld [vmem:[%s10211_s28 + $0xa18] sm:$0xff] }
 0x29d   : > { %7276 = vmatprep.mubr.bf16.mxu0 %v10395_v49  ;;  %7604 = vmatprep.mubr.bf16.mxu1 %v10395_v49  ;;  %v9026_v49 = vcombine.low %v529_v22, %v533_v10  ;;  %v573_v11 = vld [vmem:[%s10211_s28 + $0xa38] sm:$0xff]  ;;  %v9065_v14 = vcombine.high %v568_v5, %v572_v30  ;;  %v9064_v17 = vcombine.low %v568_v5, %v572_v30 }
 0x29e   : > { %v9067_v15 = vcombine.high %v569_v7, %v573_v11  ;;  %v9066_v21 = vcombine.low %v569_v7, %v573_v11 }
 0x29f   : > { %7247 = vmatpush1.bf16.msra.mxu0 %v9008_v16  ;;  %7575 = vmatpush1.bf16.msra.mxu1 %v9010_v2  ;;  %v576_v16 = vld [vmem:[%s10211_s28 + $0xa50] sm:$0xff] }
 0x2a0   : > { %7248 = vmatprep.subr.bf16.mxu0 %v9017_v18  ;;  %7576 = vmatprep.subr.bf16.mxu1 %v9019_v54  ;;  %v580_v2 = vld [vmem:[%s10211_s28 + $0xa70] sm:$0xff]  ;;  %v577_v18 = vld [vmem:[%s10211_s28 + $0xa58] sm:$0xff] }
 0x2a1   : > { %v581_v54 = vld [vmem:[%s10211_s28 + $0xa78] sm:$0xff]  ;;  %v9073_v22 = vcombine.high %v576_v16, %v580_v2  ;;  %v9072_v27 = vcombine.low %v576_v16, %v580_v2 }
 0x2a2   : > { %v9075_v10 = vcombine.high %v577_v18, %v581_v54  ;;  %v9074_v29 = vcombine.low %v577_v18, %v581_v54 }
 0x2a3   : > { %7249 = vmatpush1.bf16.msra.mxu0 %v9016_v39  ;;  %7577 = vmatpush1.bf16.msra.mxu1 %v9018_v23  ;;  %v584_v39 = vld [vmem:[%s10211_s28 + $0xa90] sm:$0xff] }
 0x2a4   : > { %7250 = vmatprep.subr.bf16.mxu0 %v9025_v25  ;;  %7578 = vmatprep.subr.bf16.mxu1 %v9027_v26  ;;  %v588_v23 = vld [vmem:[%s10211_s28 + $0xab0] sm:$0xff]  ;;  %v585_v25 = vld [vmem:[%s10211_s28 + $0xa98] sm:$0xff] }
 0x2a5   : > { %v589_v26 = vld [vmem:[%s10211_s28 + $0xab8] sm:$0xff]  ;;  %v9081_v31 = vcombine.high %v584_v39, %v588_v23  ;;  %v9080_v36 = vcombine.low %v584_v39, %v588_v23 }
 0x2a6   : > { %v9083_v32 = vcombine.high %v585_v25, %v589_v26  ;;  %v9082_v37 = vcombine.low %v585_v25, %v589_v26 }
 0x2a7   : > { %7251 = vmatpush1.bf16.msra.mxu0 %v9024_v0  ;;  %7579 = vmatpush1.bf16.msra.mxu1 %v9026_v49  ;;  %v592_v0 = vld [vmem:[%s10211_s28 + $0xad0] sm:$0xff] }
 0x2a8   : > { %7252 = vmatprep.subr.bf16.mxu0 %v9033_v34  ;;  %7580 = vmatprep.subr.bf16.mxu1 %v9035_v35  ;;  %v596_v49 = vld [vmem:[%s10211_s28 + $0xaf0] sm:$0xff]  ;;  %v593_v34 = vld [vmem:[%s10211_s28 + $0xad8] sm:$0xff] }
 0x2a9   : > { %v597_v35 = vld [vmem:[%s10211_s28 + $0xaf8] sm:$0xff]  ;;  %v9089_v40 = vcombine.high %v592_v0, %v596_v49  ;;  %v9088_v47 = vcombine.low %v592_v0, %v596_v49 }
 0x2aa   : > { %v9091_v41 = vcombine.high %v593_v34, %v597_v35  ;;  %v9090_v48 = vcombine.low %v593_v34, %v597_v35 }
 0x2ab   : > { %7253 = vmatpush1.bf16.msra.mxu0 %v9032_v42  ;;  %7581 = vmatpush1.bf16.msra.mxu1 %v9034_v43  ;;  %v600_v42 = vld [vmem:[%s10211_s28 + $0xb10] sm:$0xff] }
 0x2ac   : > { %7254 = vmatprep.subr.bf16.mxu0 %v9041_v44  ;;  %7582 = vmatprep.subr.bf16.mxu1 %v9043_v46  ;;  %v604_v43 = vld [vmem:[%s10211_s28 + $0xb30] sm:$0xff]  ;;  %v601_v44 = vld [vmem:[%s10211_s28 + $0xb18] sm:$0xff] }
 0x2ad   : > { %v605_v46 = vld [vmem:[%s10211_s28 + $0xb38] sm:$0xff]  ;;  %v9097_v51 = vcombine.high %v600_v42, %v604_v43  ;;  %v9096_v58 = vcombine.low %v600_v42, %v604_v43 }
 0x2ae   : > { %v9099_v53 = vcombine.high %v601_v44, %v605_v46  ;;  %v9098_v61 = vcombine.low %v601_v44, %v605_v46 }
 0x2af   : > { %7255 = vmatpush1.bf16.msra.mxu0 %v9040_v24  ;;  %7583 = vmatpush1.bf16.msra.mxu1 %v9042_v55  ;;  %v608_v24 = vld [vmem:[%s10211_s28 + $0xb50] sm:$0xff] }
 0x2b0   : > { %7256 = vmatprep.subr.bf16.mxu0 %v9049_v56  ;;  %7584 = vmatprep.subr.bf16.mxu1 %v9051_v57  ;;  %v612_v55 = vld [vmem:[%s10211_s28 + $0xb70] sm:$0xff]  ;;  %v609_v56 = vld [vmem:[%s10211_s28 + $0xb58] sm:$0xff] }
 0x2b1   : > { %v613_v57 = vld [vmem:[%s10211_s28 + $0xb78] sm:$0xff]  ;;  %v9105_v62 = vcombine.high %v608_v24, %v612_v55  ;;  %v9104_v5 = vcombine.low %v608_v24, %v612_v55 }
 0x2b2   : > { %v9107_v63 = vcombine.high %v609_v56, %v613_v57  ;;  %v9106_v30 = vcombine.low %v609_v56, %v613_v57  ;;  %v664_v57 = vld [vmem:[%s10211_s28 + $0xd10] sm:$0xff] }
 0x2b3   : > { %7257 = vmatpush1.bf16.msra.mxu0 %v9048_v9  ;;  %7585 = vmatpush1.bf16.msra.mxu1 %v9050_v33  ;;  %v616_v9 = vld [vmem:[%s10211_s28 + $0xb90] sm:$0xff] }
 0x2b4   : > { %7258 = vmatprep.subr.bf16.mxu0 %v9057_v3  ;;  %7586 = vmatprep.subr.bf16.mxu1 %v9059_v4  ;;  %v620_v33 = vld [vmem:[%s10211_s28 + $0xbb0] sm:$0xff]  ;;  %v617_v3 = vld [vmem:[%s10211_s28 + $0xb98] sm:$0xff] }
 0x2b5   : > { %v621_v4 = vld [vmem:[%s10211_s28 + $0xbb8] sm:$0xff]  ;;  %v9113_v7 = vcombine.high %v616_v9, %v620_v33  ;;  %v9112_v16 = vcombine.low %v616_v9, %v620_v33 }
 0x2b6   : > { %v9115_v11 = vcombine.high %v617_v3, %v621_v4  ;;  %v9114_v2 = vcombine.low %v617_v3, %v621_v4  ;;  %v10159_v3 = vmov 1983009808  }
 0x2b7   : > { %7259 = vmatpush1.bf16.msra.mxu0 %v9056_v12  ;;  %7587 = vmatpush1.bf16.msra.mxu1 %v9058_v13  ;;  %v624_v12 = vld [vmem:[%s10211_s28 + $0xbd0] sm:$0xff]  ;;  %v7829_v4 = vunpack.c.l.s4 %v10159_v3  ;;  %v709_v3 = vld [vmem:[%s10211_s28 + $0xe78] sm:$0xff] }
 0x2b8   : > { %7260 = vmatprep.subr.bf16.mxu0 %v9065_v14  ;;  %7588 = vmatprep.subr.bf16.mxu1 %v9067_v15  ;;  %v628_v13 = vld [vmem:[%s10211_s28 + $0xbf0] sm:$0xff]  ;;  %v625_v14 = vld [vmem:[%s10211_s28 + $0xbd8] sm:$0xff] }
 0x2b9   : > { %v629_v15 = vld [vmem:[%s10211_s28 + $0xbf8] sm:$0xff]  ;;  %v9121_v18 = vcombine.high %v624_v12, %v628_v13  ;;  %v9120_v39 = vcombine.low %v624_v12, %v628_v13 }
 0x2ba   : > { %v9123_v54 = vcombine.high %v625_v14, %v629_v15  ;;  %v9122_v23 = vcombine.low %v625_v14, %v629_v15  ;;  %v7830_v15 = vunpack.c.0.s8 %v7829_v4 }
 0x2bb   : > { %7261 = vmatpush1.bf16.msra.mxu0 %v9064_v17  ;;  %7589 = vmatpush1.bf16.msra.mxu1 %v9066_v21  ;;  %v632_v17 = vld [vmem:[%s10211_s28 + $0xc10] sm:$0xff] }
 0x2bc   : > { %7262 = vmatprep.subr.bf16.mxu0 %v9073_v22  ;;  %7590 = vmatprep.subr.bf16.mxu1 %v9075_v10  ;;  %v636_v21 = vld [vmem:[%s10211_s28 + $0xc30] sm:$0xff]  ;;  %v633_v22 = vld [vmem:[%s10211_s28 + $0xc18] sm:$0xff] }
 0x2bd   : > { %v637_v10 = vld [vmem:[%s10211_s28 + $0xc38] sm:$0xff]  ;;  %v9129_v25 = vcombine.high %v632_v17, %v636_v21  ;;  %v9128_v0 = vcombine.low %v632_v17, %v636_v21 }
 0x2be   : > { %v9131_v26 = vcombine.high %v633_v22, %v637_v10  ;;  %v9130_v49 = vcombine.low %v633_v22, %v637_v10  ;;  %v685_v17 = vld [vmem:[%s10211_s28 + $0xdb8] sm:$0xff] }
 0x2bf   : > { %7263 = vmatpush1.bf16.msra.mxu0 %v9072_v27  ;;  %7591 = vmatpush1.bf16.msra.mxu1 %v9074_v29  ;;  %v640_v27 = vld [vmem:[%s10211_s28 + $0xc50] sm:$0xff] }
 0x2c0   : > { %7264 = vmatprep.subr.bf16.mxu0 %v9081_v31  ;;  %7592 = vmatprep.subr.bf16.mxu1 %v9083_v32  ;;  %v644_v29 = vld [vmem:[%s10211_s28 + $0xc70] sm:$0xff]  ;;  %v641_v31 = vld [vmem:[%s10211_s28 + $0xc58] sm:$0xff] }
 0x2c1   : > { %v645_v32 = vld [vmem:[%s10211_s28 + $0xc78] sm:$0xff]  ;;  %v9137_v34 = vcombine.high %v640_v27, %v644_v29  ;;  %v9136_v42 = vcombine.low %v640_v27, %v644_v29  ;;  %v692_v27 = vld [vmem:[%s10211_s28 + $0xdf0] sm:$0xff] }
 0x2c2   : > { %v9139_v35 = vcombine.high %v641_v31, %v645_v32  ;;  %v9138_v43 = vcombine.low %v641_v31, %v645_v32  ;;  %v689_v32 = vld [vmem:[%s10211_s28 + $0xdd8] sm:$0xff] }
 0x2c3   : > { %7265 = vmatpush1.bf16.msra.mxu0 %v9080_v36  ;;  %7593 = vmatpush1.bf16.msra.mxu1 %v9082_v37  ;;  %v648_v36 = vld [vmem:[%s10211_s28 + $0xc90] sm:$0xff] }
 0x2c4   : > { %7266 = vmatprep.subr.bf16.mxu0 %v9089_v40  ;;  %7594 = vmatprep.subr.bf16.mxu1 %v9091_v41  ;;  %v652_v37 = vld [vmem:[%s10211_s28 + $0xcb0] sm:$0xff]  ;;  %v649_v40 = vld [vmem:[%s10211_s28 + $0xc98] sm:$0xff] }
 0x2c5   : > { %v653_v41 = vld [vmem:[%s10211_s28 + $0xcb8] sm:$0xff]  ;;  %v9145_v44 = vcombine.high %v648_v36, %v652_v37 }
 0x2c6   : > { %v9147_v46 = vcombine.high %v649_v40, %v653_v41  ;;  %v9146_v24 = vcombine.low %v649_v40, %v653_v41 }
 0x2c7   : > { %7267 = vmatpush1.bf16.msra.mxu0 %v9088_v47  ;;  %7595 = vmatpush1.bf16.msra.mxu1 %v9090_v48  ;;  %v656_v47 = vld [vmem:[%s10211_s28 + $0xcd0] sm:$0xff] }
 0x2c8   : > { %7268 = vmatprep.subr.bf16.mxu0 %v9097_v51  ;;  %7596 = vmatprep.subr.bf16.mxu1 %v9099_v53  ;;  %v660_v48 = vld [vmem:[%s10211_s28 + $0xcf0] sm:$0xff]  ;;  %v657_v51 = vld [vmem:[%s10211_s28 + $0xcd8] sm:$0xff] }
 0x2c9   : > { %v661_v53 = vld [vmem:[%s10211_s28 + $0xcf8] sm:$0xff]  ;;  %v9153_v55 = vcombine.high %v656_v47, %v660_v48 }
 0x2ca   : > { %v9155_v56 = vcombine.high %v657_v51, %v661_v53 }
 0x2cb   : > { %7269 = vmatpush1.bf16.msra.mxu0 %v9096_v58  ;;  %7597 = vmatpush1.bf16.msra.mxu1 %v9098_v61  ;;  %v668_v58 = vld [vmem:[%s10211_s28 + $0xd30] sm:$0xff]  ;;  %v665_v61 = vld [vmem:[%s10211_s28 + $0xd18] sm:$0xff] }
 0x2cc   : > { %7270 = vmatprep.subr.bf16.mxu0 %v9105_v62  ;;  %7598 = vmatprep.subr.bf16.mxu1 %v9107_v63  ;;  %v669_v62 = vld [vmem:[%s10211_s28 + $0xd38] sm:$0xff]  ;;  %v9152_v63 = vcombine.low %v656_v47, %v660_v48  ;;  %v9161_v9 = vcombine.high %v664_v57, %v668_v58  ;;  %v9160_v12 = vcombine.low %v664_v57, %v668_v58  ;;  %v696_v48 = vld [vmem:[%s10211_s28 + $0xe10] sm:$0xff] }
 0x2cd   : > { %v9163_v33 = vcombine.high %v665_v61, %v669_v62  ;;  %v9162_v13 = vcombine.low %v665_v61, %v669_v62 }
 0x2cf   : > { %7271 = vmatpush1.bf16.msra.mxu0 %v9104_v5  ;;  %7599 = vmatpush1.bf16.msra.mxu1 %v9106_v30  ;;  %v672_v5 = vld [vmem:[%s10211_s28 + $0xd50] sm:$0xff] }
 0x2d0   : > { %7272 = vmatprep.subr.bf16.mxu0 %v9113_v7  ;;  %7600 = vmatprep.subr.bf16.mxu1 %v9115_v11  ;;  %v676_v30 = vld [vmem:[%s10211_s28 + $0xd70] sm:$0xff]  ;;  %v673_v7 = vld [vmem:[%s10211_s28 + $0xd58] sm:$0xff] }
 0x2d1   : > { %v677_v11 = vld [vmem:[%s10211_s28 + $0xd78] sm:$0xff]  ;;  %v9169_v14 = vcombine.high %v672_v5, %v676_v30  ;;  %v9168_v21 = vcombine.low %v672_v5, %v676_v30 }
 0x2d2   : > { %v9170_v22 = vcombine.low %v673_v7, %v677_v11 }
 0x2d3   : > { %7273 = vmatpush1.bf16.msra.mxu0 %v9112_v16  ;;  %7601 = vmatpush1.bf16.msra.mxu1 %v9114_v2  ;;  %v9171_v16 = vcombine.high %v673_v7, %v677_v11  ;;  %v680_v2 = vld [vmem:[%s10211_s28 + $0xd90] sm:$0xff] }
 0x2d4   : > { %7274 = vmatprep.subr.bf16.mxu0 %v9121_v18  ;;  %7602 = vmatprep.subr.bf16.mxu1 %v9123_v54  ;;  %v684_v18 = vld [vmem:[%s10211_s28 + $0xdb0] sm:$0xff]  ;;  %v681_v54 = vld [vmem:[%s10211_s28 + $0xd98] sm:$0xff] }
 0x2d5   : > { %v9177_v10 = vcombine.high %v680_v2, %v684_v18  ;;  %v712_v11 = vld [vmem:[%s10211_s28 + $0xe90] sm:$0xff] }
 0x2d7   : > { %7275 = vmatpush1.bf16.msra.mxu0 %v9120_v39  ;;  %7603 = vmatpush1.bf16.msra.mxu1 %v9122_v23  ;;  %v11090_v23 = vsub.s32 %v7830_v15, %v10236_v45 }
 0x2d8   : > { %7285 = vmatprep.subr.bf16.mxu0 %v9129_v25  ;;  %7613 = vmatprep.subr.bf16.mxu1 %v9131_v26  ;;  %v9179_v25 = vcombine.high %v681_v54, %v685_v17  ;;  %v688_v26 = vld [vmem:[%s10211_s28 + $0xdd0] sm:$0xff] }
 0x2da   : > { %7277 = vmatmul.mubr.bf16.vlgmr.msra.gmra.mrb[4].mxu0 %v10463_v59  ;;  %7605 = vmatmul.mubr.bf16.vlgmr.msra.gmra.mrb[4].mxu1 %v10463_v59  ;;  %v9144_v59 = vcombine.low %v648_v36, %v652_v37  ;;  %v9176_v36 = vcombine.low %v680_v2, %v684_v18 }
 0x2db   : > { %7286 = vmatpush1.bf16.msra.mxu0 %v9128_v0  ;;  %7614 = vmatpush1.bf16.msra.mxu1 %v9130_v49  ;;  %v693_v0 = vld [vmem:[%s10211_s28 + $0xdf8] sm:$0xff] }
 0x2dc   : > { %7287 = vmatprep.subr.bf16.mxu0 %v9137_v34  ;;  %7615 = vmatprep.subr.bf16.mxu1 %v9139_v35  ;;  %v9187_v47 = vcombine.high %v689_v32, %v693_v0  ;;  %v9186_v58 = vcombine.low %v689_v32, %v693_v0  ;;  %v733_v32 = vld [vmem:[%s10211_s28 + $0xf38] sm:$0xff] }
 0x2dd   : > { %7317 = vmatprep.mubr.bf16.mxu0 %v10471_v6  ;;  %7645 = vmatprep.mubr.bf16.mxu1 %v10471_v6  ;;  %v9154_v6 = vcombine.low %v657_v51, %v661_v53  ;;  %v700_v51 = vld [vmem:[%s10211_s28 + $0xe30] sm:$0xff] }
 0x2de   : > { %v9193_v61 = vcombine.high %v696_v48, %v700_v51  ;;  %v9192_v4 = vcombine.low %v696_v48, %v700_v51  ;;  %v748_v48 = vld [vmem:[%s10211_s28 + $0xfb0] sm:$0xff]  ;;  %v745_v51 = vld [vmem:[%s10211_s28 + $0xf98] sm:$0xff] }
 0x2df   : > { %7288 = vmatpush1.bf16.msra.mxu0 %v9136_v42  ;;  %7616 = vmatpush1.bf16.msra.mxu1 %v9138_v43  ;;  %v9178_v42 = vcombine.low %v681_v54, %v685_v17  ;;  %v9185_v43 = vcombine.high %v688_v26, %v692_v27  ;;  %v720_v54 = vld [vmem:[%s10211_s28 + $0xed0] sm:$0xff] }
 0x2e0   : > { %7289 = vmatprep.subr.bf16.mxu0 %v9145_v44  ;;  %7617 = vmatprep.subr.bf16.mxu1 %v9147_v46  ;;  %v724_v17 = vld [vmem:[%s10211_s28 + $0xef0] sm:$0xff] }
 0x2e1   : > { %v9216_v0 = vcombine.low %v720_v54, %v724_v17 }
 0x2e3   : > { %7290 = vmatpush1.bf16.msra.mxu0 %v9144_v59  ;;  %7618 = vmatpush1.bf16.msra.mxu1 %v9146_v24  ;;  %v697_v59 = vld [vmem:[%s10211_s28 + $0xe18] sm:$0xff] }
 0x2e4   : > { %7291 = vmatprep.subr.bf16.mxu0 %v9153_v55  ;;  %7619 = vmatprep.subr.bf16.mxu1 %v9155_v56  ;;  %v701_v24 = vld [vmem:[%s10211_s28 + $0xe38] sm:$0xff]  ;;  %v242_v55 = vld [vmem:[#allocation2] sm:$0xff]  ;;  %v9184_v56 = vcombine.low %v688_v26, %v692_v27  ;;  %v728_v27 = vld [vmem:[%s10211_s28 + $0xf10] sm:$0xff] }
 0x2e5   : > { %v9195_v62 = vcombine.high %v697_v59, %v701_v24  ;;  %v9194_v5 = vcombine.low %v697_v59, %v701_v24 }
 0x2e7   : > { %7292 = vmatpush1.bf16.msra.mxu0 %v9152_v63  ;;  %7620 = vmatpush1.bf16.msra.mxu1 %v9154_v6  ;;  %v704_v63 = vld [vmem:[%s10211_s28 + $0xe50] sm:$0xff] }
 0x2e8   : > { %7293 = vmatprep.subr.bf16.mxu0 %v9161_v9  ;;  %7621 = vmatprep.subr.bf16.mxu1 %v9163_v33  ;;  %v708_v6 = vld [vmem:[%s10211_s28 + $0xe70] sm:$0xff]  ;;  %v705_v33 = vld [vmem:[%s10211_s28 + $0xe58] sm:$0xff] }
 0x2e9   : > { %v9201_v30 = vcombine.high %v704_v63, %v708_v6  ;;  %v9203_v7 = vcombine.high %v705_v33, %v709_v3  ;;  %v9200_v15 = vcombine.low %v704_v63, %v708_v6 }
 0x2eb   : > { %7294 = vmatpush1.bf16.msra.mxu0 %v9160_v12  ;;  %7622 = vmatpush1.bf16.msra.mxu1 %v9162_v13  ;;  %v716_v12 = vld [vmem:[%s10211_s28 + $0xeb0] sm:$0xff]  ;;  %v713_v13 = vld [vmem:[%s10211_s28 + $0xe98] sm:$0xff] }
 0x2ec   : > { %7295 = vmatprep.subr.bf16.mxu0 %v9169_v14  ;;  %7623 = vmatprep.subr.bf16.mxu1 %v9171_v16  ;;  %v717_v14 = vld [vmem:[%s10211_s28 + $0xeb8] sm:$0xff]  ;;  %v9202_v16 = vcombine.low %v705_v33, %v709_v3  ;;  %v9209_v2 = vcombine.high %v712_v11, %v716_v12  ;;  %v760_v3 = vld [vmem:[%s10211_s28 + $0x1010] sm:$0xff] }
 0x2ed   : > { %v6827_v39 = vpop.f32.mrb[0].mxu0  ;;  %v7155_v29 = vpop.f32.mrb[0].mxu1  ;;  %v9211_v18 = vcombine.high %v713_v13, %v717_v14 }
 0x2ee   : > { %v6829_v31 = vpop.f32.mrb[1].mxu0  ;;  %v7157_v34 = vpop.f32.mrb[1].mxu1 }
 0x2ef   : > { %v7826_v49 = vcombine.low %v6827_v39, %v6829_v31  ;;  %v6831_v35 = vpop.f32.mrb[2].mxu0  ;;  %7296 = vmatpush1.bf16.msra.mxu0 %v9168_v21  ;;  %v7827_v37 = vcombine.low %v7155_v29, %v7157_v34  ;;  %v7159_v40 = vpop.f32.mrb[2].mxu1  ;;  %7624 = vmatpush1.bf16.msra.mxu1 %v9170_v22  ;;  %v721_v21 = vld [vmem:[%s10211_s28 + $0xed8] sm:$0xff]  ;;  %v9210_v39 = vcombine.low %v713_v13, %v717_v14  ;;  %v732_v29 = vld [vmem:[%s10211_s28 + $0xf30] sm:$0xff] }
 0x2f0   : > { %v6832_v41 = vpop.f32.mrb[3].mxu0  ;;  %7297 = vmatprep.subr.bf16.mxu0 %v9177_v10  ;;  %v7160_v46 = vpop.f32.mrb[3].mxu1  ;;  %7625 = vmatprep.subr.bf16.mxu1 %v9179_v25  ;;  %v725_v22 = vld [vmem:[%s10211_s28 + $0xef8] sm:$0xff]  ;;  %v9208_v10 = vcombine.low %v712_v11, %v716_v12  ;;  %v9217_v25 = vcombine.high %v720_v54, %v724_v17  ;;  %v9225_v34 = vcombine.high %v728_v27, %v732_v29  ;;  %v768_v14 = vld [vmem:[%s10211_s28 + $0x1050] sm:$0xff] }
 0x2f1   : > { %v7834_v44 = vrot.slane %v7826_v49, %v11090_v23  ;;  %v7841_v53 = vrot.slane %v7827_v37, %v11090_v23  ;;  %v9219_v26 = vcombine.high %v721_v21, %v725_v22  ;;  %v729_v31 = vld [vmem:[%s10211_s28 + $0xf18] sm:$0xff]  ;;  %v9218_v49 = vcombine.low %v721_v21, %v725_v22  ;;  %v740_v37 = vld [vmem:[%s10211_s28 + $0xf70] sm:$0xff] }
 0x2f2   : > { %v9227_v35 = vcombine.high %v729_v31, %v733_v32  ;;  %v737_v40 = vld [vmem:[%s10211_s28 + $0xf58] sm:$0xff]  ;;  %v776_v22 = vld [vmem:[%s10211_s28 + $0x1090] sm:$0xff] }
 0x2f3   : > { %7298 = vmatpush1.bf16.msra.mxu0 %v9176_v36  ;;  %v7842_v57 = vcombine.low %v7834_v44, %v7841_v53  ;;  %7626 = vmatpush1.bf16.msra.mxu1 %v9178_v42  ;;  %v736_v36 = vld [vmem:[%s10211_s28 + $0xf50] sm:$0xff]  ;;  %v741_v41 = vld [vmem:[%s10211_s28 + $0xf78] sm:$0xff]  ;;  %v9224_v42 = vcombine.low %v728_v27, %v732_v29 }
 0x2f4   : > { %7299 = vmatprep.subr.bf16.mxu0 %v9185_v43  ;;  %7627 = vmatprep.subr.bf16.mxu1 %v9187_v47  ;;  %v9226_v43 = vcombine.low %v729_v31, %v733_v32  ;;  %v9233_v44 = vcombine.high %v736_v36, %v740_v37  ;;  %v9235_v46 = vcombine.high %v737_v40, %v741_v41  ;;  %v744_v47 = vld [vmem:[%s10211_s28 + $0xf90] sm:$0xff]  ;;  %v749_v53 = vld [vmem:[%s10211_s28 + $0xfb8] sm:$0xff] }
 0x2f5   : > { %v7862_v9 = vadd.f32 %v7842_v57, %v242_v55  ;;  %v9232_v59 = vcombine.low %v736_v36, %v740_v37  ;;  %v9234_v24 = vcombine.low %v737_v40, %v741_v41  ;;  %v9241_v55 = vcombine.high %v744_v47, %v748_v48  ;;  %v752_v57 = vld [vmem:[%s10211_s28 + $0xfd0] sm:$0xff] }
 0x2f6   : > { %v9240_v63 = vcombine.low %v744_v47, %v748_v48  ;;  %v9242_v6 = vcombine.low %v745_v51, %v749_v53  ;;  %v784_v32 = vld [vmem:[%s10211_s28 + $0x10d0] sm:$0xff] }
 0x2f7   : > { %7300 = vmatpush1.bf16.msra.mxu0 %v9184_v56  ;;  %7864 = vst [vmem:[#allocation2] sm:$0xff] %v7862_v9  ;;  %7628 = vmatpush1.bf16.msra.mxu1 %v9186_v58  ;;  %v9243_v56 = vcombine.high %v745_v51, %v749_v53  ;;  %v756_v58 = vld [vmem:[%s10211_s28 + $0xff0] sm:$0xff]  ;;  %v801_v53 = vld [vmem:[%s10211_s28 + $0x1158] sm:$0xff] }
 0x2f8   : > { %7301 = vmatprep.subr.bf16.mxu0 %v9193_v61  ;;  %7629 = vmatprep.subr.bf16.mxu1 %v9195_v62  ;;  %v753_v61 = vld [vmem:[%s10211_s28 + $0xfd8] sm:$0xff]  ;;  %v9249_v9 = vcombine.high %v752_v57, %v756_v58  ;;  %v792_v40 = vld [vmem:[%s10211_s28 + $0x1110] sm:$0xff] }
 0x2f9   : > { %v757_v62 = vld [vmem:[%s10211_s28 + $0xff8] sm:$0xff]  ;;  %v796_v41 = vld [vmem:[%s10211_s28 + $0x1130] sm:$0xff] }
 0x2fa   : > { %v9251_v33 = vcombine.high %v753_v61, %v757_v62  ;;  %v9250_v11 = vcombine.low %v753_v61, %v757_v62  ;;  %v800_v48 = vld [vmem:[%s10211_s28 + $0x1150] sm:$0xff]  ;;  %v809_v62 = vld [vmem:[%s10211_s28 + $0x1198] sm:$0xff] }
 0x2fb   : > { %7302 = vmatpush1.bf16.msra.mxu0 %v9192_v4  ;;  %7630 = vmatpush1.bf16.msra.mxu1 %v9194_v5  ;;  %v764_v4 = vld [vmem:[%s10211_s28 + $0x1030] sm:$0xff]  ;;  %v761_v5 = vld [vmem:[%s10211_s28 + $0x1018] sm:$0xff] }
 0x2fc   : > { %7303 = vmatprep.subr.bf16.mxu0 %v9201_v30  ;;  %7631 = vmatprep.subr.bf16.mxu1 %v9203_v7  ;;  %v765_v30 = vld [vmem:[%s10211_s28 + $0x1038] sm:$0xff]  ;;  %v9248_v7 = vcombine.low %v752_v57, %v756_v58  ;;  %v9257_v12 = vcombine.high %v760_v3, %v764_v4  ;;  %v804_v51 = vld [vmem:[%s10211_s28 + $0x1170] sm:$0xff] }
 0x2fd   : > { %v9259_v13 = vcombine.high %v761_v5, %v765_v30  ;;  %v9258_v54 = vcombine.low %v761_v5, %v765_v30  ;;  %v808_v58 = vld [vmem:[%s10211_s28 + $0x1190] sm:$0xff]  ;;  %v817_v30 = vld [vmem:[%s10211_s28 + $0x11d8] sm:$0xff] }
 0x2fe   : > { %v812_v61 = vld [vmem:[%s10211_s28 + $0x11b0] sm:$0xff] }
 0x2ff   : > { %7304 = vmatpush1.bf16.msra.mxu0 %v9200_v15  ;;  %7632 = vmatpush1.bf16.msra.mxu1 %v9202_v16  ;;  %v772_v15 = vld [vmem:[%s10211_s28 + $0x1070] sm:$0xff]  ;;  %v769_v16 = vld [vmem:[%s10211_s28 + $0x1058] sm:$0xff] }
 0x300   : > { %7305 = vmatprep.subr.bf16.mxu0 %v9209_v2  ;;  %7633 = vmatprep.subr.bf16.mxu1 %v9211_v18  ;;  %v773_v2 = vld [vmem:[%s10211_s28 + $0x1078] sm:$0xff]  ;;  %v9256_v18 = vcombine.low %v760_v3, %v764_v4  ;;  %v9265_v17 = vcombine.high %v768_v14, %v772_v15  ;;  %v816_v4 = vld [vmem:[%s10211_s28 + $0x11d0] sm:$0xff] }
 0x301   : > { %v9267_v21 = vcombine.high %v769_v16, %v773_v2  ;;  %v9266_v27 = vcombine.low %v769_v16, %v773_v2  ;;  %v820_v5 = vld [vmem:[%s10211_s28 + $0x11f0] sm:$0xff]  ;;  %v825_v2 = vld [vmem:[%s10211_s28 + $0x1218] sm:$0xff] }
 0x302   : > { %v828_v16 = vld [vmem:[%s10211_s28 + $0x1230] sm:$0xff] }
 0x303   : > { %7306 = vmatpush1.bf16.msra.mxu0 %v9208_v10  ;;  %7634 = vmatpush1.bf16.msra.mxu1 %v9210_v39  ;;  %v780_v10 = vld [vmem:[%s10211_s28 + $0x10b0] sm:$0xff]  ;;  %v777_v39 = vld [vmem:[%s10211_s28 + $0x1098] sm:$0xff] }
 0x304   : > { %7307 = vmatprep.subr.bf16.mxu0 %v9217_v25  ;;  %7635 = vmatprep.subr.bf16.mxu1 %v9219_v26  ;;  %v781_v25 = vld [vmem:[%s10211_s28 + $0x10b8] sm:$0xff]  ;;  %v9264_v26 = vcombine.low %v768_v14, %v772_v15  ;;  %v9273_v29 = vcombine.high %v776_v22, %v780_v10  ;;  %v824_v15 = vld [vmem:[%s10211_s28 + $0x1210] sm:$0xff] }
 0x305   : > { %v9275_v31 = vcombine.high %v777_v39, %v781_v25 }
 0x307   : > { %7308 = vmatpush1.bf16.msra.mxu0 %v9216_v0  ;;  %7636 = vmatpush1.bf16.msra.mxu1 %v9218_v49  ;;  %v788_v0 = vld [vmem:[%s10211_s28 + $0x10f0] sm:$0xff]  ;;  %v785_v49 = vld [vmem:[%s10211_s28 + $0x10d8] sm:$0xff] }
 0x308   : > { %7309 = vmatprep.subr.bf16.mxu0 %v9225_v34  ;;  %7637 = vmatprep.subr.bf16.mxu1 %v9227_v35  ;;  %v789_v34 = vld [vmem:[%s10211_s28 + $0x10f8] sm:$0xff]  ;;  %v9274_v35 = vcombine.low %v777_v39, %v781_v25  ;;  %v9281_v36 = vcombine.high %v784_v32, %v788_v0  ;;  %v836_v39 = vld [vmem:[%s10211_s28 + $0x1270] sm:$0xff] }
 0x309   : > { %v9283_v37 = vcombine.high %v785_v49, %v789_v34  ;;  %v833_v25 = vld [vmem:[%s10211_s28 + $0x1258] sm:$0xff] }
 0x30b   : > { %7310 = vmatpush1.bf16.msra.mxu0 %v9224_v42  ;;  %7638 = vmatpush1.bf16.msra.mxu1 %v9226_v43  ;;  %v793_v42 = vld [vmem:[%s10211_s28 + $0x1118] sm:$0xff] }
 0x30c   : > { %7311 = vmatprep.subr.bf16.mxu0 %v9233_v44  ;;  %7639 = vmatprep.subr.bf16.mxu1 %v9235_v46  ;;  %v797_v43 = vld [vmem:[%s10211_s28 + $0x1138] sm:$0xff]  ;;  %v9280_v44 = vcombine.low %v784_v32, %v788_v0  ;;  %v9289_v46 = vcombine.high %v792_v40, %v796_v41  ;;  %v840_v0 = vld [vmem:[%s10211_s28 + $0x1290] sm:$0xff] }
 0x30d   : > { %v9291_v47 = vcombine.high %v793_v42, %v797_v43 }
 0x30f   : > { %7312 = vmatpush1.bf16.msra.mxu0 %v9232_v59  ;;  %7640 = vmatpush1.bf16.msra.mxu1 %v9234_v24  ;;  %v805_v59 = vld [vmem:[%s10211_s28 + $0x1178] sm:$0xff]  ;;  %v9288_v24 = vcombine.low %v792_v40, %v796_v41  ;;  %v848_v41 = vld [vmem:[%s10211_s28 + $0x12d0] sm:$0xff] }
 0x310   : > { %7313 = vmatprep.subr.bf16.mxu0 %v9241_v55  ;;  %7641 = vmatprep.subr.bf16.mxu1 %v9243_v56  ;;  %v9290_v55 = vcombine.low %v793_v42, %v797_v43  ;;  %v9297_v56 = vcombine.high %v800_v48, %v804_v51  ;;  %v9299_v57 = vcombine.high %v801_v53, %v805_v59  ;;  %v852_v42 = vld [vmem:[%s10211_s28 + $0x12f0] sm:$0xff]  ;;  %v849_v43 = vld [vmem:[%s10211_s28 + $0x12d8] sm:$0xff] }
 0x313   : > { %7314 = vmatpush1.bf16.msra.mxu0 %v9240_v63  ;;  %7642 = vmatpush1.bf16.msra.mxu1 %v9242_v6  ;;  %v813_v63 = vld [vmem:[%s10211_s28 + $0x11b8] sm:$0xff]  ;;  %v9296_v6 = vcombine.low %v800_v48, %v804_v51  ;;  %v856_v51 = vld [vmem:[%s10211_s28 + $0x1310] sm:$0xff] }
 0x314   : > { %7315 = vmatprep.subr.bf16.mxu0 %v9249_v9  ;;  %7643 = vmatprep.subr.bf16.mxu1 %v9251_v33  ;;  %v9298_v9 = vcombine.low %v801_v53, %v805_v59  ;;  %v9305_v33 = vcombine.high %v808_v58, %v812_v61  ;;  %v9307_v3 = vcombine.high %v809_v62, %v813_v63  ;;  %v860_v53 = vld [vmem:[%s10211_s28 + $0x1330] sm:$0xff]  ;;  %v857_v59 = vld [vmem:[%s10211_s28 + $0x1318] sm:$0xff] }
 0x317   : > { %7316 = vmatpush1.bf16.msra.mxu0 %v9248_v7  ;;  %7644 = vmatpush1.bf16.msra.mxu1 %v9250_v11  ;;  %v821_v7 = vld [vmem:[%s10211_s28 + $0x11f8] sm:$0xff]  ;;  %v9304_v11 = vcombine.low %v808_v58, %v812_v61  ;;  %v864_v61 = vld [vmem:[%s10211_s28 + $0x1350] sm:$0xff] }
 0x318   : > { %7326 = vmatprep.subr.bf16.mxu0 %v9257_v12  ;;  %7654 = vmatprep.subr.bf16.mxu1 %v9259_v13  ;;  %v9306_v12 = vcombine.low %v809_v62, %v813_v63  ;;  %v9313_v13 = vcombine.high %v816_v4, %v820_v5  ;;  %v9315_v14 = vcombine.high %v817_v30, %v821_v7  ;;  %v868_v62 = vld [vmem:[%s10211_s28 + $0x1370] sm:$0xff]  ;;  %v865_v63 = vld [vmem:[%s10211_s28 + $0x1358] sm:$0xff] }
 0x31a   : > { %7318 = vmatmul.mubr.bf16.vlgmr.msra.gmra.mrb[4].mxu0 %v10548_v20  ;;  %7646 = vmatmul.mubr.bf16.vlgmr.msra.gmra.mrb[4].mxu1 %v10548_v20  ;;  %v9272_v20 = vcombine.low %v776_v22, %v780_v10  ;;  %v832_v10 = vld [vmem:[%s10211_s28 + $0x1250] sm:$0xff] }
 0x31b   : > { %7327 = vmatpush1.bf16.msra.mxu0 %v9256_v18  ;;  %7655 = vmatpush1.bf16.msra.mxu1 %v9258_v54  ;;  %v829_v18 = vld [vmem:[%s10211_s28 + $0x1238] sm:$0xff]  ;;  %v9312_v54 = vcombine.low %v816_v4, %v820_v5  ;;  %v872_v5 = vld [vmem:[%s10211_s28 + $0x1390] sm:$0xff] }
 0x31c   : > { %7328 = vmatprep.subr.bf16.mxu0 %v9265_v17  ;;  %7656 = vmatprep.subr.bf16.mxu1 %v9267_v21  ;;  %v9314_v17 = vcombine.low %v817_v30, %v821_v7  ;;  %v9321_v21 = vcombine.high %v824_v15, %v828_v16  ;;  %v9323_v22 = vcombine.high %v825_v2, %v829_v18  ;;  %v876_v30 = vld [vmem:[%s10211_s28 + $0x13b0] sm:$0xff]  ;;  %v873_v7 = vld [vmem:[%s10211_s28 + $0x1398] sm:$0xff] }
 0x31d   : > { %7358 = vmatprep.mubr.bf16.mxu0 %v10555_v60  ;;  %7686 = vmatprep.mubr.bf16.mxu1 %v10555_v60  ;;  %v9282_v60 = vcombine.low %v785_v49, %v789_v34  ;;  %v844_v49 = vld [vmem:[%s10211_s28 + $0x12b0] sm:$0xff]  ;;  %v841_v34 = vld [vmem:[%s10211_s28 + $0x1298] sm:$0xff] }
 0x31f   : > { %7329 = vmatpush1.bf16.msra.mxu0 %v9264_v26  ;;  %7657 = vmatpush1.bf16.msra.mxu1 %v9266_v27  ;;  %v837_v26 = vld [vmem:[%s10211_s28 + $0x1278] sm:$0xff]  ;;  %v9320_v27 = vcombine.low %v824_v15, %v828_v16  ;;  %v880_v16 = vld [vmem:[%s10211_s28 + $0x13d0] sm:$0xff] }
 0x320   : > { %7330 = vmatprep.subr.bf16.mxu0 %v9273_v29  ;;  %7658 = vmatprep.subr.bf16.mxu1 %v9275_v31  ;;  %v9322_v29 = vcombine.low %v825_v2, %v829_v18  ;;  %v9329_v31 = vcombine.high %v832_v10, %v836_v39  ;;  %v9331_v32 = vcombine.high %v833_v25, %v837_v26  ;;  %v884_v2 = vld [vmem:[%s10211_s28 + $0x13f0] sm:$0xff]  ;;  %v881_v18 = vld [vmem:[%s10211_s28 + $0x13d8] sm:$0xff] }
 0x323   : > { %7331 = vmatpush1.bf16.msra.mxu0 %v9272_v20  ;;  %7659 = vmatpush1.bf16.msra.mxu1 %v9274_v35  ;;  %v845_v20 = vld [vmem:[%s10211_s28 + $0x12b8] sm:$0xff]  ;;  %v9328_v35 = vcombine.low %v832_v10, %v836_v39  ;;  %v888_v39 = vld [vmem:[%s10211_s28 + $0x1410] sm:$0xff] }
 0x324   : > { %7332 = vmatprep.subr.bf16.mxu0 %v9281_v36  ;;  %7660 = vmatprep.subr.bf16.mxu1 %v9283_v37  ;;  %v9330_v36 = vcombine.low %v833_v25, %v837_v26  ;;  %v9337_v37 = vcombine.high %v840_v0, %v844_v49  ;;  %v9339_v40 = vcombine.high %v841_v34, %v845_v20  ;;  %v892_v25 = vld [vmem:[%s10211_s28 + $0x1430] sm:$0xff]  ;;  %v889_v26 = vld [vmem:[%s10211_s28 + $0x1418] sm:$0xff] }
 0x327   : > { %7333 = vmatpush1.bf16.msra.mxu0 %v9280_v44  ;;  %7661 = vmatpush1.bf16.msra.mxu1 %v9282_v60  ;;  %v853_v44 = vld [vmem:[%s10211_s28 + $0x12f8] sm:$0xff]  ;;  %v9336_v60 = vcombine.low %v840_v0, %v844_v49  ;;  %v896_v49 = vld [vmem:[%s10211_s28 + $0x1450] sm:$0xff] }
 0x328   : > { %7334 = vmatprep.subr.bf16.mxu0 %v9289_v46  ;;  %7662 = vmatprep.subr.bf16.mxu1 %v9291_v47  ;;  %v9338_v46 = vcombine.low %v841_v34, %v845_v20  ;;  %v9345_v47 = vcombine.high %v848_v41, %v852_v42  ;;  %v9347_v48 = vcombine.high %v849_v43, %v853_v44  ;;  %v900_v34 = vld [vmem:[%s10211_s28 + $0x1470] sm:$0xff]  ;;  %v897_v20 = vld [vmem:[%s10211_s28 + $0x1458] sm:$0xff] }
 0x32b   : > { %7335 = vmatpush1.bf16.msra.mxu0 %v9288_v24  ;;  %7663 = vmatpush1.bf16.msra.mxu1 %v9290_v55  ;;  %v861_v24 = vld [vmem:[%s10211_s28 + $0x1338] sm:$0xff]  ;;  %v9344_v55 = vcombine.low %v848_v41, %v852_v42  ;;  %v904_v42 = vld [vmem:[%s10211_s28 + $0x1490] sm:$0xff] }
 0x32c   : > { %7336 = vmatprep.subr.bf16.mxu0 %v9297_v56  ;;  %7664 = vmatprep.subr.bf16.mxu1 %v9299_v57  ;;  %v9346_v56 = vcombine.low %v849_v43, %v853_v44  ;;  %v9353_v57 = vcombine.high %v856_v51, %v860_v53  ;;  %v9355_v58 = vcombine.high %v857_v59, %v861_v24  ;;  %v908_v43 = vld [vmem:[%s10211_s28 + $0x14b0] sm:$0xff]  ;;  %v905_v44 = vld [vmem:[%s10211_s28 + $0x1498] sm:$0xff] }
 0x32f   : > { %7337 = vmatpush1.bf16.msra.mxu0 %v9296_v6  ;;  %7665 = vmatpush1.bf16.msra.mxu1 %v9298_v9  ;;  %v869_v6 = vld [vmem:[%s10211_s28 + $0x1378] sm:$0xff]  ;;  %v9352_v9 = vcombine.low %v856_v51, %v860_v53  ;;  %v912_v53 = vld [vmem:[%s10211_s28 + $0x14d0] sm:$0xff] }
 0x330   : > { %7338 = vmatprep.subr.bf16.mxu0 %v9305_v33  ;;  %7666 = vmatprep.subr.bf16.mxu1 %v9307_v3  ;;  %v9354_v33 = vcombine.low %v857_v59, %v861_v24  ;;  %v9361_v3 = vcombine.high %v864_v61, %v868_v62  ;;  %v9363_v4 = vcombine.high %v865_v63, %v869_v6  ;;  %v916_v59 = vld [vmem:[%s10211_s28 + $0x14f0] sm:$0xff]  ;;  %v913_v24 = vld [vmem:[%s10211_s28 + $0x14d8] sm:$0xff] }
 0x333   : > { %7339 = vmatpush1.bf16.msra.mxu0 %v9304_v11  ;;  %7667 = vmatpush1.bf16.msra.mxu1 %v9306_v12  ;;  %v877_v11 = vld [vmem:[%s10211_s28 + $0x13b8] sm:$0xff]  ;;  %v9360_v12 = vcombine.low %v864_v61, %v868_v62  ;;  %v920_v61 = vld [vmem:[%s10211_s28 + $0x1510] sm:$0xff] }
 0x334   : > { %7340 = vmatprep.subr.bf16.mxu0 %v9313_v13  ;;  %7668 = vmatprep.subr.bf16.mxu1 %v9315_v14  ;;  %v9362_v13 = vcombine.low %v865_v63, %v869_v6  ;;  %v9369_v14 = vcombine.high %v872_v5, %v876_v30  ;;  %v9371_v15 = vcombine.high %v873_v7, %v877_v11  ;;  %v924_v62 = vld [vmem:[%s10211_s28 + $0x1530] sm:$0xff]  ;;  %v921_v63 = vld [vmem:[%s10211_s28 + $0x1518] sm:$0xff] }
 0x335   : > { %v925_v6 = vld [vmem:[%s10211_s28 + $0x1538] sm:$0xff] }
 0x337   : > { %7341 = vmatpush1.bf16.msra.mxu0 %v9312_v54  ;;  %7669 = vmatpush1.bf16.msra.mxu1 %v9314_v17  ;;  %v885_v54 = vld [vmem:[%s10211_s28 + $0x13f8] sm:$0xff]  ;;  %v9368_v17 = vcombine.low %v872_v5, %v876_v30  ;;  %v932_v5 = vld [vmem:[%s10211_s28 + $0x1570] sm:$0xff] }
 0x338   : > { %7342 = vmatprep.subr.bf16.mxu0 %v9321_v21  ;;  %7670 = vmatprep.subr.bf16.mxu1 %v9323_v22  ;;  %v9370_v21 = vcombine.low %v873_v7, %v877_v11  ;;  %v9377_v22 = vcombine.high %v880_v16, %v884_v2  ;;  %v9379_v10 = vcombine.high %v881_v18, %v885_v54  ;;  %v929_v30 = vld [vmem:[%s10211_s28 + $0x1558] sm:$0xff] }
 0x339   : > { %v933_v7 = vld [vmem:[%s10211_s28 + $0x1578] sm:$0xff]  ;;  %v9416_v11 = vcombine.low %v920_v61, %v924_v62 }
 0x33b   : > { %7343 = vmatpush1.bf16.msra.mxu0 %v9320_v27  ;;  %7671 = vmatpush1.bf16.msra.mxu1 %v9322_v29  ;;  %v893_v27 = vld [vmem:[%s10211_s28 + $0x1438] sm:$0xff]  ;;  %v9376_v29 = vcombine.low %v880_v16, %v884_v2  ;;  %v940_v16 = vld [vmem:[%s10211_s28 + $0x15b0] sm:$0xff] }
 0x33c   : > { %7344 = vmatprep.subr.bf16.mxu0 %v9329_v31  ;;  %7672 = vmatprep.subr.bf16.mxu1 %v9331_v32  ;;  %v9378_v31 = vcombine.low %v881_v18, %v885_v54  ;;  %v9385_v32 = vcombine.high %v888_v39, %v892_v25  ;;  %v9387_v0 = vcombine.high %v889_v26, %v893_v27  ;;  %v937_v2 = vld [vmem:[%s10211_s28 + $0x1598] sm:$0xff] }
 0x33d   : > { %v941_v18 = vld [vmem:[%s10211_s28 + $0x15b8] sm:$0xff] }
 0x33f   : > { %7345 = vmatpush1.bf16.msra.mxu0 %v9328_v35  ;;  %7673 = vmatpush1.bf16.msra.mxu1 %v9330_v36  ;;  %v901_v35 = vld [vmem:[%s10211_s28 + $0x1478] sm:$0xff]  ;;  %v9384_v36 = vcombine.low %v888_v39, %v892_v25  ;;  %v948_v39 = vld [vmem:[%s10211_s28 + $0x15f0] sm:$0xff] }
 0x340   : > { %7346 = vmatprep.subr.bf16.mxu0 %v9337_v37  ;;  %7674 = vmatprep.subr.bf16.mxu1 %v9339_v40  ;;  %v9386_v37 = vcombine.low %v889_v26, %v893_v27  ;;  %v9393_v40 = vcombine.high %v896_v49, %v900_v34  ;;  %v9395_v41 = vcombine.high %v897_v20, %v901_v35  ;;  %v945_v25 = vld [vmem:[%s10211_s28 + $0x15d8] sm:$0xff] }
 0x341   : > { %v949_v26 = vld [vmem:[%s10211_s28 + $0x15f8] sm:$0xff] }
 0x343   : > { %7347 = vmatpush1.bf16.msra.mxu0 %v9336_v60  ;;  %7675 = vmatpush1.bf16.msra.mxu1 %v9338_v46  ;;  %v909_v60 = vld [vmem:[%s10211_s28 + $0x14b8] sm:$0xff]  ;;  %v9392_v46 = vcombine.low %v896_v49, %v900_v34  ;;  %v956_v49 = vld [vmem:[%s10211_s28 + $0x1630] sm:$0xff] }
 0x344   : > { %7348 = vmatprep.subr.bf16.mxu0 %v9345_v47  ;;  %7676 = vmatprep.subr.bf16.mxu1 %v9347_v48  ;;  %v9394_v47 = vcombine.low %v897_v20, %v901_v35  ;;  %v9401_v48 = vcombine.high %v904_v42, %v908_v43  ;;  %v9403_v51 = vcombine.high %v905_v44, %v909_v60  ;;  %v953_v34 = vld [vmem:[%s10211_s28 + $0x1618] sm:$0xff] }
 0x345   : > { %v957_v20 = vld [vmem:[%s10211_s28 + $0x1638] sm:$0xff] }
 0x347   : > { %7349 = vmatpush1.bf16.msra.mxu0 %v9344_v55  ;;  %7677 = vmatpush1.bf16.msra.mxu1 %v9346_v56  ;;  %v917_v55 = vld [vmem:[%s10211_s28 + $0x14f8] sm:$0xff]  ;;  %v9402_v56 = vcombine.low %v905_v44, %v909_v60 }
 0x348   : > { %7350 = vmatprep.subr.bf16.mxu0 %v9353_v57  ;;  %7678 = vmatprep.subr.bf16.mxu1 %v9355_v58  ;;  %v9409_v57 = vcombine.high %v912_v53, %v916_v59  ;;  %v9411_v58 = vcombine.high %v913_v24, %v917_v55  ;;  %v965_v44 = vld [vmem:[%s10211_s28 + $0x1678] sm:$0xff] }
 0x34b   : > { %7351 = vmatpush1.bf16.msra.mxu0 %v9352_v9  ;;  %7679 = vmatpush1.bf16.msra.mxu1 %v9354_v33  ;;  %v9408_v9 = vcombine.low %v912_v53, %v916_v59  ;;  %v9417_v33 = vcombine.high %v920_v61, %v924_v62  ;;  %v972_v53 = vld [vmem:[%s10211_s28 + $0x16b0] sm:$0xff]  ;;  %v969_v59 = vld [vmem:[%s10211_s28 + $0x1698] sm:$0xff] }
 0x34c   : > { %7352 = vmatprep.subr.bf16.mxu0 %v9361_v3  ;;  %7680 = vmatprep.subr.bf16.mxu1 %v9363_v4  ;;  %v9419_v3 = vcombine.high %v921_v63, %v925_v6  ;;  %v928_v4 = vld [vmem:[%s10211_s28 + $0x1550] sm:$0xff]  ;;  %v977_v62 = vld [vmem:[%s10211_s28 + $0x16d8] sm:$0xff] }
 0x34d   : > { %v9424_v54 = vcombine.low %v928_v4, %v932_v5  ;;  %v980_v61 = vld [vmem:[%s10211_s28 + $0x16f0] sm:$0xff] }
 0x34f   : > { %7353 = vmatpush1.bf16.msra.mxu0 %v9360_v12  ;;  %7681 = vmatpush1.bf16.msra.mxu1 %v9362_v13  ;;  %v9418_v12 = vcombine.low %v921_v63, %v925_v6  ;;  %v9425_v13 = vcombine.high %v928_v4, %v932_v5  ;;  %v981_v63 = vld [vmem:[%s10211_s28 + $0x16f8] sm:$0xff]  ;;  %v988_v4 = vld [vmem:[%s10211_s28 + $0x1730] sm:$0xff] }
 0x350   : > { %7354 = vmatprep.subr.bf16.mxu0 %v9369_v14  ;;  %7682 = vmatprep.subr.bf16.mxu1 %v9371_v15  ;;  %v9427_v14 = vcombine.high %v929_v30, %v933_v7  ;;  %v936_v15 = vld [vmem:[%s10211_s28 + $0x1590] sm:$0xff]  ;;  %v985_v5 = vld [vmem:[%s10211_s28 + $0x1718] sm:$0xff] }
 0x351   : > { %v9432_v27 = vcombine.low %v936_v15, %v940_v16 }
 0x353   : > { %7355 = vmatpush1.bf16.msra.mxu0 %v9368_v17  ;;  %7683 = vmatpush1.bf16.msra.mxu1 %v9370_v21  ;;  %v9426_v17 = vcombine.low %v929_v30, %v933_v7  ;;  %v9433_v21 = vcombine.high %v936_v15, %v940_v16  ;;  %v989_v30 = vld [vmem:[%s10211_s28 + $0x1738] sm:$0xff]  ;;  %v996_v15 = vld [vmem:[%s10211_s28 + $0x1770] sm:$0xff] }
 0x354   : > { %7356 = vmatprep.subr.bf16.mxu0 %v9377_v22  ;;  %7684 = vmatprep.subr.bf16.mxu1 %v9379_v10  ;;  %v9435_v22 = vcombine.high %v937_v2, %v941_v18  ;;  %v944_v10 = vld [vmem:[%s10211_s28 + $0x15d0] sm:$0xff]  ;;  %v993_v16 = vld [vmem:[%s10211_s28 + $0x1758] sm:$0xff] }
 0x355   : > { %v9440_v35 = vcombine.low %v944_v10, %v948_v39 }
 0x357   : > { %7357 = vmatpush1.bf16.msra.mxu0 %v9376_v29  ;;  %7685 = vmatpush1.bf16.msra.mxu1 %v9378_v31  ;;  %v9434_v29 = vcombine.low %v937_v2, %v941_v18  ;;  %v9441_v31 = vcombine.high %v944_v10, %v948_v39  ;;  %v997_v2 = vld [vmem:[%s10211_s28 + $0x1778] sm:$0xff]  ;;  %v1004_v10 = vld [vmem:[%s10211_s28 + $0x17b0] sm:$0xff] }
 0x358   : > { %7367 = vmatprep.subr.bf16.mxu0 %v9385_v32  ;;  %7695 = vmatprep.subr.bf16.mxu1 %v9387_v0  ;;  %v9443_v32 = vcombine.high %v945_v25, %v949_v26  ;;  %v952_v0 = vld [vmem:[%s10211_s28 + $0x1610] sm:$0xff]  ;;  %v1001_v39 = vld [vmem:[%s10211_s28 + $0x1798] sm:$0xff] }
 0x359   : > { %v9448_v60 = vcombine.low %v952_v0, %v956_v49 }
 0x35a   : > { %7359 = vmatmul.mubr.bf16.vlgmr.msra.gmra.mrb[4].mxu0 %v10623_v52  ;;  %7687 = vmatmul.mubr.bf16.vlgmr.msra.gmra.mrb[4].mxu1 %v10623_v52  ;;  %v9400_v52 = vcombine.low %v904_v42, %v908_v43  ;;  %v964_v42 = vld [vmem:[%s10211_s28 + $0x1670] sm:$0xff]  ;;  %v961_v43 = vld [vmem:[%s10211_s28 + $0x1658] sm:$0xff] }
 0x35b   : > { %7368 = vmatpush1.bf16.msra.mxu0 %v9384_v36  ;;  %7696 = vmatpush1.bf16.msra.mxu1 %v9386_v37  ;;  %v9442_v36 = vcombine.low %v945_v25, %v949_v26  ;;  %v9449_v37 = vcombine.high %v952_v0, %v956_v49  ;;  %v1005_v25 = vld [vmem:[%s10211_s28 + $0x17b8] sm:$0xff]  ;;  %v1012_v0 = vld [vmem:[%s10211_s28 + $0x17f0] sm:$0xff] }
 0x35c   : > { %7369 = vmatprep.subr.bf16.mxu0 %v9393_v40  ;;  %7697 = vmatprep.subr.bf16.mxu1 %v9395_v41  ;;  %v9451_v40 = vcombine.high %v953_v34, %v957_v20  ;;  %v960_v41 = vld [vmem:[%s10211_s28 + $0x1650] sm:$0xff]  ;;  %v1009_v49 = vld [vmem:[%s10211_s28 + $0x17d8] sm:$0xff] }
 0x35d   : > { %7399 = vmatprep.mubr.bf16.mxu0 %v10631_v1  ;;  %7727 = vmatprep.mubr.bf16.mxu1 %v10631_v1  ;;  %v9410_v1 = vcombine.low %v913_v24, %v917_v55  ;;  %v973_v24 = vld [vmem:[%s10211_s28 + $0x16b8] sm:$0xff]  ;;  %v9456_v55 = vcombine.low %v960_v41, %v964_v42 }
 0x35f   : > { %7370 = vmatpush1.bf16.msra.mxu0 %v9392_v46  ;;  %7698 = vmatpush1.bf16.msra.mxu1 %v9394_v47  ;;  %v9450_v46 = vcombine.low %v953_v34, %v957_v20  ;;  %v9457_v47 = vcombine.high %v960_v41, %v964_v42  ;;  %v1013_v34 = vld [vmem:[%s10211_s28 + $0x17f8] sm:$0xff]  ;;  %v1020_v41 = vld [vmem:[%s10211_s28 + $0x1830] sm:$0xff] }
 0x360   : > { %7371 = vmatprep.subr.bf16.mxu0 %v9401_v48  ;;  %7699 = vmatprep.subr.bf16.mxu1 %v9403_v51  ;;  %v9459_v48 = vcombine.high %v961_v43, %v965_v44  ;;  %v968_v51 = vld [vmem:[%s10211_s28 + $0x1690] sm:$0xff]  ;;  %v1017_v42 = vld [vmem:[%s10211_s28 + $0x1818] sm:$0xff] }
 0x361   : > { %v9464_v6 = vcombine.low %v968_v51, %v972_v53 }
 0x363   : > { %7372 = vmatpush1.bf16.msra.mxu0 %v9400_v52  ;;  %7700 = vmatpush1.bf16.msra.mxu1 %v9402_v56  ;;  %v9458_v52 = vcombine.low %v961_v43, %v965_v44  ;;  %v9465_v56 = vcombine.high %v968_v51, %v972_v53  ;;  %v1021_v43 = vld [vmem:[%s10211_s28 + $0x1838] sm:$0xff]  ;;  %v1028_v51 = vld [vmem:[%s10211_s28 + $0x1870] sm:$0xff] }
 0x364   : > { %7373 = vmatprep.subr.bf16.mxu0 %v9409_v57  ;;  %7701 = vmatprep.subr.bf16.mxu1 %v9411_v58  ;;  %v9467_v57 = vcombine.high %v969_v59, %v973_v24  ;;  %v976_v58 = vld [vmem:[%s10211_s28 + $0x16d0] sm:$0xff]  ;;  %v1025_v53 = vld [vmem:[%s10211_s28 + $0x1858] sm:$0xff] }
 0x365   : > { %v9472_v7 = vcombine.low %v976_v58, %v980_v61 }
 0x367   : > { %7374 = vmatpush1.bf16.msra.mxu0 %v9408_v9  ;;  %7702 = vmatpush1.bf16.msra.mxu1 %v9410_v1  ;;  %v9466_v9 = vcombine.low %v969_v59, %v973_v24  ;;  %v9473_v1 = vcombine.high %v976_v58, %v980_v61  ;;  %v1029_v59 = vld [vmem:[%s10211_s28 + $0x1878] sm:$0xff]  ;;  %v1036_v58 = vld [vmem:[%s10211_s28 + $0x18b0] sm:$0xff] }
 0x368   : > { %7375 = vmatprep.subr.bf16.mxu0 %v9417_v33  ;;  %7703 = vmatprep.subr.bf16.mxu1 %v9419_v3  ;;  %v9475_v33 = vcombine.high %v977_v62, %v981_v63  ;;  %v984_v3 = vld [vmem:[%s10211_s28 + $0x1710] sm:$0xff]  ;;  %v1033_v61 = vld [vmem:[%s10211_s28 + $0x1898] sm:$0xff] }
 0x369   : > { %v9480_v18 = vcombine.low %v984_v3, %v988_v4 }
 0x36b   : > { %7376 = vmatpush1.bf16.msra.mxu0 %v9416_v11  ;;  %7704 = vmatpush1.bf16.msra.mxu1 %v9418_v12  ;;  %v9474_v11 = vcombine.low %v977_v62, %v981_v63  ;;  %v9481_v12 = vcombine.high %v984_v3, %v988_v4  ;;  %v1037_v62 = vld [vmem:[%s10211_s28 + $0x18b8] sm:$0xff]  ;;  %v1044_v3 = vld [vmem:[%s10211_s28 + $0x18f0] sm:$0xff] }
 0x36c   : > { %7377 = vmatprep.subr.bf16.mxu0 %v9425_v13  ;;  %7705 = vmatprep.subr.bf16.mxu1 %v9427_v14  ;;  %v9483_v13 = vcombine.high %v985_v5, %v989_v30  ;;  %v992_v14 = vld [vmem:[%s10211_s28 + $0x1750] sm:$0xff]  ;;  %v1041_v4 = vld [vmem:[%s10211_s28 + $0x18d8] sm:$0xff] }
 0x36d   : > { %v9488_v26 = vcombine.low %v992_v14, %v996_v15 }
 0x36f   : > { %7378 = vmatpush1.bf16.msra.mxu0 %v9424_v54  ;;  %7706 = vmatpush1.bf16.msra.mxu1 %v9426_v17  ;;  %v9482_v54 = vcombine.low %v985_v5, %v989_v30  ;;  %v9489_v17 = vcombine.high %v992_v14, %v996_v15  ;;  %v1045_v5 = vld [vmem:[%s10211_s28 + $0x18f8] sm:$0xff]  ;;  %v9530_v30 = vcombine.low %v1033_v61, %v1037_v62 }
 0x370   : > { %7379 = vmatprep.subr.bf16.mxu0 %v9433_v21  ;;  %7707 = vmatprep.subr.bf16.mxu1 %v9435_v22  ;;  %v9491_v21 = vcombine.high %v993_v16, %v997_v2  ;;  %v1000_v22 = vld [vmem:[%s10211_s28 + $0x1790] sm:$0xff]  ;;  %v1049_v14 = vld [vmem:[%s10211_s28 + $0x1918] sm:$0xff] }
 0x371   : > { %v9496_v20 = vcombine.low %v1000_v22, %v1004_v10  ;;  %v1053_v15 = vld [vmem:[%s10211_s28 + $0x1938] sm:$0xff] }
 0x373   : > { %7380 = vmatpush1.bf16.msra.mxu0 %v9432_v27  ;;  %7708 = vmatpush1.bf16.msra.mxu1 %v9434_v29  ;;  %v9490_v27 = vcombine.low %v993_v16, %v997_v2  ;;  %v9497_v29 = vcombine.high %v1000_v22, %v1004_v10  ;;  %v1061_v22 = vld [vmem:[%s10211_s28 + $0x1978] sm:$0xff] }
 0x374   : > { %7381 = vmatprep.subr.bf16.mxu0 %v9441_v31  ;;  %7709 = vmatprep.subr.bf16.mxu1 %v9443_v32  ;;  %v9499_v31 = vcombine.high %v1001_v39, %v1005_v25  ;;  %v1008_v32 = vld [vmem:[%s10211_s28 + $0x17d0] sm:$0xff] }
 0x375   : > { %v9504_v44 = vcombine.low %v1008_v32, %v1012_v0 }
 0x377   : > { %7382 = vmatpush1.bf16.msra.mxu0 %v9440_v35  ;;  %7710 = vmatpush1.bf16.msra.mxu1 %v9442_v36  ;;  %v9498_v35 = vcombine.low %v1001_v39, %v1005_v25  ;;  %v9505_v36 = vcombine.high %v1008_v32, %v1012_v0  ;;  %v9546_v39 = vcombine.low %v1049_v14, %v1053_v15  ;;  %v1069_v32 = vld [vmem:[%s10211_s28 + $0x19b8] sm:$0xff] }
 0x378   : > { %7383 = vmatprep.subr.bf16.mxu0 %v9449_v37  ;;  %7711 = vmatprep.subr.bf16.mxu1 %v9451_v40  ;;  %v9507_v37 = vcombine.high %v1009_v49, %v1013_v34  ;;  %v1016_v40 = vld [vmem:[%s10211_s28 + $0x1810] sm:$0xff] }
 0x379   : > { %v9512_v24 = vcombine.low %v1016_v40, %v1020_v41 }
 0x37b   : > { %7384 = vmatpush1.bf16.msra.mxu0 %v9448_v60  ;;  %7712 = vmatpush1.bf16.msra.mxu1 %v9450_v46  ;;  %v9506_v60 = vcombine.low %v1009_v49, %v1013_v34  ;;  %v9513_v46 = vcombine.high %v1016_v40, %v1020_v41  ;;  %v1077_v40 = vld [vmem:[%s10211_s28 + $0x19f8] sm:$0xff] }
 0x37c   : > { %7385 = vmatprep.subr.bf16.mxu0 %v9457_v47  ;;  %7713 = vmatprep.subr.bf16.mxu1 %v9459_v48  ;;  %v9515_v47 = vcombine.high %v1017_v42, %v1021_v43  ;;  %v1024_v48 = vld [vmem:[%s10211_s28 + $0x1850] sm:$0xff] }
 0x37d   : > { %v9520_v63 = vcombine.low %v1024_v48, %v1028_v51 }
 0x37f   : > { %7386 = vmatpush1.bf16.msra.mxu0 %v9456_v55  ;;  %7714 = vmatpush1.bf16.msra.mxu1 %v9458_v52  ;;  %v9514_v55 = vcombine.low %v1017_v42, %v1021_v43  ;;  %v9521_v52 = vcombine.high %v1024_v48, %v1028_v51  ;;  %v1085_v48 = vld [vmem:[%s10211_s28 + $0x1a38] sm:$0xff] }
 0x380   : > { %7387 = vmatprep.subr.bf16.mxu0 %v9465_v56  ;;  %7715 = vmatprep.subr.bf16.mxu1 %v9467_v57  ;;  %v9523_v56 = vcombine.high %v1025_v53, %v1029_v59  ;;  %v1032_v57 = vld [vmem:[%s10211_s28 + $0x1890] sm:$0xff] }
 0x383   : > { %7388 = vmatpush1.bf16.msra.mxu0 %v9464_v6  ;;  %7716 = vmatpush1.bf16.msra.mxu1 %v9466_v9  ;;  %v9522_v6 = vcombine.low %v1025_v53, %v1029_v59  ;;  %v9529_v9 = vcombine.high %v1032_v57, %v1036_v58 }
 0x384   : > { %7389 = vmatprep.subr.bf16.mxu0 %v9473_v1  ;;  %7717 = vmatprep.subr.bf16.mxu1 %v9475_v33  ;;  %v9531_v1 = vcombine.high %v1033_v61, %v1037_v62  ;;  %v1040_v33 = vld [vmem:[%s10211_s28 + $0x18d0] sm:$0xff] }
 0x385   : > { %v9536_v16 = vcombine.low %v1040_v33, %v1044_v3 }
 0x387   : > { %7390 = vmatpush1.bf16.msra.mxu0 %v9472_v7  ;;  %7718 = vmatpush1.bf16.msra.mxu1 %v9474_v11  ;;  %v9537_v7 = vcombine.high %v1040_v33, %v1044_v3  ;;  %v9539_v11 = vcombine.high %v1041_v4, %v1045_v5  ;;  %v1101_v33 = vld [vmem:[%s10211_s28 + $0x1ab8] sm:$0xff] }
 0x388   : > { %7391 = vmatprep.subr.bf16.mxu0 %v9481_v12  ;;  %7719 = vmatprep.subr.bf16.mxu1 %v9483_v13  ;;  %v1048_v12 = vld [vmem:[%s10211_s28 + $0x1910] sm:$0xff] }
 0x389   : > { %v1052_v13 = vld [vmem:[%s10211_s28 + $0x1930] sm:$0xff] }
 0x38a   : > { %v9545_v2 = vcombine.high %v1048_v12, %v1052_v13  ;;  %v9544_v10 = vcombine.low %v1048_v12, %v1052_v13  ;;  %v1109_v12 = vld [vmem:[%s10211_s28 + $0x1af8] sm:$0xff] }
 0x38b   : > { %7392 = vmatpush1.bf16.msra.mxu0 %v9480_v18  ;;  %7720 = vmatpush1.bf16.msra.mxu1 %v9482_v54  ;;  %v9547_v18 = vcombine.high %v1049_v14, %v1053_v15  ;;  %v1056_v54 = vld [vmem:[%s10211_s28 + $0x1950] sm:$0xff] }
 0x38c   : > { %7393 = vmatprep.subr.bf16.mxu0 %v9489_v17  ;;  %7721 = vmatprep.subr.bf16.mxu1 %v9491_v21  ;;  %v1060_v17 = vld [vmem:[%s10211_s28 + $0x1970] sm:$0xff]  ;;  %v1057_v21 = vld [vmem:[%s10211_s28 + $0x1958] sm:$0xff] }
 0x38d   : > { %v9553_v25 = vcombine.high %v1056_v54, %v1060_v17  ;;  %v9552_v0 = vcombine.low %v1056_v54, %v1060_v17  ;;  %v9554_v49 = vcombine.low %v1057_v21, %v1061_v22  ;;  %v1117_v54 = vld [vmem:[%s10211_s28 + $0x1b38] sm:$0xff] }
 0x38f   : > { %7394 = vmatpush1.bf16.msra.mxu0 %v9488_v26  ;;  %7722 = vmatpush1.bf16.msra.mxu1 %v9490_v27  ;;  %v9555_v26 = vcombine.high %v1057_v21, %v1061_v22  ;;  %v1064_v27 = vld [vmem:[%s10211_s28 + $0x1990] sm:$0xff] }
 0x390   : > { %7395 = vmatprep.subr.bf16.mxu0 %v9497_v29  ;;  %7723 = vmatprep.subr.bf16.mxu1 %v9499_v31  ;;  %v1068_v29 = vld [vmem:[%s10211_s28 + $0x19b0] sm:$0xff]  ;;  %v1065_v31 = vld [vmem:[%s10211_s28 + $0x1998] sm:$0xff] }
 0x391   : > { %v9561_v34 = vcombine.high %v1064_v27, %v1068_v29  ;;  %v9560_v41 = vcombine.low %v1064_v27, %v1068_v29  ;;  %v9562_v42 = vcombine.low %v1065_v31, %v1069_v32  ;;  %v1125_v27 = vld [vmem:[%s10211_s28 + $0x1b78] sm:$0xff] }
 0x393   : > { %7396 = vmatpush1.bf16.msra.mxu0 %v9496_v20  ;;  %7724 = vmatpush1.bf16.msra.mxu1 %v9498_v35  ;;  %v9563_v20 = vcombine.high %v1065_v31, %v1069_v32  ;;  %v1072_v35 = vld [vmem:[%s10211_s28 + $0x19d0] sm:$0xff] }
 0x394   : > { %7397 = vmatprep.subr.bf16.mxu0 %v9505_v36  ;;  %7725 = vmatprep.subr.bf16.mxu1 %v9507_v37  ;;  %v1076_v36 = vld [vmem:[%s10211_s28 + $0x19f0] sm:$0xff]  ;;  %v1073_v37 = vld [vmem:[%s10211_s28 + $0x19d8] sm:$0xff] }
 0x395   : > { %v9569_v43 = vcombine.high %v1072_v35, %v1076_v36  ;;  %v9568_v51 = vcombine.low %v1072_v35, %v1076_v36  ;;  %v9570_v53 = vcombine.low %v1073_v37, %v1077_v40  ;;  %v1133_v35 = vld [vmem:[%s10211_s28 + $0x1bb8] sm:$0xff] }
 0x397   : > { %7398 = vmatpush1.bf16.msra.mxu0 %v9504_v44  ;;  %7726 = vmatpush1.bf16.msra.mxu1 %v9506_v60  ;;  %v9571_v44 = vcombine.high %v1073_v37, %v1077_v40  ;;  %v1080_v60 = vld [vmem:[%s10211_s28 + $0x1a10] sm:$0xff] }
 0x398   : > { %7408 = vmatprep.subr.bf16.mxu0 %v9513_v46  ;;  %7736 = vmatprep.subr.bf16.mxu1 %v9515_v47  ;;  %v1084_v46 = vld [vmem:[%s10211_s28 + $0x1a30] sm:$0xff]  ;;  %v1081_v47 = vld [vmem:[%s10211_s28 + $0x1a18] sm:$0xff] }
 0x399   : > { %v9577_v59 = vcombine.high %v1080_v60, %v1084_v46  ;;  %v9578_v61 = vcombine.low %v1081_v47, %v1085_v48 }
 0x39a   : > { %7400 = vmatmul.mubr.bf16.vlgmr.msra.gmra.mrb[4].mxu0 %v10706_v28  ;;  %7728 = vmatmul.mubr.bf16.vlgmr.msra.gmra.mrb[4].mxu1 %v10706_v28  ;;  %v9528_v28 = vcombine.low %v1032_v57, %v1036_v58  ;;  %v1093_v57 = vld [vmem:[%s10211_s28 + $0x1a78] sm:$0xff]  ;;  %v9576_v58 = vcombine.low %v1080_v60, %v1084_v46 }
 0x39b   : > { %7409 = vmatpush1.bf16.msra.mxu0 %v9512_v24  ;;  %7737 = vmatpush1.bf16.msra.mxu1 %v9514_v55  ;;  %v9579_v24 = vcombine.high %v1081_v47, %v1085_v48  ;;  %v1088_v55 = vld [vmem:[%s10211_s28 + $0x1a50] sm:$0xff]  ;;  %v1141_v60 = vld [vmem:[%s10211_s28 + $0x1bf8] sm:$0xff] }
 0x39c   : > { %7410 = vmatprep.subr.bf16.mxu0 %v9521_v52  ;;  %7738 = vmatprep.subr.bf16.mxu1 %v9523_v56  ;;  %v1092_v52 = vld [vmem:[%s10211_s28 + $0x1a70] sm:$0xff]  ;;  %v1089_v56 = vld [vmem:[%s10211_s28 + $0x1a58] sm:$0xff] }
 0x39d   : > { %7440 = vmatprep.mubr.bf16.mxu0 %v10713_v38  ;;  %7768 = vmatprep.mubr.bf16.mxu1 %v10713_v38  ;;  %v9538_v38 = vcombine.low %v1041_v4, %v1045_v5  ;;  %v9585_v62 = vcombine.high %v1088_v55, %v1092_v52  ;;  %v9584_v3 = vcombine.low %v1088_v55, %v1092_v52  ;;  %v1149_v55 = vld [vmem:[%s10211_s28 + $0x1c38] sm:$0xff] }
 0x39e   : > { %v9586_v4 = vcombine.low %v1089_v56, %v1093_v57 }
 0x39f   : > { %7411 = vmatpush1.bf16.msra.mxu0 %v9520_v63  ;;  %7739 = vmatpush1.bf16.msra.mxu1 %v9522_v6  ;;  %v9587_v63 = vcombine.high %v1089_v56, %v1093_v57  ;;  %v1096_v6 = vld [vmem:[%s10211_s28 + $0x1a90] sm:$0xff] }
 0x3a0   : > { %7412 = vmatprep.subr.bf16.mxu0 %v9529_v9  ;;  %7740 = vmatprep.subr.bf16.mxu1 %v9531_v1  ;;  %v1100_v9 = vld [vmem:[%s10211_s28 + $0x1ab0] sm:$0xff]  ;;  %v1097_v1 = vld [vmem:[%s10211_s28 + $0x1a98] sm:$0xff] }
 0x3a1   : > { %v9593_v5 = vcombine.high %v1096_v6, %v1100_v9  ;;  %v9592_v13 = vcombine.low %v1096_v6, %v1100_v9  ;;  %v9594_v14 = vcombine.low %v1097_v1, %v1101_v33  ;;  %v1157_v6 = vld [vmem:[%s10211_s28 + $0x1c78] sm:$0xff] }
 0x3a3   : > { %7413 = vmatpush1.bf16.msra.mxu0 %v9528_v28  ;;  %7741 = vmatpush1.bf16.msra.mxu1 %v9530_v30  ;;  %v9595_v28 = vcombine.high %v1097_v1, %v1101_v33  ;;  %v1104_v30 = vld [vmem:[%s10211_s28 + $0x1ad0] sm:$0xff] }
 0x3a4   : > { %7414 = vmatprep.subr.bf16.mxu0 %v9537_v7  ;;  %7742 = vmatprep.subr.bf16.mxu1 %v9539_v11  ;;  %v1108_v7 = vld [vmem:[%s10211_s28 + $0x1af0] sm:$0xff]  ;;  %v1105_v11 = vld [vmem:[%s10211_s28 + $0x1ad8] sm:$0xff] }
 0x3a5   : > { %v9601_v15 = vcombine.high %v1104_v30, %v1108_v7  ;;  %v9600_v17 = vcombine.low %v1104_v30, %v1108_v7  ;;  %v9602_v21 = vcombine.low %v1105_v11, %v1109_v12  ;;  %v1165_v30 = vld [vmem:[%s10211_s28 + $0x1cb8] sm:$0xff] }
 0x3a7   : > { %7415 = vmatpush1.bf16.msra.mxu0 %v9536_v16  ;;  %7743 = vmatpush1.bf16.msra.mxu1 %v9538_v38  ;;  %v9603_v16 = vcombine.high %v1105_v11, %v1109_v12  ;;  %v1112_v38 = vld [vmem:[%s10211_s28 + $0x1b10] sm:$0xff] }
 0x3a8   : > { %7416 = vmatprep.subr.bf16.mxu0 %v9545_v2  ;;  %7744 = vmatprep.subr.bf16.mxu1 %v9547_v18  ;;  %v1116_v2 = vld [vmem:[%s10211_s28 + $0x1b30] sm:$0xff]  ;;  %v1113_v18 = vld [vmem:[%s10211_s28 + $0x1b18] sm:$0xff] }
 0x3a9   : > { %v9609_v22 = vcombine.high %v1112_v38, %v1116_v2  ;;  %v9608_v29 = vcombine.low %v1112_v38, %v1116_v2  ;;  %v9610_v31 = vcombine.low %v1113_v18, %v1117_v54  ;;  %v1173_v38 = vld [vmem:[%s10211_s28 + $0x1cf8] sm:$0xff] }
 0x3ab   : > { %7417 = vmatpush1.bf16.msra.mxu0 %v9544_v10  ;;  %7745 = vmatpush1.bf16.msra.mxu1 %v9546_v39  ;;  %v9611_v10 = vcombine.high %v1113_v18, %v1117_v54  ;;  %v1120_v39 = vld [vmem:[%s10211_s28 + $0x1b50] sm:$0xff] }
 0x3ac   : > { %7418 = vmatprep.subr.bf16.mxu0 %v9553_v25  ;;  %7746 = vmatprep.subr.bf16.mxu1 %v9555_v26  ;;  %v1124_v25 = vld [vmem:[%s10211_s28 + $0x1b70] sm:$0xff]  ;;  %v1121_v26 = vld [vmem:[%s10211_s28 + $0x1b58] sm:$0xff] }
 0x3ad   : > { %v9617_v32 = vcombine.high %v1120_v39, %v1124_v25  ;;  %v9616_v36 = vcombine.low %v1120_v39, %v1124_v25  ;;  %v9618_v37 = vcombine.low %v1121_v26, %v1125_v27 }
 0x3af   : > { %7419 = vmatpush1.bf16.msra.mxu0 %v9552_v0  ;;  %7747 = vmatpush1.bf16.msra.mxu1 %v9554_v49  ;;  %v9619_v0 = vcombine.high %v1121_v26, %v1125_v27  ;;  %v1128_v49 = vld [vmem:[%s10211_s28 + $0x1b90] sm:$0xff] }
 0x3b0   : > { %7420 = vmatprep.subr.bf16.mxu0 %v9561_v34  ;;  %7748 = vmatprep.subr.bf16.mxu1 %v9563_v20  ;;  %v1132_v34 = vld [vmem:[%s10211_s28 + $0x1bb0] sm:$0xff]  ;;  %v1129_v20 = vld [vmem:[%s10211_s28 + $0x1b98] sm:$0xff] }
 0x3b1   : > { %v9625_v40 = vcombine.high %v1128_v49, %v1132_v34  ;;  %v9624_v46 = vcombine.low %v1128_v49, %v1132_v34  ;;  %v9626_v47 = vcombine.low %v1129_v20, %v1133_v35  ;;  %v1184_v27 = vld [vmem:[%s10211_s28 + $0x1d50] sm:$0xff] }
 0x3b3   : > { %7421 = vmatpush1.bf16.msra.mxu0 %v9560_v41  ;;  %7749 = vmatpush1.bf16.msra.mxu1 %v9562_v42  ;;  %v9627_v41 = vcombine.high %v1129_v20, %v1133_v35  ;;  %v1136_v42 = vld [vmem:[%s10211_s28 + $0x1bd0] sm:$0xff] }
 0x3b4   : > { %7422 = vmatprep.subr.bf16.mxu0 %v9569_v43  ;;  %7750 = vmatprep.subr.bf16.mxu1 %v9571_v44  ;;  %v1140_v43 = vld [vmem:[%s10211_s28 + $0x1bf0] sm:$0xff]  ;;  %v1137_v44 = vld [vmem:[%s10211_s28 + $0x1bd8] sm:$0xff] }
 0x3b5   : > { %v9633_v48 = vcombine.high %v1136_v42, %v1140_v43  ;;  %v9632_v52 = vcombine.low %v1136_v42, %v1140_v43  ;;  %v9634_v56 = vcombine.low %v1137_v44, %v1141_v60  ;;  %v1192_v35 = vld [vmem:[%s10211_s28 + $0x1d90] sm:$0xff] }
 0x3b7   : > { %7423 = vmatpush1.bf16.msra.mxu0 %v9568_v51  ;;  %7751 = vmatpush1.bf16.msra.mxu1 %v9570_v53  ;;  %v9635_v51 = vcombine.high %v1137_v44, %v1141_v60  ;;  %v1144_v53 = vld [vmem:[%s10211_s28 + $0x1c10] sm:$0xff] }
 0x3b8   : > { %7424 = vmatprep.subr.bf16.mxu0 %v9577_v59  ;;  %7752 = vmatprep.subr.bf16.mxu1 %v9579_v24  ;;  %v1148_v59 = vld [vmem:[%s10211_s28 + $0x1c30] sm:$0xff]  ;;  %v1145_v24 = vld [vmem:[%s10211_s28 + $0x1c18] sm:$0xff] }
 0x3b9   : > { %v9641_v57 = vcombine.high %v1144_v53, %v1148_v59  ;;  %v9640_v9 = vcombine.low %v1144_v53, %v1148_v59  ;;  %v9642_v1 = vcombine.low %v1145_v24, %v1149_v55  ;;  %v1200_v60 = vld [vmem:[%s10211_s28 + $0x1dd0] sm:$0xff] }
 0x3bb   : > { %7425 = vmatpush1.bf16.msra.mxu0 %v9576_v58  ;;  %7753 = vmatpush1.bf16.msra.mxu1 %v9578_v61  ;;  %v9643_v58 = vcombine.high %v1145_v24, %v1149_v55  ;;  %v1152_v61 = vld [vmem:[%s10211_s28 + $0x1c50] sm:$0xff] }
 0x3bc   : > { %7426 = vmatprep.subr.bf16.mxu0 %v9585_v62  ;;  %7754 = vmatprep.subr.bf16.mxu1 %v9587_v63  ;;  %v1156_v62 = vld [vmem:[%s10211_s28 + $0x1c70] sm:$0xff]  ;;  %v1153_v63 = vld [vmem:[%s10211_s28 + $0x1c58] sm:$0xff] }
 0x3bd   : > { %v9649_v33 = vcombine.high %v1152_v61, %v1156_v62  ;;  %v9648_v7 = vcombine.low %v1152_v61, %v1156_v62  ;;  %v9650_v11 = vcombine.low %v1153_v63, %v1157_v6  ;;  %v1208_v55 = vld [vmem:[%s10211_s28 + $0x1e10] sm:$0xff] }
 0x3bf   : > { %7427 = vmatpush1.bf16.msra.mxu0 %v9584_v3  ;;  %7755 = vmatpush1.bf16.msra.mxu1 %v9586_v4  ;;  %v9651_v3 = vcombine.high %v1153_v63, %v1157_v6  ;;  %v1160_v4 = vld [vmem:[%s10211_s28 + $0x1c90] sm:$0xff] }
 0x3c0   : > { %7428 = vmatprep.subr.bf16.mxu0 %v9593_v5  ;;  %7756 = vmatprep.subr.bf16.mxu1 %v9595_v28  ;;  %v1164_v5 = vld [vmem:[%s10211_s28 + $0x1cb0] sm:$0xff]  ;;  %v1161_v28 = vld [vmem:[%s10211_s28 + $0x1c98] sm:$0xff] }
 0x3c1   : > { %v9657_v12 = vcombine.high %v1160_v4, %v1164_v5  ;;  %v9658_v2 = vcombine.low %v1161_v28, %v1165_v30  ;;  %v1216_v6 = vld [vmem:[%s10211_s28 + $0x1e50] sm:$0xff] }
 0x3c3   : > { %7429 = vmatpush1.bf16.msra.mxu0 %v9592_v13  ;;  %7757 = vmatpush1.bf16.msra.mxu1 %v9594_v14  ;;  %v9659_v13 = vcombine.high %v1161_v28, %v1165_v30  ;;  %v1168_v14 = vld [vmem:[%s10211_s28 + $0x1cd0] sm:$0xff] }
 0x3c4   : > { %7430 = vmatprep.subr.bf16.mxu0 %v9601_v15  ;;  %7758 = vmatprep.subr.bf16.mxu1 %v9603_v16  ;;  %v1172_v15 = vld [vmem:[%s10211_s28 + $0x1cf0] sm:$0xff]  ;;  %v1169_v16 = vld [vmem:[%s10211_s28 + $0x1cd8] sm:$0xff] }
 0x3c5   : > { %v9665_v18 = vcombine.high %v1168_v14, %v1172_v15  ;;  %v9667_v54 = vcombine.high %v1169_v16, %v1173_v38  ;;  %v9664_v39 = vcombine.low %v1168_v14, %v1172_v15  ;;  %v1224_v30 = vld [vmem:[%s10211_s28 + $0x1e90] sm:$0xff] }
 0x3c7   : > { %7431 = vmatpush1.bf16.msra.mxu0 %v9600_v17  ;;  %7759 = vmatpush1.bf16.msra.mxu1 %v9602_v21  ;;  %v1176_v17 = vld [vmem:[%s10211_s28 + $0x1d10] sm:$0xff] }
 0x3c8   : > { %7432 = vmatprep.subr.bf16.mxu0 %v9609_v22  ;;  %7760 = vmatprep.subr.bf16.mxu1 %v9611_v10  ;;  %v1180_v21 = vld [vmem:[%s10211_s28 + $0x1d30] sm:$0xff]  ;;  %v1177_v22 = vld [vmem:[%s10211_s28 + $0x1d18] sm:$0xff] }
 0x3c9   : > { %v1181_v10 = vld [vmem:[%s10211_s28 + $0x1d38] sm:$0xff]  ;;  %v9673_v25 = vcombine.high %v1176_v17, %v1180_v21 }
 0x3ca   : > { %v9675_v26 = vcombine.high %v1177_v22, %v1181_v10  ;;  %v9674_v49 = vcombine.low %v1177_v22, %v1181_v10  ;;  %v1240_v10 = vld [vmem:[%s10211_s28 + $0x1f10] sm:$0xff] }
 0x3cb   : > { %7433 = vmatpush1.bf16.msra.mxu0 %v9608_v29  ;;  %7761 = vmatpush1.bf16.msra.mxu1 %v9610_v31  ;;  %v1188_v29 = vld [vmem:[%s10211_s28 + $0x1d70] sm:$0xff]  ;;  %v1185_v31 = vld [vmem:[%s10211_s28 + $0x1d58] sm:$0xff] }
 0x3cc   : > { %7434 = vmatprep.subr.bf16.mxu0 %v9617_v32  ;;  %7762 = vmatprep.subr.bf16.mxu1 %v9619_v0  ;;  %v1189_v32 = vld [vmem:[%s10211_s28 + $0x1d78] sm:$0xff]  ;;  %v9672_v0 = vcombine.low %v1176_v17, %v1180_v21  ;;  %v9681_v34 = vcombine.high %v1184_v27, %v1188_v29 }
 0x3cd   : > { %v9683_v20 = vcombine.high %v1185_v31, %v1189_v32  ;;  %v9682_v42 = vcombine.low %v1185_v31, %v1189_v32  ;;  %v1248_v32 = vld [vmem:[%s10211_s28 + $0x1f50] sm:$0xff] }
 0x3cf   : > { %7435 = vmatpush1.bf16.msra.mxu0 %v9616_v36  ;;  %7763 = vmatpush1.bf16.msra.mxu1 %v9618_v37  ;;  %v1196_v36 = vld [vmem:[%s10211_s28 + $0x1db0] sm:$0xff]  ;;  %v1193_v37 = vld [vmem:[%s10211_s28 + $0x1d98] sm:$0xff] }
 0x3d0   : > { %7436 = vmatprep.subr.bf16.mxu0 %v9625_v40  ;;  %7764 = vmatprep.subr.bf16.mxu1 %v9627_v41  ;;  %v1197_v40 = vld [vmem:[%s10211_s28 + $0x1db8] sm:$0xff]  ;;  %v9680_v41 = vcombine.low %v1184_v27, %v1188_v29  ;;  %v9689_v43 = vcombine.high %v1192_v35, %v1196_v36 }
 0x3d1   : > { %v9691_v44 = vcombine.high %v1193_v37, %v1197_v40  ;;  %v9690_v53 = vcombine.low %v1193_v37, %v1197_v40  ;;  %v1256_v40 = vld [vmem:[%s10211_s28 + $0x1f90] sm:$0xff] }
 0x3d3   : > { %7437 = vmatpush1.bf16.msra.mxu0 %v9624_v46  ;;  %7765 = vmatpush1.bf16.msra.mxu1 %v9626_v47  ;;  %v1204_v46 = vld [vmem:[%s10211_s28 + $0x1df0] sm:$0xff]  ;;  %v1201_v47 = vld [vmem:[%s10211_s28 + $0x1dd8] sm:$0xff] }
 0x3d4   : > { %7438 = vmatprep.subr.bf16.mxu0 %v9633_v48  ;;  %7766 = vmatprep.subr.bf16.mxu1 %v9635_v51  ;;  %v1205_v48 = vld [vmem:[%s10211_s28 + $0x1df8] sm:$0xff]  ;;  %v9688_v51 = vcombine.low %v1192_v35, %v1196_v36  ;;  %v9697_v59 = vcombine.high %v1200_v60, %v1204_v46 }
 0x3d5   : > { %v9699_v24 = vcombine.high %v1201_v47, %v1205_v48  ;;  %v9698_v61 = vcombine.low %v1201_v47, %v1205_v48  ;;  %v1264_v48 = vld [vmem:[%s10211_s28 + $0x1fd0] sm:$0xff] }
 0x3d7   : > { %7439 = vmatpush1.bf16.msra.mxu0 %v9632_v52  ;;  %7767 = vmatpush1.bf16.msra.mxu1 %v9634_v56  ;;  %v1212_v52 = vld [vmem:[%s10211_s28 + $0x1e30] sm:$0xff]  ;;  %v1209_v56 = vld [vmem:[%s10211_s28 + $0x1e18] sm:$0xff] }
 0x3d8   : > { %7449 = vmatprep.subr.bf16.mxu0 %v9641_v57  ;;  %7777 = vmatprep.subr.bf16.mxu1 %v9643_v58  ;;  %v1213_v57 = vld [vmem:[%s10211_s28 + $0x1e38] sm:$0xff]  ;;  %v9696_v58 = vcombine.low %v1200_v60, %v1204_v46  ;;  %v9705_v62 = vcombine.high %v1208_v55, %v1212_v52 }
 0x3d9   : > { %v9707_v63 = vcombine.high %v1209_v56, %v1213_v57 }
 0x3da   : > { %7441 = vmatmul.mubr.bf16.vlgmr.msra.gmra.mrb[4].mxu0 %v10781_v8  ;;  %7769 = vmatmul.mubr.bf16.vlgmr.msra.gmra.mrb[4].mxu1 %v10781_v8  ;;  %v9656_v8 = vcombine.low %v1160_v4, %v1164_v5  ;;  %v9706_v4 = vcombine.low %v1209_v56, %v1213_v57 }
 0x3db   : > { %7450 = vmatpush1.bf16.msra.mxu0 %v9640_v9  ;;  %7778 = vmatpush1.bf16.msra.mxu1 %v9642_v1  ;;  %v1220_v9 = vld [vmem:[%s10211_s28 + $0x1e70] sm:$0xff]  ;;  %v1217_v1 = vld [vmem:[%s10211_s28 + $0x1e58] sm:$0xff] }
 0x3dc   : > { %7451 = vmatprep.subr.bf16.mxu0 %v9649_v33  ;;  %7779 = vmatprep.subr.bf16.mxu1 %v9651_v3  ;;  %v1221_v33 = vld [vmem:[%s10211_s28 + $0x1e78] sm:$0xff]  ;;  %v9704_v3 = vcombine.low %v1208_v55, %v1212_v52  ;;  %v9713_v5 = vcombine.high %v1216_v6, %v1220_v9 }
 0x3dd   : > { %7481 = vmatprep.mubr.bf16.mxu0 %v10789_v19  ;;  %7809 = vmatprep.mubr.bf16.mxu1 %v10789_v19  ;;  %v9666_v19 = vcombine.low %v1169_v16, %v1173_v38  ;;  %v9715_v28 = vcombine.high %v1217_v1, %v1221_v33  ;;  %v9714_v14 = vcombine.low %v1217_v1, %v1221_v33  ;;  %v1232_v38 = vld [vmem:[%s10211_s28 + $0x1ed0] sm:$0xff] }
 0x3df   : > { %7452 = vmatpush1.bf16.msra.mxu0 %v9648_v7  ;;  %7780 = vmatpush1.bf16.msra.mxu1 %v9650_v11  ;;  %v1228_v7 = vld [vmem:[%s10211_s28 + $0x1eb0] sm:$0xff]  ;;  %v1225_v11 = vld [vmem:[%s10211_s28 + $0x1e98] sm:$0xff] }
 0x3e0   : > { %7453 = vmatprep.subr.bf16.mxu0 %v9657_v12  ;;  %7781 = vmatprep.subr.bf16.mxu1 %v9659_v13  ;;  %v1229_v12 = vld [vmem:[%s10211_s28 + $0x1eb8] sm:$0xff]  ;;  %v9712_v13 = vcombine.low %v1216_v6, %v1220_v9  ;;  %v9721_v15 = vcombine.high %v1224_v30, %v1228_v7 }
 0x3e1   : > { %v9723_v16 = vcombine.high %v1225_v11, %v1229_v12  ;;  %v9722_v17 = vcombine.low %v1225_v11, %v1229_v12 }
 0x3e3   : > { %7454 = vmatpush1.bf16.msra.mxu0 %v9656_v8  ;;  %7782 = vmatpush1.bf16.msra.mxu1 %v9658_v2  ;;  %v1236_v8 = vld [vmem:[%s10211_s28 + $0x1ef0] sm:$0xff]  ;;  %v1233_v2 = vld [vmem:[%s10211_s28 + $0x1ed8] sm:$0xff] }
 0x3e4   : > { %7455 = vmatprep.subr.bf16.mxu0 %v9665_v18  ;;  %7783 = vmatprep.subr.bf16.mxu1 %v9667_v54  ;;  %v1237_v18 = vld [vmem:[%s10211_s28 + $0x1ef8] sm:$0xff]  ;;  %v9720_v54 = vcombine.low %v1224_v30, %v1228_v7  ;;  %v9729_v21 = vcombine.high %v1232_v38, %v1236_v8  ;;  %v243_v7 = vld [vmem:[#allocation2 + $0x8] sm:$0xff] }
 0x3e5   : > { %v9731_v22 = vcombine.high %v1233_v2, %v1237_v18  ;;  %v9730_v27 = vcombine.low %v1233_v2, %v1237_v18  ;;  %v10062_v2 = vld [vmem:[%s11650_s3 + $0x88] sm:$0xff] (!%p9764_p6)   ;;  %v10063_v18 = vld [vmem:[%s11650_s3 + $0x50] sm:$0xff] (!%p9764_p6)  }
 0x3e7   : > { %7456 = vmatpush1.bf16.msra.mxu0 %v9664_v39  ;;  %7784 = vmatpush1.bf16.msra.mxu1 %v9666_v19  ;;  %v1244_v39 = vld [vmem:[%s10211_s28 + $0x1f30] sm:$0xff]  ;;  %v1241_v19 = vld [vmem:[%s10211_s28 + $0x1f18] sm:$0xff] }
 0x3e8   : > { %7457 = vmatprep.subr.bf16.mxu0 %v9673_v25  ;;  %7785 = vmatprep.subr.bf16.mxu1 %v9675_v26  ;;  %v1245_v25 = vld [vmem:[%s10211_s28 + $0x1f38] sm:$0xff]  ;;  %v9728_v26 = vcombine.low %v1232_v38, %v1236_v8  ;;  %v9737_v29 = vcombine.high %v1240_v10, %v1244_v39  ;;  %v10060_v38 = vld [vmem:[%s11650_s3 + $0xc8] sm:$0xff] (!%p9764_p6)  }
 0x3e9   : > { %v9739_v31 = vcombine.high %v1241_v19, %v1245_v25  ;;  %v9738_v35 = vcombine.low %v1241_v19, %v1245_v25  ;;  %v10061_v8 = vld [vmem:[%s11650_s3 + $0x8] sm:$0xff] (!%p9764_p6)   ;;  %v10070_v19 = vld [vmem:[%s11650_s3 + $0x98] sm:$0xff] (!%p9764_p6)   ;;  %v10071_v25 = vld [vmem:[%s11650_s3 + $0x60] sm:$0xff] (!%p9764_p6)  }
 0x3eb   : > { %7458 = vmatpush1.bf16.msra.mxu0 %v9672_v0  ;;  %7786 = vmatpush1.bf16.msra.mxu1 %v9674_v49  ;;  %v1252_v0 = vld [vmem:[%s10211_s28 + $0x1f70] sm:$0xff]  ;;  %v1249_v49 = vld [vmem:[%s10211_s28 + $0x1f58] sm:$0xff] }
 0x3ec   : > { %7459 = vmatprep.subr.bf16.mxu0 %v9681_v34  ;;  %7787 = vmatprep.subr.bf16.mxu1 %v9683_v20  ;;  %v1253_v34 = vld [vmem:[%s10211_s28 + $0x1f78] sm:$0xff]  ;;  %v9736_v20 = vcombine.low %v1240_v10, %v1244_v39  ;;  %v9745_v36 = vcombine.high %v1248_v32, %v1252_v0 }
 0x3ed   : > { %v9747_v37 = vcombine.high %v1249_v49, %v1253_v34  ;;  %v9746_v60 = vcombine.low %v1249_v49, %v1253_v34  ;;  %v10068_v10 = vld [vmem:[%s11650_s3 + $0xd8] sm:$0xff] (!%p9764_p6)   ;;  %v10078_v49 = vld [vmem:[%s11650_s3 + $0xa8] sm:$0xff] (!%p9764_p6)   ;;  %v10079_v34 = vld [vmem:[%s11650_s3 + $0x70] sm:$0xff] (!%p9764_p6)  }
 0x3ee   : > { %v10069_v39 = vld [vmem:[%s11650_s3 + $0x18] sm:$0xff] (!%p9764_p6)  }
 0x3ef   : > { %7460 = vmatpush1.bf16.msra.mxu0 %v9680_v41  ;;  %7788 = vmatpush1.bf16.msra.mxu1 %v9682_v42  ;;  %v1260_v41 = vld [vmem:[%s10211_s28 + $0x1fb0] sm:$0xff]  ;;  %v1257_v42 = vld [vmem:[%s10211_s28 + $0x1f98] sm:$0xff] }
 0x3f0   : > { %7461 = vmatprep.subr.bf16.mxu0 %v9689_v43  ;;  %7789 = vmatprep.subr.bf16.mxu1 %v9691_v44  ;;  %v1261_v43 = vld [vmem:[%s10211_s28 + $0x1fb8] sm:$0xff]  ;;  %v9744_v44 = vcombine.low %v1248_v32, %v1252_v0  ;;  %v9753_v46 = vcombine.high %v1256_v40, %v1260_v41  ;;  %v10076_v32 = vld [vmem:[%s11650_s3 + $0xe8] sm:$0xff] (!%p9764_p6)  }
 0x3f1   : > { %v9755_v47 = vcombine.high %v1257_v42, %v1261_v43  ;;  %v9754_v55 = vcombine.low %v1257_v42, %v1261_v43  ;;  %v10077_v0 = vld [vmem:[%s11650_s3 + $0x28] sm:$0xff] (!%p9764_p6)   ;;  %v7884_v42 = vsub.s32 (!%p9764_p6), 2, %v10236_v45  ;;  %v10084_v43 = vld [vmem:[%s11650_s3 + $0xf8] sm:$0xff] (!%p9764_p6)  }
 0x3f3   : > { %7462 = vmatpush1.bf16.msra.mxu0 %v9688_v51  ;;  %7790 = vmatpush1.bf16.msra.mxu1 %v9690_v53  ;;  %v1268_v51 = vld [vmem:[%s10211_s28 + $0x1ff0] sm:$0xff]  ;;  %v1265_v53 = vld [vmem:[%s10211_s28 + $0x1fd8] sm:$0xff] }
 0x3f4   : > { %7463 = vmatprep.subr.bf16.mxu0 %v9697_v59  ;;  %7791 = vmatprep.subr.bf16.mxu1 %v9699_v24  ;;  %v1269_v59 = vld [vmem:[%s10211_s28 + $0x1ff8] sm:$0xff]  ;;  %v9752_v24 = vcombine.low %v1256_v40, %v1260_v41  ;;  %v9761_v52 = vcombine.high %v1264_v48, %v1268_v51  ;;  %v9760_v57 = vcombine.low %v1264_v48, %v1268_v51  ;;  %v7880_v40 = vsub.s32 (!%p9764_p6), 1, %v10236_v45 }
 0x3f5   : > { %v9763_v56 = vcombine.high %v1265_v53, %v1269_v59  ;;  %v10083_v41 = vld [vmem:[%s11650_s3 + $0x78] sm:$0xff] (!%p9764_p6)  }
 0x3f7   : > { %7464 = vmatpush1.bf16.msra.mxu0 %v9696_v58  ;;  %7792 = vmatpush1.bf16.msra.mxu1 %v9698_v61  ;;  %v9762_v58 = vcombine.low %v1265_v53, %v1269_v59 }
 0x3f8   : > { %7465 = vmatprep.subr.bf16.mxu0 %v9705_v62  ;;  %7793 = vmatprep.subr.bf16.mxu1 %v9707_v63 }
 0x3fb   : > { %7466 = vmatpush1.bf16.msra.mxu0 %v9704_v3  ;;  %7794 = vmatpush1.bf16.msra.mxu1 %v9706_v4 }
 0x3fc   : > { %7467 = vmatprep.subr.bf16.mxu0 %v9713_v5  ;;  %7795 = vmatprep.subr.bf16.mxu1 %v9715_v28 }
 0x3ff   : > { %7468 = vmatpush1.bf16.msra.mxu0 %v9712_v13  ;;  %7796 = vmatpush1.bf16.msra.mxu1 %v9714_v14  ;;  %v10056_v13 = vld [vmem:[%s11650_s3 + $0xc0] sm:$0xff] (!%p9764_p6)  }
 0x400   : > { %7469 = vmatprep.subr.bf16.mxu0 %v9721_v15  ;;  %7797 = vmatprep.subr.bf16.mxu1 %v9723_v16  ;;  %v10057_v14 = vld [vmem:[%s11650_s3] sm:$0xff] (!%p9764_p6)   ;;  %v10059_v16 = vld [vmem:[%s11650_s3 + $0x48] sm:$0xff] (!%p9764_p6)  }
 0x401   : > { %v10058_v15 = vld [vmem:[%s11650_s3 + $0x80] sm:$0xff] (!%p9764_p6)  }
 0x403   : > { %7470 = vmatpush1.bf16.msra.mxu0 %v9720_v54  ;;  %7798 = vmatpush1.bf16.msra.mxu1 %v9722_v17  ;;  %v10064_v54 = vld [vmem:[%s11650_s3 + $0xd0] sm:$0xff] (!%p9764_p6)  }
 0x404   : > { %7471 = vmatprep.subr.bf16.mxu0 %v9729_v21  ;;  %7799 = vmatprep.subr.bf16.mxu1 %v9731_v22  ;;  %v10065_v17 = vld [vmem:[%s11650_s3 + $0x10] sm:$0xff] (!%p9764_p6)   ;;  %v10067_v22 = vld [vmem:[%s11650_s3 + $0x58] sm:$0xff] (!%p9764_p6)  }
 0x405   : > { %v10066_v21 = vld [vmem:[%s11650_s3 + $0x90] sm:$0xff] (!%p9764_p6)  }
 0x407   : > { %7472 = vmatpush1.bf16.msra.mxu0 %v9728_v26  ;;  %7800 = vmatpush1.bf16.msra.mxu1 %v9730_v27  ;;  %v10072_v26 = vld [vmem:[%s11650_s3 + $0xe0] sm:$0xff] (!%p9764_p6)  }
 0x408   : > { %7473 = vmatprep.subr.bf16.mxu0 %v9737_v29  ;;  %7801 = vmatprep.subr.bf16.mxu1 %v9739_v31  ;;  %v10073_v27 = vld [vmem:[%s11650_s3 + $0x20] sm:$0xff] (!%p9764_p6)   ;;  %v10075_v31 = vld [vmem:[%s11650_s3 + $0x68] sm:$0xff] (!%p9764_p6)  }
 0x409   : > { %v10074_v29 = vld [vmem:[%s11650_s3 + $0xa0] sm:$0xff] (!%p9764_p6)  }
 0x40b   : > { %7474 = vmatpush1.bf16.msra.mxu0 %v9736_v20  ;;  %7802 = vmatpush1.bf16.msra.mxu1 %v9738_v35  ;;  %v10080_v20 = vld [vmem:[%s11650_s3 + $0xf0] sm:$0xff] (!%p9764_p6)  }
 0x40c   : > { %7475 = vmatprep.subr.bf16.mxu0 %v9745_v36  ;;  %7803 = vmatprep.subr.bf16.mxu1 %v9747_v37  ;;  %v10081_v35 = vld [vmem:[%s11650_s3 + $0x30] sm:$0xff] (!%p9764_p6)   ;;  %v7876_v36 = vsub.s32 (!%p9764_p6), 0, %v10236_v45 }
 0x40d   : > { %v10082_v37 = vld [vmem:[%s11650_s3 + $0xb0] sm:$0xff] (!%p9764_p6)  }
 0x40f   : > { %7476 = vmatpush1.bf16.msra.mxu0 %v9744_v44  ;;  %7804 = vmatpush1.bf16.msra.mxu1 %v9746_v60  ;;  %v7888_v44 = vsub.s32 (!%p9764_p6), 3, %v10236_v45  ;;  %v10085_v60 = vld [vmem:[%s11650_s3 + $0x38] sm:$0xff] (!%p9764_p6)  }
 0x410   : > { %7477 = vmatprep.subr.bf16.mxu0 %v9753_v46  ;;  %7805 = vmatprep.subr.bf16.mxu1 %v9755_v47  ;;  %v10086_v46 = vld [vmem:[%s11650_s3 + $0xb8] sm:$0xff] (!%p9764_p6)   ;;  %v7872_v47 = vld [vmem:[%s11649_s2] sm:$0xff] (!%p9764_p6) }
 0x411   : > { %v7877_v48 = vrot.slane (!%p9764_p6), %v7872_v47, %v7876_v36  ;;  %v7881_v51 = vrot.slane (!%p9764_p6), %v7872_v47, %v7880_v40  ;;  %v7885_v53 = vrot.slane (!%p9764_p6), %v7872_v47, %v7884_v42  ;;  %v7889_v59 = vrot.slane (!%p9764_p6), %v7872_v47, %v7888_v44  ;;  %v10109_v42 = vld [vmem:[%s11650_s3 + $0x128] sm:$0xff] (!%p9764_p6)  }
 0x413   : > { %7478 = vmatpush1.bf16.msra.mxu0 %v9752_v24  ;;  %7806 = vmatpush1.bf16.msra.mxu1 %v9754_v55  ;;  %v10087_v24 = vld [vmem:[%s11650_s3 + $0x140] sm:$0xff] (!%p9764_p6)  }
 0x414   : > { %7479 = vmatprep.subr.bf16.mxu0 %v9761_v52  ;;  %7807 = vmatprep.subr.bf16.mxu1 %v9763_v56  ;;  %v10088_v55 = vld [vmem:[%s11650_s3 + $0x1c0] sm:$0xff] (!%p9764_p6)   ;;  %v7906_v52 = vcombine.low (!%p9764_p6), %v7877_v48, %v7881_v51  ;;  %v7907_v56 = vcombine.low (!%p9764_p6), %v7885_v53, %v7889_v59  ;;  %v10112_v51 = vld [vmem:[%s11650_s3 + $0x1f0] sm:$0xff] (!%p9764_p6)  }
 0x415   : > { %v10113_v53 = vld [vmem:[%s11650_s3 + $0x130] sm:$0xff] (!%p9764_p6)  }
 0x417   : > { %7480 = vmatpush1.bf16.msra.mxu0 %v9760_v57  ;;  %7808 = vmatpush1.bf16.msra.mxu1 %v9762_v58  ;;  %v7914_v57 = vrot.slane (!%p9764_p6), %v7906_v52, %v11090_v23  ;;  %v7921_v58 = vrot.slane (!%p9764_p6), %v7907_v56, %v11090_v23  ;;  %v10116_v56 = vld [vmem:[%s11650_s3 + $0x1f8] sm:$0xff] (!%p9764_p6)  }
 0x418   : > { %9857 = vmatprep.subr.bf16.mxu1 (!%p9764_p6), %v10056_v13  ;;  %v10091_v13 = vld [vmem:[%s11650_s3 + $0x148] sm:$0xff] (!%p9764_p6)  }
 0x41a   : > { %7482 = vmatmul.mubr.bf16.vlgmr.msra.gmra.mrb[4].mxu0 %v10857_v50  ;;  %7810 = vmatmul.mubr.bf16.vlgmr.msra.gmra.mrb[4].mxu1 %v10857_v50  ;;  %v10055_v50 = vld [vmem:[%s11650_s3 + $0x40] sm:$0xff] (!%p9764_p6)  }
 0x41b   : > { %9835 = vmatprep.subr.bf16.mxu0 (!%p9764_p6), %v10055_v50  ;;  %9858 = vmatpush3.bf16.msra.mxu1 (!%p9764_p6), %v10058_v15 }
 0x41c   : > { %9836 = vmatpush3.bf16.msra.mxu0 (!%p9764_p6), %v10057_v14  ;;  %9859 = vmatprep.subr.bf16.mxu1 (!%p9764_p6), %v10060_v38 }
 0x41d   : > { %9837 = vmatprep.subr.bf16.mxu0 (!%p9764_p6), %v10059_v16  ;;  %v10090_v16 = vld [vmem:[%s11650_s3 + $0x180] sm:$0xff] (!%p9764_p6)  }
 0x41f   : > { %9860 = vmatpush3.bf16.msra.mxu1 (!%p9764_p6), %v10062_v2  ;;  %v10092_v2 = vld [vmem:[%s11650_s3 + $0x1c8] sm:$0xff] (!%p9764_p6)  }
 0x420   : > { %9838 = vmatpush3.bf16.msra.mxu0 (!%p9764_p6), %v10061_v8  ;;  %9861 = vmatprep.subr.bf16.mxu1 (!%p9764_p6), %v10064_v54  ;;  %v10095_v54 = vld [vmem:[%s11650_s3 + $0x150] sm:$0xff] (!%p9764_p6)  }
 0x421   : > { %9839 = vmatprep.subr.bf16.mxu0 (!%p9764_p6), %v10063_v18  ;;  %v10093_v18 = vld [vmem:[%s11650_s3 + $0x108] sm:$0xff] (!%p9764_p6)  }
 0x423   : > { %9862 = vmatpush3.bf16.msra.mxu1 (!%p9764_p6), %v10066_v21 }
 0x424   : > { %9840 = vmatpush3.bf16.msra.mxu0 (!%p9764_p6), %v10065_v17  ;;  %9863 = vmatprep.subr.bf16.mxu1 (!%p9764_p6), %v10068_v10  ;;  %v10094_v17 = vld [vmem:[%s11650_s3 + $0x188] sm:$0xff] (!%p9764_p6)   ;;  %v10096_v10 = vld [vmem:[%s11650_s3 + $0x1d0] sm:$0xff] (!%p9764_p6)  }
 0x425   : > { %9841 = vmatprep.subr.bf16.mxu0 (!%p9764_p6), %v10067_v22 }
 0x427   : > { %9864 = vmatpush3.bf16.msra.mxu1 (!%p9764_p6), %v10070_v19  ;;  %v10099_v19 = vld [vmem:[%s11650_s3 + $0x158] sm:$0xff] (!%p9764_p6)  }
 0x428   : > { %9842 = vmatpush3.bf16.msra.mxu0 (!%p9764_p6), %v10069_v39  ;;  %9865 = vmatprep.subr.bf16.mxu1 (!%p9764_p6), %v10072_v26  ;;  %v10097_v39 = vld [vmem:[%s11650_s3 + $0x110] sm:$0xff] (!%p9764_p6)  }
 0x429   : > { %9843 = vmatprep.subr.bf16.mxu0 (!%p9764_p6), %v10071_v25  ;;  %v10098_v25 = vld [vmem:[%s11650_s3 + $0x190] sm:$0xff] (!%p9764_p6)  }
 0x42b   : > { %9866 = vmatpush3.bf16.msra.mxu1 (!%p9764_p6), %v10074_v29  ;;  %v10100_v29 = vld [vmem:[%s11650_s3 + $0x1d8] sm:$0xff] (!%p9764_p6)  }
 0x42c   : > { %9844 = vmatpush3.bf16.msra.mxu0 (!%p9764_p6), %v10073_v27  ;;  %9867 = vmatprep.subr.bf16.mxu1 (!%p9764_p6), %v10076_v32  ;;  %v10103_v32 = vld [vmem:[%s11650_s3 + $0x160] sm:$0xff] (!%p9764_p6)  }
 0x42d   : > { %9845 = vmatprep.subr.bf16.mxu0 (!%p9764_p6), %v10075_v31  ;;  %v10101_v31 = vld [vmem:[%s11650_s3 + $0x118] sm:$0xff] (!%p9764_p6)  }
 0x42f   : > { %9868 = vmatpush3.bf16.msra.mxu1 (!%p9764_p6), %v10078_v49 }
 0x430   : > { %9846 = vmatpush3.bf16.msra.mxu0 (!%p9764_p6), %v10077_v0  ;;  %9869 = vmatprep.subr.bf16.mxu1 (!%p9764_p6), %v10080_v20  ;;  %v10102_v0 = vld [vmem:[%s11650_s3 + $0x198] sm:$0xff] (!%p9764_p6)   ;;  %v10105_v20 = vld [vmem:[%s11650_s3 + $0x120] sm:$0xff] (!%p9764_p6)  }
 0x431   : > { %9847 = vmatprep.subr.bf16.mxu0 (!%p9764_p6), %v10079_v34  ;;  %v10104_v34 = vld [vmem:[%s11650_s3 + $0x1e0] sm:$0xff] (!%p9764_p6)  }
 0x433   : > { %9870 = vmatpush3.bf16.msra.mxu1 (!%p9764_p6), %v10082_v37  ;;  %v10106_v37 = vld [vmem:[%s11650_s3 + $0x1a0] sm:$0xff] (!%p9764_p6)  }
 0x434   : > { %9848 = vmatpush3.bf16.msra.mxu0 (!%p9764_p6), %v10081_v35  ;;  %9871 = vmatprep.subr.bf16.mxu1 (!%p9764_p6), %v10084_v43  ;;  %v10107_v35 = vld [vmem:[%s11650_s3 + $0x168] sm:$0xff] (!%p9764_p6)  }
 0x435   : > { %9849 = vmatprep.subr.bf16.mxu0 (!%p9764_p6), %v10083_v41  ;;  %v10108_v41 = vld [vmem:[%s11650_s3 + $0x1e8] sm:$0xff] (!%p9764_p6)  }
 0x437   : > { %9872 = vmatpush3.bf16.msra.mxu1 (!%p9764_p6), %v10086_v46  ;;  %v10110_v46 = vld [vmem:[%s11650_s3 + $0x1a8] sm:$0xff] (!%p9764_p6)  }
 0x438   : > { %9850 = vmatpush3.bf16.msra.mxu0 (!%p9764_p6), %v10085_v60  ;;  %9901 = vmatprep.subr.bf16.mxu1 (!%p9764_p6), %v10088_v55  ;;  %v10111_v60 = vld [vmem:[%s11650_s3 + $0x170] sm:$0xff] (!%p9764_p6)   ;;  %v10115_v55 = vld [vmem:[%s11650_s3 + $0x178] sm:$0xff] (!%p9764_p6)  }
 0x439   : > { %9879 = vmatprep.subr.bf16.mxu0 (!%p9764_p6), %v10087_v24 }
 0x4ed   : > { %v7483_v61 = vpop.f32.mrb[4].mxu0  ;;  %v7811_v62 = vpop.f32.mrb[4].mxu1 }
 0x4ee   : > { %v7485_v63 = vpop.f32.mrb[5].mxu0  ;;  %v7813_v9 = vpop.f32.mrb[5].mxu1 }
 0x4ef   : > { %v7843_v6 = vcombine.low %v7483_v61, %v7485_v63  ;;  %v7487_v1 = vpop.f32.mrb[6].mxu0  ;;  %v7844_v33 = vcombine.low %v7811_v62, %v7813_v9  ;;  %v7815_v3 = vpop.f32.mrb[6].mxu1  ;;  %v7870_v61 = vld [vmem:[#allocation2] sm:$0xff] (!%p9764_p6)  ;;  %v7922_v62 = vcombine.low (!%p9764_p6), %v7914_v57, %v7921_v58  ;;  %v10117_v57 = vld [vmem:[%s11650_s3 + $0x138] sm:$0xff] (!%p9764_p6)  }
 0x4f0   : > { %v7488_v4 = vpop.f32.mrb[7].mxu0  ;;  %v7816_v28 = vpop.f32.mrb[7].mxu1  ;;  %v7892_v1 = vsub.s32 (!%p9764_p6), 4, %v10236_v45  ;;  %v10118_v58 = vld [vmem:[%s11650_s3 + $0x1b8] sm:$0xff] (!%p9764_p6)  }
 0x4f1   : > { %v7851_v5 = vrot.slane %v7843_v6, %v11090_v23  ;;  %v7858_v30 = vrot.slane %v7844_v33, %v11090_v23  ;;  %7869 = sbr.rel (%p9764_p6) target bundleno = 1526 (0x5f6), region = 48  ;;  %v7942_v63 = vadd.f32 (!%p9764_p6), %v7922_v62, %v7870_v61  ;;  %v7896_v33 = vsub.s32 (!%p9764_p6), 5, %v10236_v45 }
 0x4f2   : > { %v7904_v28 = vsub.s32 (!%p9764_p6), 7, %v10236_v45  ;;  %v7893_v14 = vrot.slane (!%p9764_p6), %v7872_v47, %v7892_v1 }
 0x4f3   : > { %v7859_v11 = vcombine.low %v7851_v5, %v7858_v30  ;;  %v7953_v6 = vrot.slane (!%p9764_p6), %v7942_v63, %v11090_v23  ;;  %v7946_v9 = vcombine.high (!%p9764_p6), %v7942_v63, %v7942_v63  ;;  %v7900_v5 = vsub.s32 (!%p9764_p6), 6, %v10236_v45 }
 0x4f4   : > { %v7897_v45 = vrot.slane (!%p9764_p6), %v7872_v47, %v7896_v33  ;;  %v7905_v8 = vrot.slane (!%p9764_p6), %v7872_v47, %v7904_v28 }
 0x4f5   : > { %v7863_v12 = vadd.f32 %v7859_v11, %v243_v7  ;;  %v7961_v3 = vcombine.high (!%p9764_p6), %v7953_v6, %v7953_v6  ;;  %v7960_v4 = vrot.slane (!%p9764_p6), %v7946_v9, %v11090_v23  ;;  %v7988_v30 = vpack.c.bf16 (!%p9764_p6), %v7953_v6, %v7953_v6  ;;  %v9765_v6 = vld [vmem:[%s11651_s4] ss:$0 sm:$0xff] (!%p9764_p6) }
 0x4f6   : > { %v7901_v38 = vrot.slane (!%p9764_p6), %v7872_v47, %v7900_v5  ;;  %v7923_v21 = vcombine.low (!%p9764_p6), %v7893_v14, %v7897_v45 }
 0x4f7   : > { %7865 = vst [vmem:[#allocation2 + $0x8] sm:$0xff] %v7863_v12  ;;  %v7989_v7 = vpack.c.bf16 (!%p9764_p6), %v7961_v3, %v7961_v3  ;;  %v7962_v11 = vcombine.high (!%p9764_p6), %v7960_v4, %v7960_v4  ;;  %v10089_v12 = vld [vmem:[%s11650_s3 + $0x100] sm:$0xff] (!%p9764_p6)   ;;  %v7990_v50 = vpack.c.bf16 (!%p9764_p6), %v7960_v4, %v7960_v4 }
 0x4f8   : > { %v7924_v22 = vcombine.low %v7901_v38, %v7905_v8  ;;  %v7931_v26 = vrot.slane %v7923_v21, %v11090_v23 }
 0x4f9   : > { %8547 = vmatprep.mubr.bf16.mxu0 %v7989_v7  ;;  %v7991_v15 = vpack.c.bf16 %v7962_v11, %v7962_v11 }
 0x4fa   : > { %8548 = vmatmul.mubr.bf16.vlgmr.msra.gmra.mrb[0].mxu0 %v7988_v30  ;;  %v7938_v27 = vrot.slane %v7924_v22, %v11090_v23 }
 0x4fb   : > { %8587 = vmatprep.mubr.bf16.mxu1 %v7991_v15  ;;  %9880 = vmatpush3.bf16.msra.mxu0 %v10089_v12 }
 0x4fc   : > { %8588 = vmatmul.mubr.bf16.vlgmr.msra.gmra.mrb[0].mxu1 %v7990_v50  ;;  %9881 = vmatprep.subr.bf16.mxu0 %v10091_v13  ;;  %v7939_v49 = vcombine.low %v7931_v26, %v7938_v27 }
 0x4fd   : > { %9902 = vmatpush3.bf16.msra.mxu1 %v10090_v16 }
 0x4fe   : > { %9903 = vmatprep.subr.bf16.mxu1 %v10092_v2  ;;  %v7871_v36 = vld [vmem:[#allocation2 + $0x8] sm:$0xff] }
 0x4ff   : > { %9882 = vmatpush3.bf16.msra.mxu0 %v10093_v18  ;;  %v7943_v40 = vadd.f32 %v7939_v49, %v7871_v36 }
 0x500   : > { %9883 = vmatprep.subr.bf16.mxu0 %v10095_v54 }
 0x501   : > { %9904 = vmatpush3.bf16.msra.mxu1 %v10094_v17  ;;  %v7970_v43 = vrot.slane %v7943_v40, %v11090_v23  ;;  %v7963_v44 = vcombine.high %v7943_v40, %v7943_v40 }
 0x502   : > { %9905 = vmatprep.subr.bf16.mxu1 %v10096_v10 }
 0x503   : > { %9884 = vmatpush3.bf16.msra.mxu0 %v10097_v39  ;;  %v7978_v47 = vcombine.high %v7970_v43, %v7970_v43  ;;  %v7977_v48 = vrot.slane %v7963_v44, %v11090_v23  ;;  %v10114_v23 = vld [vmem:[%s11650_s3 + $0x1b0] sm:$0xff]   ;;  %v7992_v61 = vpack.c.bf16 %v7970_v43, %v7970_v43 }
 0x504   : > { %9885 = vmatprep.subr.bf16.mxu0 %v10099_v19 }
 0x505   : > { %9906 = vmatpush3.bf16.msra.mxu1 %v10098_v25  ;;  %v7993_v59 = vpack.c.bf16 %v7978_v47, %v7978_v47  ;;  %v7979_v24 = vcombine.high %v7977_v48, %v7977_v48  ;;  %v7994_v62 = vpack.c.bf16 %v7977_v48, %v7977_v48 }
 0x506   : > { %9907 = vmatprep.subr.bf16.mxu1 %v10100_v29 }
 0x507   : > { %9886 = vmatpush3.bf16.msra.mxu0 %v10101_v31  ;;  %8627 = vmatprep.mubr.bf16.mxu0 %v7993_v59  ;;  %v7995_v52 = vpack.c.bf16 %v7979_v24, %v7979_v24 }
 0x508   : > { %9887 = vmatprep.subr.bf16.mxu0 %v10103_v32 }
 0x509   : > { %9908 = vmatpush3.bf16.msra.mxu1 %v10102_v0  ;;  %8667 = vmatprep.mubr.bf16.mxu1 %v7995_v52 }
 0x50a   : > { %9909 = vmatprep.subr.bf16.mxu1 %v10104_v34 }
 0x50b   : > { %9888 = vmatpush3.bf16.msra.mxu0 %v10105_v20 }
 0x50c   : > { %9889 = vmatprep.subr.bf16.mxu0 %v10107_v35 }
 0x50d   : > { %9910 = vmatpush3.bf16.msra.mxu1 %v10106_v37 }
 0x50e   : > { %9911 = vmatprep.subr.bf16.mxu1 %v10108_v41 }
 0x50f   : > { %9890 = vmatpush3.bf16.msra.mxu0 %v10109_v42 }
 0x510   : > { %9891 = vmatprep.subr.bf16.mxu0 %v10111_v60 }
 0x511   : > { %9912 = vmatpush3.bf16.msra.mxu1 %v10110_v46 }
 0x512   : > { %9913 = vmatprep.subr.bf16.mxu1 %v10112_v51 }
 0x513   : > { %9892 = vmatpush3.bf16.msra.mxu0 %v10113_v53 }
 0x514   : > { %9893 = vmatprep.subr.bf16.mxu0 %v10115_v55 }
 0x515   : > { %9914 = vmatpush3.bf16.msra.mxu1 %v10114_v23 }
 0x516   : > { %9915 = vmatprep.subr.bf16.mxu1 %v10116_v56 }
 0x517   : > { %9894 = vmatpush3.bf16.msra.mxu0 %v10117_v57 }
 0x519   : > { %9916 = vmatpush3.bf16.msra.mxu1 %v10118_v58 }
 0x51a   : > { %8628 = vmatmul.mubr.bf16.vlgmr.msra.gmra.mrb[4].mxu0 %v7992_v61 }
 0x51c   : > { %8668 = vmatmul.mubr.bf16.vlgmr.msra.gmra.mrb[4].mxu1 %v7994_v62 }
 0x5cd   : > { %v9851_v63 = vpop.f32.mrb[0].mxu0 }
 0x5ce   : > { %v9852_v9 = vpop.f32.mrb[1].mxu0 }
 0x5cf   : > { %v9873_v1 = vpop.f32.mrb[0].mxu1  ;;  %v9853_v33 = vadd.f32 %v9852_v9, %v9851_v63  ;;  %v9854_v3 = vpop.f32.mrb[2].mxu0 }
 0x5d0   : > { %v9874_v4 = vpop.f32.mrb[1].mxu1  ;;  %v9855_v5 = vpop.f32.mrb[3].mxu0 }
 0x5d1   : > { %v8550_v28 = vadd.f32 %v9853_v33, %v9765_v6  ;;  %v9875_v30 = vadd.f32 %v9874_v4, %v9873_v1  ;;  %v9876_v7 = vpop.f32.mrb[2].mxu1 }
 0x5d2   : > { %v9877_v11 = vpop.f32.mrb[3].mxu1 }
 0x5d3   : > { %v8590_v12 = vadd.f32 %v9875_v30, %v8550_v28 }
 0x5ed   : > { %v9895_v50 = vpop.f32.mrb[4].mxu0 }
 0x5ee   : > { %v9896_v13 = vpop.f32.mrb[5].mxu0 }
 0x5ef   : > { %v9917_v14 = vpop.f32.mrb[4].mxu1  ;;  %v9897_v15 = vadd.f32 %v9896_v13, %v9895_v50  ;;  %v9898_v16 = vpop.f32.mrb[6].mxu0 }
 0x5f0   : > { %v9918_v45 = vpop.f32.mrb[5].mxu1  ;;  %v9899_v38 = vpop.f32.mrb[7].mxu0 }
 0x5f1   : > { %v8630_v8 = vadd.f32 %v9897_v15, %v8590_v12  ;;  %v9919_v2 = vadd.f32 %v9918_v45, %v9917_v14  ;;  %v9920_v18 = vpop.f32.mrb[6].mxu1 }
 0x5f2   : > { %v9921_v54 = vpop.f32.mrb[7].mxu1 }
 0x5f3   : > { %v8670_v17 = vadd.f32 %v9919_v2, %v8630_v8 }
 0x5f5   : > { %8675 = vst [vmem:[#allocation3] sm:$0x3] %v8670_v17 }
 0x5f6 PF: > { %p10039_p7 = scmp.eq.s32.totalorder %s10197_s19, 1  ;;  %s10160_s23 = smov [#allocation3]  }
 0x5f7   : > { %s8683_s24 = sshll.u32 %s10160_s23, 4  ;;  %s8684_s24 = int_to_ptr.vmem [resolvable:$true] %s8683_s24 }
 0x5f8   : > { %s10119_s25 = scalar_lea.vmem %s8684_s24, 32  ;;  %p10126_p11 = scmp.lt.s32.totalorder %s8684_s24, %s8684_s24 }
 0x5f9   : > { %p10120_p8 = scmp.ne.s32.totalorder %s8684_s24, %s10119_s25  ;;  %p10127_p12 = scmp.lt.s32.totalorder %s10119_s25, %s10119_s25 }
 0x5fb   : > { %p10121_p9 = pnand %p10120_p8, %p10039_p7  ;;  %p10128_p13 = por %p10127_p12, %p10126_p11 }
 0x5fd   : > { %p10122_p10 = pneg %p10121_p9 }
 0x5ff   : > { %p10129_p0 = pnand %p10128_p13, %p10122_p10 }
 0x601   : > { %10132 = shalt.err (!%p10129_p0)
}
 0x602   : > { %s10133_s28 = scalar_lea.hbm %s11652_s5, 32 }
 0x603   : > { %p10134_p1 = scmp.ne.s32.totalorder %s11652_s5, %s10133_s28  ;;  %p10139_p4 = scmp.lt.u32.totalorder %s10133_s28, %s11652_s5 }
 0x605   : > { %p10135_p2 = pnand %p10134_p1, %p10039_p7 }
 0x607   : > { %p10136_p3 = pneg %p10135_p2 }
 0x609   : > { %p10141_p5 = pnand %p10139_p4, %p10136_p3 }
 0x60b   : > { %10144 = shalt.err (!%p10141_p5)
}
 0x60c   : > { %10036 = dma.vmem_to_hbm [thread:$0]  (%p10039_p7), %s8684_s24, 32, %s11652_s5, [#allocation4]  }
 0x60d   : > { %10150 = dma.done.wait (%p10039_p7), [#allocation4], 32  }
 0x60e   : > { %10152 = vsyncadd (%p10039_p7), [#allocation4], 4294967264 }
 0x60f PF: > { %s16_s18 = sadd.s32 1, %s10155_s18  }
 0x610   : > { %p13_p6 = scmp.ge.s32.totalorder %s16_s18, 4  }
 0x612   :  { %15 = sbr.rel (!%p13_p6) target bundleno = 1 (0x1), region = 78 }
 0x619   :  { %8696 = vsyncpa [#allocation4], 1 }
 0x61a   :  { %8698 = vsyncpa [#allocation4 + $0x1], 1 }

</bundles_post_ra>
